<compile_context>
chip_gen: v7x
topology: tpu7x:2x2x1
jax: 0.10.0
libtpu: 0.0.40
codegen_flags: <defaults>
</compile_context>

<pallas_src>
import functools

import jax
import jax.numpy as jnp
from jax import lax
from jax.experimental import pallas as pl
from jax.experimental.pallas import tpu as pltpu

EPS = 1e-5
NUM_GROUPS = 32

# Residue r (rows) / s (cols) of ConvTranspose2d(k=4, s=2, p=1):
# output index 2m+r pulls from input index m+d through kernel tap k, for the (d, k) pairs below.
_CT_PAIRS = (((0, 1), (-1, 3)),   # residue 0
             ((0, 2), (1, 0)))    # residue 1


# --------------------------------------------------------------------------
# In-kernel helpers (operate on VMEM values).
# --------------------------------------------------------------------------
def _pad1_hw(x):
    """Zero-pad a (H, W, C) value by 1 on both spatial dims, entirely in VMEM."""
    H, W, C = x.shape
    zr = jnp.zeros((1, W, C), x.dtype)
    x = jnp.concatenate([zr, x, zr], axis=0)
    zc = jnp.zeros((H + 2, 1, C), x.dtype)
    return jnp.concatenate([zc, x, zc], axis=1)


def _im2col_3x3(xp, H, W):
    """xp: (H+2, W+2, C) -> (H*W, 9*C) patch matrix; tap order (dh major, dw minor)."""
    C = xp.shape[-1]
    cols = [xp[dh:dh + H, dw:dw + W, :] for dh in range(3) for dw in range(3)]
    patches = jnp.concatenate(cols, axis=-1)          # (H, W, 9*C)
    return patches.reshape(H * W, 9 * C)


def _gn_silu(x, gamma, beta, gmat, eps):
    """GroupNorm(affine) + SiLU on x: (N, C) float32. Group stats via a (C,C) averaging matmul."""
    ch_mean = jnp.mean(x, axis=0, keepdims=True)                       # (1, C)
    g_mean = jnp.dot(ch_mean, gmat, preferred_element_type=jnp.float32,
                     precision=lax.Precision.HIGHEST)
    d = x - g_mean
    ch_var = jnp.mean(d * d, axis=0, keepdims=True)                    # (1, C)
    g_var = jnp.dot(ch_var, gmat, preferred_element_type=jnp.float32,
                    precision=lax.Precision.HIGHEST)
    y = d * lax.rsqrt(g_var + eps)
    y = y * gamma + beta
    return y * jax.nn.sigmoid(y)                                       # SiLU


def _conv3x3_matmul(x_bf16, w_ref, b_row, H, W):
    """(H,W,Cin) bf16 -> (H*W, Cout) f32 via one im2col matmul (weight ref is (9*Cin, Cout))."""
    patches = _im2col_3x3(_pad1_hw(x_bf16), H, W)
    acc = jnp.dot(patches, w_ref[...], preferred_element_type=jnp.float32)
    return acc + b_row


def _store_residue_packed(o_ref, res, H, W):
    """res: (HW, 4*Cout) f32, columns ordered (2r+s)*Cout + c.
    o_ref: (1, H, 2, W, 2*Cout) laid out as (i, r, j, s*Cout+c) -> out[2i+r, 2j+s, c]."""
    Cq = res.shape[-1] // 2
    o_ref[0, :, 0, :, :] = res[:, :Cq].reshape(H, W, Cq).astype(o_ref.dtype)   # r = 0
    o_ref[0, :, 1, :, :] = res[:, Cq:].reshape(H, W, Cq).astype(o_ref.dtype)   # r = 1


# --------------------------------------------------------------------------
# Kernel bodies.
# --------------------------------------------------------------------------
def _in_up_block_kernel(x_ref, wi_ref, bi_ref, gamma_ref, beta_ref, gmat_ref,
                        wc_ref, bc_ref, o_ref, *, H, W, eps):
    """Fused Conv2d(3x3,s1,p1) + GroupNorm + SiLU + ConvTranspose2d(4,s2,p1) (first up block)."""
    hid = wi_ref.shape[-1]
    xb = x_ref[0].astype(jnp.bfloat16)
    y = _conv3x3_matmul(xb, wi_ref, bi_ref[...], H, W)                 # (HW, hid) f32
    y = _gn_silu(y, gamma_ref[...], beta_ref[...], gmat_ref[...], eps)
    yb = y.reshape(H, W, hid).astype(jnp.bfloat16)
    res = _conv3x3_matmul(yb, wc_ref, bc_ref[...], H, W)               # (HW, 4*hid) f32
    _store_residue_packed(o_ref, res, H, W)


def _up_block_kernel(x_ref, gamma_ref, beta_ref, gmat_ref, wc_ref, bc_ref, o_ref,
                     *, H, W, eps):
    """Fused GroupNorm + SiLU + ConvTranspose2d(4,s2,p1)."""
    C = x_ref.shape[-1]
    x = x_ref[0].reshape(H * W, C).astype(jnp.float32)
    y = _gn_silu(x, gamma_ref[...], beta_ref[...], gmat_ref[...], eps)
    yb = y.reshape(H, W, C).astype(jnp.bfloat16)
    res = _conv3x3_matmul(yb, wc_ref, bc_ref[...], H, W)               # (HW, 4*C) f32
    _store_residue_packed(o_ref, res, H, W)


def _conv3x3_kernel(x_ref, w_ref, b_ref, o_ref, *, H, W):
    """Stand-alone Conv2d(3x3,s1,p1) (used only when num_conv_blocks == 0)."""
    Cout = w_ref.shape[-1]
    xb = x_ref[0].astype(jnp.bfloat16)
    acc = _conv3x3_matmul(xb, w_ref, b_ref[...], H, W)
    o_ref[0] = acc.reshape(H, W, Cout).astype(o_ref.dtype)


def _gn_silu_conv1x1_kernel(x_ref, gamma_ref, beta_ref, gmat_ref, w_ref, b_ref, o_ref,
                            *, H, W, eps):
    """Fused GroupNorm + SiLU + 1x1 conv, emitting channel-major (Cout, H*W)."""
    C = x_ref.shape[-1]
    x = x_ref[0].reshape(H * W, C).astype(jnp.float32)
    y = _gn_silu(x, gamma_ref[...], beta_ref[...], gmat_ref[...], eps).astype(jnp.bfloat16)
    # (Cout, C) x (HW, C)^T -> (Cout, HW): single MXU matmul with lane-dense output rows.
    res = jnp.einsum("oc,nc->on", w_ref[...], y, preferred_element_type=jnp.float32)
    res = res + b_ref[...]
    o_ref[0] = res.astype(o_ref.dtype)


# --------------------------------------------------------------------------
# Weight packing / helpers.
# --------------------------------------------------------------------------
def _pack_convT_weight(w):
    # w: (4,4,Cin,Cout)  (== torch ConvTranspose2d weight [Cin,Cout,4,4].transpose(2,3,0,1)).
    # Returns the equivalent 3x3 "residue packed" conv weight (9*Cin, 4*Cout); packed output
    # channel index = (2*r + s)*Cout + c for fine-grid output pixel (2i+r, 2j+s).
    Cin, Cout = w.shape[2], w.shape[3]
    V = jnp.zeros((3, 3, Cin, 4, Cout), w.dtype)
    for r in range(2):
        for s in range(2):
            for dh, kh in _CT_PAIRS[r]:
                for dw, kw in _CT_PAIRS[s]:
                    V = V.at[dh + 1, dw + 1, :, 2 * r + s, :].set(w[kh, kw])
    return V.reshape(9 * Cin, 4 * Cout)


def _group_avg_matrix(C, num_groups):
    cg = C // num_groups
    gid = jnp.arange(C) // cg
    return (gid[:, None] == gid[None, :]).astype(jnp.float32) / cg     # (C, C), float32


def _full(shape):
    """BlockSpec for a grid-invariant (broadcast) operand: whole array every step."""
    return pl.BlockSpec(shape, lambda g: (0,) * len(shape))


# --------------------------------------------------------------------------
# Stage wrappers (pallas_call plumbing).
# --------------------------------------------------------------------------
def conv2d_3x3(x, w, b):
    # x: (B,H,W,Cin); w: (3,3,Cin,Cout) HWIO; b: (Cout,)
    B, H, W, Cin = x.shape
    Cout = w.shape[-1]
    w_packed = w.reshape(9 * Cin, Cout).astype(jnp.bfloat16)
    kern = functools.partial(_conv3x3_kernel, H=H, W=W)
    return pl.pallas_call(
        kern,
        out_shape=jax.ShapeDtypeStruct((B, H, W, Cout), x.dtype),
        grid=(B,),
        in_specs=[pl.BlockSpec((1, H, W, Cin), lambda g: (g, 0, 0, 0)),
                  _full((9 * Cin, Cout)),
                  _full((1, Cout))],
        out_specs=pl.BlockSpec((1, H, W, Cout), lambda g: (g, 0, 0, 0)),
        compiler_params=pltpu.CompilerParams(dimension_semantics=("parallel",)),
    )(x, w_packed, b.reshape(1, Cout).astype(jnp.float32))


def in_up_block(x, w_in, b_in, gamma, beta, w_ct, b_ct, num_groups=NUM_GROUPS, eps=EPS):
    # Fused conv_in + first up block.  x: (B,H,W,Cin); w_in: (3,3,Cin,hid); w_ct: (4,4,hid,hid).
    B, H, W, Cin = x.shape
    hid = w_in.shape[-1]
    Cout = w_ct.shape[-1]
    gmat = _group_avg_matrix(hid, num_groups)
    wi_p = w_in.reshape(9 * Cin, hid).astype(jnp.bfloat16)
    wc_p = _pack_convT_weight(w_ct).astype(jnp.bfloat16)              # (9*hid, 4*Cout)
    b4 = jnp.tile(b_ct.astype(jnp.float32), 4).reshape(1, 4 * Cout)
    kern = functools.partial(_in_up_block_kernel, H=H, W=W, eps=eps)
    y = pl.pallas_call(
        kern,
        out_shape=jax.ShapeDtypeStruct((B, H, 2, W, 2 * Cout), x.dtype),
        grid=(B,),
        in_specs=[pl.BlockSpec((1, H, W, Cin), lambda g: (g, 0, 0, 0)),
                  _full((9 * Cin, hid)),
                  _full((1, hid)),
                  _full((1, hid)),
                  _full((1, hid)),
                  _full((hid, hid)),
                  _full((9 * hid, 4 * Cout)),
                  _full((1, 4 * Cout))],
        out_specs=pl.BlockSpec((1, H, 2, W, 2 * Cout), lambda g: (g, 0, 0, 0, 0)),
        compiler_params=pltpu.CompilerParams(dimension_semantics=("parallel",)),
    )(x, wi_p, b_in.reshape(1, hid).astype(jnp.float32),
      gamma.reshape(1, hid).astype(jnp.float32),
      beta.reshape(1, hid).astype(jnp.float32), gmat, wc_p, b4)
    # (B, H, 2, W, 2*Cout) -> (B, 2H, 2W, Cout): contiguous (free) pixel-shuffle reshape.
    return y.reshape(B, 2 * H, 2 * W, Cout)


def up_block(x, gamma, beta, w_ct, b_ct, num_groups=NUM_GROUPS, eps=EPS):
    B, H, W, C = x.shape
    Cout = w_ct.shape[-1]
    gmat = _group_avg_matrix(C, num_groups)
    wc_p = _pack_convT_weight(w_ct).astype(jnp.bfloat16)              # (9*C, 4*Cout)
    b4 = jnp.tile(b_ct.astype(jnp.float32), 4).reshape(1, 4 * Cout)
    kern = functools.partial(_up_block_kernel, H=H, W=W, eps=eps)
    y = pl.pallas_call(
        kern,
        out_shape=jax.ShapeDtypeStruct((B, H, 2, W, 2 * Cout), x.dtype),
        grid=(B,),
        in_specs=[pl.BlockSpec((1, H, W, C), lambda g: (g, 0, 0, 0)),
                  _full((1, C)),
                  _full((1, C)),
                  _full((C, C)),
                  _full((9 * C, 4 * Cout)),
                  _full((1, 4 * Cout))],
        out_specs=pl.BlockSpec((1, H, 2, W, 2 * Cout), lambda g: (g, 0, 0, 0, 0)),
        compiler_params=pltpu.CompilerParams(dimension_semantics=("parallel",)),
    )(x, gamma.reshape(1, C).astype(jnp.float32),
      beta.reshape(1, C).astype(jnp.float32), gmat, wc_p, b4)
    return y.reshape(B, 2 * H, 2 * W, Cout)


def gn_silu_conv1x1_to_nchw(x, gamma, beta, w, b, num_groups=NUM_GROUPS, eps=EPS):
    # x: (B,H,W,C); w: (1,1,C,Cout); b: (Cout,). Returns NCHW (B, Cout, H, W).
    B, H, W, C = x.shape
    Cout = w.shape[-1]
    gmat = _group_avg_matrix(C, num_groups)
    w_t = w.reshape(C, Cout).T.astype(jnp.bfloat16)                    # (Cout, C)
    kern = functools.partial(_gn_silu_conv1x1_kernel, H=H, W=W, eps=eps)
    y = pl.pallas_call(
        kern,
        out_shape=jax.ShapeDtypeStruct((B, Cout, H * W), x.dtype),
        grid=(B,),
        in_specs=[pl.BlockSpec((1, H, W, C), lambda g: (g, 0, 0, 0)),
                  _full((1, C)),
                  _full((1, C)),
                  _full((C, C)),
                  _full((Cout, C)),
                  _full((Cout, 1))],
        out_specs=pl.BlockSpec((1, Cout, H * W), lambda g: (g, 0, 0)),
        compiler_params=pltpu.CompilerParams(dimension_semantics=("parallel",)),
    )(x, gamma.reshape(1, C).astype(jnp.float32),
      beta.reshape(1, C).astype(jnp.float32), gmat, w_t,
      b.reshape(Cout, 1).astype(jnp.float32))
    return y.reshape(B, Cout, H, W)                                    # NCHW (contiguous)


# --------------------------------------------------------------------------
# Full decoder forward (NCHW in / NCHW out, like the PyTorch module).
# --------------------------------------------------------------------------
def decoder_forward(params, x_nchw):
    x = x_nchw.transpose(0, 2, 3, 1)                                   # NCHW -> NHWC (tiny)
    blocks = params["up_blocks"]
    if blocks:
        blk0 = blocks[0]
        x = in_up_block(x, params["conv_in_w"], params["conv_in_b"],
                        blk0["gn_gamma"], blk0["gn_beta"], blk0["ct_w"], blk0["ct_b"])
        for blk in blocks[1:]:
            x = up_block(x, blk["gn_gamma"], blk["gn_beta"], blk["ct_w"], blk["ct_b"])
    else:
        x = conv2d_3x3(x, params["conv_in_w"], params["conv_in_b"])
    return gn_silu_conv1x1_to_nchw(x, params["gn_out_gamma"], params["gn_out_beta"],
                                   params["conv_out_w"], params["conv_out_b"])


# --------------------------------------------------------------------------
# Pure-JAX reference (independent impl via lax.conv_general_dilated, float32).
# --------------------------------------------------------------------------
def _ref_conv_same(x, w, b):
    p = w.shape[0] // 2
    y = lax.conv_general_dilated(x, w, (1, 1), ((p, p), (p, p)),
                                 dimension_numbers=("NHWC", "HWIO", "NHWC"),
                                 precision=lax.Precision.HIGHEST)
    return y + b


def _ref_conv_transpose(x, w, b):
    y = lax.conv_general_dilated(x, w[::-1, ::-1], (1, 1), ((2, 2), (2, 2)),
                                 lhs_dilation=(2, 2),
                                 dimension_numbers=("NHWC", "HWIO", "NHWC"),
                                 precision=lax.Precision.HIGHEST)
    return y + b


def _ref_gn_silu(x, gamma, beta, G=NUM_GROUPS, eps=EPS):
    B, H, W, C = x.shape
    xg = x.reshape(B, H * W, G, C // G)
    mean = xg.mean(axis=(1, 3), keepdims=True)
    var = ((xg - mean) ** 2).mean(axis=(1, 3), keepdims=True)
    xn = ((xg - mean) / jnp.sqrt(var + eps)).reshape(B, H, W, C)
    y = xn * gamma + beta
    return y * jax.nn.sigmoid(y)


def ref_forward(params, x_nchw):
    x = x_nchw.transpose(0, 2, 3, 1)
    x = _ref_conv_same(x, params["conv_in_w"], params["conv_in_b"])
    for blk in params["up_blocks"]:
        x = _ref_gn_silu(x, blk["gn_gamma"], blk["gn_beta"])
        x = _ref_conv_transpose(x, blk["ct_w"], blk["ct_b"])
    x = _ref_gn_silu(x, params["gn_out_gamma"], params["gn_out_beta"])
    x = _ref_conv_same(x, params["conv_out_w"], params["conv_out_b"])
    return x.transpose(0, 3, 1, 2)


# --------------------------------------------------------------------------
# Deterministic parameter init (shapes follow the module's __init__).
# --------------------------------------------------------------------------
def init_params(key, cfg):
    hid, emb, cin = cfg["hidden_channels"], cfg["embed_dim"], cfg["in_channels"]
    nb = cfg["num_conv_blocks"]

    def nrm(k, shape, scale=0.05):
        return scale * jax.random.normal(k, shape, jnp.float32)

    ks = iter(jax.random.split(key, 4 * nb + 6))
    params = {
        "conv_in_w": nrm(next(ks), (3, 3, emb, hid)),          # HWIO
        "conv_in_b": nrm(next(ks), (hid,)),
        "up_blocks": [],
        "gn_out_gamma": 1.0 + nrm(next(ks), (hid,)),
        "gn_out_beta": nrm(next(ks), (hid,)),
        "conv_out_w": nrm(next(ks), (1, 1, hid, cin)),         # HWIO
        "conv_out_b": nrm(next(ks), (cin,)),
    }
    for _ in range(nb):
        params["up_blocks"].append({
            "gn_gamma": 1.0 + nrm(next(ks), (hid,)),
            "gn_beta": nrm(next(ks), (hid,)),
            # (kh,kw,Cin,Cout)  (== torch ConvTranspose2d weight [Cin,Cout,4,4].transpose(2,3,0,1))
            "ct_w": nrm(next(ks), (4, 4, hid, hid)),
            "ct_b": nrm(next(ks), (hid,)),
        })
    return params


if __name__ == "__main__":
    cfg = dict(in_channels=4, hidden_channels=32, embed_dim=8,
               num_conv_blocks=2, bias=True)
    key = jax.random.PRNGKey(0)
    kp, kx = jax.random.split(key)
    params = init_params(kp, cfg)

    B, H, W = 2, 8, 8
    x = jax.random.normal(kx, (B, cfg["embed_dim"], H, W), jnp.float32)  # NCHW

    out = jax.jit(decoder_forward)(params, x)
    out = jax.block_until_ready(out)

    up = 2 ** cfg["num_conv_blocks"]
    assert out.shape == (B, cfg["in_channels"], H * up, W * up), out.shape

    ref = ref_forward(params, x)
    max_err = float(jnp.max(jnp.abs(out - ref)))
    assert jnp.allclose(out, ref, atol=5e-2, rtol=5e-2), max_err

    print("KERNEL_OK")
</pallas_src>

<mosaic_0001>
module attributes {stable_mosaic.version = 11 : i64} {
  func.func @_in_up_block_kernel(%arg0: i32, %arg1: memref<1x8x8x8xf32, #tpu.memory_space<vmem>>, %arg2: memref<72x32xbf16, #tpu.memory_space<vmem>>, %arg3: memref<1x32xf32, #tpu.memory_space<vmem>>, %arg4: memref<1x32xf32, #tpu.memory_space<vmem>>, %arg5: memref<1x32xf32, #tpu.memory_space<vmem>>, %arg6: memref<32x32xf32, #tpu.memory_space<vmem>>, %arg7: memref<288x128xbf16, #tpu.memory_space<vmem>>, %arg8: memref<1x128xf32, #tpu.memory_space<vmem>>, %arg9: memref<1x8x2x8x64xf32, #tpu.memory_space<vmem>>) attributes {dimension_semantics = [#tpu.dimension_semantics<parallel>], iteration_bounds = array<i64: 2>, scalar_prefetch = 0 : i64, scratch_operands = 0 : i64, tpu.core_type = #tpu.core_type<tc>, window_params = [{transform_indices = @transform_0, window_bounds = array<i64: 1, 8, 8, 8>}, {pipeline_mode = #tpu.pipeline_mode<synchronous>, transform_indices = @transform_1, window_bounds = array<i64: 72, 32>}, {pipeline_mode = #tpu.pipeline_mode<synchronous>, transform_indices = @transform_2, window_bounds = array<i64: 1, 32>}, {pipeline_mode = #tpu.pipeline_mode<synchronous>, transform_indices = @transform_3, window_bounds = array<i64: 1, 32>}, {pipeline_mode = #tpu.pipeline_mode<synchronous>, transform_indices = @transform_4, window_bounds = array<i64: 1, 32>}, {pipeline_mode = #tpu.pipeline_mode<synchronous>, transform_indices = @transform_5, window_bounds = array<i64: 32, 32>}, {pipeline_mode = #tpu.pipeline_mode<synchronous>, transform_indices = @transform_6, window_bounds = array<i64: 288, 128>}, {pipeline_mode = #tpu.pipeline_mode<synchronous>, transform_indices = @transform_7, window_bounds = array<i64: 1, 128>}, {transform_indices = @transform_8, window_bounds = array<i64: 1, 8, 2, 8, 64>}]} {
    %c0 = arith.constant 0 : index
    %c0_0 = arith.constant 0 : index
    %c0_1 = arith.constant 0 : index
    %c0_2 = arith.constant 0 : index
    %0 = vector.load %arg1[%c0, %c0_0, %c0_1, %c0_2] : memref<1x8x8x8xf32, #tpu.memory_space<vmem>>, vector<1x8x8x8xf32>
    %1 = vector.shape_cast %0 : vector<1x8x8x8xf32> to vector<8x8x8xf32>
    %2 = arith.truncf %1 : vector<8x8x8xf32> to vector<8x8x8xbf16>
    %c0_3 = arith.constant 0 : index
    %c0_4 = arith.constant 0 : index
    %3 = vector.load %arg3[%c0_3, %c0_4] : memref<1x32xf32, #tpu.memory_space<vmem>>, vector<1x32xf32>
    %cst = arith.constant 0.000000e+00 : bf16
    %4 = vector.broadcast %cst : bf16 to vector<1x8x8xbf16>
    %5 = tpu.concatenate %4, %2, %4 in 0 : vector<1x8x8xbf16>, vector<8x8x8xbf16>, vector<1x8x8xbf16> -> vector<10x8x8xbf16>
    %cst_5 = arith.constant 0.000000e+00 : bf16
    %6 = vector.broadcast %cst_5 : bf16 to vector<10x1x8xbf16>
    %7 = tpu.concatenate %6, %5, %6 in 1 : vector<10x1x8xbf16>, vector<10x8x8xbf16>, vector<10x1x8xbf16> -> vector<10x10x8xbf16>
    %8 = vector.extract_strided_slice %7 {offsets = [0, 0, 0], sizes = [8, 8, 8], strides = [1, 1, 1]} : vector<10x10x8xbf16> to vector<8x8x8xbf16>
    %9 = vector.extract_strided_slice %7 {offsets = [0, 1, 0], sizes = [8, 8, 8], strides = [1, 1, 1]} : vector<10x10x8xbf16> to vector<8x8x8xbf16>
    %10 = vector.extract_strided_slice %7 {offsets = [0, 2, 0], sizes = [8, 8, 8], strides = [1, 1, 1]} : vector<10x10x8xbf16> to vector<8x8x8xbf16>
    %11 = vector.extract_strided_slice %7 {offsets = [1, 0, 0], sizes = [8, 8, 8], strides = [1, 1, 1]} : vector<10x10x8xbf16> to vector<8x8x8xbf16>
    %12 = vector.extract_strided_slice %7 {offsets = [1, 1, 0], sizes = [8, 8, 8], strides = [1, 1, 1]} : vector<10x10x8xbf16> to vector<8x8x8xbf16>
    %13 = vector.extract_strided_slice %7 {offsets = [1, 2, 0], sizes = [8, 8, 8], strides = [1, 1, 1]} : vector<10x10x8xbf16> to vector<8x8x8xbf16>
    %14 = vector.extract_strided_slice %7 {offsets = [2, 0, 0], sizes = [8, 8, 8], strides = [1, 1, 1]} : vector<10x10x8xbf16> to vector<8x8x8xbf16>
    %15 = vector.extract_strided_slice %7 {offsets = [2, 1, 0], sizes = [8, 8, 8], strides = [1, 1, 1]} : vector<10x10x8xbf16> to vector<8x8x8xbf16>
    %16 = vector.extract_strided_slice %7 {offsets = [2, 2, 0], sizes = [8, 8, 8], strides = [1, 1, 1]} : vector<10x10x8xbf16> to vector<8x8x8xbf16>
    %17 = tpu.concatenate %8, %9, %10, %11, %12, %13, %14, %15, %16 in 2 : vector<8x8x8xbf16>, vector<8x8x8xbf16>, vector<8x8x8xbf16>, vector<8x8x8xbf16>, vector<8x8x8xbf16>, vector<8x8x8xbf16>, vector<8x8x8xbf16>, vector<8x8x8xbf16>, vector<8x8x8xbf16> -> vector<8x8x72xbf16>
    %18 = vector.shape_cast %17 : vector<8x8x72xbf16> to vector<64x72xbf16>
    %c0_6 = arith.constant 0 : index
    %c0_7 = arith.constant 0 : index
    %19 = vector.load %arg2[%c0_6, %c0_7] : memref<72x32xbf16, #tpu.memory_space<vmem>>, vector<72x32xbf16>
    %cst_8 = arith.constant dense<0.000000e+00> : vector<64x32xf32>
    %20 = tpu.matmul %18, %19, %cst_8 {dimension_numbers = #tpu.dot_dimension_numbers<[1], [0], [0], [1], [0, 0, 1, 1], [], []>} : vector<64x72xbf16>, vector<72x32xbf16>, vector<64x32xf32> -> vector<64x32xf32>
    %21 = vector.broadcast %3 : vector<1x32xf32> to vector<64x32xf32>
    %22 = arith.addf %20, %21 : vector<64x32xf32>
    %c0_9 = arith.constant 0 : index
    %c0_10 = arith.constant 0 : index
    %23 = vector.load %arg4[%c0_9, %c0_10] : memref<1x32xf32, #tpu.memory_space<vmem>>, vector<1x32xf32>
    %c0_11 = arith.constant 0 : index
    %c0_12 = arith.constant 0 : index
    %24 = vector.load %arg5[%c0_11, %c0_12] : memref<1x32xf32, #tpu.memory_space<vmem>>, vector<1x32xf32>
    %c0_13 = arith.constant 0 : index
    %c0_14 = arith.constant 0 : index
    %25 = vector.load %arg6[%c0_13, %c0_14] : memref<32x32xf32, #tpu.memory_space<vmem>>, vector<32x32xf32>
    %cst_15 = arith.constant dense<0.000000e+00> : vector<32xf32>
    %26 = vector.multi_reduction <add>, %22, %cst_15 [0] : vector<64x32xf32> to vector<32xf32>
    %27 = vector.shape_cast %26 : vector<32xf32> to vector<1x32xf32>
    %cst_16 = arith.constant 6.400000e+01 : f32
    %28 = vector.broadcast %cst_16 : f32 to vector<1x32xf32>
    %29 = arith.divf %27, %28 : vector<1x32xf32>
    %cst_17 = arith.constant dense<0.000000e+00> : vector<1x32xf32>
    %30 = tpu.matmul %29, %25, %cst_17 {dimension_numbers = #tpu.dot_dimension_numbers<[1], [0], [0], [1], [0, 0, 1, 1], [], []>, precision = #tpu.contract_precision<fp32>} : vector<1x32xf32>, vector<32x32xf32>, vector<1x32xf32> -> vector<1x32xf32>
    %31 = vector.broadcast %30 : vector<1x32xf32> to vector<64x32xf32>
    %32 = arith.subf %22, %31 : vector<64x32xf32>
    %33 = arith.mulf %32, %32 : vector<64x32xf32>
    %cst_18 = arith.constant dense<0.000000e+00> : vector<32xf32>
    %34 = vector.multi_reduction <add>, %33, %cst_18 [0] : vector<64x32xf32> to vector<32xf32>
    %35 = vector.shape_cast %34 : vector<32xf32> to vector<1x32xf32>
    %cst_19 = arith.constant 6.400000e+01 : f32
    %36 = vector.broadcast %cst_19 : f32 to vector<1x32xf32>
    %37 = arith.divf %35, %36 : vector<1x32xf32>
    %cst_20 = arith.constant dense<0.000000e+00> : vector<1x32xf32>
    %38 = tpu.matmul %37, %25, %cst_20 {dimension_numbers = #tpu.dot_dimension_numbers<[1], [0], [0], [1], [0, 0, 1, 1], [], []>, precision = #tpu.contract_precision<fp32>} : vector<1x32xf32>, vector<32x32xf32>, vector<1x32xf32> -> vector<1x32xf32>
    %cst_21 = arith.constant 9.99999974E-6 : f32
    %39 = vector.broadcast %cst_21 : f32 to vector<1x32xf32>
    %40 = arith.addf %38, %39 : vector<1x32xf32>
    %41 = math.rsqrt %40 : vector<1x32xf32>
    %42 = vector.broadcast %41 : vector<1x32xf32> to vector<64x32xf32>
    %43 = arith.mulf %32, %42 : vector<64x32xf32>
    %44 = vector.broadcast %23 : vector<1x32xf32> to vector<64x32xf32>
    %45 = arith.mulf %43, %44 : vector<64x32xf32>
    %46 = vector.broadcast %24 : vector<1x32xf32> to vector<64x32xf32>
    %47 = arith.addf %45, %46 : vector<64x32xf32>
    %48 = arith.negf %47 : vector<64x32xf32>
    %49 = math.exp %48 : vector<64x32xf32>
    %cst_22 = arith.constant 1.000000e+00 : f32
    %50 = vector.broadcast %cst_22 : f32 to vector<64x32xf32>
    %51 = arith.addf %50, %49 : vector<64x32xf32>
    %52 = arith.divf %50, %51 : vector<64x32xf32>
    %53 = arith.mulf %47, %52 : vector<64x32xf32>
    %54 = vector.shape_cast %53 : vector<64x32xf32> to vector<8x8x32xf32>
    %55 = arith.truncf %54 : vector<8x8x32xf32> to vector<8x8x32xbf16>
    %c0_23 = arith.constant 0 : index
    %c0_24 = arith.constant 0 : index
    %56 = vector.load %arg8[%c0_23, %c0_24] : memref<1x128xf32, #tpu.memory_space<vmem>>, vector<1x128xf32>
    %cst_25 = arith.constant 0.000000e+00 : bf16
    %57 = vector.broadcast %cst_25 : bf16 to vector<1x8x32xbf16>
    %58 = tpu.concatenate %57, %55, %57 in 0 : vector<1x8x32xbf16>, vector<8x8x32xbf16>, vector<1x8x32xbf16> -> vector<10x8x32xbf16>
    %cst_26 = arith.constant 0.000000e+00 : bf16
    %59 = vector.broadcast %cst_26 : bf16 to vector<10x1x32xbf16>
    %60 = tpu.concatenate %59, %58, %59 in 1 : vector<10x1x32xbf16>, vector<10x8x32xbf16>, vector<10x1x32xbf16> -> vector<10x10x32xbf16>
    %61 = vector.extract_strided_slice %60 {offsets = [0, 0, 0], sizes = [8, 8, 32], strides = [1, 1, 1]} : vector<10x10x32xbf16> to vector<8x8x32xbf16>
    %62 = vector.extract_strided_slice %60 {offsets = [0, 1, 0], sizes = [8, 8, 32], strides = [1, 1, 1]} : vector<10x10x32xbf16> to vector<8x8x32xbf16>
    %63 = vector.extract_strided_slice %60 {offsets = [0, 2, 0], sizes = [8, 8, 32], strides = [1, 1, 1]} : vector<10x10x32xbf16> to vector<8x8x32xbf16>
    %64 = vector.extract_strided_slice %60 {offsets = [1, 0, 0], sizes = [8, 8, 32], strides = [1, 1, 1]} : vector<10x10x32xbf16> to vector<8x8x32xbf16>
    %65 = vector.extract_strided_slice %60 {offsets = [1, 1, 0], sizes = [8, 8, 32], strides = [1, 1, 1]} : vector<10x10x32xbf16> to vector<8x8x32xbf16>
    %66 = vector.extract_strided_slice %60 {offsets = [1, 2, 0], sizes = [8, 8, 32], strides = [1, 1, 1]} : vector<10x10x32xbf16> to vector<8x8x32xbf16>
    %67 = vector.extract_strided_slice %60 {offsets = [2, 0, 0], sizes = [8, 8, 32], strides = [1, 1, 1]} : vector<10x10x32xbf16> to vector<8x8x32xbf16>
    %68 = vector.extract_strided_slice %60 {offsets = [2, 1, 0], sizes = [8, 8, 32], strides = [1, 1, 1]} : vector<10x10x32xbf16> to vector<8x8x32xbf16>
    %69 = vector.extract_strided_slice %60 {offsets = [2, 2, 0], sizes = [8, 8, 32], strides = [1, 1, 1]} : vector<10x10x32xbf16> to vector<8x8x32xbf16>
    %70 = tpu.concatenate %61, %62, %63, %64, %65, %66, %67, %68, %69 in 2 : vector<8x8x32xbf16>, vector<8x8x32xbf16>, vector<8x8x32xbf16>, vector<8x8x32xbf16>, vector<8x8x32xbf16>, vector<8x8x32xbf16>, vector<8x8x32xbf16>, vector<8x8x32xbf16>, vector<8x8x32xbf16> -> vector<8x8x288xbf16>
    %71 = vector.shape_cast %70 : vector<8x8x288xbf16> to vector<64x288xbf16>
    %c0_27 = arith.constant 0 : index
    %c0_28 = arith.constant 0 : index
    %72 = vector.load %arg7[%c0_27, %c0_28] : memref<288x128xbf16, #tpu.memory_space<vmem>>, vector<288x128xbf16>
    %cst_29 = arith.constant dense<0.000000e+00> : vector<64x128xf32>
    %73 = tpu.matmul %71, %72, %cst_29 {dimension_numbers = #tpu.dot_dimension_numbers<[1], [0], [0], [1], [0, 0, 1, 1], [], []>} : vector<64x288xbf16>, vector<288x128xbf16>, vector<64x128xf32> -> vector<64x128xf32>
    %74 = vector.broadcast %56 : vector<1x128xf32> to vector<64x128xf32>
    %75 = arith.addf %73, %74 : vector<64x128xf32>
    %76 = vector.extract_strided_slice %75 {offsets = [0, 0], sizes = [64, 64], strides = [1, 1]} : vector<64x128xf32> to vector<64x64xf32>
    %77 = vector.shape_cast %76 : vector<64x64xf32> to vector<8x8x64xf32>
    %c0_30 = arith.constant 0 : index
    %c0_31 = arith.constant 0 : index
    %c0_32 = arith.constant 0 : index
    %c0_33 = arith.constant 0 : index
    %c0_34 = arith.constant 0 : index
    %78 = vector.load %arg9[%c0_30, %c0_31, %c0_32, %c0_33, %c0_34] : memref<1x8x2x8x64xf32, #tpu.memory_space<vmem>>, vector<1x8x1x8x64xf32>
    %79 = vector.shape_cast %78 : vector<1x8x1x8x64xf32> to vector<8x8x64xf32>
    %80 = vector.shape_cast %77 : vector<8x8x64xf32> to vector<1x8x1x8x64xf32>
    tpu.vector_store %arg9[%c0_30, %c0_31, %c0_32, %c0_33, %c0_34], %80 {strides = array<i32>} : memref<1x8x2x8x64xf32, #tpu.memory_space<vmem>>, vector<1x8x1x8x64xf32>,
    %81 = vector.extract_strided_slice %75 {offsets = [0, 64], sizes = [64, 64], strides = [1, 1]} : vector<64x128xf32> to vector<64x64xf32>
    %82 = vector.shape_cast %81 : vector<64x64xf32> to vector<8x8x64xf32>
    %c0_35 = arith.constant 0 : index
    %c0_36 = arith.constant 0 : index
    %c1 = arith.constant 1 : index
    %c0_37 = arith.constant 0 : index
    %c0_38 = arith.constant 0 : index
    %83 = vector.load %arg9[%c0_35, %c0_36, %c1, %c0_37, %c0_38] : memref<1x8x2x8x64xf32, #tpu.memory_space<vmem>>, vector<1x8x1x8x64xf32>
    %84 = vector.shape_cast %83 : vector<1x8x1x8x64xf32> to vector<8x8x64xf32>
    %85 = vector.shape_cast %82 : vector<8x8x64xf32> to vector<1x8x1x8x64xf32>
    tpu.vector_store %arg9[%c0_35, %c0_36, %c1, %c0_37, %c0_38], %85 {strides = array<i32>} : memref<1x8x2x8x64xf32, #tpu.memory_space<vmem>>, vector<1x8x1x8x64xf32>,
    return
  }
  func.func @transform_0(%arg0: i32) -> (i32, i32, i32, i32) {
    %c0_i32 = arith.constant 0 : i32
    %c0_i32_0 = arith.constant 0 : i32
    %c0_i32_1 = arith.constant 0 : i32
    %c0_i32_2 = arith.constant 0 : i32
    return %arg0, %c0_i32, %c0_i32_0, %c0_i32_1 : i32, i32, i32, i32
  }
  func.func @transform_1(%arg0: i32) -> (i32, i32) {
    %c0_i32 = arith.constant 0 : i32
    %c0_i32_0 = arith.constant 0 : i32
    %c0_i32_1 = arith.constant 0 : i32
    return %c0_i32, %c0_i32_0 : i32, i32
  }
  func.func @transform_2(%arg0: i32) -> (i32, i32) {
    %c0_i32 = arith.constant 0 : i32
    %c0_i32_0 = arith.constant 0 : i32
    %c0_i32_1 = arith.constant 0 : i32
    return %c0_i32, %c0_i32_0 : i32, i32
  }
  func.func @transform_3(%arg0: i32) -> (i32, i32) {
    %c0_i32 = arith.constant 0 : i32
    %c0_i32_0 = arith.constant 0 : i32
    %c0_i32_1 = arith.constant 0 : i32
    return %c0_i32, %c0_i32_0 : i32, i32
  }
  func.func @transform_4(%arg0: i32) -> (i32, i32) {
    %c0_i32 = arith.constant 0 : i32
    %c0_i32_0 = arith.constant 0 : i32
    %c0_i32_1 = arith.constant 0 : i32
    return %c0_i32, %c0_i32_0 : i32, i32
  }
  func.func @transform_5(%arg0: i32) -> (i32, i32) {
    %c0_i32 = arith.constant 0 : i32
    %c0_i32_0 = arith.constant 0 : i32
    %c0_i32_1 = arith.constant 0 : i32
    return %c0_i32, %c0_i32_0 : i32, i32
  }
  func.func @transform_6(%arg0: i32) -> (i32, i32) {
    %c0_i32 = arith.constant 0 : i32
    %c0_i32_0 = arith.constant 0 : i32
    %c0_i32_1 = arith.constant 0 : i32
    return %c0_i32, %c0_i32_0 : i32, i32
  }
  func.func @transform_7(%arg0: i32) -> (i32, i32) {
    %c0_i32 = arith.constant 0 : i32
    %c0_i32_0 = arith.constant 0 : i32
    %c0_i32_1 = arith.constant 0 : i32
    return %c0_i32, %c0_i32_0 : i32, i32
  }
  func.func @transform_8(%arg0: i32) -> (i32, i32, i32, i32, i32) {
    %c0_i32 = arith.constant 0 : i32
    %c0_i32_0 = arith.constant 0 : i32
    %c0_i32_1 = arith.constant 0 : i32
    %c0_i32_2 = arith.constant 0 : i32
    %c0_i32_3 = arith.constant 0 : i32
    return %arg0, %c0_i32, %c0_i32_0, %c0_i32_1, %c0_i32_2 : i32, i32, i32, i32, i32
  }
}

module attributes {stable_mosaic.version = 11 : i64} {
  func.func @_up_block_kernel(%arg0: i32, %arg1: memref<1x16x16x32xf32, #tpu.memory_space<vmem>>, %arg2: memref<1x32xf32, #tpu.memory_space<vmem>>, %arg3: memref<1x32xf32, #tpu.memory_space<vmem>>, %arg4: memref<32x32xf32, #tpu.memory_space<vmem>>, %arg5: memref<288x128xbf16, #tpu.memory_space<vmem>>, %arg6: memref<1x128xf32, #tpu.memory_space<vmem>>, %arg7: memref<1x16x2x16x64xf32, #tpu.memory_space<vmem>>) attributes {dimension_semantics = [#tpu.dimension_semantics<parallel>], iteration_bounds = array<i64: 2>, scalar_prefetch = 0 : i64, scratch_operands = 0 : i64, tpu.core_type = #tpu.core_type<tc>, window_params = [{transform_indices = @transform_0, window_bounds = array<i64: 1, 16, 16, 32>}, {pipeline_mode = #tpu.pipeline_mode<synchronous>, transform_indices = @transform_1, window_bounds = array<i64: 1, 32>}, {pipeline_mode = #tpu.pipeline_mode<synchronous>, transform_indices = @transform_2, window_bounds = array<i64: 1, 32>}, {pipeline_mode = #tpu.pipeline_mode<synchronous>, transform_indices = @transform_3, window_bounds = array<i64: 32, 32>}, {pipeline_mode = #tpu.pipeline_mode<synchronous>, transform_indices = @transform_4, window_bounds = array<i64: 288, 128>}, {pipeline_mode = #tpu.pipeline_mode<synchronous>, transform_indices = @transform_5, window_bounds = array<i64: 1, 128>}, {transform_indices = @transform_6, window_bounds = array<i64: 1, 16, 2, 16, 64>}]} {
    %c0 = arith.constant 0 : index
    %c0_0 = arith.constant 0 : index
    %c0_1 = arith.constant 0 : index
    %c0_2 = arith.constant 0 : index
    %0 = vector.load %arg1[%c0, %c0_0, %c0_1, %c0_2] : memref<1x16x16x32xf32, #tpu.memory_space<vmem>>, vector<1x16x16x32xf32>
    %1 = vector.shape_cast %0 : vector<1x16x16x32xf32> to vector<16x16x32xf32>
    %2 = vector.shape_cast %1 : vector<16x16x32xf32> to vector<256x32xf32>
    %c0_3 = arith.constant 0 : index
    %c0_4 = arith.constant 0 : index
    %3 = vector.load %arg2[%c0_3, %c0_4] : memref<1x32xf32, #tpu.memory_space<vmem>>, vector<1x32xf32>
    %c0_5 = arith.constant 0 : index
    %c0_6 = arith.constant 0 : index
    %4 = vector.load %arg3[%c0_5, %c0_6] : memref<1x32xf32, #tpu.memory_space<vmem>>, vector<1x32xf32>
    %c0_7 = arith.constant 0 : index
    %c0_8 = arith.constant 0 : index
    %5 = vector.load %arg4[%c0_7, %c0_8] : memref<32x32xf32, #tpu.memory_space<vmem>>, vector<32x32xf32>
    %cst = arith.constant dense<0.000000e+00> : vector<32xf32>
    %6 = vector.multi_reduction <add>, %2, %cst [0] : vector<256x32xf32> to vector<32xf32>
    %7 = vector.shape_cast %6 : vector<32xf32> to vector<1x32xf32>
    %cst_9 = arith.constant 2.560000e+02 : f32
    %8 = vector.broadcast %cst_9 : f32 to vector<1x32xf32>
    %9 = arith.divf %7, %8 : vector<1x32xf32>
    %cst_10 = arith.constant dense<0.000000e+00> : vector<1x32xf32>
    %10 = tpu.matmul %9, %5, %cst_10 {dimension_numbers = #tpu.dot_dimension_numbers<[1], [0], [0], [1], [0, 0, 1, 1], [], []>, precision = #tpu.contract_precision<fp32>} : vector<1x32xf32>, vector<32x32xf32>, vector<1x32xf32> -> vector<1x32xf32>
    %11 = vector.broadcast %10 : vector<1x32xf32> to vector<256x32xf32>
    %12 = arith.subf %2, %11 : vector<256x32xf32>
    %13 = arith.mulf %12, %12 : vector<256x32xf32>
    %cst_11 = arith.constant dense<0.000000e+00> : vector<32xf32>
    %14 = vector.multi_reduction <add>, %13, %cst_11 [0] : vector<256x32xf32> to vector<32xf32>
    %15 = vector.shape_cast %14 : vector<32xf32> to vector<1x32xf32>
    %cst_12 = arith.constant 2.560000e+02 : f32
    %16 = vector.broadcast %cst_12 : f32 to vector<1x32xf32>
    %17 = arith.divf %15, %16 : vector<1x32xf32>
    %cst_13 = arith.constant dense<0.000000e+00> : vector<1x32xf32>
    %18 = tpu.matmul %17, %5, %cst_13 {dimension_numbers = #tpu.dot_dimension_numbers<[1], [0], [0], [1], [0, 0, 1, 1], [], []>, precision = #tpu.contract_precision<fp32>} : vector<1x32xf32>, vector<32x32xf32>, vector<1x32xf32> -> vector<1x32xf32>
    %cst_14 = arith.constant 9.99999974E-6 : f32
    %19 = vector.broadcast %cst_14 : f32 to vector<1x32xf32>
    %20 = arith.addf %18, %19 : vector<1x32xf32>
    %21 = math.rsqrt %20 : vector<1x32xf32>
    %22 = vector.broadcast %21 : vector<1x32xf32> to vector<256x32xf32>
    %23 = arith.mulf %12, %22 : vector<256x32xf32>
    %24 = vector.broadcast %3 : vector<1x32xf32> to vector<256x32xf32>
    %25 = arith.mulf %23, %24 : vector<256x32xf32>
    %26 = vector.broadcast %4 : vector<1x32xf32> to vector<256x32xf32>
    %27 = arith.addf %25, %26 : vector<256x32xf32>
    %28 = arith.negf %27 : vector<256x32xf32>
    %29 = math.exp %28 : vector<256x32xf32>
    %cst_15 = arith.constant 1.000000e+00 : f32
    %30 = vector.broadcast %cst_15 : f32 to vector<256x32xf32>
    %31 = arith.addf %30, %29 : vector<256x32xf32>
    %32 = arith.divf %30, %31 : vector<256x32xf32>
    %33 = arith.mulf %27, %32 : vector<256x32xf32>
    %34 = vector.shape_cast %33 : vector<256x32xf32> to vector<16x16x32xf32>
    %35 = arith.truncf %34 : vector<16x16x32xf32> to vector<16x16x32xbf16>
    %c0_16 = arith.constant 0 : index
    %c0_17 = arith.constant 0 : index
    %36 = vector.load %arg6[%c0_16, %c0_17] : memref<1x128xf32, #tpu.memory_space<vmem>>, vector<1x128xf32>
    %cst_18 = arith.constant 0.000000e+00 : bf16
    %37 = vector.broadcast %cst_18 : bf16 to vector<1x16x32xbf16>
    %38 = tpu.concatenate %37, %35, %37 in 0 : vector<1x16x32xbf16>, vector<16x16x32xbf16>, vector<1x16x32xbf16> -> vector<18x16x32xbf16>
    %cst_19 = arith.constant 0.000000e+00 : bf16
    %39 = vector.broadcast %cst_19 : bf16 to vector<18x1x32xbf16>
    %40 = tpu.concatenate %39, %38, %39 in 1 : vector<18x1x32xbf16>, vector<18x16x32xbf16>, vector<18x1x32xbf16> -> vector<18x18x32xbf16>
    %41 = vector.extract_strided_slice %40 {offsets = [0, 0, 0], sizes = [16, 16, 32], strides = [1, 1, 1]} : vector<18x18x32xbf16> to vector<16x16x32xbf16>
    %42 = vector.extract_strided_slice %40 {offsets = [0, 1, 0], sizes = [16, 16, 32], strides = [1, 1, 1]} : vector<18x18x32xbf16> to vector<16x16x32xbf16>
    %43 = vector.extract_strided_slice %40 {offsets = [0, 2, 0], sizes = [16, 16, 32], strides = [1, 1, 1]} : vector<18x18x32xbf16> to vector<16x16x32xbf16>
    %44 = vector.extract_strided_slice %40 {offsets = [1, 0, 0], sizes = [16, 16, 32], strides = [1, 1, 1]} : vector<18x18x32xbf16> to vector<16x16x32xbf16>
    %45 = vector.extract_strided_slice %40 {offsets = [1, 1, 0], sizes = [16, 16, 32], strides = [1, 1, 1]} : vector<18x18x32xbf16> to vector<16x16x32xbf16>
    %46 = vector.extract_strided_slice %40 {offsets = [1, 2, 0], sizes = [16, 16, 32], strides = [1, 1, 1]} : vector<18x18x32xbf16> to vector<16x16x32xbf16>
    %47 = vector.extract_strided_slice %40 {offsets = [2, 0, 0], sizes = [16, 16, 32], strides = [1, 1, 1]} : vector<18x18x32xbf16> to vector<16x16x32xbf16>
    %48 = vector.extract_strided_slice %40 {offsets = [2, 1, 0], sizes = [16, 16, 32], strides = [1, 1, 1]} : vector<18x18x32xbf16> to vector<16x16x32xbf16>
    %49 = vector.extract_strided_slice %40 {offsets = [2, 2, 0], sizes = [16, 16, 32], strides = [1, 1, 1]} : vector<18x18x32xbf16> to vector<16x16x32xbf16>
    %50 = tpu.concatenate %41, %42, %43, %44, %45, %46, %47, %48, %49 in 2 : vector<16x16x32xbf16>, vector<16x16x32xbf16>, vector<16x16x32xbf16>, vector<16x16x32xbf16>, vector<16x16x32xbf16>, vector<16x16x32xbf16>, vector<16x16x32xbf16>, vector<16x16x32xbf16>, vector<16x16x32xbf16> -> vector<16x16x288xbf16>
    %51 = vector.shape_cast %50 : vector<16x16x288xbf16> to vector<256x288xbf16>
    %c0_20 = arith.constant 0 : index
    %c0_21 = arith.constant 0 : index
    %52 = vector.load %arg5[%c0_20, %c0_21] : memref<288x128xbf16, #tpu.memory_space<vmem>>, vector<288x128xbf16>
    %cst_22 = arith.constant dense<0.000000e+00> : vector<256x128xf32>
    %53 = tpu.matmul %51, %52, %cst_22 {dimension_numbers = #tpu.dot_dimension_numbers<[1], [0], [0], [1], [0, 0, 1, 1], [], []>} : vector<256x288xbf16>, vector<288x128xbf16>, vector<256x128xf32> -> vector<256x128xf32>
    %54 = vector.broadcast %36 : vector<1x128xf32> to vector<256x128xf32>
    %55 = arith.addf %53, %54 : vector<256x128xf32>
    %56 = vector.extract_strided_slice %55 {offsets = [0, 0], sizes = [256, 64], strides = [1, 1]} : vector<256x128xf32> to vector<256x64xf32>
    %57 = vector.shape_cast %56 : vector<256x64xf32> to vector<16x16x64xf32>
    %c0_23 = arith.constant 0 : index
    %c0_24 = arith.constant 0 : index
    %c0_25 = arith.constant 0 : index
    %c0_26 = arith.constant 0 : index
    %c0_27 = arith.constant 0 : index
    %58 = vector.load %arg7[%c0_23, %c0_24, %c0_25, %c0_26, %c0_27] : memref<1x16x2x16x64xf32, #tpu.memory_space<vmem>>, vector<1x16x1x16x64xf32>
    %59 = vector.shape_cast %58 : vector<1x16x1x16x64xf32> to vector<16x16x64xf32>
    %60 = vector.shape_cast %57 : vector<16x16x64xf32> to vector<1x16x1x16x64xf32>
    tpu.vector_store %arg7[%c0_23, %c0_24, %c0_25, %c0_26, %c0_27], %60 {strides = array<i32>} : memref<1x16x2x16x64xf32, #tpu.memory_space<vmem>>, vector<1x16x1x16x64xf32>,
    %61 = vector.extract_strided_slice %55 {offsets = [0, 64], sizes = [256, 64], strides = [1, 1]} : vector<256x128xf32> to vector<256x64xf32>
    %62 = vector.shape_cast %61 : vector<256x64xf32> to vector<16x16x64xf32>
    %c0_28 = arith.constant 0 : index
    %c0_29 = arith.constant 0 : index
    %c1 = arith.constant 1 : index
    %c0_30 = arith.constant 0 : index
    %c0_31 = arith.constant 0 : index
    %63 = vector.load %arg7[%c0_28, %c0_29, %c1, %c0_30, %c0_31] : memref<1x16x2x16x64xf32, #tpu.memory_space<vmem>>, vector<1x16x1x16x64xf32>
    %64 = vector.shape_cast %63 : vector<1x16x1x16x64xf32> to vector<16x16x64xf32>
    %65 = vector.shape_cast %62 : vector<16x16x64xf32> to vector<1x16x1x16x64xf32>
    tpu.vector_store %arg7[%c0_28, %c0_29, %c1, %c0_30, %c0_31], %65 {strides = array<i32>} : memref<1x16x2x16x64xf32, #tpu.memory_space<vmem>>, vector<1x16x1x16x64xf32>,
    return
  }
  func.func @transform_0(%arg0: i32) -> (i32, i32, i32, i32) {
    %c0_i32 = arith.constant 0 : i32
    %c0_i32_0 = arith.constant 0 : i32
    %c0_i32_1 = arith.constant 0 : i32
    %c0_i32_2 = arith.constant 0 : i32
    return %arg0, %c0_i32, %c0_i32_0, %c0_i32_1 : i32, i32, i32, i32
  }
  func.func @transform_1(%arg0: i32) -> (i32, i32) {
    %c0_i32 = arith.constant 0 : i32
    %c0_i32_0 = arith.constant 0 : i32
    %c0_i32_1 = arith.constant 0 : i32
    return %c0_i32, %c0_i32_0 : i32, i32
  }
  func.func @transform_2(%arg0: i32) -> (i32, i32) {
    %c0_i32 = arith.constant 0 : i32
    %c0_i32_0 = arith.constant 0 : i32
    %c0_i32_1 = arith.constant 0 : i32
    return %c0_i32, %c0_i32_0 : i32, i32
  }
  func.func @transform_3(%arg0: i32) -> (i32, i32) {
    %c0_i32 = arith.constant 0 : i32
    %c0_i32_0 = arith.constant 0 : i32
    %c0_i32_1 = arith.constant 0 : i32
    return %c0_i32, %c0_i32_0 : i32, i32
  }
  func.func @transform_4(%arg0: i32) -> (i32, i32) {
    %c0_i32 = arith.constant 0 : i32
    %c0_i32_0 = arith.constant 0 : i32
    %c0_i32_1 = arith.constant 0 : i32
    return %c0_i32, %c0_i32_0 : i32, i32
  }
  func.func @transform_5(%arg0: i32) -> (i32, i32) {
    %c0_i32 = arith.constant 0 : i32
    %c0_i32_0 = arith.constant 0 : i32
    %c0_i32_1 = arith.constant 0 : i32
    return %c0_i32, %c0_i32_0 : i32, i32
  }
  func.func @transform_6(%arg0: i32) -> (i32, i32, i32, i32, i32) {
    %c0_i32 = arith.constant 0 : i32
    %c0_i32_0 = arith.constant 0 : i32
    %c0_i32_1 = arith.constant 0 : i32
    %c0_i32_2 = arith.constant 0 : i32
    %c0_i32_3 = arith.constant 0 : i32
    return %arg0, %c0_i32, %c0_i32_0, %c0_i32_1, %c0_i32_2 : i32, i32, i32, i32, i32
  }
}

module attributes {stable_mosaic.version = 11 : i64} {
  func.func @_gn_silu_conv1x1_kernel(%arg0: i32, %arg1: memref<1x32x32x32xf32, #tpu.memory_space<vmem>>, %arg2: memref<1x32xf32, #tpu.memory_space<vmem>>, %arg3: memref<1x32xf32, #tpu.memory_space<vmem>>, %arg4: memref<32x32xf32, #tpu.memory_space<vmem>>, %arg5: memref<4x32xbf16, #tpu.memory_space<vmem>>, %arg6: memref<4x1xf32, #tpu.memory_space<vmem>>, %arg7: memref<1x4x1024xf32, #tpu.memory_space<vmem>>) attributes {dimension_semantics = [#tpu.dimension_semantics<parallel>], iteration_bounds = array<i64: 2>, scalar_prefetch = 0 : i64, scratch_operands = 0 : i64, tpu.core_type = #tpu.core_type<tc>, window_params = [{transform_indices = @transform_0, window_bounds = array<i64: 1, 32, 32, 32>}, {pipeline_mode = #tpu.pipeline_mode<synchronous>, transform_indices = @transform_1, window_bounds = array<i64: 1, 32>}, {pipeline_mode = #tpu.pipeline_mode<synchronous>, transform_indices = @transform_2, window_bounds = array<i64: 1, 32>}, {pipeline_mode = #tpu.pipeline_mode<synchronous>, transform_indices = @transform_3, window_bounds = array<i64: 32, 32>}, {pipeline_mode = #tpu.pipeline_mode<synchronous>, transform_indices = @transform_4, window_bounds = array<i64: 4, 32>}, {pipeline_mode = #tpu.pipeline_mode<synchronous>, transform_indices = @transform_5, window_bounds = array<i64: 4, 1>}, {transform_indices = @transform_6, window_bounds = array<i64: 1, 4, 1024>}]} {
    %c0 = arith.constant 0 : index
    %c0_0 = arith.constant 0 : index
    %c0_1 = arith.constant 0 : index
    %c0_2 = arith.constant 0 : index
    %0 = vector.load %arg1[%c0, %c0_0, %c0_1, %c0_2] : memref<1x32x32x32xf32, #tpu.memory_space<vmem>>, vector<1x32x32x32xf32>
    %1 = vector.shape_cast %0 : vector<1x32x32x32xf32> to vector<32x32x32xf32>
    %2 = vector.shape_cast %1 : vector<32x32x32xf32> to vector<1024x32xf32>
    %c0_3 = arith.constant 0 : index
    %c0_4 = arith.constant 0 : index
    %3 = vector.load %arg2[%c0_3, %c0_4] : memref<1x32xf32, #tpu.memory_space<vmem>>, vector<1x32xf32>
    %c0_5 = arith.constant 0 : index
    %c0_6 = arith.constant 0 : index
    %4 = vector.load %arg3[%c0_5, %c0_6] : memref<1x32xf32, #tpu.memory_space<vmem>>, vector<1x32xf32>
    %c0_7 = arith.constant 0 : index
    %c0_8 = arith.constant 0 : index
    %5 = vector.load %arg4[%c0_7, %c0_8] : memref<32x32xf32, #tpu.memory_space<vmem>>, vector<32x32xf32>
    %cst = arith.constant dense<0.000000e+00> : vector<32xf32>
    %6 = vector.multi_reduction <add>, %2, %cst [0] : vector<1024x32xf32> to vector<32xf32>
    %7 = vector.shape_cast %6 : vector<32xf32> to vector<1x32xf32>
    %cst_9 = arith.constant 1.024000e+03 : f32
    %8 = vector.broadcast %cst_9 : f32 to vector<1x32xf32>
    %9 = arith.divf %7, %8 : vector<1x32xf32>
    %cst_10 = arith.constant dense<0.000000e+00> : vector<1x32xf32>
    %10 = tpu.matmul %9, %5, %cst_10 {dimension_numbers = #tpu.dot_dimension_numbers<[1], [0], [0], [1], [0, 0, 1, 1], [], []>, precision = #tpu.contract_precision<fp32>} : vector<1x32xf32>, vector<32x32xf32>, vector<1x32xf32> -> vector<1x32xf32>
    %11 = vector.broadcast %10 : vector<1x32xf32> to vector<1024x32xf32>
    %12 = arith.subf %2, %11 : vector<1024x32xf32>
    %13 = arith.mulf %12, %12 : vector<1024x32xf32>
    %cst_11 = arith.constant dense<0.000000e+00> : vector<32xf32>
    %14 = vector.multi_reduction <add>, %13, %cst_11 [0] : vector<1024x32xf32> to vector<32xf32>
    %15 = vector.shape_cast %14 : vector<32xf32> to vector<1x32xf32>
    %cst_12 = arith.constant 1.024000e+03 : f32
    %16 = vector.broadcast %cst_12 : f32 to vector<1x32xf32>
    %17 = arith.divf %15, %16 : vector<1x32xf32>
    %cst_13 = arith.constant dense<0.000000e+00> : vector<1x32xf32>
    %18 = tpu.matmul %17, %5, %cst_13 {dimension_numbers = #tpu.dot_dimension_numbers<[1], [0], [0], [1], [0, 0, 1, 1], [], []>, precision = #tpu.contract_precision<fp32>} : vector<1x32xf32>, vector<32x32xf32>, vector<1x32xf32> -> vector<1x32xf32>
    %cst_14 = arith.constant 9.99999974E-6 : f32
    %19 = vector.broadcast %cst_14 : f32 to vector<1x32xf32>
    %20 = arith.addf %18, %19 : vector<1x32xf32>
    %21 = math.rsqrt %20 : vector<1x32xf32>
    %22 = vector.broadcast %21 : vector<1x32xf32> to vector<1024x32xf32>
    %23 = arith.mulf %12, %22 : vector<1024x32xf32>
    %24 = vector.broadcast %3 : vector<1x32xf32> to vector<1024x32xf32>
    %25 = arith.mulf %23, %24 : vector<1024x32xf32>
    %26 = vector.broadcast %4 : vector<1x32xf32> to vector<1024x32xf32>
    %27 = arith.addf %25, %26 : vector<1024x32xf32>
    %28 = arith.negf %27 : vector<1024x32xf32>
    %29 = math.exp %28 : vector<1024x32xf32>
    %cst_15 = arith.constant 1.000000e+00 : f32
    %30 = vector.broadcast %cst_15 : f32 to vector<1024x32xf32>
    %31 = arith.addf %30, %29 : vector<1024x32xf32>
    %32 = arith.divf %30, %31 : vector<1024x32xf32>
    %33 = arith.mulf %27, %32 : vector<1024x32xf32>
    %34 = arith.truncf %33 : vector<1024x32xf32> to vector<1024x32xbf16>
    %c0_16 = arith.constant 0 : index
    %c0_17 = arith.constant 0 : index
    %35 = vector.load %arg5[%c0_16, %c0_17] : memref<4x32xbf16, #tpu.memory_space<vmem>>, vector<4x32xbf16>
    "tpu.trace_start"() <{level = 10 : i32, message = "oc,nc->on"}> : () -> ()
    %cst_18 = arith.constant dense<0.000000e+00> : vector<4x1024xf32>
    %36 = tpu.matmul %35, %34, %cst_18 {dimension_numbers = #tpu.dot_dimension_numbers<[1], [1], [0], [0], [0, 0, 1, 0], [], []>} : vector<4x32xbf16>, vector<1024x32xbf16>, vector<4x1024xf32> -> vector<4x1024xf32>
    "tpu.trace_stop"() : () -> ()
    %c0_19 = arith.constant 0 : index
    %c0_20 = arith.constant 0 : index
    %37 = vector.load %arg6[%c0_19, %c0_20] : memref<4x1xf32, #tpu.memory_space<vmem>>, vector<4x1xf32>
    %38 = vector.broadcast %37 : vector<4x1xf32> to vector<4x1024xf32>
    %39 = arith.addf %36, %38 : vector<4x1024xf32>
    %c0_21 = arith.constant 0 : index
    %c0_22 = arith.constant 0 : index
    %c0_23 = arith.constant 0 : index
    %40 = vector.load %arg7[%c0_21, %c0_22, %c0_23] : memref<1x4x1024xf32, #tpu.memory_space<vmem>>, vector<1x4x1024xf32>
    %41 = vector.shape_cast %40 : vector<1x4x1024xf32> to vector<4x1024xf32>
    %42 = vector.shape_cast %39 : vector<4x1024xf32> to vector<1x4x1024xf32>
    tpu.vector_store %arg7[%c0_21, %c0_22, %c0_23], %42 {strides = array<i32>} : memref<1x4x1024xf32, #tpu.memory_space<vmem>>, vector<1x4x1024xf32>,
    return
  }
  func.func @transform_0(%arg0: i32) -> (i32, i32, i32, i32) {
    %c0_i32 = arith.constant 0 : i32
    %c0_i32_0 = arith.constant 0 : i32
    %c0_i32_1 = arith.constant 0 : i32
    %c0_i32_2 = arith.constant 0 : i32
    return %arg0, %c0_i32, %c0_i32_0, %c0_i32_1 : i32, i32, i32, i32
  }
  func.func @transform_1(%arg0: i32) -> (i32, i32) {
    %c0_i32 = arith.constant 0 : i32
    %c0_i32_0 = arith.constant 0 : i32
    %c0_i32_1 = arith.constant 0 : i32
    return %c0_i32, %c0_i32_0 : i32, i32
  }
  func.func @transform_2(%arg0: i32) -> (i32, i32) {
    %c0_i32 = arith.constant 0 : i32
    %c0_i32_0 = arith.constant 0 : i32
    %c0_i32_1 = arith.constant 0 : i32
    return %c0_i32, %c0_i32_0 : i32, i32
  }
  func.func @transform_3(%arg0: i32) -> (i32, i32) {
    %c0_i32 = arith.constant 0 : i32
    %c0_i32_0 = arith.constant 0 : i32
    %c0_i32_1 = arith.constant 0 : i32
    return %c0_i32, %c0_i32_0 : i32, i32
  }
  func.func @transform_4(%arg0: i32) -> (i32, i32) {
    %c0_i32 = arith.constant 0 : i32
    %c0_i32_0 = arith.constant 0 : i32
    %c0_i32_1 = arith.constant 0 : i32
    return %c0_i32, %c0_i32_0 : i32, i32
  }
  func.func @transform_5(%arg0: i32) -> (i32, i32) {
    %c0_i32 = arith.constant 0 : i32
    %c0_i32_0 = arith.constant 0 : i32
    %c0_i32_1 = arith.constant 0 : i32
    return %c0_i32, %c0_i32_0 : i32, i32
  }
  func.func @transform_6(%arg0: i32) -> (i32, i32, i32) {
    %c0_i32 = arith.constant 0 : i32
    %c0_i32_0 = arith.constant 0 : i32
    %c0_i32_1 = arith.constant 0 : i32
    return %arg0, %c0_i32, %c0_i32_0 : i32, i32, i32
  }
}

</mosaic_0001>

<bundles_post_ra>
// kernel: tile.13
= control target key start
LH: loop header
LB: loop body
LE: loop exit
PB: predicated region body
PF: predicated region fallthrough
CT: control target
= control target key end

     0   :  { %s22_s0 = inlined_call_operand.vmem [shape: f32[32], index: 0, kind: input, shape index: {}]   ;;  %s23_s1 = inlined_call_operand.vmem [shape: f32[4,32], index: 1, kind: output, shape index: {}]  }
   0x1   :  { %v4_v0 = vld [vmem:[%s22_s0] ss:$0 sm:$0xff] }
   0x2   :  { %5 = vst [vmem:[%s23_s1] sm:$0xf] %v4_v0 }

// kernel: tile.14
= control target key start
LH: loop header
LB: loop body
LE: loop exit
PB: predicated region body
PF: predicated region fallthrough
CT: control target
= control target key end

     0   :  { %vm7_vm0 = vcmask 261120   ;;  %s37_s8 = smov 32   ;;  %s38_s9 = smov 64   ;;  %vm13_vm1 = vcmask 1048320   ;;  %vm19_vm2 = vcmask 785920   ;;  %vm25_vm3 = vcmask 523520   ;;  %s55_s0 = inlined_call_operand.vmem [shape: f32[4,32], index: 0, kind: input, shape index: {}]   ;;  %s56_s1 = inlined_call_operand.vmem [shape: f32[1,128], index: 1, kind: output, shape index: {}]  }
   0x1   :  { %v4_v0 = vld [vmem:[%s55_s0] sm:$0xf]  ;;  %s36_s0 = smov 96  }
   0x2   :  { %5 = vst [vmem:[#allocation1] sm:$0xf] %v4_v0 }
   0x9   :  { %v10_v1 = vld [vmem:[#allocation1 + $0x3] sm:$0x1]   ;;  %v22_v2 = vld [vmem:[#allocation1 + $0x1] sm:$0x1]   ;;  %v6_v3 = vld [vmem:[#allocation1] sm:$0x1]  }
   0xa   :  { %11 = vrot.lane.b32.xlu0 %v10_v1, %s36_s0  ;;  %23 = vrot.lane.b32.xlu1 %v22_v2, %s37_s8  ;;  %v16_v4 = vld [vmem:[#allocation1 + $0x2] sm:$0x1]   ;;  %8 = vst.msk [vmem:[#allocation0] sm:$0x1] %vm7_vm0, %v6_v3  }
   0xe   :  { %17 = vrot.lane.b32.xlu0 %v16_v4, %s38_s9 }
  0x7c   :  { %v12_v5 = vpop.permute.xlu0 %11   ;;  %v24_v6 = vpop.permute.xlu1 %23  }
  0x7d   :  { %14 = vst.msk [vmem:[#allocation0] sm:$0x1] %vm13_vm1, %v12_v5  }
  0x80   :  { %v18_v7 = vpop.permute.xlu0 %17  }
  0x81   :  { %20 = vst.msk [vmem:[#allocation0] sm:$0x1] %vm19_vm2, %v18_v7  }
  0x82   :  { %26 = vst.msk [vmem:[#allocation0] sm:$0x1] %vm25_vm3, %v24_v6  }
  0x89   :  { %v30_v8 = vld [vmem:[#allocation0] sm:$0x1] }
  0x8a   :  { %32 = vst [vmem:[%s56_s1] sm:$0x1] %v30_v8 }

// kernel: decoder_forward.3
= control target key start
LH: loop header
LB: loop body
LE: loop exit
PB: predicated region body
PF: predicated region fallthrough
CT: control target
= control target key end

     0   :  { %s3462_s27 = smov 0   ;;  %s4387_s0 = inlined_call_operand.vmem [shape: f32[2,8,8,8], index: 0, kind: input, shape index: {}]   ;;  %s4388_s1 = inlined_call_operand.vmem [shape: bf16[72,32], index: 1, kind: input, shape index: {}]   ;;  %s4389_s2 = inlined_call_operand.vmem [shape: f32[1,32], index: 2, kind: input, shape index: {}]   ;;  %s4390_s3 = inlined_call_operand.vmem [shape: f32[1,32], index: 3, kind: input, shape index: {}]   ;;  %s4391_s4 = inlined_call_operand.vmem [shape: f32[1,32], index: 4, kind: input, shape index: {}]   ;;  %s4392_s5 = inlined_call_operand.vmem [shape: f32[32,32], index: 5, kind: input, shape index: {}]   ;;  %s4393_s6 = inlined_call_operand.vmem [shape: bf16[288,128], index: 6, kind: input, shape index: {}]   ;;  %s4394_s7 = inlined_call_operand.vmem [shape: f32[1,128], index: 7, kind: input, shape index: {}]   ;;  %s4395_s8 = inlined_call_operand.vmem [shape: f32[2,8,2,8,64], index: 8, kind: output, shape index: {}]  }
   0x1 LB: > { %s2868_s28 = sadd.s32 4294967295, %s3402_s27   ;;  %p2872_p0 = scmp.ge.s32.totalorder %s3402_s27, 1  ;;  %s3402_s27 = sphi %s3462_s27, %s18_s27  }
   0x2   : > { %p262_p1 = scmp.lt.s32.totalorder %s3402_s27, 3 }
   0x4   : > { %p263_p2 = pnand %p2872_p0, %p262_p1 }
   0x5   : > { %vm396_vm0 = vcmask (!%p263_p2), 1040384   ;;  %vm397_vm1 = vsmask.f32 (!%p263_p2), 256  ;;  %vm408_vm2 = vcmask (!%p263_p2), 1044480   ;;  %v3404_v0 = vmov (!%p263_p2), 0   ;;  %p296_p3 = scmp.lt.s32.totalorder (!%p263_p2), %s2868_s28, 1 }
   0x6   : > { %266 = sbr.rel (%p263_p2) target bundleno = 1656 (0x678), region = 52  ;;  %v327_v1 = vrot.slane (!%p263_p2), %v3404_v0, 7  ;;  %vm3470_vm3 = vmand (!%p263_p2), %vm396_vm0, %vm397_vm1  ;;  %vm409_vm4 = vsmask.f32 (!%p263_p2), 4352  ;;  %s3405_s11 = smov (!%p263_p2), 16   ;;  %vm840_vm6 = vcmask (!%p263_p2), 1043456  }
   0x7   : > { %vm3474_vm5 = vmand (!%p263_p2), %vm408_vm2, %vm409_vm4  ;;  %s3406_s12 = smov (!%p263_p2), 8   ;;  %s3407_s13 = smov (!%p263_p2), 24   ;;  %vm629_vm7 = vcmask (!%p263_p2), 64512   ;;  %vm646_vm8 = vcmask (!%p263_p2), 130048   ;;  %vm663_vm9 = vcmask (!%p263_p2), 195584   ;;  %vm680_vm10 = vcmask (!%p263_p2), 261120  }
   0x8   : > { %v399_v4 = vsel (!%p263_p2), %vm3470_vm3, 0, %v327_v1  ;;  %s3408_s14 = smov (!%p263_p2), 32   ;;  %s3409_s15 = smov (!%p263_p2), 40   ;;  %vm697_vm11 = vcmask (!%p263_p2), 326656   ;;  %vm714_vm12 = vcmask (!%p263_p2), 392192   ;;  %vm731_vm13 = vcmask (!%p263_p2), 457728  }
   0x9   : > { %v3484_v5 = vsel (!%p263_p2), %vm3474_vm5, %v399_v4, 0  ;;  %s3410_s18 = smov (!%p263_p2), 48   ;;  %s3411_s23 = smov (!%p263_p2), 56   ;;  %vm748_vm14 = vcmask (!%p263_p2), 523264   ;;  %vm827_vm15 = vcmask (!%p263_p2), 588800   ;;  %vm3414_vm0 = vmmov (!%p263_p2), 0  }
   0xa   : > { %v3487_v6 = vrot.slane (!%p263_p2), %v3484_v5, 1  ;;  %v421_v7 = vshrl.u32 (!%p263_p2), %v3484_v5, 16  ;;  %v423_v8 = vshll.u32 (!%p263_p2), %v3484_v5, 16  ;;  %s3412_s30 = smov (!%p263_p2), 64   ;;  %s3416_s9 = smov (!%p263_p2), 96   ;;  %v3346_v2 = vld [vmem:[%s4393_s6 + $0x40] sm:$0xff] (!%p263_p2)  }
   0xb   : > { %v3347_v3 = vld [vmem:[%s4393_s6] sm:$0xff] (!%p263_p2)   ;;  %vm2339_vm1 = vcmask (!%p263_p2), 785408  }
   0xc   : > { %508 = vrot.lane.b32.xlu0 (!%p263_p2), %v3487_v6, %s3405_s11  ;;  %v425_v9 = vrot.slane (!%p263_p2), %v423_v8, 1 }
   0xd   : > { %s4401_s28 = smov (!%p296_p3, %s2868_s28), 1 }
   0xe   : > { %s2946_s29 = sshll.u32 %s4401_s28, 6  ;;  %v3503_v17 = vor.u32 %v425_v9, %v421_v7  ;;  %s2947_s26 = sshll.u32 %s4401_s28, 7 }
   0xf   : > { %s3495_s10 = scalar_lea.vmem %s4387_s0, %s2946_s29 }
  0x10   : > { %v308_v10 = vld [vmem:[%s3495_s10 + $0x8] sm:$0xff]  ;;  %v307_v11 = vld [vmem:[%s3495_s10] sm:$0xff]  ;;  %v310_v12 = vld [vmem:[%s3495_s10 + $0x18] sm:$0xff]  ;;  %476 = vrot.lane.b32.xlu0 %v3503_v17, %s3406_s12 }
  0x11   : > { %v316_v13 = vpack.c.bf16 %v308_v10, %v308_v10  ;;  %v315_v14 = vpack.c.bf16 %v307_v11, %v307_v11  ;;  %v318_v15 = vpack.c.bf16 %v310_v12, %v310_v12  ;;  %v309_v16 = vld [vmem:[%s3495_s10 + $0x10] sm:$0xff]  ;;  %v311_v59 = vld [vmem:[%s3495_s10 + $0x20] sm:$0xff]  ;;  %v312_v63 = vld [vmem:[%s3495_s10 + $0x28] sm:$0xff] }
  0x12   : > { %v317_v18 = vpack.c.bf16 %v309_v16, %v309_v16  ;;  %v319_v62 = vpack.c.bf16 %v311_v59, %v311_v59  ;;  %v320_v4 = vpack.c.bf16 %v312_v63, %v312_v63  ;;  %v313_v10 = vld [vmem:[%s3495_s10 + $0x30] sm:$0xff]  ;;  %v3339_v11 = vld [vmem:[%s4388_s1] sm:$0xff]  }
  0x13   : > { %v339_v19 = vshrl.u32 %v316_v13, 16  ;;  %v342_v20 = vshll.u32 %v316_v13, 16  ;;  %v332_v21 = vshrl.u32 %v315_v14, 16  ;;  %v335_v22 = vshll.u32 %v315_v14, 16  ;;  %3063 = vmatprep.subr.bf16.mxu0 %v3339_v11 }
  0x14   : > { %v353_v23 = vshrl.u32 %v318_v15, 16  ;;  %v356_v24 = vshll.u32 %v318_v15, 16  ;;  %v346_v25 = vshrl.u32 %v317_v18, 16  ;;  %v349_v26 = vshll.u32 %v317_v18, 16  ;;  %3064 = vmatpush3.bf16.msra.mxu0 %v3339_v11  ;;  %v3340_v18 = vld [vmem:[%s4388_s1 + $0x8] sm:$0xff]  }
  0x15   : > { %v341_v27 = vrot.slane %v339_v19, 7  ;;  %v334_v28 = vrot.slane %v332_v21, 7  ;;  %v360_v1 = vshrl.u32 %v319_v62, 16  ;;  %v363_v8 = vshll.u32 %v319_v62, 16  ;;  %3065 = vmatprep.subr.bf16.mxu0 %v3340_v18 }
  0x16   : > { %v355_v29 = vrot.slane %v353_v23, 7  ;;  %v348_v30 = vrot.slane %v346_v25, 7  ;;  %v367_v9 = vshrl.u32 %v320_v4, 16  ;;  %v370_v15 = vshll.u32 %v320_v4, 16  ;;  %v3341_v23 = vld [vmem:[%s4388_s1 + $0x10] sm:$0xff]  }
  0x17   : > { %v344_v31 = vor.u32 %v342_v20, %v341_v27  ;;  %v337_v32 = vor.u32 %v335_v22, %v334_v28  ;;  %v362_v7 = vrot.slane %v360_v1, 7  ;;  %v321_v16 = vpack.c.bf16 %v313_v10, %v313_v10  ;;  %v3342_v28 = vld [vmem:[%s4388_s1 + $0x18] sm:$0xff]  }
  0x18   : > { %v358_v33 = vor.u32 %v356_v24, %v355_v29  ;;  %v351_v34 = vor.u32 %v349_v26, %v348_v30  ;;  %v369_v14 = vrot.slane %v367_v9, 7  ;;  %3066 = vmatpush3.bf16.msra.mxu0 %v3340_v18 }
  0x19   : > { %v401_v35 = vsel %vm3470_vm3, 0, %v344_v31  ;;  %v400_v36 = vsel %vm3470_vm3, 0, %v337_v32  ;;  %v365_v13 = vor.u32 %v363_v8, %v362_v7  ;;  %v374_v21 = vshrl.u32 %v321_v16, 16  ;;  %3067 = vmatprep.subr.bf16.mxu0 %v3341_v23 }
  0x1a   : > { %v3513_v37 = vsel %vm3474_vm5, %v401_v35, 0  ;;  %v3517_v38 = vsel %vm3474_vm5, %v400_v36, 0  ;;  %v403_v39 = vsel %vm3470_vm3, 0, %v358_v33  ;;  %v402_v40 = vsel %vm3470_vm3, 0, %v351_v34  ;;  %v3343_v33 = vld [vmem:[%s4388_s1 + $0x20] ss:$0 sps:$4 sm:$0xff]  }
  0x1b   : > { %527 = vrot.lane.b32.xlu1 %v3513_v37, %s3407_s13  ;;  %525 = vrot.lane.b32.xlu0 %v3517_v38, %s3407_s13  ;;  %v3529_v41 = vsel %vm3474_vm5, %v403_v39, 0  ;;  %v3533_v42 = vsel %vm3474_vm5, %v402_v40, 0  ;;  %v430_v43 = vshll.u32 %v3517_v38, 16  ;;  %v3537_v44 = vrot.slane %v3513_v37, 1 }
  0x1c   : > { %v501_v45 = vrot.slane %v3517_v38, 1  ;;  %v428_v46 = vshrl.u32 %v3517_v38, 16  ;;  %v437_v48 = vshll.u32 %v3513_v37, 16  ;;  %v3547_v49 = vrot.slane %v3533_v42, 1  ;;  %3068 = vmatpush3.bf16.msra.mxu0 %v3341_v23 }
  0x1d   : > { %v432_v47 = vrot.slane %v430_v43, 1  ;;  %v435_v51 = vshrl.u32 %v3513_v37, 16  ;;  %v444_v53 = vshll.u32 %v3533_v42, 16  ;;  %v442_v55 = vshrl.u32 %v3533_v42, 16  ;;  %3069 = vmatprep.subr.bf16.mxu0 %v3342_v28 }
  0x1e   : > { %v439_v52 = vrot.slane %v437_v48, 1  ;;  %v451_v58 = vshll.u32 %v3529_v41, 16  ;;  %v449_v60 = vshrl.u32 %v3529_v41, 16  ;;  %v504_v12 = vrot.slane %v3529_v41, 1 }
  0x1f   : > { %531 = vrot.lane.b32.xlu1 %v3529_v41, %s3407_s13  ;;  %529 = vrot.lane.b32.xlu0 %v3533_v42, %s3407_s13  ;;  %v433_v50 = vor.u32 %v432_v47, %v428_v46  ;;  %v446_v56 = vrot.slane %v444_v53, 1  ;;  %v404_v19 = vsel %vm3470_vm3, 0, %v365_v13  ;;  %v372_v20 = vor.u32 %v370_v15, %v369_v14  ;;  %v314_v47 = vld [vmem:[%s3495_s10 + $0x38] sm:$0xff] }
  0x20   : > { %v440_v54 = vor.u32 %v439_v52, %v435_v51  ;;  %v453_v61 = vrot.slane %v451_v58, 1  ;;  %v3590_v22 = vsel %vm3474_vm5, %v404_v19, 0  ;;  %v376_v26 = vrot.slane %v374_v21, 7  ;;  %3070 = vmatpush3.bf16.msra.mxu0 %v3342_v28 }
  0x21   : > { %v447_v57 = vor.u32 %v446_v56, %v442_v55  ;;  %v458_v24 = vshll.u32 %v3590_v22, 16  ;;  %v405_v25 = vsel %vm3470_vm3, 0, %v372_v20  ;;  %v377_v27 = vshll.u32 %v321_v16, 16  ;;  %3317 = vmatprep.subr.msk.bf16.mxu0 %vm840_vm6, %v3343_v33 }
  0x22   : > { %v454_v0 = vor.u32 %v453_v61, %v449_v60  ;;  %v456_v29 = vshrl.u32 %v3590_v22, 16  ;;  %v3610_v31 = vsel %vm3474_vm5, %v405_v25, 0  ;;  %v842_v39 = vsel %vm840_vm6, %v3343_v33, 0 }
  0x23   : > { %512 = vrot.lane.b32.xlu0 %v3537_v44, %s3405_s11  ;;  %510 = vrot.lane.b32.xlu1 %v501_v45, %s3405_s11  ;;  %v460_v30 = vrot.slane %v458_v24, 1  ;;  %v379_v32 = vor.u32 %v377_v27, %v376_v26  ;;  %v465_v35 = vshll.u32 %v3610_v31, 16  ;;  %v463_v40 = vshrl.u32 %v3610_v31, 16 }
  0x24   : > { %3072 = vmatpush3.bf16.msra.mxu0 %v842_v39  ;;  %v505_v48 = vrot.slane %v3590_v22, 1  ;;  %v322_v52 = vpack.c.bf16 %v314_v47, %v314_v47  ;;  %v506_v53 = vrot.slane %v3610_v31, 1 }
  0x25   : > { %v461_v34 = vor.u32 %v460_v30, %v456_v29  ;;  %v406_v36 = vsel %vm3470_vm3, 0, %v379_v32  ;;  %v467_v43 = vrot.slane %v465_v35, 1 }
  0x26   : > { %v384_v56 = vshll.u32 %v322_v52, 16 }
  0x27   : > { %514 = vrot.lane.b32.xlu1 %v3547_v49, %s3405_s11  ;;  %478 = vrot.lane.b32.xlu0 %v433_v50, %s3406_s12 }
  0x2b   : > { %480 = vrot.lane.b32.xlu1 %v440_v54, %s3406_s12  ;;  %548 = vrot.lane.b32.xlu0 %v433_v50, %s3408_s14 }
  0x2f   : > { %482 = vrot.lane.b32.xlu1 %v447_v57, %s3406_s12  ;;  %552 = vrot.lane.b32.xlu0 %v447_v57, %s3408_s14 }
  0x33   : > { %550 = vrot.lane.b32.xlu1 %v440_v54, %s3408_s14  ;;  %565 = vrot.lane.b32.xlu0 %v501_v45, %s3409_s15  ;;  %v468_v45 = vor.u32 %v467_v43, %v463_v40 }
  0x37   : > { %554 = vrot.lane.b32.xlu1 %v454_v0, %s3408_s14  ;;  %569 = vrot.lane.b32.xlu0 %v3547_v49, %s3409_s15 }
  0x3b   : > { %567 = vrot.lane.b32.xlu1 %v3537_v44, %s3409_s15  ;;  %581 = vrot.lane.b32.xlu0 %v3513_v37, %s3410_s18 }
  0x3f   : > { %571 = vrot.lane.b32.xlu1 %v504_v12, %s3409_s15  ;;  %585 = vrot.lane.b32.xlu0 %v3529_v41, %s3410_s18 }
  0x43   : > { %583 = vrot.lane.b32.xlu1 %v3533_v42, %s3410_s18  ;;  %597 = vrot.lane.b32.xlu0 %v440_v54, %s3411_s23  ;;  %v381_v54 = vshrl.u32 %v322_v52, 16 }
  0x45   : > { %v383_v55 = vrot.slane %v381_v54, 7 }
  0x47   : > { %587 = vrot.lane.b32.xlu1 %v3590_v22, %s3410_s18  ;;  %601 = vrot.lane.b32.xlu0 %v454_v0, %s3411_s23  ;;  %v386_v58 = vor.u32 %v384_v56, %v383_v55 }
  0x49   : > { %v407_v59 = vsel %vm3470_vm3, 0, %v386_v58 }
  0x4a   : > { %v419_v60 = vsel %vm3474_vm5, %v407_v59, 0 }
  0x4b   : > { %599 = vrot.lane.b32.xlu1 %v447_v57, %s3411_s23  ;;  %613 = vrot.lane.b32.xlu0 %v3537_v44, %s3412_s30  ;;  %v3626_v44 = vsel %vm3474_vm5, %v406_v36, 0  ;;  %v544_v61 = vshll.u32 %v419_v60, 16  ;;  %v542_v62 = vshrl.u32 %v419_v60, 16  ;;  %v564_v1 = vrot.slane %v419_v60, 1 }
  0x4c   : > { %v472_v46 = vshll.u32 %v3626_v44, 16  ;;  %v470_v50 = vshrl.u32 %v3626_v44, 16  ;;  %v507_v57 = vrot.slane %v3626_v44, 1 }
  0x4d   : > { %v546_v63 = vrot.slane %v544_v61, 1 }
  0x4e   : > { %v474_v51 = vrot.slane %v472_v46, 1 }
  0x4f   : > { %603 = vrot.lane.b32.xlu1 %v461_v34, %s3411_s23  ;;  %484 = vrot.lane.b32.xlu0 %v454_v0, %s3406_s12  ;;  %v547_v0 = vor.u32 %v546_v63, %v542_v62 }
  0x53   : > { %615 = vrot.lane.b32.xlu1 %v3547_v49, %s3412_s30  ;;  %617 = vrot.lane.b32.xlu0 %v504_v12, %s3412_s30  ;;  %v475_v49 = vor.u32 %v474_v51, %v470_v50 }
  0x57   : > { %486 = vrot.lane.b32.xlu1 %v461_v34, %s3406_s12  ;;  %488 = vrot.lane.b32.xlu0 %v468_v45, %s3406_s12 }
  0x5b   : > { %619 = vrot.lane.b32.xlu1 %v505_v48, %s3412_s30  ;;  %516 = vrot.lane.b32.xlu0 %v504_v12, %s3405_s11 }
  0x5f   : > { %490 = vrot.lane.b32.xlu1 %v475_v49, %s3406_s12  ;;  %520 = vrot.lane.b32.xlu0 %v506_v53, %s3405_s11 }
  0x63   : > { %518 = vrot.lane.b32.xlu1 %v505_v48, %s3405_s11  ;;  %533 = vrot.lane.b32.xlu0 %v3590_v22, %s3407_s13 }
  0x67   : > { %522 = vrot.lane.b32.xlu1 %v507_v57, %s3405_s11  ;;  %537 = vrot.lane.b32.xlu0 %v3626_v44, %s3407_s13  ;;  %s4342_s11 = scalar_lea.vmem %s4395_s8, %s2947_s26 }
  0x6b   : > { %535 = vrot.lane.b32.xlu1 %v3610_v31, %s3407_s13  ;;  %556 = vrot.lane.b32.xlu0 %v461_v34, %s3408_s14 }
  0x6f   : > { %539 = vrot.lane.b32.xlu1 %v419_v60, %s3407_s13  ;;  %560 = vrot.lane.b32.xlu0 %v475_v49, %s3408_s14 }
  0x73   : > { %558 = vrot.lane.b32.xlu1 %v468_v45, %s3408_s14  ;;  %573 = vrot.lane.b32.xlu0 %v505_v48, %s3409_s15 }
  0x77   : > { %562 = vrot.lane.b32.xlu1 %v547_v0, %s3408_s14  ;;  %577 = vrot.lane.b32.xlu0 %v507_v57, %s3409_s15 }
  0x7b   : > { %575 = vrot.lane.b32.xlu1 %v506_v53, %s3409_s15  ;;  %589 = vrot.lane.b32.xlu0 %v3610_v31, %s3410_s18 }
  0x7e   : > { %v509_v4 = vpop.permute.xlu0 %508 }
  0x7f   : > { %579 = vrot.lane.b32.xlu1 %v564_v1, %s3409_s15  ;;  %593 = vrot.lane.b32.xlu0 %v419_v60, %s3410_s18 }
  0x82   : > { %v477_v7 = vpop.permute.xlu0 %476 }
  0x83   : > { %591 = vrot.lane.b32.xlu1 %v3626_v44, %s3410_s18  ;;  %605 = vrot.lane.b32.xlu0 %v468_v45, %s3411_s23  ;;  %v631_v35 = vsel %vm629_vm7, %v3484_v5, %v477_v7 }
  0x84   : > { %v648_v43 = vsel %vm646_vm8, %v631_v35, %v509_v4 }
  0x87   : > { %595 = vrot.lane.b32.xlu1 %v3484_v5, %s3410_s18  ;;  %609 = vrot.lane.b32.xlu0 %v547_v0, %s3411_s23 }
  0x8b   : > { %607 = vrot.lane.b32.xlu1 %v475_v49, %s3411_s23  ;;  %621 = vrot.lane.b32.xlu0 %v506_v53, %s3412_s30 }
  0x8d   : > { %v528_v8 = vpop.permute.xlu1 %527  ;;  %v526_v9 = vpop.permute.xlu0 %525 }
  0x8e   : > { %v665_v46 = vsel %vm663_vm9, %v648_v43, %v526_v9 }
  0x8f   : > { %611 = vrot.lane.b32.xlu1 %v3503_v17, %s3411_s23  ;;  %625 = vrot.lane.b32.xlu0 %v564_v1, %s3412_s30 }
  0x91   : > { %v3678_v10 = vpop.permute.xlu1 %531  ;;  %v530_v11 = vpop.permute.xlu0 %529 }
  0x93   : > { %623 = vrot.lane.b32.xlu1 %v507_v57, %s3412_s30  ;;  %2191 = vrot.lane.b32.xlu0 %v3503_v17, %s3408_s14 }
  0x95   : > { %v513_v12 = vpop.permute.xlu0 %512  ;;  %v511_v13 = vpop.permute.xlu1 %510 }
  0x97   : > { %627 = vrot.lane.b32.xlu1 %v3487_v6, %s3412_s30  ;;  %2290 = vrot.lane.b32.xlu0 %v3484_v5, %s3412_s30 }
  0x99   : > { %v515_v14 = vpop.permute.xlu1 %514  ;;  %v479_v15 = vpop.permute.xlu0 %478 }
  0x9a   : > { %v633_v36 = vsel %vm629_vm7, %v3517_v38, %v479_v15 }
  0x9b   : > { %v650_v45 = vsel %vm646_vm8, %v633_v36, %v511_v13 }
  0x9c   : > { %v667_v48 = vsel %vm663_vm9, %v650_v45, %v528_v8 }
  0x9d   : > { %v481_v16 = vpop.permute.xlu1 %480  ;;  %v549_v18 = vpop.permute.xlu0 %548 }
  0x9e   : > { %v635_v47 = vsel %vm629_vm7, %v3513_v37, %v481_v16  ;;  %v682_v38 = vsel %vm680_vm10, %v665_v46, %v549_v18 }
  0x9f   : > { %v652_v37 = vsel %vm646_vm8, %v635_v47, %v513_v12 }
  0xa0   : > { %v669_v63 = vsel %vm663_vm9, %v652_v37, %v530_v11 }
  0xa1   : > { %v483_v19 = vpop.permute.xlu1 %482  ;;  %v553_v20 = vpop.permute.xlu0 %552 }
  0xa2   : > { %v637_v49 = vsel %vm629_vm7, %v3533_v42, %v483_v19  ;;  %v686_v8 = vsel %vm680_vm10, %v669_v63, %v553_v20 }
  0xa3   : > { %v654_v61 = vsel %vm646_vm8, %v637_v49, %v515_v14 }
  0xa4   : > { %v671_v1 = vsel %vm663_vm9, %v654_v61, %v3678_v10 }
  0xa5   : > { %v551_v21 = vpop.permute.xlu1 %550  ;;  %v566_v23 = vpop.permute.xlu0 %565 }
  0xa6   : > { %v684_v52 = vsel %vm680_vm10, %v667_v48, %v551_v21  ;;  %v699_v53 = vsel %vm697_vm11, %v682_v38, %v566_v23 }
  0xa9   : > { %v555_v24 = vpop.permute.xlu1 %554  ;;  %v570_v25 = vpop.permute.xlu0 %569 }
  0xaa   : > { %v688_v9 = vsel %vm680_vm10, %v671_v1, %v555_v24  ;;  %v703_v12 = vsel %vm697_vm11, %v686_v8, %v570_v25 }
  0xad   : > { %v568_v26 = vpop.permute.xlu1 %567  ;;  %v582_v27 = vpop.permute.xlu0 %581 }
  0xae   : > { %v701_v54 = vsel %vm697_vm11, %v684_v52, %v568_v26  ;;  %v716_v55 = vsel %vm714_vm12, %v699_v53, %v582_v27 }
  0xb1   : > { %v572_v28 = vpop.permute.xlu1 %571  ;;  %v586_v29 = vpop.permute.xlu0 %585 }
  0xb2   : > { %v705_v13 = vsel %vm697_vm11, %v688_v9, %v572_v28  ;;  %v720_v14 = vsel %vm714_vm12, %v703_v12, %v586_v29 }
  0xb5   : > { %v584_v30 = vpop.permute.xlu1 %583  ;;  %v598_v32 = vpop.permute.xlu0 %597 }
  0xb6   : > { %v718_v56 = vsel %vm714_vm12, %v701_v54, %v584_v30  ;;  %v733_v57 = vsel %vm731_vm13, %v716_v55, %v598_v32 }
  0xb9   : > { %v588_v33 = vpop.permute.xlu1 %587  ;;  %v602_v34 = vpop.permute.xlu0 %601 }
  0xba   : > { %v722_v11 = vsel %vm714_vm12, %v705_v13, %v588_v33  ;;  %v737_v15 = vsel %vm731_vm13, %v720_v14, %v602_v34 }
  0xbd   : > { %v600_v39 = vpop.permute.xlu1 %599  ;;  %v614_v40 = vpop.permute.xlu0 %613 }
  0xbe   : > { %v735_v58 = vsel %vm731_vm13, %v718_v56, %v600_v39  ;;  %v750_v42 = vsel %vm748_vm14, %v733_v57, %v614_v40 }
  0xc1   : > { %v604_v50 = vpop.permute.xlu1 %603  ;;  %v3697_v51 = vpop.permute.xlu0 %484 }
  0xc2   : > { %v739_v10 = vsel %vm731_vm13, %v722_v11, %v604_v50  ;;  %v639_v49 = vsel %vm629_vm7, %v3529_v41, %v3697_v51 }
  0xc5   : > { %v616_v59 = vpop.permute.xlu1 %615  ;;  %v618_v60 = vpop.permute.xlu0 %617 }
  0xc6   : > { %v752_v62 = vsel %vm748_vm14, %v735_v58, %v616_v59  ;;  %v754_v19 = vsel %vm748_vm14, %v737_v15, %v618_v60 }
  0xc7   : > { %v2878_v0 = vcombine.low %v750_v42, %v752_v62 }
  0xc9   : > { %v487_v4 = vpop.permute.xlu1 %486  ;;  %3073 = vmatprep.mubr.msk.bf16.mxu0 %vm827_vm15, %v2878_v0  ;;  %v489_v7 = vpop.permute.xlu0 %488 }
  0xca   : > { %v641_v53 = vsel %vm629_vm7, %v3590_v22, %v487_v4  ;;  %v643_v55 = vsel %vm629_vm7, %v3610_v31, %v489_v7 }
  0xcd   : > { %v620_v16 = vpop.permute.xlu1 %619  ;;  %v517_v18 = vpop.permute.xlu0 %516 }
  0xce   : > { %v756_v20 = vsel %vm748_vm14, %v739_v10, %v620_v16  ;;  %v656_v54 = vsel %vm646_vm8, %v639_v49, %v517_v18 }
  0xcf   : > { %v2879_v21 = vcombine.low %v754_v19, %v756_v20 }
  0xd1   : > { %v491_v23 = vpop.permute.xlu1 %490  ;;  %3074 = vmatmul.mubr.msk.bf16.vlgmr.msra.gmra.mrb[0].mxu0 %vm827_vm15, %v2879_v21  ;;  %v521_v24 = vpop.permute.xlu0 %520 }
  0xd2   : > { %v645_v22 = vsel %vm629_vm7, %v3626_v44, %v491_v23  ;;  %v660_v42 = vsel %vm646_vm8, %v643_v55, %v521_v24 }
  0xd5   : > { %v519_v25 = vpop.permute.xlu1 %518  ;;  %v534_v26 = vpop.permute.xlu0 %533 }
  0xd6   : > { %v658_v37 = vsel %vm646_vm8, %v641_v53, %v519_v25  ;;  %v673_v56 = vsel %vm663_vm9, %v656_v54, %v534_v26  ;;  %v911_v26 = vld [vmem:[%s4392_s5] sm:$0xff] }
  0xd9   : > { %v523_v27 = vpop.permute.xlu1 %522  ;;  %v538_v28 = vpop.permute.xlu0 %537 }
  0xda   : > { %v662_v31 = vsel %vm646_vm8, %v645_v22, %v523_v27  ;;  %v677_v0 = vsel %vm663_vm9, %v660_v42, %v538_v28  ;;  %v912_v27 = vld [vmem:[%s4392_s5 + $0x8] sm:$0xff]  ;;  %v942_v28 = vand.u32 4294901760, %v911_v26 }
  0xdd   : > { %v536_v29 = vpop.permute.xlu1 %535  ;;  %v557_v30 = vpop.permute.xlu0 %556 }
  0xde   : > { %v675_v57 = vsel %vm663_vm9, %v658_v37, %v536_v29  ;;  %v690_v60 = vsel %vm680_vm10, %v673_v56, %v557_v30  ;;  %v945_v29 = vand.u32 4294901760, %v912_v27  ;;  %v1022_v30 = vsub.f32 %v911_v26, %v942_v28 }
  0xe1   : > { %v540_v32 = vpop.permute.xlu1 %539  ;;  %v561_v33 = vpop.permute.xlu0 %560 }
  0xe2   : > { %v679_v1 = vsel %vm663_vm9, %v662_v31, %v540_v32  ;;  %v694_v8 = vsel %vm680_vm10, %v677_v0, %v561_v33  ;;  %v1029_v32 = vsub.f32 %v912_v27, %v945_v29  ;;  %v913_v33 = vld [vmem:[%s4392_s5 + $0x10] sm:$0xff]  ;;  %v2877_v0 = vld [vmem:[%s4389_s2] ss:$0 sm:$0xff] }
  0xe5   : > { %v559_v34 = vpop.permute.xlu1 %558  ;;  %v574_v35 = vpop.permute.xlu0 %573 }
  0xe6   : > { %v692_v41 = vsel %vm680_vm10, %v675_v57, %v559_v34  ;;  %v707_v51 = vsel %vm697_vm11, %v690_v60, %v574_v35  ;;  %v914_v34 = vld [vmem:[%s4392_s5 + $0x18] sm:$0xff]  ;;  %v1023_v35 = vand.u32 4294901760, %v1022_v30  ;;  %v3415_v57 = vmov 0.0  }
  0xe7   : > { %3100 = vmatprep.mubr.msk.f32.mxu1 %vm3414_vm0, %v3415_v57 }
  0xe9   : > { %v563_v36 = vpop.permute.xlu1 %562  ;;  %v578_v39 = vpop.permute.xlu0 %577 }
  0xea   : > { %v696_v9 = vsel %vm680_vm10, %v679_v1, %v563_v36  ;;  %v711_v14 = vsel %vm697_vm11, %v694_v8, %v578_v39  ;;  %v1030_v36 = vand.u32 4294901760, %v1029_v32  ;;  %v948_v39 = vand.u32 4294901760, %v913_v33 }
  0xed   : > { %v576_v40 = vpop.permute.xlu1 %575  ;;  %v590_v43 = vpop.permute.xlu0 %589 }
  0xee   : > { %v709_v61 = vsel %vm697_vm11, %v692_v41, %v576_v40  ;;  %v724_v62 = vsel %vm714_vm12, %v707_v51, %v590_v43  ;;  %v951_v40 = vand.u32 4294901760, %v914_v34  ;;  %v1024_v43 = vsub.f32 %v1022_v30, %v1023_v35 }
  0xef   : > { %v3804_v41 = vpack.c.bf16 %v1029_v32, %v1022_v30  ;;  %v3808_v51 = vpack.c.bf16 %v1030_v36, %v1023_v35 }
  0xf0   : > { %v3788_v37 = vpack.c.bf16 %v951_v40, %v948_v39 }
  0xf1   : > { %v580_v45 = vpop.permute.xlu1 %579  ;;  %v594_v46 = vpop.permute.xlu0 %593 }
  0xf2   : > { %v713_v11 = vsel %vm697_vm11, %v696_v9, %v580_v45  ;;  %v728_v16 = vsel %vm714_vm12, %v711_v14, %v594_v46  ;;  %v1031_v45 = vsub.f32 %v1029_v32, %v1030_v36  ;;  %v1036_v46 = vsub.f32 %v913_v33, %v948_v39 }
  0xf4   : > { %v1037_v49 = vand.u32 4294901760, %v1036_v46 }
  0xf5   : > { %v592_v47 = vpop.permute.xlu1 %591  ;;  %v606_v48 = vpop.permute.xlu0 %605 }
  0xf6   : > { %v726_v63 = vsel %vm714_vm12, %v709_v61, %v592_v47  ;;  %v741_v4 = vsel %vm731_vm13, %v724_v62, %v606_v48  ;;  %v1043_v47 = vsub.f32 %v914_v34, %v951_v40  ;;  %v3782_v48 = vpack.c.bf16 %v945_v29, %v942_v28 }
  0xf7   : > { %v1038_v55 = vsub.f32 %v1036_v46, %v1037_v49 }
  0xf8   : > { %v1044_v53 = vand.u32 4294901760, %v1043_v47  ;;  %v3806_v22 = vpack.c.bf16 %v1043_v47, %v1036_v46 }
  0xf9   : > { %v596_v50 = vpop.permute.xlu1 %595  ;;  %v610_v38 = vpop.permute.xlu0 %609 }
  0xfa   : > { %v730_v18 = vsel %vm714_vm12, %v713_v11, %v596_v50  ;;  %v745_v19 = vsel %vm731_vm13, %v728_v16, %v610_v38  ;;  %v1025_v50 = vand.u32 4294901760, %v1024_v43  ;;  %v1032_v38 = vand.u32 4294901760, %v1031_v45 }
  0xfb   : > { %v1045_v56 = vsub.f32 %v1043_v47, %v1044_v53  ;;  %v3810_v61 = vpack.c.bf16 %v1044_v53, %v1037_v49 }
  0xfc   : > { %v3786_v54 = vpack.c.bf16 %v1032_v38, %v1025_v50 }
  0xfd   : > { %v608_v52 = vpop.permute.xlu1 %607  ;;  %v622_v58 = vpop.permute.xlu0 %621 }
  0xfe   : > { %v743_v44 = vsel %vm731_vm13, %v726_v63, %v608_v52  ;;  %v758_v12 = vsel %vm748_vm14, %v741_v4, %v622_v58  ;;  %v3413_v52 = vmov 0.0|0.0   ;;  %v1039_v58 = vand.u32 4294901760, %v1038_v55 }
  0xff   : > { %3231 = vmatprep.subr.bf16.mxu1 %v3413_v52  ;;  %3225 = vmatprep.subr.bf16.mxu0 %v3413_v52 }
 0x100   : > { %3227 = vmatpush3.bf16.msra.mxu0 %v3782_v48  ;;  %3233 = vmatpush3.bf16.msra.mxu1 %v3786_v54 }
 0x101   : > { %v612_v59 = vpop.permute.xlu1 %611  ;;  %v626_v15 = vpop.permute.xlu0 %625  ;;  %3228 = vmatprep.subr.bf16.mxu0 %v3413_v52  ;;  %3234 = vmatprep.subr.bf16.mxu1 %v3413_v52 }
 0x102   : > { %v747_v20 = vsel %vm731_vm13, %v730_v18, %v612_v59  ;;  %v762_v23 = vsel %vm748_vm14, %v745_v19, %v626_v15  ;;  %v1046_v59 = vand.u32 4294901760, %v1045_v56 }
 0x104   : > { %3230 = vmatpush3.bf16.msra.mxu0 %v3788_v37  ;;  %v3799_v60 = vpack.c.bf16 %v1046_v59, %v1039_v58  ;;  %v1426_v59 = vlaneseq }
 0x105   : > { %v624_v7 = vpop.permute.xlu1 %623  ;;  %3261 = vmatprep.subr.bf16.mxu0 %v3413_v52 }
 0x106   : > { %v760_v13 = vsel %vm748_vm14, %v743_v44, %v624_v7  ;;  %3236 = vmatpush3.bf16.msra.mxu1 %v3799_v60 }
 0x107   : > { %v2880_v10 = vcombine.low %v758_v12, %v760_v13  ;;  %3237 = vmatprep.subr.bf16.mxu1 %v3413_v52 }
 0x109   : > { %v3763_v21 = vpop.permute.xlu1 %627  ;;  %3077 = vmatprep.mubr.msk.bf16.mxu0 %vm827_vm15, %v2880_v10 }
 0x10a   : > { %v764_v24 = vsel %vm748_vm14, %v747_v20, %v3763_v21 }
 0x10b   : > { %v2881_v25 = vcombine.low %v762_v23, %v764_v24 }
 0x10d   : > { %3078 = vmatmul.mubr.msk.bf16.gmra.mrb[4].mxu0 %vm827_vm15, %v2881_v25 }
 0x10e   : > { %3089 = vmatprep.mubr.msk.f32.mxu0 %vm3414_vm0, %v3415_v57 }
 0x1a4   : > { %v3075_v42 = vpop.f32.mrb[0].mxu0 }
 0x1a5   : > { %v878_v31 = vpop.f32.mrb[1].mxu0  ;;  %v3821_v7 = vadd.f32 %v3075_v42, %v2877_v0  ;;  %v3877_v42 = vshrl.u32 %v1426_v59, 7 }
 0x1a6   : > { %v3076_v62 = vpop.f32.mrb[2].mxu0  ;;  %v3817_v4 = vadd.f32 %v2877_v0, %v878_v31 }
 0x1a7   : > { %v881_v63 = vpop.f32.mrb[3].mxu0  ;;  %v918_v12 = vsel %vm680_vm10, %v3821_v7, 0.0  ;;  %v3827_v13 = vadd.f32 %v3076_v62, %v2877_v0  ;;  %v1428_v31 = vsub.s32 0, %v3877_v42 }
 0x1a8   : > { %v3815_v1 = vadd.f32 %v2877_v0, %v881_v63  ;;  %v915_v8 = vsel %vm680_vm10, %v3817_v4, 0.0 }
 0x1a9   : > { %v920_v10 = vsel %vm680_vm10, %v3827_v13, 0.0 }
 0x1aa   : > { %v916_v44 = vsel %vm680_vm10, %v3815_v1, 0.0 }
 0x1ab   : > { %v917_v9 = vadd.f32 %v916_v44, %v915_v8 }
 0x1ad   : > { %v919_v14 = vadd.f32 %v918_v12, %v917_v9 }
 0x1af   : > { %v921_v19 = vadd.f32 %v920_v10, %v919_v14 }
 0x1e0   : > { %v3079_v11 = vpop.f32.mrb[4].mxu0 }
 0x1e1   : > { %v894_v15 = vpop.f32.mrb[5].mxu0  ;;  %v3833_v23 = vadd.f32 %v3079_v11, %v2877_v0 }
 0x1e2   : > { %v3831_v16 = vadd.f32 %v2877_v0, %v894_v15  ;;  %v3080_v18 = vpop.f32.mrb[6].mxu0 }
 0x1e3   : > { %v897_v20 = vpop.f32.mrb[7].mxu0  ;;  %v3839_v27 = vadd.f32 %v3080_v18, %v2877_v0  ;;  %v926_v30 = vsel %vm680_vm10, %v3833_v23, 0.0 }
 0x1e4   : > { %v922_v24 = vsel %vm680_vm10, %v3831_v16, 0.0  ;;  %v3837_v25 = vadd.f32 %v2877_v0, %v897_v20 }
 0x1e5   : > { %v923_v26 = vadd.f32 %v922_v24, %v921_v19  ;;  %v928_v33 = vsel %vm680_vm10, %v3839_v27, 0.0 }
 0x1e6   : > { %v924_v28 = vsel %vm680_vm10, %v3837_v25, 0.0 }
 0x1e7   : > { %v925_v29 = vadd.f32 %v924_v28, %v923_v26 }
 0x1e9   : > { %v927_v32 = vadd.f32 %v926_v30, %v925_v29 }
 0x1eb   : > { %v929_v34 = vadd.f32 %v928_v33, %v927_v32 }
 0x1ed   : > { %v930_v35 = vrot.slane %v929_v34, 4 }
 0x1ef   : > { %v931_v36 = vadd.f32 %v930_v35, %v929_v34 }
 0x1f1   : > { %v932_v39 = vrot.slane %v931_v36, 2 }
 0x1f3   : > { %v933_v40 = vadd.f32 %v932_v39, %v931_v36 }
 0x1f5   : > { %v934_v43 = vrot.slane %v933_v40, 1 }
 0x1f7   : > { %v935_v45 = vadd.f32 %v934_v43, %v933_v40 }
 0x1f9   : > { %v937_v46 = vmul.f32 0.015625, %v935_v45 }
 0x1fb   : > { %v939_v47 = vsel %vm680_vm10, %v937_v46, 0 }
 0x1fc   : > { %v1010_v50 = vand.u32 4294901760, %v939_v47 }
 0x1fe   : > { %v1011_v38 = vsub.f32 %v939_v47, %v1010_v50  ;;  %3101 = vmatmul.mubr.f32.vlgmr.msra.gmra.mrb[0].mxu1 %v1010_v50 }
 0x1ff   : > { %3239 = vmatpush3.bf16.msra.mxu1 %v3804_v41  ;;  %3111 = vmatprep.mubr.msk.f32.mxu1 %vm3414_vm0, %v3415_v57 }
 0x200   : > { %v1012_v49 = vand.u32 4294901760, %v1011_v38  ;;  %3240 = vmatprep.subr.bf16.mxu1 %v3413_v52 }
 0x202   : > { %v1013_v53 = vsub.f32 %v1011_v38, %v1012_v49 }
 0x203   : > { %3242 = vmatpush3.bf16.msra.mxu1 %v3806_v22 }
 0x204   : > { %3243 = vmatprep.subr.bf16.mxu1 %v3413_v52  ;;  %v1014_v55 = vand.u32 4294901760, %v1013_v53 }
 0x206   : > { %3090 = vmatmul.mubr.f32.vlgmr.msra.gmra.mrb[8].mxu0 %v1014_v55  ;;  %3112 = vmatmul.mubr.f32.vlgmr.msra.gmra.mrb[0].mxu1 %v1011_v38 }
 0x207   : > { %3245 = vmatpush3.bf16.msra.mxu1 %v3782_v48  ;;  %3122 = vmatprep.mubr.msk.f32.mxu1 %vm3414_vm0, %v3415_v57 }
 0x208   : > { %3246 = vmatprep.subr.bf16.mxu1 %v3413_v52  ;;  %3263 = vmatpush3.bf16.msra.mxu0 %v3782_v48 }
 0x209   : > { %3264 = vmatprep.subr.bf16.mxu0 %v3413_v52  ;;  %3155 = vmatprep.mubr.msk.f32.mxu0 %vm3414_vm0, %v3415_v57 }
 0x20b   : > { %3248 = vmatpush3.bf16.msra.mxu1 %v3788_v37 }
 0x20c   : > { %3249 = vmatprep.subr.bf16.mxu1 %v3413_v52  ;;  %3266 = vmatpush3.bf16.msra.mxu0 %v3788_v37 }
 0x20d   : > { %3267 = vmatprep.subr.bf16.mxu0 %v3413_v52 }
 0x20e   : > { %3123 = vmatmul.mubr.f32.vlgmr.msra.gmra.mrb[0].mxu1 %v1012_v49 }
 0x20f   : > { %3251 = vmatpush3.bf16.msra.mxu1 %v3808_v51  ;;  %3133 = vmatprep.mubr.msk.f32.mxu1 %vm3414_vm0, %v3415_v57 }
 0x210   : > { %3252 = vmatprep.subr.bf16.mxu1 %v3413_v52 }
 0x213   : > { %3254 = vmatpush3.bf16.msra.mxu1 %v3810_v61 }
 0x214   : > { %3255 = vmatprep.subr.bf16.mxu1 %v3413_v52 }
 0x216   : > { %3134 = vmatmul.mubr.f32.vlgmr.msra.gmra.mrb[0].mxu1 %v1010_v50 }
 0x217   : > { %3257 = vmatpush3.bf16.msra.mxu1 %v3782_v48  ;;  %3144 = vmatprep.mubr.msk.f32.mxu1 %vm3414_vm0, %v3415_v57 }
 0x218   : > { %3258 = vmatprep.subr.bf16.mxu1 %v3413_v52 }
 0x21b   : > { %3260 = vmatpush3.bf16.msra.mxu1 %v3788_v37 }
 0x21c   : > { %3017 = vmatprep.subr.bf16.mxu1 %v3346_v2 }
 0x21e   : > { %3145 = vmatmul.mubr.f32.vlgmr.msra.gmra.mrb[0].mxu1 %v1010_v50 }
 0x21f   : > { %3018 = vmatpush3.bf16.msra.mxu1 %v3347_v3 }
 0x2d9   : > { %v1016_v56 = vpop.f32.mrb[8].mxu0 }
 0x2da   : > { %v3091_v58 = vpop.f32.mrb[9].mxu0 }
 0x2f1   : > { %v1422_v62 = vpop.f32.mrb[0].mxu1 }
 0x2f2   : > { %v3297_v63 = vadd.f32 %v1422_v62, %v1016_v56  ;;  %v3146_v0 = vpop.f32.mrb[1].mxu1 }
 0x2f4   : > { %v1429_v44 = vrot.slane %v3297_v63, %v1428_v31 }
 0x2f6   : > { %v3883_v8 = vsub.f32 %v3817_v4, %v1429_v44  ;;  %v3886_v9 = vsub.f32 %v3815_v1, %v1429_v44  ;;  %v3889_v12 = vsub.f32 %v3821_v7, %v1429_v44  ;;  %v3892_v14 = vsub.f32 %v3827_v13, %v1429_v44 }
 0x2f7   : > { %v3899_v10 = vsub.f32 %v3831_v16, %v1429_v44  ;;  %v3904_v1 = vsub.f32 %v3837_v25, %v1429_v44  ;;  %v3911_v20 = vsub.f32 %v3833_v23, %v1429_v44  ;;  %v3917_v25 = vsub.f32 %v3839_v27, %v1429_v44 }
 0x2f8   : > { %v1438_v11 = vmul.f32 %v3883_v8, %v3883_v8  ;;  %v1439_v15 = vmul.f32 %v3886_v9, %v3886_v9  ;;  %v1440_v4 = vmul.f32 %v3889_v12, %v3889_v12  ;;  %v1441_v7 = vmul.f32 %v3892_v14, %v3892_v14 }
 0x2f9   : > { %v1442_v16 = vmul.f32 %v3899_v10, %v3899_v10  ;;  %v1443_v28 = vmul.f32 %v3904_v1, %v3904_v1  ;;  %v1444_v32 = vmul.f32 %v3911_v20, %v3911_v20  ;;  %v1445_v34 = vmul.f32 %v3917_v25, %v3917_v25 }
 0x2fa   : > { %v1446_v13 = vsel %vm680_vm10, %v1438_v11, 0.0  ;;  %v1447_v18 = vsel %vm680_vm10, %v1439_v15, 0.0  ;;  %v1449_v24 = vsel %vm680_vm10, %v1440_v4, 0.0  ;;  %v1451_v29 = vsel %vm680_vm10, %v1441_v7, 0.0  ;;  %v2892_v11 = vld [vmem:[%s4391_s4] ss:$0 sm:$0xff] }
 0x2fb   : > { %v1448_v19 = vadd.f32 %v1447_v18, %v1446_v13  ;;  %v1453_v23 = vsel %vm680_vm10, %v1442_v16, 0.0  ;;  %v1455_v35 = vsel %vm680_vm10, %v1443_v28, 0.0  ;;  %v1457_v27 = vsel %vm680_vm10, %v1444_v32, 0.0 }
 0x2fc   : > { %v1459_v40 = vsel %vm680_vm10, %v1445_v34, 0.0 }
 0x2fd   : > { %v1450_v26 = vadd.f32 %v1449_v24, %v1448_v19 }
 0x2ff   : > { %v1452_v30 = vadd.f32 %v1451_v29, %v1450_v26 }
 0x301   : > { %v1454_v33 = vadd.f32 %v1453_v23, %v1452_v30 }
 0x303   : > { %v1456_v36 = vadd.f32 %v1455_v35, %v1454_v33 }
 0x305   : > { %v1458_v39 = vadd.f32 %v1457_v27, %v1456_v36 }
 0x307   : > { %v1460_v43 = vadd.f32 %v1459_v40, %v1458_v39 }
 0x309   : > { %v1461_v45 = vrot.slane %v1460_v43, 4 }
 0x30b   : > { %v1462_v46 = vadd.f32 %v1461_v45, %v1460_v43 }
 0x30d   : > { %v1463_v47 = vrot.slane %v1462_v46, 2 }
 0x30f   : > { %v1464_v50 = vadd.f32 %v1463_v47, %v1462_v46 }
 0x311   : > { %v1465_v38 = vrot.slane %v1464_v50, 1 }
 0x313   : > { %v1466_v49 = vadd.f32 %v1465_v38, %v1464_v50 }
 0x315   : > { %v1467_v53 = vmul.f32 0.015625, %v1466_v49 }
 0x317   : > { %v1469_v55 = vsel %vm680_vm10, %v1467_v53, 0 }
 0x318   : > { %v1540_v56 = vand.u32 4294901760, %v1469_v55 }
 0x31a   : > { %v1541_v58 = vsub.f32 %v1469_v55, %v1540_v56 }
 0x31c   : > { %v1542_v59 = vand.u32 4294901760, %v1541_v58 }
 0x31e   : > { %v1543_v62 = vsub.f32 %v1541_v58, %v1542_v59 }
 0x320   : > { %v1544_v63 = vand.u32 4294901760, %v1543_v62 }
 0x322   : > { %3156 = vmatmul.mubr.f32.vlgmr.msra.gmra.mrb[10].mxu0 %v1544_v63 }
 0x323   : > { %3269 = vmatpush3.bf16.msra.mxu0 %v3786_v54  ;;  %3166 = vmatprep.mubr.msk.f32.mxu0 %vm3414_vm0, %v3415_v57  ;;  %v3344_v54 = vld [vmem:[%s4393_s6 + $0x80] sm:$0xff]  }
 0x324   : > { %3270 = vmatprep.subr.bf16.mxu0 %v3413_v52 }
 0x327   : > { %3272 = vmatpush3.bf16.msra.mxu0 %v3799_v60  ;;  %v3345_v60 = vld [vmem:[%s4393_s6 + $0x88] sm:$0xff]  }
 0x328   : > { %3273 = vmatprep.subr.bf16.mxu0 %v3413_v52 }
 0x32a   : > { %3167 = vmatmul.mubr.f32.vlgmr.msra.gmra.mrb[10].mxu0 %v1540_v56 }
 0x32b   : > { %3275 = vmatpush3.bf16.msra.mxu0 %v3804_v41  ;;  %3177 = vmatprep.mubr.msk.f32.mxu0 %vm3414_vm0, %v3415_v57 }
 0x32c   : > { %3276 = vmatprep.subr.bf16.mxu0 %v3413_v52 }
 0x32f   : > { %3278 = vmatpush3.bf16.msra.mxu0 %v3806_v22  ;;  %v2891_v22 = vld [vmem:[%s4390_s3] ss:$0 sm:$0xff] }
 0x330   : > { %3279 = vmatprep.subr.bf16.mxu0 %v3413_v52 }
 0x332   : > { %3178 = vmatmul.mubr.f32.vlgmr.msra.gmra.mrb[10].mxu0 %v1541_v58 }
 0x333   : > { %3281 = vmatpush3.bf16.msra.mxu0 %v3782_v48  ;;  %3188 = vmatprep.mubr.msk.f32.mxu0 %vm3414_vm0, %v3415_v57 }
 0x334   : > { %3282 = vmatprep.subr.bf16.mxu0 %v3413_v52 }
 0x337   : > { %3284 = vmatpush3.bf16.msra.mxu0 %v3788_v37 }
 0x338   : > { %3285 = vmatprep.subr.bf16.mxu0 %v3413_v52 }
 0x33a   : > { %3189 = vmatmul.mubr.f32.vlgmr.msra.gmra.mrb[10].mxu0 %v1542_v59 }
 0x33b   : > { %3287 = vmatpush3.bf16.msra.mxu0 %v3808_v51  ;;  %3199 = vmatprep.mubr.msk.f32.mxu0 %vm3414_vm0, %v3415_v57 }
 0x33c   : > { %3288 = vmatprep.subr.bf16.mxu0 %v3413_v52 }
 0x33f   : > { %3290 = vmatpush3.bf16.msra.mxu0 %v3810_v61 }
 0x340   : > { %3291 = vmatprep.subr.bf16.mxu0 %v3413_v52 }
 0x342   : > { %3200 = vmatmul.mubr.f32.vlgmr.msra.gmra.mrb[10].mxu0 %v1540_v56 }
 0x343   : > { %3293 = vmatpush3.bf16.msra.mxu0 %v3782_v48  ;;  %3210 = vmatprep.mubr.msk.f32.mxu0 %vm3414_vm0, %v3415_v57 }
 0x344   : > { %3294 = vmatprep.subr.bf16.mxu0 %v3413_v52 }
 0x347   : > { %3296 = vmatpush3.bf16.msra.mxu0 %v3788_v37 }
 0x348   : > { %3213 = vmatprep.subr.bf16.mxu0 %v3344_v54 }
 0x34a   : > { %3211 = vmatmul.mubr.f32.vlgmr.msra.gmra.mrb[10].mxu0 %v1540_v56 }
 0x34b   : > { %3214 = vmatpush3.bf16.msra.mxu0 %v3344_v54 }
 0x34c   : > { %3215 = vmatprep.subr.bf16.mxu0 %v3345_v60 }
 0x34f   : > { %3216 = vmatpush3.bf16.msra.mxu0 %v3345_v60 }
 0x41d   : > { %v1952_v48 = vpop.f32.mrb[10].mxu0 }
 0x41e   : > { %v3298_v41 = vadd.f32 1e-05, %v1952_v48  ;;  %v3212_v57 = vpop.f32.mrb[11].mxu0 }
 0x420   : > { %3362 = vrsqrt.f32 %v3298_v41 }
 0x42a   : > { %v3363_v52 = vpop.eup %3362 }
 0x42b   : > { %v1960_v37 = vrot.slane %v3363_v52, %v1428_v31 }
 0x42d   : > { %v1963_v51 = vmul.f32 %v1960_v37, %v3889_v12  ;;  %v1962_v61 = vmul.f32 %v1960_v37, %v3886_v9  ;;  %v1961_v0 = vmul.f32 %v1960_v37, %v3883_v8  ;;  %v1964_v44 = vmul.f32 %v1960_v37, %v3892_v14 }
 0x42e   : > { %v1965_v15 = vmul.f32 %v1960_v37, %v3899_v10  ;;  %v1966_v42 = vmul.f32 %v1960_v37, %v3904_v1  ;;  %v1967_v31 = vmul.f32 %v1960_v37, %v3911_v20  ;;  %v1968_v4 = vmul.f32 %v1960_v37, %v3917_v25 }
 0x42f   : > { %v1977_v7 = vmul.f32 %v2891_v22, %v1963_v51  ;;  %v1976_v12 = vmul.f32 %v2891_v22, %v1962_v61  ;;  %v1975_v13 = vmul.f32 %v2891_v22, %v1961_v0  ;;  %v1978_v9 = vmul.f32 %v2891_v22, %v1964_v44 }
 0x430   : > { %v1979_v18 = vmul.f32 %v2891_v22, %v1965_v15  ;;  %v1980_v8 = vmul.f32 %v2891_v22, %v1966_v42  ;;  %v1981_v19 = vmul.f32 %v2891_v22, %v1967_v31  ;;  %v1982_v14 = vmul.f32 %v2891_v22, %v1968_v4 }
 0x431   : > { %v1991_v16 = vadd.f32 %v2892_v11, %v1977_v7  ;;  %v1990_v24 = vadd.f32 %v2892_v11, %v1976_v12  ;;  %v1989_v26 = vadd.f32 %v2892_v11, %v1975_v13  ;;  %v1992_v28 = vadd.f32 %v2892_v11, %v1978_v9 }
 0x432   : > { %v1993_v29 = vadd.f32 %v2892_v11, %v1979_v18  ;;  %v3982_v10 = vadd.f32 %v2892_v11, %v1980_v8  ;;  %v3984_v32 = vadd.f32 %v2892_v11, %v1981_v19  ;;  %v3986_v23 = vadd.f32 %v2892_v11, %v1982_v14 }
 0x433   : > { %v2895_v1 = vmul.f32 -1.442695, %v1991_v16  ;;  %v2894_v30 = vmul.f32 -1.442695, %v1990_v24  ;;  %v2893_v20 = vmul.f32 -1.442695, %v1989_v26 }
 0x434   : > { %v2896_v25 = vmul.f32 -1.442695, %v1992_v28  ;;  %v2897_v33 = vmul.f32 -1.442695, %v1993_v29  ;;  %v2898_v34 = vmul.f32 -1.442695, %v3982_v10 }
 0x435   : > { %3364 = vpow2.f32 %v2895_v1  ;;  %v2899_v35 = vmul.f32 -1.442695, %v3984_v32  ;;  %v2900_v36 = vmul.f32 -1.442695, %v3986_v23 }
 0x436   : > { %3366 = vpow2.f32 %v2894_v30 }
 0x437   : > { %3368 = vpow2.f32 %v2893_v20 }
 0x438   : > { %3370 = vpow2.f32 %v2896_v25 }
 0x439   : > { %3372 = vpow2.f32 %v2897_v33 }
 0x43a   : > { %3374 = vpow2.f32 %v2898_v34 }
 0x43b   : > { %3376 = vpow2.f32 %v2899_v35 }
 0x43c   : > { %3378 = vpow2.f32 %v2900_v36 }
 0x43f   : > { %v3365_v27 = vpop.eup %3364 }
 0x440   : > { %v3367_v39 = vpop.eup %3366  ;;  %v2023_v40 = vadd.f32 1.0, %v3365_v27 }
 0x441   : > { %v3369_v43 = vpop.eup %3368  ;;  %v2022_v45 = vadd.f32 1.0, %v3367_v39 }
 0x442   : > { %v3371_v46 = vpop.eup %3370  ;;  %3380 = vrcp.f32 %v2023_v40  ;;  %v2021_v47 = vadd.f32 1.0, %v3369_v43 }
 0x443   : > { %v3373_v50 = vpop.eup %3372  ;;  %3382 = vrcp.f32 %v2022_v45  ;;  %v2024_v38 = vadd.f32 1.0, %v3371_v46 }
 0x444   : > { %v3375_v49 = vpop.eup %3374  ;;  %3384 = vrcp.f32 %v2021_v47  ;;  %v2025_v53 = vadd.f32 1.0, %v3373_v50 }
 0x445   : > { %v3377_v55 = vpop.eup %3376  ;;  %3386 = vrcp.f32 %v2024_v38  ;;  %v2026_v56 = vadd.f32 1.0, %v3375_v49 }
 0x446   : > { %v3379_v58 = vpop.eup %3378  ;;  %3388 = vrcp.f32 %v2025_v53  ;;  %v2027_v59 = vadd.f32 1.0, %v3377_v55 }
 0x447   : > { %3390 = vrcp.f32 %v2026_v56  ;;  %v2028_v62 = vadd.f32 1.0, %v3379_v58 }
 0x448   : > { %3392 = vrcp.f32 %v2027_v59 }
 0x449   : > { %3394 = vrcp.f32 %v2028_v62 }
 0x44c   : > { %v3381_v63 = vpop.eup %3380 }
 0x44d   : > { %v3383_v54 = vpop.eup %3382  ;;  %v2047_v60 = vmul.f32 %v3381_v63, %v1991_v16 }
 0x44e   : > { %v3385_v48 = vpop.eup %3384  ;;  %v2046_v41 = vmul.f32 %v3383_v54, %v1990_v24 }
 0x44f   : > { %v3387_v57 = vpop.eup %3386  ;;  %v2055_v52 = vpack.c.bf16 %v2047_v60, %v2047_v60  ;;  %v2045_v37 = vmul.f32 %v3385_v48, %v1989_v26 }
 0x450   : > { %v3389_v22 = vpop.eup %3388  ;;  %v2054_v51 = vpack.c.bf16 %v2046_v41, %v2046_v41  ;;  %v2048_v61 = vmul.f32 %v3387_v57, %v1992_v28 }
 0x451   : > { %v3391_v0 = vpop.eup %3390  ;;  %v2077_v44 = vshrl.u32 %v2055_v52, 16  ;;  %v2080_v11 = vshll.u32 %v2055_v52, 16  ;;  %v2053_v15 = vpack.c.bf16 %v2045_v37, %v2045_v37  ;;  %v2049_v42 = vmul.f32 %v3389_v22, %v1993_v29 }
 0x452   : > { %v3393_v31 = vpop.eup %3392  ;;  %v2070_v4 = vshrl.u32 %v2054_v51, 16  ;;  %v2073_v7 = vshll.u32 %v2054_v51, 16  ;;  %v2056_v12 = vpack.c.bf16 %v2048_v61, %v2048_v61  ;;  %v2050_v13 = vmul.f32 %v3391_v0, %v3982_v10 }
 0x453   : > { %v2079_v9 = vrot.slane %v2077_v44, 7  ;;  %v2063_v18 = vshrl.u32 %v2053_v15, 16  ;;  %v2066_v8 = vshll.u32 %v2053_v15, 16  ;;  %v2057_v19 = vpack.c.bf16 %v2049_v42, %v2049_v42  ;;  %v3395_v14 = vpop.eup %3394 }
 0x454   : > { %v2072_v16 = vrot.slane %v2070_v4, 7  ;;  %v2084_v24 = vshrl.u32 %v2056_v12, 16  ;;  %v2087_v26 = vshll.u32 %v2056_v12, 16  ;;  %v2051_v28 = vmul.f32 %v3393_v31, %v3984_v32 }
 0x455   : > { %v2082_v1 = vor.u32 %v2080_v11, %v2079_v9  ;;  %v2065_v30 = vrot.slane %v2063_v18, 7  ;;  %v2091_v20 = vshrl.u32 %v2057_v19, 16  ;;  %v2094_v29 = vshll.u32 %v2057_v19, 16 }
 0x456   : > { %v2075_v25 = vor.u32 %v2073_v7, %v2072_v16  ;;  %v2086_v33 = vrot.slane %v2084_v24, 7  ;;  %v2058_v34 = vpack.c.bf16 %v2050_v13, %v2050_v13  ;;  %v2059_v35 = vpack.c.bf16 %v2051_v28, %v2051_v28  ;;  %v3349_v16 = vld [vmem:[%s4393_s6 + $0x8] sm:$0xff]   ;;  %v3350_v24 = vld [vmem:[%s4393_s6 + $0x50] sm:$0xff]   ;;  %v3352_v28 = vld [vmem:[%s4393_s6 + $0x58] sm:$0xff]  }
 0x457   : > { %v2128_v10 = vsel %vm3470_vm3, 0, %v2082_v1  ;;  %v2068_v36 = vor.u32 %v2066_v8, %v2065_v30  ;;  %v2093_v27 = vrot.slane %v2091_v20, 7  ;;  %v2052_v39 = vmul.f32 %v3395_v14, %v3986_v23  ;;  %v3348_v14 = vld [vmem:[%s4393_s6 + $0x48] sm:$0xff]   ;;  %v3353_v1 = vld [vmem:[%s4393_s6 + $0x18] sm:$0xff]   ;;  %v3354_v30 = vld [vmem:[%s4393_s6 + $0x60] sm:$0xff]  }
 0x458   : > { %v3998_v40 = vsel %vm3474_vm5, %v2128_v10, 0  ;;  %v2127_v32 = vsel %vm3470_vm3, 0, %v2075_v25  ;;  %v2089_v43 = vor.u32 %v2087_v26, %v2086_v33  ;;  %v2098_v45 = vshrl.u32 %v2058_v34, 16  ;;  %3019 = vmatprep.subr.bf16.mxu1 %v3348_v14  ;;  %v3351_v26 = vld [vmem:[%s4393_s6 + $0x10] sm:$0xff]   ;;  %v3355_v20 = vld [vmem:[%s4393_s6 + $0x20] sm:$0xff]   ;;  %v3357_v25 = vld [vmem:[%s4393_s6 + $0x28] sm:$0xff]  }
 0x459   : > { %2278 = vrot.lane.b32.xlu1 %v3998_v40, %s3412_s30  ;;  %v4006_v46 = vsel %vm3474_vm5, %v2127_v32, 0  ;;  %v4009_v47 = vrot.slane %v3998_v40, 1  ;;  %v2126_v23 = vsel %vm3470_vm3, 0, %v2068_v36  ;;  %v2096_v50 = vor.u32 %v2094_v29, %v2093_v27  ;;  %3020 = vmatpush3.bf16.msra.mxu1 %v3349_v16  ;;  %v3356_v29 = vld [vmem:[%s4393_s6 + $0x68] sm:$0xff]   ;;  %v3360_v36 = vld [vmem:[%s4393_s6 + $0x78] sm:$0xff]  }
 0x45a   : > { %2276 = vrot.lane.b32.xlu0 %v4006_v46, %s3412_s30  ;;  %v4016_v38 = vrot.slane %v4006_v46, 1  ;;  %v4020_v49 = vsel %vm3474_vm5, %v2126_v23, 0  ;;  %v2129_v53 = vsel %vm3470_vm3, 0, %v2089_v43  ;;  %v2100_v55 = vrot.slane %v2098_v45, 7  ;;  %3021 = vmatprep.subr.bf16.mxu1 %v3350_v24  ;;  %v3361_v27 = vld [vmem:[%s4393_s6 + $0x38] sm:$0xff]  }
 0x45b   : > { %v2130_v56 = vsel %vm3470_vm3, 0, %v2096_v50  ;;  %v4028_v58 = vsel %vm3474_vm5, %v2129_v53, 0  ;;  %v2101_v59 = vshll.u32 %v2058_v34, 16  ;;  %v2105_v62 = vshrl.u32 %v2059_v35, 16  ;;  %v3358_v34 = vld [vmem:[%s4393_s6 + $0x70] sm:$0xff]  }
 0x45c   : > { %v2904_v63 = vcombine.low %v4016_v38, %v4009_v47  ;;  %v4034_v54 = vsel %vm3474_vm5, %v2130_v56, 0  ;;  %v4037_v60 = vrot.slane %v4028_v58, 1  ;;  %v2108_v48 = vshll.u32 %v2059_v35, 16  ;;  %v3359_v35 = vld [vmem:[%s4393_s6 + $0x30] sm:$0xff]  }
 0x45d   : > { %2236 = vrot.lane.b32.xlu1 %v4020_v49, %s3416_s9  ;;  %v4042_v41 = vrot.slane %v4034_v54, 1  ;;  %v2103_v57 = vor.u32 %v2101_v59, %v2100_v55  ;;  %v2107_v52 = vrot.slane %v2105_v62, 7  ;;  %v2060_v37 = vpack.c.bf16 %v2052_v39, %v2052_v39  ;;  %3022 = vmatpush3.bf16.msra.mxu1 %v3351_v26 }
 0x45e   : > { %2238 = vrot.lane.b32.xlu0 %v4006_v46, %s3416_s9  ;;  %3217 = vmatprep.mubr.msk.bf16.mxu0 %vm680_vm10, %v2904_v63  ;;  %v2145_v33 = vshll.u32 %v4020_v49, 16  ;;  %v2159_v10 = vshll.u32 %v3998_v40, 16  ;;  %v2152_v32 = vshll.u32 %v4006_v46, 16  ;;  %v2143_v45 = vshrl.u32 %v4020_v49, 16 }
 0x45f   : > { %v2907_v22 = vcombine.low %v4037_v60, %v4042_v41  ;;  %v2110_v51 = vor.u32 %v2108_v48, %v2107_v52  ;;  %v2131_v61 = vsel %vm3470_vm3, 0, %v2103_v57  ;;  %v2112_v0 = vshrl.u32 %v2060_v37, 16  ;;  %3023 = vmatprep.subr.bf16.mxu1 %v3352_v28 }
 0x460   : > { %v4053_v44 = vsel %vm3474_vm5, %v2131_v61, 0  ;;  %v2115_v31 = vshll.u32 %v2060_v37, 16  ;;  %v2147_v39 = vrot.slane %v2145_v33, 1  ;;  %v2161_v43 = vrot.slane %v2159_v10, 1 }
 0x461   : > { %3218 = vmatmul.mubr.msk.bf16.vlgmr.msra.gmra.mrb[12].mxu0 %vm680_vm10, %v2907_v22  ;;  %v2132_v11 = vsel %vm3470_vm3, 0, %v2110_v51  ;;  %v4059_v15 = vrot.slane %v4053_v44, 1  ;;  %2280 = vrot.lane.b32.xlu1 %v4028_v58, %s3412_s30  ;;  %v2114_v42 = vrot.slane %v2112_v0, 7  ;;  %v2154_v50 = vrot.slane %v2152_v32, 1 }
 0x462   : > { %v4065_v4 = vsel %vm3474_vm5, %v2132_v11, 0  ;;  %2282 = vrot.lane.b32.xlu0 %v4034_v54, %s3412_s30  ;;  %3024 = vmatpush3.bf16.msra.mxu1 %v3353_v1  ;;  %v4179_v23 = vor.u32 %v2147_v39, %v2143_v45  ;;  %v2173_v53 = vshll.u32 %v4034_v54, 16  ;;  %v2150_v55 = vshrl.u32 %v4006_v46, 16 }
 0x463   : > { %v4070_v7 = vrot.slane %v4065_v4, 1  ;;  %v2117_v12 = vor.u32 %v2115_v31, %v2114_v42  ;;  %3025 = vmatprep.subr.bf16.mxu1 %v3354_v30  ;;  %v2166_v59 = vshll.u32 %v4028_v58, 16  ;;  %v2171_v63 = vshrl.u32 %v4034_v54, 16 }
 0x464   : > { %v4189_v56 = vor.u32 %v2154_v50, %v2150_v55  ;;  %v2175_v62 = vrot.slane %v2173_v53, 1  ;;  %v2164_v57 = vshrl.u32 %v4028_v58, 16  ;;  %v2180_v37 = vshll.u32 %v4053_v44, 16 }
 0x465   : > { %v2910_v13 = vcombine.low %v4059_v15, %v4070_v7  ;;  %2240 = vrot.lane.b32.xlu1 %v3998_v40, %s3416_s9  ;;  %v2133_v9 = vsel %vm3470_vm3, 0, %v2117_v12  ;;  %v2185_v51 = vshrl.u32 %v4065_v4, 16  ;;  %v2178_v11 = vshrl.u32 %v4053_v44, 16 }
 0x466   : > { %2242 = vrot.lane.b32.xlu0 %v4028_v58, %s3416_s9  ;;  %v4082_v18 = vsel %vm3474_vm5, %v2133_v9, 0  ;;  %3026 = vmatpush3.bf16.msra.mxu1 %v3355_v20  ;;  %v4197_v48 = vor.u32 %v2175_v62, %v2171_v63  ;;  %v2182_v61 = vrot.slane %v2180_v37, 1 }
 0x467   : > { %3221 = vmatprep.mubr.msk.bf16.mxu0 %vm680_vm10, %v2910_v13  ;;  %v2259_v8 = vrot.slane %v4082_v18, 1  ;;  %3027 = vmatprep.subr.bf16.mxu1 %v3356_v29  ;;  %v2255_v42 = vshll.u32 %v4082_v18, 16 }
 0x469   : > { %v2913_v19 = vcombine.low %v2259_v8, %v3487_v6  ;;  %2284 = vrot.lane.b32.xlu1 %v4053_v44, %s3412_s30  ;;  %v2214_v6 = vrot.slane %v4020_v49, 1  ;;  %v2257_v31 = vrot.slane %v2255_v42, 1 }
 0x46a   : > { %2286 = vrot.lane.b32.xlu0 %v4065_v4, %s3412_s30  ;;  %3028 = vmatpush3.bf16.msra.mxu1 %v3357_v25 }
 0x46b   : > { %3222 = vmatmul.mubr.msk.bf16.gmra.mrb[16].mxu0 %vm680_vm10, %v2913_v19  ;;  %3029 = vmatprep.subr.bf16.mxu1 %v3358_v34 }
 0x46d   : > { %2244 = vrot.lane.b32.xlu1 %v4034_v54, %s3416_s9 }
 0x46e   : > { %2246 = vrot.lane.b32.xlu0 %v4053_v44, %s3416_s9  ;;  %3030 = vmatpush3.bf16.msra.mxu1 %v3359_v35 }
 0x46f   : > { %3031 = vmatprep.subr.bf16.mxu1 %v3360_v36 }
 0x471   : > { %2288 = vrot.lane.b32.xlu1 %v4082_v18, %s3412_s30 }
 0x472   : > { %2260 = vrot.lane.b32.xlu0 %v2214_v6, %s3408_s14  ;;  %3032 = vmatpush3.bf16.msra.mxu1 %v3361_v27 }
 0x475   : > { %2262 = vrot.lane.b32.xlu1 %v4016_v38, %s3408_s14 }
 0x476   : > { %2221 = vrot.lane.b32.xlu0 %v2214_v6, %s3412_s30 }
 0x479   : > { %2264 = vrot.lane.b32.xlu1 %v4009_v47, %s3408_s14 }
 0x47a   : > { %2266 = vrot.lane.b32.xlu0 %v4037_v60, %s3408_s14 }
 0x47d   : > { %2223 = vrot.lane.b32.xlu1 %v4016_v38, %s3412_s30 }
 0x47e   : > { %2225 = vrot.lane.b32.xlu0 %v4009_v47, %s3412_s30  ;;  %v2157_v47 = vshrl.u32 %v3998_v40, 16 }
 0x480   : > { %v4181_v38 = vor.u32 %v2161_v43, %v2157_v47 }
 0x481   : > { %2268 = vrot.lane.b32.xlu1 %v4042_v41, %s3408_s14 }
 0x482   : > { %2270 = vrot.lane.b32.xlu0 %v4059_v15, %s3408_s14 }
 0x485   : > { %2227 = vrot.lane.b32.xlu1 %v4037_v60, %s3412_s30  ;;  %v2168_v60 = vrot.slane %v2166_v59, 1 }
 0x486   : > { %2229 = vrot.lane.b32.xlu0 %v4042_v41, %s3412_s30  ;;  %v2187_v41 = vshll.u32 %v4065_v4, 16 }
 0x487   : > { %v4205_v52 = vor.u32 %v2168_v60, %v2164_v57 }
 0x488   : > { %v2189_v22 = vrot.slane %v2187_v41, 1 }
 0x489   : > { %2272 = vrot.lane.b32.xlu1 %v4070_v7, %s3408_s14 }
 0x48a   : > { %2274 = vrot.lane.b32.xlu0 %v2259_v8, %s3408_s14  ;;  %v4213_v0 = vor.u32 %v2189_v22, %v2185_v51 }
 0x48d   : > { %2231 = vrot.lane.b32.xlu1 %v4059_v15, %s3412_s30  ;;  %v4220_v15 = vor.u32 %v2182_v61, %v2178_v11 }
 0x48e   : > { %2233 = vrot.lane.b32.xlu0 %v4070_v7, %s3412_s30  ;;  %v2253_v7 = vshrl.u32 %v4082_v18, 16 }
 0x490   : > { %v4232_v12 = vor.u32 %v2257_v31, %v2253_v7 }
 0x491   : > { %2193 = vrot.lane.b32.xlu1 %v4179_v23, %s3408_s14 }
 0x492   : > { %2294 = vrot.lane.b32.xlu0 %v4181_v38, %s3416_s9 }
 0x495   : > { %2292 = vrot.lane.b32.xlu1 %v4189_v56, %s3416_s9 }
 0x496   : > { %2197 = vrot.lane.b32.xlu0 %v4181_v38, %s3408_s14 }
 0x499   : > { %2195 = vrot.lane.b32.xlu1 %v4189_v56, %s3408_s14 }
 0x49a   : > { %2298 = vrot.lane.b32.xlu0 %v4197_v48, %s3416_s9 }
 0x49d   : > { %2296 = vrot.lane.b32.xlu1 %v4205_v52, %s3416_s9 }
 0x49e   : > { %2201 = vrot.lane.b32.xlu0 %v4197_v48, %s3408_s14 }
 0x4a1   : > { %2199 = vrot.lane.b32.xlu1 %v4205_v52, %s3408_s14 }
 0x4a2   : > { %2302 = vrot.lane.b32.xlu0 %v4213_v0, %s3416_s9 }
 0x4a5   : > { %2300 = vrot.lane.b32.xlu1 %v4220_v15, %s3416_s9 }
 0x4a6   : > { %2306 = vrot.lane.b32.xlu0 %v3503_v17, %s3416_s9  ;;  %v2192_v17 = vpop.permute.xlu0 %2191 }
 0x4a7   : > { %v2309_v63 = vsel %vm680_vm10, %v3484_v5, %v2192_v17 }
 0x4a9   : > { %2203 = vrot.lane.b32.xlu1 %v4220_v15, %s3408_s14 }
 0x4aa   : > { %2205 = vrot.lane.b32.xlu0 %v4213_v0, %s3408_s14  ;;  %v4240_v13 = vpop.permute.xlu0 %2290 }
 0x4ad   : > { %2304 = vrot.lane.b32.xlu1 %v4232_v12, %s3416_s9 }
 0x4ae   : > { %2250 = vrot.lane.b32.xlu0 %v4082_v18, %s3416_s9 }
 0x4b1   : > { %2248 = vrot.lane.b32.xlu1 %v4065_v4, %s3416_s9 }
 0x4cb   : > { %v2279_v9 = vpop.permute.xlu1 %2278 }
 0x4cc   : > { %v2277_v8 = vpop.permute.xlu0 %2276 }
 0x4cf   : > { %v2237_v19 = vpop.permute.xlu1 %2236 }
 0x4d0   : > { %v2239_v2 = vpop.permute.xlu0 %2238 }
 0x4d3   : > { %v2281_v3 = vpop.permute.xlu1 %2280 }
 0x4d4   : > { %v2283_v6 = vpop.permute.xlu0 %2282 }
 0x4d7   : > { %v2241_v14 = vpop.permute.xlu1 %2240 }
 0x4d8   : > { %v2243_v16 = vpop.permute.xlu0 %2242 }
 0x4db   : > { %v4242_v24 = vpop.permute.xlu1 %2284 }
 0x4dc   : > { %v4244_v26 = vpop.permute.xlu0 %2286 }
 0x4df   : > { %v4246_v28 = vpop.permute.xlu1 %2244 }
 0x4e0   : > { %v4248_v18 = vpop.permute.xlu0 %2246 }
 0x4e3   : > { %v4250_v1 = vpop.permute.xlu1 %2288 }
 0x4e4   : > { %v2261_v30 = vpop.permute.xlu0 %2260 }
 0x4e5   : > { %v2358_v53 = vsel %vm680_vm10, %v4179_v23, %v2261_v30 }
 0x4e6   : > { %v2381_v23 = vsel %vm748_vm14, %v2358_v53, %v2277_v8 }
 0x4e7   : > { %v2263_v20 = vpop.permute.xlu1 %2262 }
 0x4e8   : > { %v2222_v29 = vpop.permute.xlu0 %2221  ;;  %v2361_v55 = vsel %vm680_vm10, %v4189_v56, %v2263_v20  ;;  %v2324_v56 = vsel %vm748_vm14, %v2309_v63, %v3763_v21 }
 0x4e9   : > { %v2383_v57 = vsel %vm748_vm14, %v2361_v55, %v2279_v9  ;;  %v2341_v5 = vsel %vm2339_vm1, %v2324_v56, %v2237_v19 }
 0x4eb   : > { %v2265_v25 = vpop.permute.xlu1 %2264 }
 0x4ec   : > { %v2267_v33 = vpop.permute.xlu0 %2266  ;;  %v2364_v7 = vsel %vm680_vm10, %v4181_v38, %v2265_v25 }
 0x4ed   : > { %v2367_v21 = vsel %vm680_vm10, %v4205_v52, %v2267_v33 }
 0x4ef   : > { %v2224_v34 = vpop.permute.xlu1 %2223 }
 0x4f0   : > { %v2226_v35 = vpop.permute.xlu0 %2225 }
 0x4f3   : > { %v2269_v10 = vpop.permute.xlu1 %2268 }
 0x4f4   : > { %v2271_v36 = vpop.permute.xlu0 %2270 }
 0x4f7   : > { %v2228_v27 = vpop.permute.xlu1 %2227 }
 0x4f8   : > { %v2230_v39 = vpop.permute.xlu0 %2229 }
 0x4fb   : > { %v4252_v32 = vpop.permute.xlu1 %2272 }
 0x4fc   : > { %v4254_v43 = vpop.permute.xlu0 %2274 }
 0x4ff   : > { %v4256_v45 = vpop.permute.xlu1 %2231 }
 0x500   : > { %v4258_v47 = vpop.permute.xlu0 %2233 }
 0x503   : > { %v2194_v50 = vpop.permute.xlu1 %2193 }
 0x504   : > { %v2311_v59 = vsel %vm680_vm10, %v4020_v49, %v2194_v50  ;;  %v2295_v62 = vpop.permute.xlu0 %2294 }
 0x505   : > { %v2326_v60 = vsel %vm748_vm14, %v2311_v59, %v2222_v29  ;;  %v2399_v22 = vsel %vm2339_vm1, %v2383_v57, %v2295_v62 }
 0x506   : > { %v2343_v41 = vsel %vm2339_vm1, %v2326_v60, %v2239_v2  ;;  %v2387_v2 = vsel %vm748_vm14, %v2367_v21, %v2283_v6  ;;  %v2373_v6 = vsel %vm680_vm10, %v4220_v15, %v2271_v36 }
 0x507   : > { %v2293_v37 = vpop.permute.xlu1 %2292  ;;  %v2902_v11 = vcombine.low %v2341_v5, %v2343_v41 }
 0x508   : > { %v2397_v49 = vsel %vm2339_vm1, %v2381_v23, %v2293_v37  ;;  %v2198_v51 = vpop.permute.xlu0 %2197 }
 0x509   : > { %v2903_v61 = vcombine.low %v2397_v49, %v2399_v22  ;;  %v2315_v42 = vsel %vm680_vm10, %v3998_v40, %v2198_v51  ;;  %v2385_v40 = vsel %vm748_vm14, %v2364_v7, %v2281_v3  ;;  %v2370_v3 = vsel %vm680_vm10, %v4197_v48, %v2269_v10 }
 0x50a   : > { %v2330_v19 = vsel %vm748_vm14, %v2315_v42, %v2226_v35  ;;  %v2389_v55 = vsel %vm748_vm14, %v2370_v3, %v4242_v24  ;;  %v2376_v24 = vsel %vm680_vm10, %v4213_v0, %v4252_v32 }
 0x50b   : > { %v2196_v31 = vpop.permute.xlu1 %2195  ;;  %2666 = vmatprep.mubr.bf16.mxu1 %v2903_v61  ;;  %v2393_v60 = vsel %vm748_vm14, %v2376_v24, %v4250_v1 }
 0x50c   : > { %v2313_v17 = vsel %vm680_vm10, %v4006_v46, %v2196_v31  ;;  %v2299_v9 = vpop.permute.xlu0 %2298  ;;  %2667 = vmatmul.mubr.bf16.vlgmr.msra.gmra.mrb[4].mxu1 %v2902_v11  ;;  %v2347_v46 = vsel %vm2339_vm1, %v2330_v19, %v2243_v16 }
 0x50d   : > { %v2328_v8 = vsel %vm748_vm14, %v2313_v17, %v2224_v34  ;;  %v2403_v38 = vsel %vm2339_vm1, %v2387_v2, %v2299_v9 }
 0x50e   : > { %v2345_v20 = vsel %vm2339_vm1, %v2328_v8, %v2241_v14 }
 0x50f   : > { %v2297_v30 = vpop.permute.xlu1 %2296  ;;  %v2905_v33 = vcombine.low %v2345_v20, %v2347_v46 }
 0x510   : > { %v2401_v52 = vsel %vm2339_vm1, %v2385_v40, %v2297_v30  ;;  %v2202_v29 = vpop.permute.xlu0 %2201 }
 0x511   : > { %v2906_v25 = vcombine.low %v2401_v52, %v2403_v38  ;;  %v2319_v34 = vsel %vm680_vm10, %v4034_v54, %v2202_v29  ;;  %v2391_v54 = vsel %vm748_vm14, %v2373_v6, %v4244_v26  ;;  %v2379_v26 = vsel %vm680_vm10, %v4232_v12, %v4254_v43 }
 0x512   : > { %v2334_v16 = vsel %vm748_vm14, %v2319_v34, %v2230_v39  ;;  %v2395_v63 = vsel %vm748_vm14, %v2379_v26, %v4240_v13 }
 0x513   : > { %v2200_v35 = vpop.permute.xlu1 %2199  ;;  %2674 = vmatprep.mubr.bf16.mxu1 %v2906_v25 }
 0x514   : > { %v2317_v14 = vsel %vm680_vm10, %v4028_v58, %v2200_v35  ;;  %v2303_v50 = vpop.permute.xlu0 %2302  ;;  %2675 = vmatmul.mubr.bf16.gmra.mrb[8].mxu1 %v2905_v33 }
 0x515   : > { %v2332_v53 = vsel %vm748_vm14, %v2317_v14, %v2228_v27  ;;  %v2407_v15 = vsel %vm2339_vm1, %v2391_v54, %v2303_v50  ;;  %v2351_v27 = vsel %vm2339_vm1, %v2334_v16, %v4248_v18 }
 0x516   : > { %v2349_v48 = vsel %vm2339_vm1, %v2332_v53, %v4246_v28 }
 0x517   : > { %v2301_v59 = vpop.permute.xlu1 %2300  ;;  %v2908_v39 = vcombine.low %v2349_v48, %v2351_v27 }
 0x518   : > { %v2405_v58 = vsel %vm2339_vm1, %v2389_v55, %v2301_v59  ;;  %v2307_v10 = vpop.permute.xlu0 %2306 }
 0x519   : > { %v2909_v36 = vcombine.low %v2405_v58, %v2407_v15  ;;  %v2411_v41 = vsel %vm2339_vm1, %v2395_v63, %v2307_v10 }
 0x51b   : > { %v2204_v62 = vpop.permute.xlu1 %2203  ;;  %2682 = vmatprep.mubr.bf16.mxu1 %v2909_v36 }
 0x51c   : > { %v2206_v28 = vpop.permute.xlu0 %2205  ;;  %2683 = vmatmul.mubr.bf16.gmra.mrb[12].mxu1 %v2908_v39  ;;  %v2321_v57 = vsel %vm680_vm10, %v4053_v44, %v2204_v62 }
 0x51d   : > { %v2323_v0 = vsel %vm680_vm10, %v4065_v4, %v2206_v28  ;;  %v2336_v13 = vsel %vm748_vm14, %v2321_v57, %v4256_v45  ;;  %v2901_v45 = vld [vmem:[%s4394_s7] ss:$0 sm:$0xff] }
 0x51e   : > { %v2338_v37 = vsel %vm748_vm14, %v2323_v0, %v4258_v47 }
 0x51f   : > { %v2305_v18 = vpop.permute.xlu1 %2304 }
 0x520   : > { %v2409_v32 = vsel %vm2339_vm1, %v2393_v60, %v2305_v18  ;;  %v2251_v43 = vpop.permute.xlu0 %2250 }
 0x521   : > { %v2912_v12 = vcombine.low %v2409_v32, %v2411_v41  ;;  %v2355_v23 = vsel %vm2339_vm1, %v2338_v37, %v2251_v43 }
 0x523   : > { %v2249_v1 = vpop.permute.xlu1 %2248  ;;  %2690 = vmatprep.mubr.bf16.mxu1 %v2912_v12 }
 0x524   : > { %v2353_v44 = vsel %vm2339_vm1, %v2336_v13, %v2249_v1 }
 0x525   : > { %v2911_v56 = vcombine.low %v2353_v44, %v2355_v23 }
 0x527   : > { %2691 = vmatmul.mubr.bf16.gmra.mrb[16].mxu1 %v2911_v56 }
 0x534   : > { %v3219_v4 = vpop.f32.mrb[12].mxu0 }
 0x535   : > { %v2733_v22 = vpop.f32.mrb[13].mxu0 }
 0x536   : > { %v3220_v49 = vpop.f32.mrb[14].mxu0 }
 0x537   : > { %v2736_v51 = vpop.f32.mrb[15].mxu0 }
 0x53e   : > { %v3223_v5 = vpop.f32.mrb[16].mxu0 }
 0x53f   : > { %v2749_v61 = vpop.f32.mrb[17].mxu0 }
 0x540   : > { %v3224_v11 = vpop.f32.mrb[18].mxu0 }
 0x541   : > { %v2752_v47 = vpop.f32.mrb[19].mxu0 }
 0x5df   : > { %v3033_v42 = vpop.f32.mrb[4].mxu1 }
 0x5e0   : > { %v3034_v31 = vpop.f32.mrb[5].mxu1 }
 0x5e1   : > { %v3035_v7 = vadd.f32 %v3034_v31, %v3033_v42  ;;  %v3036_v21 = vpop.f32.mrb[6].mxu1 }
 0x5e2   : > { %v3037_v17 = vpop.f32.mrb[7].mxu1 }
 0x5e3   : > { %v2669_v9 = vadd.f32 %v3035_v7, %v2901_v45  ;;  %v3038_v8 = vadd.f32 %v3037_v17, %v3036_v21 }
 0x5e5   : > { %v2734_v19 = vadd.f32 %v2733_v22, %v2669_v9  ;;  %v2672_v2 = vadd.f32 %v3038_v8, %v2901_v45 }
 0x5e7   : > { %2764 = vst.msk [vmem:[%s4342_s11] sm:$0xff] %vm748_vm14, %v2734_v19  ;;  %v2737_v40 = vadd.f32 %v2736_v51, %v2672_v2  ;;  %2780 = vrot.lane.b32.xlu1 %v2734_v19, %s3412_s30  ;;  %v3039_v30 = vpop.f32.mrb[8].mxu1 }
 0x5e8   : > { %v3040_v20 = vpop.f32.mrb[9].mxu1 }
 0x5e9   : > { %2765 = vst.msk [vmem:[%s4342_s11 + $0x10] sm:$0xff] %vm748_vm14, %v2737_v40  ;;  %v3041_v38 = vadd.f32 %v3040_v20, %v3039_v30  ;;  %2782 = vrot.lane.b32.xlu0 %v2737_v40, %s3412_s30  ;;  %v3042_v52 = vpop.f32.mrb[10].mxu1 }
 0x5ea   : > { %v3043_v29 = vpop.f32.mrb[11].mxu1 }
 0x5eb   : > { %v2677_v25 = vadd.f32 %v3041_v38, %v2901_v45  ;;  %v3044_v46 = vadd.f32 %v3043_v29, %v3042_v52 }
 0x5ed   : > { %v2742_v33 = vadd.f32 %v3219_v4, %v2677_v25  ;;  %v2680_v34 = vadd.f32 %v3044_v46, %v2901_v45 }
 0x5ef   : > { %2766 = vst.msk [vmem:[%s4342_s11 + $0x20] sm:$0xff] %vm748_vm14, %v2742_v33  ;;  %v2745_v35 = vadd.f32 %v3220_v49, %v2680_v34  ;;  %2784 = vrot.lane.b32.xlu1 %v2742_v33, %s3412_s30  ;;  %v3045_v3 = vpop.f32.mrb[12].mxu1 }
 0x5f0   : > { %v3046_v6 = vpop.f32.mrb[13].mxu1 }
 0x5f1   : > { %2767 = vst.msk [vmem:[%s4342_s11 + $0x30] sm:$0xff] %vm748_vm14, %v2745_v35  ;;  %v3047_v14 = vadd.f32 %v3046_v6, %v3045_v3  ;;  %2786 = vrot.lane.b32.xlu0 %v2745_v35, %s3412_s30  ;;  %v3048_v50 = vpop.f32.mrb[14].mxu1 }
 0x5f2   : > { %v3049_v53 = vpop.f32.mrb[15].mxu1 }
 0x5f3   : > { %v2685_v16 = vadd.f32 %v3047_v14, %v2901_v45  ;;  %v3050_v54 = vadd.f32 %v3049_v53, %v3048_v50 }
 0x5f5   : > { %v2750_v55 = vadd.f32 %v2749_v61, %v2685_v16  ;;  %v2688_v59 = vadd.f32 %v3050_v54, %v2901_v45 }
 0x5f7   : > { %2768 = vst.msk [vmem:[%s4342_s11 + $0x40] sm:$0xff] %vm748_vm14, %v2750_v55  ;;  %v2753_v48 = vadd.f32 %v2752_v47, %v2688_v59  ;;  %2788 = vrot.lane.b32.xlu1 %v2750_v55, %s3412_s30 }
 0x5f9   : > { %2769 = vst.msk [vmem:[%s4342_s11 + $0x50] sm:$0xff] %vm748_vm14, %v2753_v48  ;;  %2790 = vrot.lane.b32.xlu0 %v2753_v48, %s3412_s30 }
 0x5fa   : > { %v3051_v15 = vpop.f32.mrb[16].mxu1 }
 0x5fb   : > { %v3052_v58 = vpop.f32.mrb[17].mxu1 }
 0x5fc   : > { %v3053_v10 = vadd.f32 %v3052_v58, %v3051_v15  ;;  %v3054_v36 = vpop.f32.mrb[18].mxu1 }
 0x5fd   : > { %v3055_v27 = vpop.f32.mrb[19].mxu1 }
 0x5fe   : > { %v2693_v39 = vadd.f32 %v3053_v10, %v2901_v45  ;;  %v3056_v62 = vadd.f32 %v3055_v27, %v3054_v36 }
 0x600   : > { %v2758_v24 = vadd.f32 %v3223_v5, %v2693_v39  ;;  %v2696_v26 = vadd.f32 %v3056_v62, %v2901_v45 }
 0x602   : > { %2770 = vst.msk [vmem:[%s4342_s11 + $0x60] sm:$0xff] %vm748_vm14, %v2758_v24  ;;  %v2761_v28 = vadd.f32 %v3224_v11, %v2696_v26  ;;  %2792 = vrot.lane.b32.xlu1 %v2758_v24, %s3412_s30 }
 0x604   : > { %2771 = vst.msk [vmem:[%s4342_s11 + $0x70] sm:$0xff] %vm748_vm14, %v2761_v28  ;;  %2794 = vrot.lane.b32.xlu0 %v2761_v28, %s3412_s30 }
 0x659   : > { %v2781_v63 = vpop.permute.xlu1 %2780 }
 0x65a   : > { %2936 = vst.msk [vmem:[%s4342_s11 + $0x8] sm:$0xff] %vm748_vm14, %v2781_v63 }
 0x65b   : > { %v2783_v60 = vpop.permute.xlu0 %2782 }
 0x65c   : > { %2937 = vst.msk [vmem:[%s4342_s11 + $0x18] sm:$0xff] %vm748_vm14, %v2783_v60 }
 0x661   : > { %v2785_v18 = vpop.permute.xlu1 %2784 }
 0x662   : > { %2938 = vst.msk [vmem:[%s4342_s11 + $0x28] sm:$0xff] %vm748_vm14, %v2785_v18 }
 0x663   : > { %v2787_v41 = vpop.permute.xlu0 %2786 }
 0x664   : > { %2939 = vst.msk [vmem:[%s4342_s11 + $0x38] sm:$0xff] %vm748_vm14, %v2787_v41 }
 0x669   : > { %v2789_v57 = vpop.permute.xlu1 %2788 }
 0x66a   : > { %2940 = vst.msk [vmem:[%s4342_s11 + $0x48] sm:$0xff] %vm748_vm14, %v2789_v57 }
 0x66b   : > { %v2791_v0 = vpop.permute.xlu0 %2790 }
 0x66c   : > { %2941 = vst.msk [vmem:[%s4342_s11 + $0x58] sm:$0xff] %vm748_vm14, %v2791_v0 }
 0x674   : > { %v2793_v32 = vpop.permute.xlu1 %2792 }
 0x675   : > { %2942 = vst.msk [vmem:[%s4342_s11 + $0x68] sm:$0xff] %vm748_vm14, %v2793_v32 }
 0x676   : > { %v2795_v12 = vpop.permute.xlu0 %2794 }
 0x677   : > { %2943 = vst.msk [vmem:[%s4342_s11 + $0x78] sm:$0xff] %vm748_vm14, %v2795_v12 }
 0x678 PF: > { %s18_s27 = sadd.s32 1, %s3402_s27  }
 0x679   : > { %p15_p4 = scmp.ge.s32.totalorder %s18_s27, 4  }
 0x67b   :  { %17 = sbr.rel (!%p15_p4) target bundleno = 1 (0x1), region = 83 }

// kernel: decoder_forward.4
= control target key start
LH: loop header
LB: loop body
LE: loop exit
PB: predicated region body
PF: predicated region fallthrough
CT: control target
= control target key end

     0   :  { %s4314_s21 = smov 0   ;;  %s6237_s0 = inlined_call_operand.vmem [shape: f32[2,16,16,32], index: 0, kind: input, shape index: {}]   ;;  %s6238_s1 = inlined_call_operand.vmem [shape: f32[1,32], index: 1, kind: input, shape index: {}]   ;;  %s6239_s2 = inlined_call_operand.vmem [shape: f32[1,32], index: 2, kind: input, shape index: {}]   ;;  %s6240_s3 = inlined_call_operand.vmem [shape: f32[32,32], index: 3, kind: input, shape index: {}]   ;;  %s6241_s4 = inlined_call_operand.vmem [shape: bf16[288,128], index: 4, kind: input, shape index: {}]   ;;  %s6242_s5 = inlined_call_operand.vmem [shape: f32[1,128], index: 5, kind: input, shape index: {}]   ;;  %s6243_s6 = inlined_call_operand.vmem [shape: f32[2,16,2,16,64], index: 6, kind: output, shape index: {}]  }
   0x1 LB: > { %s3514_s22 = sadd.s32 4294967295, %s4270_s21   ;;  %p3518_p0 = scmp.ge.s32.totalorder %s4270_s21, 1  ;;  %s4270_s21 = sphi %s4314_s21, %s16_s21  }
   0x2   : > { %p212_p1 = scmp.lt.s32.totalorder %s4270_s21, 3 }
   0x4   : > { %p213_p2 = pnand %p3518_p0, %p212_p1 }
   0x6   : > { %216 = sbr.rel (%p213_p2) target bundleno = 1422 (0x58e), region = 44 }
   0xd   : > { %v287_v0 = vld [vmem:[%s6240_s3] sm:$0xff]  ;;  %v288_v1 = vld [vmem:[%s6240_s3 + $0x8] sm:$0xff]  ;;  %v289_v2 = vld [vmem:[%s6240_s3 + $0x10] sm:$0xff]  ;;  %v4272_v3 = vmov 0.0|0.0   ;;  %vm4273_vm0 = vmmov 0   ;;  %v4274_v8 = vmov 0.0  }
   0xe   : > { %3986 = vmatprep.subr.bf16.mxu0 %v4272_v3  ;;  %v367_v4 = vand.u32 4294901760, %v287_v0  ;;  %v370_v5 = vand.u32 4294901760, %v288_v1  ;;  %v290_v6 = vld [vmem:[%s6240_s3 + $0x18] sm:$0xff]  ;;  %v373_v7 = vand.u32 4294901760, %v289_v2  ;;  %3826 = vmatprep.mubr.msk.f32.mxu0 %vm4273_vm0, %v4274_v8  ;;  %p242_p3 = scmp.lt.s32.totalorder %s3514_s22, 1  ;;  %vm291_vm1 = vcmask 261120  }
   0xf   : > { %v376_v9 = vand.u32 4294901760, %v290_v6  ;;  %4022 = vmatprep.subr.bf16.mxu1 %v4272_v3  ;;  %3892 = vmatprep.mubr.msk.f32.mxu1 %vm4273_vm0, %v4274_v8  ;;  %vm1984_vm2 = vcmask 1040384   ;;  %vm1985_vm3 = vsmask.f32 256  ;;  %vm2278_vm5 = vcmask 1046528   ;;  %s4276_s11 = smov 64  }
  0x10   : > { %v4340_v10 = vpack.c.bf16 %v370_v5, %v367_v4  ;;  %s6366_s22 = smov (!%p242_p3, %s3514_s22), 1  ;;  %v447_v11 = vsub.f32 %v287_v0, %v367_v4  ;;  %v454_v12 = vsub.f32 %v288_v1, %v370_v5  ;;  %v461_v13 = vsub.f32 %v289_v2, %v373_v7  ;;  %vm4823_vm4 = vmand %vm1984_vm2, %vm1985_vm3  ;;  %s4277_s12 = smov 32  }
  0x11   : > { %v468_v14 = vsub.f32 %v290_v6, %v376_v9  ;;  %v4345_v15 = vpack.c.bf16 %v376_v9, %v373_v7  ;;  %s3626_s7 = sshll.u32 %s6366_s22, 8  ;;  %vm2021_vm6 = vsmask.f32 7424  ;;  %s4278_s13 = smov 96   ;;  %vm2536_vm7 = vcmask 523264  }
  0x12   : > { %3988 = vmatpush3.bf16.msra.mxu0 %v4340_v10  ;;  %v448_v16 = vand.u32 4294901760, %v447_v11  ;;  %v455_v17 = vand.u32 4294901760, %v454_v12  ;;  %v4348_v18 = vpack.c.bf16 %v454_v12, %v447_v11  ;;  %4024 = vmatpush3.bf16.msra.mxu1 %v4340_v10  ;;  %s4355_s10 = scalar_lea.vmem %s6237_s0, %s3626_s7  ;;  %v462_v23 = vand.u32 4294901760, %v461_v13  ;;  %s3627_s16 = sshll.u32 %s6366_s22, 9 }
  0x13   : > { %3989 = vmatprep.subr.bf16.mxu0 %v4272_v3  ;;  %v4357_v19 = vpack.c.bf16 %v468_v14, %v461_v13  ;;  %4025 = vmatprep.subr.bf16.mxu1 %v4272_v3  ;;  %v4361_v20 = vld [vmem:[%s4355_s10] sm:$0xff]  ;;  %v4364_v21 = vld [vmem:[%s4355_s10 + $0x8] sm:$0xff]  ;;  %v4367_v22 = vld [vmem:[%s4355_s10 + $0x10] sm:$0xff]  ;;  %v469_v29 = vand.u32 4294901760, %v468_v14  ;;  %vm2569_vm8 = vcmask 785408   ;;  %s6027_s23 = scalar_lea.vmem %s6243_s6, %s3627_s16 }
  0x14   : > { %v4369_v24 = vpack.c.bf16 %v455_v17, %v448_v16  ;;  %v4372_v25 = vld [vmem:[%s4355_s10 + $0x18] sm:$0xff]  ;;  %v292_v26 = vsel %vm291_vm1, %v4361_v20, 0.0  ;;  %v293_v27 = vsel %vm291_vm1, %v4364_v21, 0.0  ;;  %v295_v28 = vsel %vm291_vm1, %v4367_v22, 0.0  ;;  %v4382_v30 = vld [vmem:[%s4355_s10 + $0x20] sm:$0xff]  ;;  %v4392_v34 = vld [vmem:[%s4355_s10 + $0x28] sm:$0xff] }
  0x15   : > { %v294_v31 = vadd.f32 %v293_v27, %v292_v26  ;;  %v297_v32 = vsel %vm291_vm1, %v4372_v25, 0.0  ;;  %v4388_v33 = vpack.c.bf16 %v469_v29, %v462_v23  ;;  %v299_v36 = vsel %vm291_vm1, %v4382_v30, 0.0  ;;  %v4397_v37 = vld [vmem:[%s4355_s10 + $0x30] sm:$0xff]  ;;  %v4400_v39 = vld [vmem:[%s4355_s10 + $0x38] sm:$0xff]  ;;  %v4403_v40 = vld [vmem:[%s4355_s10 + $0x40] sm:$0xff] }
  0x16   : > { %3991 = vmatpush3.bf16.msra.mxu0 %v4345_v15  ;;  %4027 = vmatpush3.bf16.msra.mxu1 %v4345_v15  ;;  %v4406_v41 = vld [vmem:[%s4355_s10 + $0x48] sm:$0xff]  ;;  %v301_v42 = vsel %vm291_vm1, %v4392_v34, 0.0  ;;  %v449_v43 = vsub.f32 %v447_v11, %v448_v16  ;;  %v456_v44 = vsub.f32 %v454_v12, %v455_v17  ;;  %v4411_v45 = vld [vmem:[%s4355_s10 + $0x50] sm:$0xff]  ;;  %v4414_v46 = vld [vmem:[%s4355_s10 + $0x58] sm:$0xff]  ;;  %v463_v48 = vsub.f32 %v461_v13, %v462_v23 }
  0x17   : > { %3992 = vmatprep.subr.bf16.mxu0 %v4272_v3  ;;  %4028 = vmatprep.subr.bf16.mxu1 %v4272_v3  ;;  %v296_v35 = vadd.f32 %v295_v28, %v294_v31  ;;  %v470_v49 = vsub.f32 %v468_v14, %v469_v29  ;;  %v303_v50 = vsel %vm291_vm1, %v4397_v37, 0.0  ;;  %v305_v52 = vsel %vm291_vm1, %v4400_v39, 0.0  ;;  %v4433_v1 = vld [vmem:[%s4355_s10 + $0x60] sm:$0xff]  ;;  %v4436_v4 = vld [vmem:[%s4355_s10 + $0x68] sm:$0xff]  ;;  %v4441_v9 = vld [vmem:[%s4355_s10 + $0x70] sm:$0xff] }
  0x18   : > { %v307_v53 = vsel %vm291_vm1, %v4403_v40, 0.0  ;;  %v309_v54 = vsel %vm291_vm1, %v4406_v41, 0.0  ;;  %v311_v55 = vsel %vm291_vm1, %v4411_v45, 0.0  ;;  %v313_v56 = vsel %vm291_vm1, %v4414_v46, 0.0  ;;  %v4446_v13 = vld [vmem:[%s4355_s10 + $0x78] sm:$0xff]  ;;  %v4451_v17 = vld [vmem:[%s4355_s10 + $0x80] sm:$0xff] }
  0x19   : > { %v298_v38 = vadd.f32 %v297_v32, %v296_v35  ;;  %v450_v57 = vand.u32 4294901760, %v449_v43  ;;  %v457_v58 = vand.u32 4294901760, %v456_v44  ;;  %v464_v60 = vand.u32 4294901760, %v463_v48  ;;  %v4456_v27 = vld [vmem:[%s4355_s10 + $0x88] sm:$0xff]  ;;  %v4461_v31 = vld [vmem:[%s4355_s10 + $0x90] sm:$0xff]  ;;  %v4471_v43 = vld [vmem:[%s4355_s10 + $0xa0] sm:$0xff] }
  0x1a   : > { %v471_v61 = vand.u32 4294901760, %v470_v49  ;;  %v315_v7 = vsel %vm291_vm1, %v4433_v1, 0.0  ;;  %v317_v12 = vsel %vm291_vm1, %v4436_v4, 0.0  ;;  %v319_v16 = vsel %vm291_vm1, %v4441_v9, 0.0  ;;  %v4476_v48 = vld [vmem:[%s4355_s10 + $0xa8] sm:$0xff] }
  0x1b   : > { %v300_v47 = vadd.f32 %v299_v36, %v298_v38  ;;  %v4428_v62 = vpack.c.bf16 %v457_v58, %v450_v57  ;;  %v321_v26 = vsel %vm291_vm1, %v4446_v13, 0.0  ;;  %v323_v29 = vsel %vm291_vm1, %v4451_v17, 0.0  ;;  %v4466_v36 = vld [vmem:[%s4355_s10 + $0x98] sm:$0xff]  ;;  %v4491_v57 = vld [vmem:[%s4355_s10 + $0xc0] sm:$0xff] }
  0x1c   : > { %v4430_v0 = vpack.c.bf16 %v471_v61, %v464_v60  ;;  %v325_v35 = vsel %vm291_vm1, %v4456_v27, 0.0  ;;  %v4496_v60 = vld [vmem:[%s4355_s10 + $0xc8] sm:$0xff] }
  0x1d   : > { %v302_v51 = vadd.f32 %v301_v42, %v300_v47  ;;  %v327_v42 = vsel %vm291_vm1, %v4461_v31, 0.0  ;;  %v329_v47 = vsel %vm291_vm1, %v4466_v36, 0.0 }
  0x1f   : > { %v304_v59 = vadd.f32 %v303_v50, %v302_v51  ;;  %v331_v50 = vsel %vm291_vm1, %v4471_v43, 0.0  ;;  %v4481_v51 = vld [vmem:[%s4355_s10 + $0xb0] sm:$0xff] }
  0x21   : > { %v306_v63 = vadd.f32 %v305_v52, %v304_v59 }
  0x23   : > { %v308_v2 = vadd.f32 %v307_v53, %v306_v63  ;;  %v333_v53 = vsel %vm291_vm1, %v4476_v48, 0.0  ;;  %v339_v63 = vsel %vm291_vm1, %v4491_v57, 0.0 }
  0x25   : > { %v310_v5 = vadd.f32 %v309_v54, %v308_v2  ;;  %v4486_v54 = vld [vmem:[%s4355_s10 + $0xb8] sm:$0xff]  ;;  %v4501_v2 = vld [vmem:[%s4355_s10 + $0xd0] sm:$0xff] }
  0x26   : > { %v337_v59 = vsel %vm291_vm1, %v4486_v54, 0.0 }
  0x27   : > { %v312_v6 = vadd.f32 %v311_v55, %v310_v5 }
  0x29   : > { %v314_v11 = vadd.f32 %v313_v56, %v312_v6  ;;  %v335_v56 = vsel %vm291_vm1, %v4481_v51, 0.0  ;;  %v341_v6 = vsel %vm291_vm1, %v4496_v60, 0.0 }
  0x2b   : > { %v316_v14 = vadd.f32 %v315_v7, %v314_v11  ;;  %v4506_v7 = vld [vmem:[%s4355_s10 + $0xd8] sm:$0xff] }
  0x2d   : > { %v318_v23 = vadd.f32 %v317_v12, %v316_v14  ;;  %v343_v12 = vsel %vm291_vm1, %v4501_v2, 0.0  ;;  %v4511_v14 = vld [vmem:[%s4355_s10 + $0xe0] sm:$0xff] }
  0x2f   : > { %v320_v28 = vadd.f32 %v319_v16, %v318_v23  ;;  %v345_v23 = vsel %vm291_vm1, %v4506_v7, 0.0 }
  0x31   : > { %v322_v32 = vadd.f32 %v321_v26, %v320_v28  ;;  %v4516_v26 = vld [vmem:[%s4355_s10 + $0xe8] sm:$0xff] }
  0x33   : > { %v324_v38 = vadd.f32 %v323_v29, %v322_v32  ;;  %v347_v29 = vsel %vm291_vm1, %v4511_v14, 0.0  ;;  %v4521_v32 = vld [vmem:[%s4355_s10 + $0xf0] sm:$0xff] }
  0x35   : > { %v326_v44 = vadd.f32 %v325_v35, %v324_v38  ;;  %v349_v38 = vsel %vm291_vm1, %v4516_v26, 0.0 }
  0x37   : > { %v328_v49 = vadd.f32 %v327_v42, %v326_v44  ;;  %v4526_v42 = vld [vmem:[%s4355_s10 + $0xf8] sm:$0xff] }
  0x39   : > { %v330_v52 = vadd.f32 %v329_v47, %v328_v49  ;;  %v351_v47 = vsel %vm291_vm1, %v4521_v32, 0.0 }
  0x3b   : > { %v332_v55 = vadd.f32 %v331_v50, %v330_v52  ;;  %v353_v50 = vsel %vm291_vm1, %v4526_v42, 0.0 }
  0x3d   : > { %v334_v58 = vadd.f32 %v333_v53, %v332_v55 }
  0x3f   : > { %v336_v61 = vadd.f32 %v335_v56, %v334_v58 }
  0x41   : > { %v338_v5 = vadd.f32 %v337_v59, %v336_v61 }
  0x43   : > { %v340_v11 = vadd.f32 %v339_v63, %v338_v5 }
  0x45   : > { %v342_v16 = vadd.f32 %v341_v6, %v340_v11 }
  0x47   : > { %v344_v28 = vadd.f32 %v343_v12, %v342_v16 }
  0x49   : > { %v346_v35 = vadd.f32 %v345_v23, %v344_v28 }
  0x4b   : > { %v348_v44 = vadd.f32 %v347_v29, %v346_v35  ;;  %v851_v29 = vlaneseq }
  0x4d   : > { %v350_v49 = vadd.f32 %v349_v38, %v348_v44  ;;  %v4562_v35 = vshrl.u32 %v851_v29, 7 }
  0x4f   : > { %v352_v52 = vadd.f32 %v351_v47, %v350_v49  ;;  %v6244_v47 = vsub.s32 0, %v4562_v35 }
  0x51   : > { %v354_v53 = vadd.f32 %v353_v50, %v352_v52 }
  0x53   : > { %v355_v55 = vrot.slane %v354_v53, 4 }
  0x55   : > { %v356_v56 = vadd.f32 %v355_v55, %v354_v53 }
  0x57   : > { %v357_v58 = vrot.slane %v356_v56, 2 }
  0x59   : > { %v358_v59 = vadd.f32 %v357_v58, %v356_v56 }
  0x5b   : > { %v359_v61 = vrot.slane %v358_v59, 1 }
  0x5d   : > { %v360_v63 = vadd.f32 %v359_v61, %v358_v59 }
  0x5f   : > { %v362_v5 = vmul.f32 0.00390625, %v360_v63 }
  0x61   : > { %v364_v6 = vsel %vm291_vm1, %v362_v5, 0 }
  0x62   : > { %v435_v11 = vand.u32 4294901760, %v364_v6 }
  0x64   : > { %v436_v12 = vsub.f32 %v364_v6, %v435_v11 }
  0x66   : > { %v437_v16 = vand.u32 4294901760, %v436_v12 }
  0x68   : > { %v438_v23 = vsub.f32 %v436_v12, %v437_v16 }
  0x6a   : > { %v439_v28 = vand.u32 4294901760, %v438_v23 }
  0x6c   : > { %3827 = vmatmul.mubr.f32.vlgmr.msra.gmra.mrb[0].mxu0 %v439_v28 }
  0x6d   : > { %3994 = vmatpush3.bf16.msra.mxu0 %v4428_v62  ;;  %3837 = vmatprep.mubr.msk.f32.mxu0 %vm4273_vm0, %v4274_v8 }
  0x6e   : > { %3995 = vmatprep.subr.bf16.mxu0 %v4272_v3 }
  0x71   : > { %3997 = vmatpush3.bf16.msra.mxu0 %v4430_v0 }
  0x72   : > { %3998 = vmatprep.subr.bf16.mxu0 %v4272_v3 }
  0x74   : > { %3838 = vmatmul.mubr.f32.vlgmr.msra.gmra.mrb[0].mxu0 %v435_v11 }
  0x75   : > { %4000 = vmatpush3.bf16.msra.mxu0 %v4348_v18  ;;  %3848 = vmatprep.mubr.msk.f32.mxu0 %vm4273_vm0, %v4274_v8 }
  0x76   : > { %4001 = vmatprep.subr.bf16.mxu0 %v4272_v3 }
  0x79   : > { %4003 = vmatpush3.bf16.msra.mxu0 %v4357_v19 }
  0x7a   : > { %4004 = vmatprep.subr.bf16.mxu0 %v4272_v3 }
  0x7c   : > { %3849 = vmatmul.mubr.f32.vlgmr.msra.gmra.mrb[0].mxu0 %v436_v12 }
  0x7d   : > { %4006 = vmatpush3.bf16.msra.mxu0 %v4340_v10  ;;  %3859 = vmatprep.mubr.msk.f32.mxu0 %vm4273_vm0, %v4274_v8 }
  0x7e   : > { %4007 = vmatprep.subr.bf16.mxu0 %v4272_v3 }
  0x81   : > { %4009 = vmatpush3.bf16.msra.mxu0 %v4345_v15 }
  0x82   : > { %4010 = vmatprep.subr.bf16.mxu0 %v4272_v3 }
  0x84   : > { %3860 = vmatmul.mubr.f32.vlgmr.msra.gmra.mrb[0].mxu0 %v437_v16 }
  0x85   : > { %4012 = vmatpush3.bf16.msra.mxu0 %v4369_v24  ;;  %3870 = vmatprep.mubr.msk.f32.mxu0 %vm4273_vm0, %v4274_v8 }
  0x86   : > { %4013 = vmatprep.subr.bf16.mxu0 %v4272_v3 }
  0x89   : > { %4015 = vmatpush3.bf16.msra.mxu0 %v4388_v33 }
  0x8a   : > { %4016 = vmatprep.subr.bf16.mxu0 %v4272_v3 }
  0x8c   : > { %3871 = vmatmul.mubr.f32.vlgmr.msra.gmra.mrb[0].mxu0 %v435_v11 }
  0x8d   : > { %4018 = vmatpush3.bf16.msra.mxu0 %v4340_v10  ;;  %3881 = vmatprep.mubr.msk.f32.mxu0 %vm4273_vm0, %v4274_v8 }
  0x8e   : > { %4019 = vmatprep.subr.bf16.mxu0 %v4272_v3 }
  0x91   : > { %4021 = vmatpush3.bf16.msra.mxu0 %v4345_v15 }
  0x94   : > { %3882 = vmatmul.mubr.f32.vlgmr.msra.gmra.mrb[0].mxu0 %v435_v11 }
 0x167   : > { %v847_v38 = vpop.f32.mrb[0].mxu0 }
 0x168   : > { %v3883_v44 = vpop.f32.mrb[1].mxu0  ;;  %v4567_v49 = vrot.slane %v847_v38, %v6244_v47 }
 0x16a   : > { %v4571_v50 = vsub.f32 %v4361_v20, %v4567_v49  ;;  %v4575_v52 = vsub.f32 %v4364_v21, %v4567_v49  ;;  %v4579_v53 = vsub.f32 %v4367_v22, %v4567_v49  ;;  %v4583_v55 = vsub.f32 %v4372_v25, %v4567_v49 }
 0x16b   : > { %v4591_v20 = vsub.f32 %v4382_v30, %v4567_v49  ;;  %v4597_v22 = vsub.f32 %v4392_v34, %v4567_v49  ;;  %v4605_v5 = vsub.f32 %v4397_v37, %v4567_v49  ;;  %v4612_v34 = vsub.f32 %v4400_v39, %v4567_v49 }
 0x16c   : > { %v887_v56 = vmul.f32 %v4571_v50, %v4571_v50  ;;  %v888_v58 = vmul.f32 %v4575_v52, %v4575_v52  ;;  %v889_v21 = vmul.f32 %v4579_v53, %v4579_v53  ;;  %v890_v25 = vmul.f32 %v4583_v55, %v4583_v55 }
 0x16d   : > { %v891_v30 = vmul.f32 %v4591_v20, %v4591_v20  ;;  %v892_v12 = vmul.f32 %v4597_v22, %v4597_v22  ;;  %v4619_v37 = vsub.f32 %v4403_v40, %v4567_v49  ;;  %v893_v28 = vmul.f32 %v4605_v5, %v4605_v5 }
 0x16e   : > { %v919_v59 = vsel %vm291_vm1, %v887_v56, 0.0  ;;  %v920_v61 = vsel %vm291_vm1, %v888_v58, 0.0  ;;  %v922_v6 = vsel %vm291_vm1, %v889_v21, 0.0  ;;  %v924_v16 = vsel %vm291_vm1, %v890_v25, 0.0 }
 0x16f   : > { %v921_v63 = vadd.f32 %v920_v61, %v919_v59  ;;  %v926_v29 = vsel %vm291_vm1, %v891_v30, 0.0  ;;  %v4626_v39 = vsub.f32 %v4406_v41, %v4567_v49  ;;  %v894_v44 = vmul.f32 %v4612_v34, %v4612_v34 }
 0x170   : > { %v928_v56 = vsel %vm291_vm1, %v892_v12, 0.0  ;;  %v4633_v40 = vsub.f32 %v4411_v45, %v4567_v49  ;;  %v895_v21 = vmul.f32 %v4619_v37, %v4619_v37  ;;  %v930_v25 = vsel %vm291_vm1, %v893_v28, 0.0 }
 0x171   : > { %v923_v11 = vadd.f32 %v922_v6, %v921_v63  ;;  %v4640_v41 = vsub.f32 %v4414_v46, %v4567_v49  ;;  %v896_v61 = vmul.f32 %v4626_v39, %v4626_v39  ;;  %v932_v63 = vsel %vm291_vm1, %v894_v44, 0.0 }
 0x172   : > { %v4647_v45 = vsub.f32 %v4433_v1, %v4567_v49  ;;  %v897_v6 = vmul.f32 %v4633_v40, %v4633_v40  ;;  %v4654_v46 = vsub.f32 %v4436_v4, %v4567_v49  ;;  %v4661_v1 = vsub.f32 %v4441_v9, %v4567_v49 }
 0x173   : > { %v925_v23 = vadd.f32 %v924_v16, %v923_v11  ;;  %v934_v11 = vsel %vm291_vm1, %v895_v21, 0.0  ;;  %v898_v16 = vmul.f32 %v4640_v41, %v4640_v41  ;;  %v4668_v4 = vsub.f32 %v4446_v13, %v4567_v49 }
 0x174   : > { %v4675_v9 = vsub.f32 %v4451_v17, %v4567_v49  ;;  %v4682_v13 = vsub.f32 %v4456_v27, %v4567_v49  ;;  %v4689_v17 = vsub.f32 %v4461_v31, %v4567_v49  ;;  %v4696_v27 = vsub.f32 %v4466_v36, %v4567_v49 }
 0x175   : > { %v927_v38 = vadd.f32 %v926_v29, %v925_v23  ;;  %v936_v23 = vsel %vm291_vm1, %v896_v61, 0.0  ;;  %v899_v29 = vmul.f32 %v4647_v45, %v4647_v45  ;;  %v4703_v31 = vsub.f32 %v4471_v43, %v4567_v49 }
 0x176   : > { %v4710_v36 = vsub.f32 %v4476_v48, %v4567_v49  ;;  %v4717_v43 = vsub.f32 %v4481_v51, %v4567_v49  ;;  %v4724_v48 = vsub.f32 %v4486_v54, %v4567_v49  ;;  %v4731_v51 = vsub.f32 %v4491_v57, %v4567_v49 }
 0x177   : > { %v929_v58 = vadd.f32 %v928_v56, %v927_v38  ;;  %v938_v38 = vsel %vm291_vm1, %v897_v6, 0.0  ;;  %v900_v56 = vmul.f32 %v4654_v46, %v4654_v46  ;;  %v4738_v54 = vsub.f32 %v4496_v60, %v4567_v49 }
 0x178   : > { %v4745_v57 = vsub.f32 %v4501_v2, %v4567_v49  ;;  %v4752_v60 = vsub.f32 %v4506_v7, %v4567_v49  ;;  %v4759_v2 = vsub.f32 %v4511_v14, %v4567_v49  ;;  %v4766_v7 = vsub.f32 %v4516_v26, %v4567_v49 }
 0x179   : > { %v931_v59 = vadd.f32 %v930_v25, %v929_v58  ;;  %v940_v58 = vsel %vm291_vm1, %v898_v16, 0.0  ;;  %v901_v25 = vmul.f32 %v4661_v1, %v4661_v1  ;;  %v4773_v14 = vsub.f32 %v4521_v32, %v4567_v49 }
 0x17a   : > { %v4780_v26 = vsub.f32 %v4526_v42, %v4567_v49 }
 0x17b   : > { %v933_v30 = vadd.f32 %v932_v63, %v931_v59  ;;  %v942_v59 = vsel %vm291_vm1, %v899_v29, 0.0  ;;  %v902_v63 = vmul.f32 %v4668_v4, %v4668_v4  ;;  %v917_v32 = vmul.f32 %v4773_v14, %v4773_v14 }
 0x17d   : > { %v935_v12 = vadd.f32 %v934_v11, %v933_v30  ;;  %v944_v30 = vsel %vm291_vm1, %v900_v56, 0.0  ;;  %v903_v11 = vmul.f32 %v4675_v9, %v4675_v9  ;;  %v978_v42 = vsel %vm291_vm1, %v917_v32, 0.0 }
 0x17f   : > { %v937_v28 = vadd.f32 %v936_v23, %v935_v12  ;;  %v946_v12 = vsel %vm291_vm1, %v901_v25, 0.0  ;;  %v904_v23 = vmul.f32 %v4682_v13, %v4682_v13 }
 0x181   : > { %v939_v44 = vadd.f32 %v938_v38, %v937_v28  ;;  %v948_v28 = vsel %vm291_vm1, %v902_v63, 0.0  ;;  %v905_v38 = vmul.f32 %v4689_v17, %v4689_v17 }
 0x183   : > { %v941_v21 = vadd.f32 %v940_v58, %v939_v44  ;;  %v950_v44 = vsel %vm291_vm1, %v903_v11, 0.0  ;;  %v906_v58 = vmul.f32 %v4696_v27, %v4696_v27 }
 0x185   : > { %v943_v61 = vadd.f32 %v942_v59, %v941_v21  ;;  %v952_v21 = vsel %vm291_vm1, %v904_v23, 0.0  ;;  %v907_v59 = vmul.f32 %v4703_v31, %v4703_v31 }
 0x187   : > { %v945_v6 = vadd.f32 %v944_v30, %v943_v61  ;;  %v954_v61 = vsel %vm291_vm1, %v905_v38, 0.0  ;;  %v908_v30 = vmul.f32 %v4710_v36, %v4710_v36 }
 0x189   : > { %v947_v16 = vadd.f32 %v946_v12, %v945_v6  ;;  %v956_v6 = vsel %vm291_vm1, %v906_v58, 0.0  ;;  %v909_v12 = vmul.f32 %v4717_v43, %v4717_v43 }
 0x18b   : > { %v949_v29 = vadd.f32 %v948_v28, %v947_v16  ;;  %v958_v16 = vsel %vm291_vm1, %v907_v59, 0.0  ;;  %v910_v28 = vmul.f32 %v4724_v48, %v4724_v48 }
 0x18d   : > { %v951_v56 = vadd.f32 %v950_v44, %v949_v29  ;;  %v960_v29 = vsel %vm291_vm1, %v908_v30, 0.0  ;;  %v911_v44 = vmul.f32 %v4731_v51, %v4731_v51 }
 0x18f   : > { %v953_v25 = vadd.f32 %v952_v21, %v951_v56  ;;  %v962_v56 = vsel %vm291_vm1, %v909_v12, 0.0  ;;  %v912_v21 = vmul.f32 %v4738_v54, %v4738_v54 }
 0x191   : > { %v955_v63 = vadd.f32 %v954_v61, %v953_v25  ;;  %v964_v25 = vsel %vm291_vm1, %v910_v28, 0.0  ;;  %v913_v61 = vmul.f32 %v4745_v57, %v4745_v57 }
 0x193   : > { %v957_v11 = vadd.f32 %v956_v6, %v955_v63  ;;  %v966_v63 = vsel %vm291_vm1, %v911_v44, 0.0  ;;  %v914_v6 = vmul.f32 %v4752_v60, %v4752_v60 }
 0x195   : > { %v959_v23 = vadd.f32 %v958_v16, %v957_v11  ;;  %v968_v11 = vsel %vm291_vm1, %v912_v21, 0.0  ;;  %v915_v16 = vmul.f32 %v4759_v2, %v4759_v2  ;;  %v918_v21 = vmul.f32 %v4780_v26, %v4780_v26 }
 0x197   : > { %v961_v38 = vadd.f32 %v960_v29, %v959_v23  ;;  %v970_v23 = vsel %vm291_vm1, %v913_v61, 0.0  ;;  %v916_v29 = vmul.f32 %v4766_v7, %v4766_v7  ;;  %v980_v61 = vsel %vm291_vm1, %v918_v21, 0.0 }
 0x199   : > { %v963_v58 = vadd.f32 %v962_v56, %v961_v38  ;;  %v972_v38 = vsel %vm291_vm1, %v914_v6, 0.0  ;;  %v974_v56 = vsel %vm291_vm1, %v915_v16, 0.0 }
 0x19b   : > { %v965_v59 = vadd.f32 %v964_v25, %v963_v58  ;;  %v976_v25 = vsel %vm291_vm1, %v916_v29, 0.0 }
 0x19d   : > { %v967_v30 = vadd.f32 %v966_v63, %v965_v59 }
 0x19f   : > { %v969_v12 = vadd.f32 %v968_v11, %v967_v30 }
 0x1a1   : > { %v971_v28 = vadd.f32 %v970_v23, %v969_v12 }
 0x1a3   : > { %v973_v44 = vadd.f32 %v972_v38, %v971_v28 }
 0x1a5   : > { %v975_v58 = vadd.f32 %v974_v56, %v973_v44 }
 0x1a7   : > { %v977_v59 = vadd.f32 %v976_v25, %v975_v58 }
 0x1a9   : > { %v979_v49 = vadd.f32 %v978_v42, %v977_v59 }
 0x1ab   : > { %v981_v63 = vadd.f32 %v980_v61, %v979_v49 }
 0x1ad   : > { %v982_v30 = vrot.slane %v981_v63, 4 }
 0x1af   : > { %v983_v6 = vadd.f32 %v982_v30, %v981_v63 }
 0x1b1   : > { %v984_v11 = vrot.slane %v983_v6, 2 }
 0x1b3   : > { %v985_v12 = vadd.f32 %v984_v11, %v983_v6  ;;  %v6279_v6 = vsub.s32 0, %v4562_v35  ;;  %v4865_v35 = vld [vmem:[%s6239_s2] ss:$0 sm:$0xff] }
 0x1b5   : > { %v986_v23 = vrot.slane %v985_v12, 1 }
 0x1b7   : > { %v987_v28 = vadd.f32 %v986_v23, %v985_v12  ;;  %v4852_v12 = vld [vmem:[%s6238_s1] ss:$0 sm:$0xff] }
 0x1b9   : > { %v988_v16 = vmul.f32 0.00390625, %v987_v28 }
 0x1bb   : > { %v990_v38 = vsel %vm291_vm1, %v988_v16, 0 }
 0x1bc   : > { %v1061_v44 = vand.u32 4294901760, %v990_v38 }
 0x1be   : > { %v1062_v56 = vsub.f32 %v990_v38, %v1061_v44 }
 0x1c0   : > { %v1063_v47 = vand.u32 4294901760, %v1062_v56 }
 0x1c2   : > { %v1064_v29 = vsub.f32 %v1062_v56, %v1063_v47 }
 0x1c4   : > { %v1065_v58 = vand.u32 4294901760, %v1064_v29 }
 0x1c6   : > { %3893 = vmatmul.mubr.f32.vlgmr.msra.gmra.mrb[0].mxu1 %v1065_v58 }
 0x1c7   : > { %4030 = vmatpush3.bf16.msra.mxu1 %v4428_v62  ;;  %3903 = vmatprep.mubr.msk.f32.mxu1 %vm4273_vm0, %v4274_v8 }
 0x1c8   : > { %4031 = vmatprep.subr.bf16.mxu1 %v4272_v3 }
 0x1cb   : > { %4033 = vmatpush3.bf16.msra.mxu1 %v4430_v0 }
 0x1cc   : > { %4034 = vmatprep.subr.bf16.mxu1 %v4272_v3 }
 0x1ce   : > { %3904 = vmatmul.mubr.f32.vlgmr.msra.gmra.mrb[0].mxu1 %v1061_v44 }
 0x1cf   : > { %4036 = vmatpush3.bf16.msra.mxu1 %v4348_v18  ;;  %3914 = vmatprep.mubr.msk.f32.mxu1 %vm4273_vm0, %v4274_v8  ;;  %v4275_v18 = vmov 0  }
 0x1d0   : > { %4037 = vmatprep.subr.bf16.mxu1 %v4272_v3 }
 0x1d3   : > { %4039 = vmatpush3.bf16.msra.mxu1 %v4357_v19  ;;  %v1834_v19 = vrot.slane %v4275_v18, 7 }
 0x1d4   : > { %4040 = vmatprep.subr.bf16.mxu1 %v4272_v3 }
 0x1d6   : > { %3915 = vmatmul.mubr.f32.vlgmr.msra.gmra.mrb[0].mxu1 %v1062_v56 }
 0x1d7   : > { %4042 = vmatpush3.bf16.msra.mxu1 %v4340_v10  ;;  %3925 = vmatprep.mubr.msk.f32.mxu1 %vm4273_vm0, %v4274_v8 }
 0x1d8   : > { %4043 = vmatprep.subr.bf16.mxu1 %v4272_v3 }
 0x1db   : > { %4045 = vmatpush3.bf16.msra.mxu1 %v4345_v15 }
 0x1dc   : > { %4046 = vmatprep.subr.bf16.mxu1 %v4272_v3 }
 0x1de   : > { %3926 = vmatmul.mubr.f32.vlgmr.msra.gmra.mrb[0].mxu1 %v1063_v47 }
 0x1df   : > { %4048 = vmatpush3.bf16.msra.mxu1 %v4369_v24  ;;  %3936 = vmatprep.mubr.msk.f32.mxu1 %vm4273_vm0, %v4274_v8 }
 0x1e0   : > { %4049 = vmatprep.subr.bf16.mxu1 %v4272_v3 }
 0x1e3   : > { %4051 = vmatpush3.bf16.msra.mxu1 %v4388_v33  ;;  %v4829_v33 = vsel %vm4823_vm4, 0, %v1834_v19 }
 0x1e4   : > { %4052 = vmatprep.subr.bf16.mxu1 %v4272_v3  ;;  %v2025_v62 = vshll.u32 %v4829_v33, 16 }
 0x1e6   : > { %3937 = vmatmul.mubr.f32.vlgmr.msra.gmra.mrb[0].mxu1 %v1061_v44  ;;  %v2027_v32 = vrot.slane %v2025_v62, 1 }
 0x1e7   : > { %4054 = vmatpush3.bf16.msra.mxu1 %v4340_v10  ;;  %3947 = vmatprep.mubr.msk.f32.mxu1 %vm4273_vm0, %v4274_v8  ;;  %v2004_v8 = vsel %vm4823_vm4, %v1834_v19, 0 }
 0x1e8   : > { %4055 = vmatprep.subr.bf16.mxu1 %v4272_v3  ;;  %v2279_v3 = vrot.slane %v4829_v33, 1  ;;  %v2280_v10 = vrot.slane %v2004_v8, 1  ;;  %v2030_v0 = vshll.u32 %v2004_v8, 16 }
 0x1ea   : > { %v4837_v47 = vsel %vm2278_vm5, %v2279_v3, %v2280_v10  ;;  %v2032_v25 = vrot.slane %v2030_v0, 1 }
 0x1eb   : > { %4057 = vmatpush3.bf16.msra.mxu1 %v4345_v15  ;;  %v2023_v15 = vshrl.u32 %v4829_v33, 16  ;;  %6278 = vst [vmem:[#allocation2_spill] sm:$0xff] %v4837_v47  ;;  %v4110_v21 = vpack.i.bf16 %v4829_v33, %v4837_v47 }
 0x1ed   : > { %v2028_v59 = vor.u32 %v2027_v32, %v2023_v15  ;;  %4111 = vrot.lane.b32.xlu1 %v4110_v21, %s4276_s11 }
 0x1ee   : > { %3948 = vmatmul.mubr.f32.vlgmr.msra.gmra.mrb[0].mxu1 %v1061_v44 }
 0x1ef   : > { %v2033_v42 = vsel %vm2021_vm6, %v2028_v59, %v2032_v25 }
 0x1f0   : > { %2214 = vrot.lane.b32.xlu0 %v2033_v42, %s4277_s12 }
 0x1f1   : > { %2502 = vrot.lane.b32.xlu1 %v2033_v42, %s4278_s13 }
 0x2c1   : > { %v1473_v49 = vpop.f32.mrb[0].mxu1 }
 0x2c2   : > { %v4074_v61 = vadd.f32 1e-05, %v1473_v49  ;;  %v3949_v63 = vpop.f32.mrb[1].mxu1 }
 0x2c4   : > { %4133 = vrsqrt.f32 %v4074_v61 }
 0x2ce   : > { %v4134_v30 = vpop.eup %4133 }
 0x2cf   : > { %v4847_v11 = vrot.slane %v4134_v30, %v6279_v6 }
 0x2d1   : > { %v1508_v23 = vmul.f32 %v4847_v11, %v4745_v57  ;;  %v1509_v28 = vmul.f32 %v4847_v11, %v4752_v60  ;;  %v1484_v16 = vmul.f32 %v4847_v11, %v4579_v53  ;;  %v1485_v38 = vmul.f32 %v4847_v11, %v4583_v55 }
 0x2d2   : > { %v1486_v44 = vmul.f32 %v4847_v11, %v4591_v20  ;;  %v1487_v57 = vmul.f32 %v4847_v11, %v4597_v22  ;;  %v1482_v60 = vmul.f32 %v4847_v11, %v4571_v50  ;;  %v1483_v53 = vmul.f32 %v4847_v11, %v4575_v52 }
 0x2d3   : > { %v1546_v56 = vmul.f32 %v4852_v12, %v1508_v23  ;;  %v1547_v55 = vmul.f32 %v4852_v12, %v1509_v28  ;;  %v1522_v29 = vmul.f32 %v4852_v12, %v1484_v16  ;;  %v1523_v58 = vmul.f32 %v4852_v12, %v1485_v38 }
 0x2d4   : > { %v1524_v18 = vmul.f32 %v4852_v12, %v1486_v44  ;;  %v1525_v20 = vmul.f32 %v4852_v12, %v1487_v57  ;;  %v1520_v22 = vmul.f32 %v4852_v12, %v1482_v60  ;;  %v1521_v19 = vmul.f32 %v4852_v12, %v1483_v53 }
 0x2d5   : > { %v4884_v50 = vadd.f32 %v4865_v35, %v1546_v56  ;;  %v4887_v52 = vadd.f32 %v4865_v35, %v1547_v55  ;;  %v4890_v8 = vadd.f32 %v4865_v35, %v1522_v29  ;;  %v4893_v3 = vadd.f32 %v4865_v35, %v1523_v58 }
 0x2d6   : > { %v4896_v10 = vadd.f32 %v4865_v35, %v1524_v18  ;;  %v4899_v15 = vadd.f32 %v4865_v35, %v1525_v20  ;;  %v4902_v62 = vadd.f32 %v4865_v35, %v1520_v22  ;;  %v4905_v0 = vadd.f32 %v4865_v35, %v1521_v19 }
 0x2d7   : > { %v3551_v32 = vmul.f32 -1.442695, %v4884_v50  ;;  %v3552_v21 = vmul.f32 -1.442695, %v4887_v52  ;;  %v3527_v25 = vmul.f32 -1.442695, %v4890_v8  ;;  %v1510_v59 = vmul.f32 %v4847_v11, %v4759_v2 }
 0x2d8   : > { %v3528_v42 = vmul.f32 -1.442695, %v4893_v3  ;;  %v3529_v49 = vmul.f32 -1.442695, %v4896_v10  ;;  %v3530_v61 = vmul.f32 -1.442695, %v4899_v15  ;;  %v1511_v63 = vmul.f32 %v4847_v11, %v4766_v7 }
 0x2d9   : > { %4135 = vpow2.f32 %v3551_v32  ;;  %v3525_v30 = vmul.f32 -1.442695, %v4902_v62  ;;  %v3526_v6 = vmul.f32 -1.442695, %v4905_v0  ;;  %v1548_v23 = vmul.f32 %v4852_v12, %v1510_v59 }
 0x2da   : > { %4137 = vpow2.f32 %v3552_v21  ;;  %v1549_v28 = vmul.f32 %v4852_v12, %v1511_v63  ;;  %v1506_v2 = vmul.f32 %v4847_v11, %v4731_v51  ;;  %v1507_v16 = vmul.f32 %v4847_v11, %v4738_v54 }
 0x2db   : > { %4139 = vpow2.f32 %v3527_v25  ;;  %v4926_v38 = vadd.f32 %v4865_v35, %v1548_v23  ;;  %v1488_v7 = vmul.f32 %v4847_v11, %v4605_v5  ;;  %v1489_v44 = vmul.f32 %v4847_v11, %v4612_v34 }
 0x2dc   : > { %4141 = vpow2.f32 %v3528_v42  ;;  %v4933_v57 = vadd.f32 %v4865_v35, %v1549_v28  ;;  %v1544_v60 = vmul.f32 %v4852_v12, %v1506_v2  ;;  %v1545_v51 = vmul.f32 %v4852_v12, %v1507_v16 }
 0x2dd   : > { %4143 = vpow2.f32 %v3529_v49  ;;  %v3553_v54 = vmul.f32 -1.442695, %v4926_v38  ;;  %v1526_v53 = vmul.f32 %v4852_v12, %v1488_v7  ;;  %v1527_v55 = vmul.f32 %v4852_v12, %v1489_v44 }
 0x2de   : > { %4145 = vpow2.f32 %v3530_v61  ;;  %v3554_v56 = vmul.f32 -1.442695, %v4933_v57  ;;  %v4941_v5 = vadd.f32 %v4865_v35, %v1544_v60  ;;  %v4944_v34 = vadd.f32 %v4865_v35, %v1545_v51 }
 0x2df   : > { %4147 = vpow2.f32 %v3525_v30  ;;  %v4948_v29 = vadd.f32 %v4865_v35, %v1526_v53  ;;  %v1512_v58 = vmul.f32 %v4847_v11, %v4773_v14  ;;  %v1513_v22 = vmul.f32 %v4847_v11, %v4780_v26 }
 0x2e0   : > { %4149 = vpow2.f32 %v3526_v6  ;;  %v3549_v18 = vmul.f32 -1.442695, %v4941_v5  ;;  %v3550_v20 = vmul.f32 -1.442695, %v4944_v34  ;;  %v1490_v21 = vmul.f32 %v4847_v11, %v4619_v37 }
 0x2e1   : > { %4151 = vpow2.f32 %v3553_v54  ;;  %v3531_v19 = vmul.f32 -1.442695, %v4948_v29  ;;  %v1550_v32 = vmul.f32 %v4852_v12, %v1512_v58  ;;  %v4961_v14 = vadd.f32 %v4865_v35, %v1527_v55 }
 0x2e2   : > { %4153 = vpow2.f32 %v3554_v56  ;;  %v1551_v49 = vmul.f32 %v4852_v12, %v1513_v22  ;;  %v1491_v26 = vmul.f32 %v4847_v11, %v4626_v39  ;;  %v1528_v37 = vmul.f32 %v4852_v12, %v1490_v21 }
 0x2e3   : > { %v4136_v25 = vpop.eup %4135  ;;  %4155 = vpow2.f32 %v3549_v18  ;;  %v4967_v30 = vadd.f32 %v4865_v35, %v1550_v32  ;;  %v1492_v28 = vmul.f32 %v4847_v11, %v4633_v40  ;;  %v3532_v7 = vmul.f32 -1.442695, %v4961_v14 }
 0x2e4   : > { %v4138_v59 = vpop.eup %4137  ;;  %v1712_v42 = vadd.f32 1.0, %v4136_v25  ;;  %4157 = vpow2.f32 %v3550_v20  ;;  %v1493_v39 = vmul.f32 %v4847_v11, %v4640_v41  ;;  %v4976_v51 = vadd.f32 %v4865_v35, %v1551_v49 }
 0x2e5   : > { %v4140_v61 = vpop.eup %4139  ;;  %v1713_v63 = vadd.f32 1.0, %v4138_v59  ;;  %4159 = vpow2.f32 %v3531_v19  ;;  %v1529_v54 = vmul.f32 %v4852_v12, %v1491_v26  ;;  %v3555_v40 = vmul.f32 -1.442695, %v4967_v30 }
 0x2e6   : > { %v4142_v6 = vpop.eup %4141  ;;  %4161 = vrcp.f32 %v1712_v42  ;;  %v1688_v23 = vadd.f32 1.0, %v4140_v61  ;;  %v4981_v55 = vadd.f32 %v4865_v35, %v1528_v37  ;;  %v1530_v41 = vmul.f32 %v4852_v12, %v1492_v28 }
 0x2e7   : > { %v4144_v2 = vpop.eup %4143  ;;  %4163 = vrcp.f32 %v1713_v63  ;;  %v1689_v16 = vadd.f32 1.0, %v4142_v6  ;;  %v1494_v20 = vmul.f32 %v4847_v11, %v4647_v45  ;;  %v1531_v32 = vmul.f32 %v4852_v12, %v1493_v39 }
 0x2e8   : > { %v4146_v44 = vpop.eup %4145  ;;  %4165 = vrcp.f32 %v1688_v23  ;;  %v1690_v60 = vadd.f32 1.0, %v4144_v2  ;;  %v1495_v21 = vmul.f32 %v4847_v11, %v4654_v46  ;;  %v4990_v42 = vadd.f32 %v4865_v35, %v1529_v54 }
 0x2e9   : > { %v4148_v53 = vpop.eup %4147  ;;  %4167 = vrcp.f32 %v1689_v16  ;;  %v1691_v56 = vadd.f32 1.0, %v4146_v44  ;;  %v1532_v49 = vmul.f32 %v4852_v12, %v1494_v20  ;;  %v1496_v63 = vmul.f32 %v4847_v11, %v4661_v1 }
 0x2ea   : > { %v4150_v58 = vpop.eup %4149  ;;  %4169 = vrcp.f32 %v1690_v60  ;;  %v1686_v18 = vadd.f32 1.0, %v4148_v53  ;;  %v1533_v45 = vmul.f32 %v4852_v12, %v1495_v21  ;;  %v4997_v46 = vadd.f32 %v4865_v35, %v1530_v41 }
 0x2eb   : > { %v4152_v22 = vpop.eup %4151  ;;  %4171 = vrcp.f32 %v1691_v56  ;;  %v1687_v19 = vadd.f32 1.0, %v4150_v58  ;;  %v1497_v23 = vmul.f32 %v4847_v11, %v4668_v4  ;;  %v5002_v16 = vadd.f32 %v4865_v35, %v1531_v32 }
 0x2ec   : > { %v4154_v25 = vpop.eup %4153  ;;  %4173 = vrcp.f32 %v1686_v18  ;;  %v1714_v59 = vadd.f32 1.0, %v4152_v22  ;;  %v5005_v39 = vadd.f32 %v4865_v35, %v1532_v49  ;;  %v3556_v1 = vmul.f32 -1.442695, %v4976_v51 }
 0x2ed   : > { %v4156_v26 = vpop.eup %4155  ;;  %4175 = vrcp.f32 %v1687_v19  ;;  %v1715_v61 = vadd.f32 1.0, %v4154_v25  ;;  %v3533_v60 = vmul.f32 -1.442695, %v4981_v55  ;;  %v5010_v54 = vadd.f32 %v4865_v35, %v1533_v45 }
 0x2ee   : > { %v4158_v37 = vpop.eup %4157  ;;  %4177 = vrcp.f32 %v1714_v59  ;;  %v1710_v6 = vadd.f32 1.0, %v4156_v26  ;;  %v1534_v56 = vmul.f32 %v4852_v12, %v1496_v63  ;;  %v1535_v58 = vmul.f32 %v4852_v12, %v1497_v23 }
 0x2ef   : > { %v4160_v28 = vpop.eup %4159  ;;  %4179 = vrcp.f32 %v1715_v61  ;;  %v1711_v2 = vadd.f32 1.0, %v4158_v37  ;;  %v3534_v22 = vmul.f32 -1.442695, %v4990_v42  ;;  %v3535_v21 = vmul.f32 -1.442695, %v4997_v46 }
 0x2f0   : > { %v4162_v44 = vpop.eup %4161  ;;  %4181 = vrcp.f32 %v1710_v6  ;;  %v1692_v20 = vadd.f32 1.0, %v4160_v28  ;;  %v5020_v25 = vmul.f32 -1.442695, %v5002_v16  ;;  %v5034_v45 = vadd.f32 %v4865_v35, %v1535_v58 }
 0x2f1   : > { %v4164_v53 = vpop.eup %4163  ;;  %v1808_v4 = vmul.f32 %v4162_v44, %v4884_v50  ;;  %4183 = vrcp.f32 %v1711_v2  ;;  %v5023_v50 = vmul.f32 -1.442695, %v5005_v39  ;;  %v1499_v28 = vmul.f32 %v4847_v11, %v4682_v13 }
 0x2f2   : > { %v4166_v18 = vpop.eup %4165  ;;  %v1809_v41 = vmul.f32 %v4164_v53, %v4887_v52  ;;  %4185 = vpow2.f32 %v3532_v7  ;;  %v5027_v52 = vmul.f32 -1.442695, %v5010_v54 }
 0x2f3   : > { %v4168_v19 = vpop.eup %4167  ;;  %v1784_v32 = vmul.f32 %v4166_v18, %v4890_v8  ;;  %4187 = vpow2.f32 %v3555_v40  ;;  %v5031_v8 = vadd.f32 %v4865_v35, %v1534_v56 }
 0x2f4   : > { %v4170_v59 = vpop.eup %4169  ;;  %v1827_v49 = vpack.c.bf16 %v1809_v41, %v1808_v4  ;;  %v1785_v26 = vmul.f32 %v4168_v19, %v4893_v3  ;;  %4189 = vpow2.f32 %v3556_v1 }
 0x2f5   : > { %v4172_v7 = vpop.eup %4171  ;;  %v1786_v61 = vmul.f32 %v4170_v59, %v4896_v10  ;;  %4191 = vrcp.f32 %v1692_v20  ;;  %v1498_v10 = vmul.f32 %v4847_v11, %v4675_v9 }
 0x2f6   : > { %v4174_v63 = vpop.eup %4173  ;;  %v1930_v37 = vshrl.u32 %v1827_v49, 16  ;;  %v1815_v6 = vpack.c.bf16 %v1785_v26, %v1784_v32  ;;  %v1787_v23 = vmul.f32 %v4172_v7, %v4899_v15  ;;  %4193 = vpow2.f32 %v3533_v60 }
 0x2f7   : > { %v4176_v3 = vpop.eup %4175  ;;  %v1782_v40 = vmul.f32 %v4174_v63, %v4902_v62  ;;  %v1933_v1 = vshll.u32 %v1827_v49, 16  ;;  %4195 = vpow2.f32 %v3534_v22 }
 0x2f8   : > { %v4178_v2 = vpop.eup %4177  ;;  %v5042_v44 = vrot.slane %v1930_v37, 7  ;;  %v1846_v53 = vshrl.u32 %v1815_v6, 16  ;;  %v1816_v4 = vpack.c.bf16 %v1787_v23, %v1786_v61  ;;  %v1849_v58 = vshll.u32 %v1815_v6, 16 }
 0x2f9   : > { %v4180_v56 = vpop.eup %4179  ;;  %v1783_v15 = vmul.f32 %v4176_v3, %v4905_v0  ;;  %v1810_v18 = vmul.f32 %v4178_v2, %v4926_v38  ;;  %4197 = vpow2.f32 %v3535_v21  ;;  %v1537_v23 = vmul.f32 %v4852_v12, %v1499_v28 }
 0x2fa   : > { %v4182_v62 = vpop.eup %4181  ;;  %v1935_v60 = vor.u32 %v1933_v1, %v5042_v44  ;;  %v5047_v9 = vrot.slane %v1846_v53, 7  ;;  %v1853_v41 = vshrl.u32 %v1816_v4, 16  ;;  %v1856_v13 = vshll.u32 %v1816_v4, 16 }
 0x2fb   : > { %v4184_v20 = vpop.eup %4183  ;;  %v1814_v19 = vpack.c.bf16 %v1783_v15, %v1782_v40  ;;  %v1811_v32 = vmul.f32 %v4180_v56, %v4933_v57  ;;  %v1806_v59 = vmul.f32 %v4182_v62, %v4941_v5  ;;  %v1536_v5 = vmul.f32 %v4852_v12, %v1498_v10 }
 0x2fc   : > { %v4186_v49 = vpop.eup %4185  ;;  %v5053_v0 = vsel %vm4823_vm4, 0, %v1935_v60  ;;  %v1851_v38 = vor.u32 %v1849_v58, %v5047_v9  ;;  %v5056_v22 = vrot.slane %v1853_v41, 7  ;;  %v1807_v26 = vmul.f32 %v4184_v20, %v4944_v34 }
 0x2fd   : > { %2464 = vrot.lane.b32.xlu0 %v5053_v0, %s4276_s11  ;;  %v1839_v7 = vshrl.u32 %v1814_v19, 16  ;;  %v1828_v61 = vpack.c.bf16 %v1811_v32, %v1810_v18  ;;  %v1693_v57 = vadd.f32 1.0, %v4186_v49  ;;  %v4188_v21 = vpop.eup %4187  ;;  %v1842_v40 = vshll.u32 %v1814_v19, 16 }
 0x2fe   : > { %v5064_v63 = vsel %vm4823_vm4, 0, %v1851_v38  ;;  %v1858_v37 = vor.u32 %v1856_v13, %v5056_v22  ;;  %v1826_v6 = vpack.c.bf16 %v1807_v26, %v1806_v59  ;;  %v4190_v3 = vpop.eup %4189  ;;  %v1716_v56 = vadd.f32 1.0, %v4188_v21 }
 0x2ff   : > { %2440 = vrot.lane.b32.xlu1 %v5064_v63, %s4276_s11  ;;  %v5070_v34 = vrot.slane %v1839_v7, 7  ;;  %v1937_v2 = vshrl.u32 %v1828_v61, 16  ;;  %4199 = vrcp.f32 %v1693_v57  ;;  %v4192_v10 = vpop.eup %4191  ;;  %v1940_v53 = vshll.u32 %v1828_v61, 16 }
 0x300   : > { %v5074_v1 = vsel %vm4823_vm4, 0, %v1858_v37  ;;  %v1923_v4 = vshrl.u32 %v1826_v6, 16  ;;  %v4194_v58 = vpop.eup %4193  ;;  %v1717_v18 = vadd.f32 1.0, %v4190_v3  ;;  %4201 = vpow2.f32 %v5020_v25 }
 0x301   : > { %2442 = vrot.lane.b32.xlu0 %v5074_v1, %s4276_s11  ;;  %v1844_v28 = vor.u32 %v1842_v40, %v5070_v34  ;;  %v5079_v15 = vrot.slane %v1937_v2, 7  ;;  %v1926_v60 = vshll.u32 %v1826_v6, 16  ;;  %4203 = vrcp.f32 %v1716_v56  ;;  %v4196_v13 = vpop.eup %4195 }
 0x302   : > { %v5082_v62 = vrot.slane %v1923_v4, 7  ;;  %v1694_v41 = vadd.f32 1.0, %v4194_v58  ;;  %4205 = vrcp.f32 %v1717_v18  ;;  %v5090_v32 = vadd.f32 %v4865_v35, %v1536_v5 }
 0x303   : > { %v5086_v20 = vsel %vm4823_vm4, 0, %v1844_v28  ;;  %v1942_v19 = vor.u32 %v1940_v53, %v5079_v15  ;;  %v1695_v59 = vadd.f32 1.0, %v4196_v13  ;;  %v5096_v49 = vadd.f32 %v4865_v35, %v1537_v23  ;;  %v4198_v38 = vpop.eup %4197 }
 0x304   : > { %2360 = vrot.lane.b32.xlu1 %v5086_v20, %s4278_s13  ;;  %v1928_v25 = vor.u32 %v1926_v60, %v5082_v62  ;;  %4207 = vrcp.f32 %v1694_v41  ;;  %v3539_v7 = vmul.f32 -1.442695, %v5031_v8  ;;  %v1696_v61 = vadd.f32 1.0, %v4198_v38 }
 0x305   : > { %v5100_v26 = vsel %vm4823_vm4, 0, %v1942_v19  ;;  %4209 = vpow2.f32 %v5023_v50  ;;  %v3540_v57 = vmul.f32 -1.442695, %v5034_v45  ;;  %v3541_v21 = vmul.f32 -1.442695, %v5090_v32 }
 0x306   : > { %2466 = vrot.lane.b32.xlu0 %v5100_v26, %s4276_s11  ;;  %4211 = vrcp.f32 %v1695_v59  ;;  %v5109_v5 = vsel %vm4823_vm4, 0, %v1928_v25  ;;  %v1504_v50 = vmul.f32 %v4847_v11, %v4717_v43  ;;  %v1788_v37 = vmul.f32 %v4192_v10, %v4948_v29 }
 0x307   : > { %4213 = vpow2.f32 %v5027_v52  ;;  %v3542_v6 = vmul.f32 -1.442695, %v5096_v49  ;;  %v1505_v23 = vmul.f32 %v4847_v11, %v4724_v48 }
 0x308   : > { %2384 = vrot.lane.b32.xlu1 %v5109_v5, %s4278_s13  ;;  %4215 = vrcp.f32 %v1696_v61  ;;  %v1542_v52 = vmul.f32 %v4852_v12, %v1504_v50 }
 0x309   : > { %v4200_v3 = vpop.eup %4199  ;;  %4217 = vpow2.f32 %v3539_v7  ;;  %v1543_v43 = vmul.f32 %v4852_v12, %v1505_v23 }
 0x30a   : > { %v1789_v40 = vmul.f32 %v4200_v3, %v4961_v14  ;;  %4219 = vpow2.f32 %v3540_v57  ;;  %v4202_v2 = vpop.eup %4201  ;;  %v5125_v53 = vadd.f32 %v4865_v35, %v1542_v52 }
 0x30b   : > { %4221 = vpow2.f32 %v3541_v21  ;;  %v4204_v29 = vpop.eup %4203  ;;  %v1697_v48 = vadd.f32 1.0, %v4202_v2  ;;  %v5130_v4 = vadd.f32 %v4865_v35, %v1543_v43 }
 0x30c   : > { %v1817_v10 = vpack.c.bf16 %v1789_v40, %v1788_v37  ;;  %2362 = vrot.lane.b32.xlu1 %v5064_v63, %s4278_s13  ;;  %4223 = vpow2.f32 %v3542_v6  ;;  %v4206_v56 = vpop.eup %4205  ;;  %v1812_v14 = vmul.f32 %v4204_v29, %v4967_v30  ;;  %v3547_v58 = vmul.f32 -1.442695, %v5125_v53 }
 0x30d   : > { %v1813_v60 = vmul.f32 %v4206_v56, %v4976_v51  ;;  %4225 = vrcp.f32 %v1697_v48  ;;  %v3548_v19 = vmul.f32 -1.442695, %v5130_v4 }
 0x30e   : > { %v4208_v28 = vpop.eup %4207  ;;  %v1860_v18 = vshrl.u32 %v1817_v10, 16  ;;  %4227 = vpow2.f32 %v3547_v58  ;;  %v1863_v38 = vshll.u32 %v1817_v10, 16 }
 0x30f   : > { %v4210_v41 = vpop.eup %4209  ;;  %v1790_v13 = vmul.f32 %v4208_v28, %v4981_v55  ;;  %v1829_v7 = vpack.c.bf16 %v1813_v60, %v1812_v14  ;;  %4229 = vpow2.f32 %v3548_v19 }
 0x310   : > { %v4212_v25 = vpop.eup %4211  ;;  %v5137_v59 = vrot.slane %v1860_v18, 7  ;;  %2386 = vrot.lane.b32.xlu1 %v5053_v0, %s4278_s13  ;;  %v1698_v30 = vadd.f32 1.0, %v4210_v41 }
 0x311   : > { %v4214_v61 = vpop.eup %4213  ;;  %v1791_v57 = vmul.f32 %v4212_v25, %v4990_v42  ;;  %v1944_v55 = vshrl.u32 %v1829_v7, 16  ;;  %v1947_v6 = vshll.u32 %v1829_v7, 16 }
 0x312   : > { %v4216_v51 = vpop.eup %4215  ;;  %v1865_v21 = vor.u32 %v1863_v38, %v5137_v59  ;;  %v1699_v50 = vadd.f32 1.0, %v4214_v61  ;;  %4231 = vrcp.f32 %v1698_v30 }
 0x313   : > { %v4218_v37 = vpop.eup %4217  ;;  %v1818_v23 = vpack.c.bf16 %v1791_v57, %v1790_v13  ;;  %v5147_v40 = vrot.slane %v1944_v55, 7  ;;  %v1792_v56 = vmul.f32 %v4216_v51, %v4997_v46 }
 0x314   : > { %v4220_v3 = vpop.eup %4219  ;;  %v5145_v52 = vsel %vm4823_vm4, 0, %v1865_v21  ;;  %2364 = vrot.lane.b32.xlu1 %v5074_v1, %s4278_s13  ;;  %4233 = vrcp.f32 %v1699_v50  ;;  %v1700_v42 = vadd.f32 1.0, %v4218_v37 }
 0x315   : > { %6280 = vst [vmem:[#allocation3_spill] sm:$0xff] %v5145_v52  ;;  %v4222_v43 = vpop.eup %4221  ;;  %2444 = vrot.lane.b32.xlu0 %v5145_v52, %s4276_s11  ;;  %v1867_v2 = vshrl.u32 %v1818_v23, 16  ;;  %v1701_v29 = vadd.f32 1.0, %v4220_v3  ;;  %v1949_v48 = vor.u32 %v1947_v6, %v5147_v40  ;;  %v1870_v28 = vshll.u32 %v1818_v23, 16 }
 0x316   : > { %v4224_v10 = vpop.eup %4223  ;;  %4235 = vrcp.f32 %v1700_v42  ;;  %v1702_v14 = vadd.f32 1.0, %v4222_v43 }
 0x317   : > { %v5155_v58 = vrot.slane %v1867_v2, 7  ;;  %4237 = vrcp.f32 %v1701_v29  ;;  %v1703_v18 = vadd.f32 1.0, %v4224_v10  ;;  %v4226_v60 = vpop.eup %4225  ;;  %v5159_v41 = vsel %vm4823_vm4, 0, %v1949_v48 }
 0x318   : > { %2388 = vrot.lane.b32.xlu1 %v5100_v26, %s4278_s13  ;;  %4239 = vrcp.f32 %v1702_v14  ;;  %v4228_v13 = vpop.eup %4227  ;;  %v1793_v19 = vmul.f32 %v4226_v60, %v5002_v16 }
 0x319   : > { %2468 = vrot.lane.b32.xlu0 %v5159_v41, %s4276_s11  ;;  %v1872_v46 = vor.u32 %v1870_v28, %v5155_v58  ;;  %4241 = vrcp.f32 %v1703_v18  ;;  %v1708_v25 = vadd.f32 1.0, %v4228_v13  ;;  %v4230_v38 = vpop.eup %4229 }
 0x31a   : > { %v1819_v7 = vpack.c.bf16 %v1793_v19, %v1792_v56  ;;  %v1709_v61 = vadd.f32 1.0, %v4230_v38 }
 0x31b   : > { %v5169_v30 = vsel %vm4823_vm4, 0, %v1872_v46  ;;  %4243 = vrcp.f32 %v1708_v25 }
 0x31c   : > { %6281 = vst [vmem:[#allocation4_spill] sm:$0xff] %v5169_v30  ;;  %2366 = vrot.lane.b32.xlu1 %v5145_v52, %s4278_s13  ;;  %v4232_v57 = vpop.eup %4231  ;;  %v1874_v51 = vshrl.u32 %v1819_v7, 16  ;;  %4245 = vrcp.f32 %v1709_v61  ;;  %v1877_v50 = vshll.u32 %v1819_v7, 16 }
 0x31d   : > { %2446 = vrot.lane.b32.xlu0 %v5169_v30, %s4276_s11  ;;  %v1794_v16 = vmul.f32 %v4232_v57, %v5005_v39  ;;  %v5215_v57 = vsel %vm4823_vm4, %v5070_v34, 0 }
 0x31e   : > { %v4234_v21 = vpop.eup %4233  ;;  %v5176_v55 = vrot.slane %v1874_v51, 7  ;;  %v2283_v34 = vrot.slane %v5215_v57, 1 }
 0x31f   : > { %v1795_v37 = vmul.f32 %v4234_v21, %v5010_v54 }
 0x320   : > { %v4236_v6 = vpop.eup %4235  ;;  %v1879_v3 = vor.u32 %v1877_v50, %v5176_v55 }
 0x321   : > { %v4238_v23 = vpop.eup %4237  ;;  %2390 = vrot.lane.b32.xlu0 %v5159_v41, %s4278_s13  ;;  %v1820_v42 = vpack.c.bf16 %v1795_v37, %v1794_v16  ;;  %v1796_v43 = vmul.f32 %v4236_v6, %v5031_v8  ;;  %v2282_v16 = vrot.slane %v5086_v20, 1  ;;  %v5231_v6 = vsel %vm4823_vm4, %v5082_v62, 0 }
 0x322   : > { %v4240_v2 = vpop.eup %4239  ;;  %v1797_v29 = vmul.f32 %v4238_v23, %v5034_v45  ;;  %v5186_v10 = vsel %vm4823_vm4, 0, %v1879_v3  ;;  %v2319_v62 = vrot.slane %v5231_v6, 1 }
 0x323   : > { %v4242_v39 = vpop.eup %4241  ;;  %6282 = vst [vmem:[#allocation5_spill] sm:$0xff] %v5186_v10  ;;  %v1881_v48 = vshrl.u32 %v1820_v42, 16  ;;  %v1798_v54 = vmul.f32 %v4240_v2, %v5090_v32  ;;  %2448 = vrot.lane.b32.xlu1 %v5186_v10, %s4276_s11  ;;  %v1884_v45 = vshll.u32 %v1820_v42, 16  ;;  %v2284_v42 = vsel %vm2278_vm5, %v2282_v16, %v2283_v34 }
 0x324   : > { %v1821_v56 = vpack.c.bf16 %v1797_v29, %v1796_v43  ;;  %v1799_v14 = vmul.f32 %v4242_v39, %v5096_v49  ;;  %v2318_v43 = vrot.slane %v5109_v5, 1  ;;  %v5312_v16 = vsel %vm4823_vm4, %v5079_v15, 0  ;;  %v4119_v15 = vld [vmem:[%s6241_s4 + $0x50] sm:$0xff]  }
 0x325   : > { %2368 = vrot.lane.b32.xlu0 %v5169_v30, %s4278_s13  ;;  %v5194_v8 = vrot.slane %v1881_v48, 7  ;;  %v4244_v28 = vpop.eup %4243  ;;  %v2324_v34 = vrot.slane %v5100_v26, 1 }
 0x326   : > { %v1888_v18 = vshrl.u32 %v1821_v56, 16  ;;  %v1822_v60 = vpack.c.bf16 %v1799_v14, %v1798_v54  ;;  %v1804_v46 = vmul.f32 %v4244_v28, %v5125_v53  ;;  %v4246_v32 = vpop.eup %4245  ;;  %v1891_v25 = vshll.u32 %v1821_v56, 16 }
 0x327   : > { %v1886_v13 = vor.u32 %v1884_v45, %v5194_v8  ;;  %v1805_v7 = vmul.f32 %v4246_v32, %v5130_v4  ;;  %v5254_v54 = vsel %vm4823_vm4, %v5047_v9, 0  ;;  %v5257_v56 = vsel %vm2278_vm5, %v2318_v43, %v2319_v62  ;;  %v4115_v32 = vld [vmem:[%s6241_s4 + $0x40] sm:$0xff]   ;;  %v4121_v43 = vld [vmem:[%s6241_s4 + $0x58] sm:$0xff]  }
 0x328   : > { %v5198_v19 = vrot.slane %v1888_v18, 7  ;;  %v1895_v38 = vshrl.u32 %v1822_v60, 16  ;;  %v1898_v51 = vshll.u32 %v1822_v60, 16  ;;  %6286 = vst [vmem:[#allocation9_spill] sm:$0xff] %v5257_v56  ;;  %v2285_v28 = vrot.slane %v5064_v63, 1  ;;  %3688 = vmatprep.subr.bf16.mxu0 %v4115_v32  ;;  %4058 = vmatprep.subr.bf16.mxu1 %v4115_v32 }
 0x329   : > { %2370 = vrot.lane.b32.xlu0 %v5186_v10, %s4278_s13  ;;  %v5204_v49 = vsel %vm4823_vm4, 0, %v1886_v13  ;;  %v1825_v21 = vpack.c.bf16 %v1805_v7, %v1804_v46  ;;  %v2286_v60 = vrot.slane %v5254_v54, 1  ;;  %v5273_v9 = vsel %vm4823_vm4, %v5042_v44, 0 }
 0x32a   : > { %6283 = vst [vmem:[#allocation6_spill] sm:$0xff] %v5204_v49  ;;  %2450 = vrot.lane.b32.xlu1 %v5204_v49, %s4276_s11  ;;  %v1893_v61 = vor.u32 %v1891_v25, %v5198_v19  ;;  %v5210_v53 = vrot.slane %v1895_v38, 7  ;;  %v2321_v46 = vrot.slane %v5053_v0, 1  ;;  %v4116_v25 = vld [vmem:[%s6241_s4] sm:$0xff]   ;;  %v2322_v38 = vrot.slane %v5273_v9, 1 }
 0x32b   : > { %v1916_v37 = vshrl.u32 %v1825_v21, 16  ;;  %v1919_v3 = vshll.u32 %v1825_v21, 16  ;;  %v5276_v13 = vsel %vm2278_vm5, %v2285_v28, %v2286_v60  ;;  %v5292_v44 = vsel %vm4823_vm4, %v5056_v22, 0  ;;  %3689 = vmatpush3.bf16.msra.mxu0 %v4116_v25  ;;  %4066 = vmatpush3.bf16.msra.mxu1 %v4116_v25  ;;  %v4118_v22 = vld [vmem:[%s6241_s4 + $0x8] sm:$0xff]  }
 0x32c   : > { %v5222_v4 = vsel %vm4823_vm4, 0, %v1893_v61  ;;  %v1900_v50 = vor.u32 %v1898_v51, %v5210_v53  ;;  %6288 = vst [vmem:[#allocation11_spill] sm:$0xff] %v5276_v13  ;;  %v5295_v7 = vsel %vm2278_vm5, %v2321_v46, %v2322_v38  ;;  %v2288_v61 = vrot.slane %v5074_v1, 1  ;;  %v4117_v51 = vld [vmem:[%s6241_s4 + $0x48] sm:$0xff]   ;;  %v4123_v46 = vld [vmem:[%s6241_s4 + $0x60] sm:$0xff]  }
 0x32d   : > { %2372 = vrot.lane.b32.xlu0 %v5204_v49, %s4278_s13  ;;  %6284 = vst [vmem:[#allocation7_spill] sm:$0xff] %v5222_v4  ;;  %v1918_v23 = vrot.slane %v1916_v37, 7  ;;  %6289 = vst [vmem:[#allocation12_spill] sm:$0xff] %v5295_v7  ;;  %v2289_v21 = vrot.slane %v5292_v44, 1  ;;  %3690 = vmatprep.subr.bf16.mxu0 %v4117_v51  ;;  %v2291_v62 = vrot.slane %v5145_v52, 1  ;;  %v5358_v28 = vsel %vm4823_vm4, %v5147_v40, 0 }
 0x32e   : > { %2452 = vrot.lane.b32.xlu1 %v5222_v4, %s4276_s11  ;;  %v5238_v2 = vsel %vm4823_vm4, 0, %v1900_v50  ;;  %v1500_v50 = vmul.f32 %v4847_v11, %v4689_v17  ;;  %4059 = vmatprep.subr.bf16.mxu1 %v4117_v51  ;;  %v4120_v17 = vld [vmem:[%s6241_s4 + $0x10] sm:$0xff]   ;;  %v2405_v25 = vrot.slane %v5159_v41, 1  ;;  %v4124_v40 = vld [vmem:[%s6241_s4 + $0x20] sm:$0xff]   ;;  %v2406_v51 = vrot.slane %v5358_v28, 1 }
 0x32f   : > { %6285 = vst [vmem:[#allocation8_spill] sm:$0xff] %v5238_v2  ;;  %v1921_v29 = vor.u32 %v1919_v3, %v1918_v23  ;;  %v5242_v39 = vsel %vm4823_vm4, %v1918_v23, 0  ;;  %v5317_v37 = vsel %vm2278_vm5, %v2288_v61, %v2289_v21  ;;  %v1501_v23 = vmul.f32 %v4847_v11, %v4696_v27  ;;  %3691 = vmatpush3.bf16.msra.mxu0 %v4118_v22  ;;  %v4125_v21 = vld [vmem:[%s6241_s4 + $0x68] sm:$0xff]  }
 0x330   : > { %v2316_v45 = vrot.slane %v5242_v39, 1  ;;  %6290 = vst [vmem:[#allocation13_spill] sm:$0xff] %v5317_v37  ;;  %4067 = vmatpush3.bf16.msra.mxu1 %v4118_v22  ;;  %v2325_v3 = vrot.slane %v5312_v16, 1  ;;  %v5336_v27 = vsel %vm4823_vm4, %v5137_v59, 0  ;;  %3692 = vmatprep.subr.bf16.mxu0 %v4119_v15  ;;  %v4122_v59 = vld [vmem:[%s6241_s4 + $0x18] sm:$0xff]   ;;  %v5381_v61 = vsel %vm4823_vm4, %v5155_v58, 0 }
 0x331   : > { %2408 = vrot.lane.b32.xlu0 %v2284_v42, %s4277_s12  ;;  %v5249_v48 = vsel %vm4823_vm4, 0, %v1921_v29  ;;  %4060 = vmatprep.subr.bf16.mxu1 %v4119_v15  ;;  %v2294_v22 = vrot.slane %v5169_v30, 1  ;;  %v2295_v58 = vrot.slane %v5381_v61, 1  ;;  %v5404_v15 = vsel %vm4823_vm4, %v5176_v55, 0  ;;  %v4127_v55 = vld [vmem:[%s6241_s4 + $0x70] sm:$0xff]  }
 0x332   : > { %2454 = vrot.lane.b32.xlu1 %v5238_v2, %s4276_s11  ;;  %v2315_v14 = vrot.slane %v5249_v48, 1  ;;  %v5343_v29 = vsel %vm2278_vm5, %v2324_v34, %v2325_v3  ;;  %v2297_v3 = vrot.slane %v5186_v10, 1 }
 0x333   : > { %6291 = vst [vmem:[#allocation14_spill] sm:$0xff] %v5343_v29  ;;  %3693 = vmatpush3.bf16.msra.mxu0 %v4120_v17 }
 0x334   : > { %v5265_v18 = vsel %vm2278_vm5, %v2315_v14, %v2316_v45  ;;  %v1539_v14 = vmul.f32 %v4852_v12, %v1501_v23  ;;  %4068 = vmatpush3.bf16.msra.mxu1 %v4120_v17  ;;  %v2292_v45 = vrot.slane %v5336_v27, 1  ;;  %3694 = vmatprep.subr.bf16.mxu0 %v4121_v43  ;;  %v4126_v23 = vld [vmem:[%s6241_s4 + $0x28] sm:$0xff]   ;;  %v5407_v17 = vsel %vm2278_vm5, %v2294_v22, %v2295_v58  ;;  %v4263_v58 = vld [vmem:[%s6239_s2] ss:$0 sm:$0xff] }
 0x335   : > { %2432 = vrot.lane.b32.xlu0 %v5257_v56, %s4277_s12  ;;  %6287 = vst [vmem:[#allocation10_spill] sm:$0xff] %v5265_v18  ;;  %4061 = vmatprep.subr.bf16.mxu1 %v4121_v43  ;;  %6294 = vst [vmem:[#allocation17_spill] sm:$0xff] %v5407_v17  ;;  %v1503_v43 = vmul.f32 %v4847_v11, %v4710_v36 }
 0x336   : > { %2351 = vrot.lane.b32.xlu1 %v5265_v18, %s4276_s11  ;;  %v5367_v32 = vsel %vm2278_vm5, %v2291_v62, %v2292_v45  ;;  %v5371_v38 = vadd.f32 %v4865_v35, %v1539_v14  ;;  %v2298_v62 = vrot.slane %v5404_v15, 1  ;;  %v5428_v14 = vsel %vm4823_vm4, %v5194_v8, 0  ;;  %v4129_v8 = vld [vmem:[%s6241_s4 + $0x78] sm:$0xff]  }
 0x337   : > { %6292 = vst [vmem:[#allocation15_spill] sm:$0xff] %v5367_v32  ;;  %3695 = vmatpush3.bf16.msra.mxu0 %v4122_v59 }
 0x338   : > { %4069 = vmatpush3.bf16.msra.mxu1 %v4122_v59  ;;  %3696 = vmatprep.subr.bf16.mxu0 %v4123_v46  ;;  %v3544_v34 = vmul.f32 -1.442695, %v5371_v38  ;;  %v5431_v36 = vsel %vm2278_vm5, %v2297_v3, %v2298_v62  ;;  %v2169_v59 = vshll.u32 %v5249_v48, 16 }
 0x339   : > { %2410 = vrot.lane.b32.xlu0 %v5276_v13, %s4277_s12  ;;  %4062 = vmatprep.subr.bf16.mxu1 %v4123_v46  ;;  %6295 = vst [vmem:[#allocation18_spill] sm:$0xff] %v5431_v36  ;;  %v1541_v46 = vmul.f32 %v4852_v12, %v1503_v43  ;;  %v2174_v43 = vshll.u32 %v5242_v39, 16 }
 0x33a   : > { %2329 = vrot.lane.b32.xlu1 %v2284_v42, %s4276_s11  ;;  %v1538_v42 = vmul.f32 %v4852_v12, %v1500_v50  ;;  %v5392_v50 = vsel %vm2278_vm5, %v2405_v25, %v2406_v51  ;;  %v2301_v25 = vrot.slane %v5428_v14, 1  ;;  %v5451_v51 = vsel %vm4823_vm4, %v5198_v19, 0 }
 0x33b   : > { %6293 = vst [vmem:[#allocation16_spill] sm:$0xff] %v5392_v50  ;;  %3697 = vmatpush3.bf16.msra.mxu0 %v4124_v40  ;;  %v2049_v19 = vshll.u32 %v5064_v63, 16  ;;  %v2304_v3 = vrot.slane %v5451_v51, 1 }
 0x33c   : > { %v5361_v60 = vadd.f32 %v4865_v35, %v1538_v42  ;;  %4070 = vmatpush3.bf16.msra.mxu1 %v4124_v40  ;;  %v1502_v42 = vmul.f32 %v4847_v11, %v4703_v31  ;;  %3698 = vmatprep.subr.bf16.mxu0 %v4125_v21  ;;  %v4128_v31 = vld [vmem:[%s6241_s4 + $0x30] sm:$0xff]   ;;  %v2300_v11 = vrot.slane %v5204_v49, 1  ;;  %v4130_v40 = vld [vmem:[%s6241_s4 + $0x38] sm:$0xff]  }
 0x33d   : > { %2434 = vrot.lane.b32.xlu0 %v5295_v7, %s4277_s12  ;;  %4063 = vmatprep.subr.bf16.mxu1 %v4125_v21  ;;  %v2171_v21 = vrot.slane %v2169_v59, 1  ;;  %v2051_v39 = vrot.slane %v2049_v19, 1 }
 0x33e   : > { %2353 = vrot.lane.b32.xlu1 %v5257_v56, %s4276_s11  ;;  %v3543_v35 = vmul.f32 -1.442695, %v5361_v60  ;;  %v1540_v45 = vmul.f32 %v4852_v12, %v1502_v42  ;;  %v2037_v12 = vshll.u32 %v5086_v20, 16  ;;  %v5455_v22 = vsel %vm2278_vm5, %v2300_v11, %v2301_v25 }
 0x33f   : > { %3699 = vmatpush3.bf16.msra.mxu0 %v4126_v23  ;;  %6296 = vst [vmem:[#allocation19_spill] sm:$0xff] %v5455_v22  ;;  %v2167_v42 = vshrl.u32 %v5249_v48, 16  ;;  %v2193_v25 = vshll.u32 %v5053_v0, 16 }
 0x340   : > { %4247 = vpow2.f32 %v3543_v35  ;;  %4071 = vmatpush3.bf16.msra.mxu1 %v4126_v23  ;;  %3700 = vmatprep.subr.bf16.mxu0 %v4127_v55  ;;  %v2303_v35 = vrot.slane %v5222_v4, 1  ;;  %v5466_v23 = vadd.f32 %v4263_v58, %v1541_v46  ;;  %v2039_v62 = vrot.slane %v2037_v12, 1 }
 0x341   : > { %2412 = vrot.lane.b32.xlu0 %v5317_v37, %s4277_s12  ;;  %4249 = vpow2.f32 %v3544_v34  ;;  %4064 = vmatprep.subr.bf16.mxu1 %v4127_v55  ;;  %v5461_v34 = vadd.f32 %v4263_v58, %v1540_v45  ;;  %v2172_v59 = vor.u32 %v2171_v21, %v2167_v42  ;;  %v2181_v45 = vshll.u32 %v5109_v5, 16 }
 0x342   : > { %2331 = vrot.lane.b32.xlu1 %v5276_v13, %s4276_s11  ;;  %v5474_v11 = vsel %vm2278_vm5, %v2303_v35, %v2304_v3  ;;  %v3546_v12 = vmul.f32 -1.442695, %v5466_v23  ;;  %v2035_v58 = vshrl.u32 %v5086_v20, 16  ;;  %v2047_v21 = vshrl.u32 %v5064_v63, 16 }
 0x343   : > { %3701 = vmatpush3.bf16.msra.mxu0 %v4128_v31  ;;  %6297 = vst [vmem:[#allocation20_spill] sm:$0xff] %v5474_v11  ;;  %v3545_v46 = vmul.f32 -1.442695, %v5461_v34  ;;  %v2054_v3 = vshll.u32 %v5254_v54, 16  ;;  %v2183_v47 = vrot.slane %v2181_v45, 1  ;;  %v2179_v54 = vshrl.u32 %v5109_v5, 16 }
 0x344   : > { %4072 = vmatpush3.bf16.msra.mxu1 %v4128_v31  ;;  %3702 = vmatprep.subr.bf16.mxu0 %v4129_v8 }
 0x345   : > { %2436 = vrot.lane.b32.xlu0 %v5343_v29, %s4277_s12  ;;  %4065 = vmatprep.subr.bf16.mxu1 %v4129_v8  ;;  %v2042_v8 = vshll.u32 %v5215_v57, 16  ;;  %v5491_v57 = vld [vmem:[%s6241_s4 + $0x80] sm:$0xff]   ;;  %4251 = vpow2.f32 %v3545_v46  ;;  %v2198_v46 = vshll.u32 %v5273_v9, 16 }
 0x346   : > { %2355 = vrot.lane.b32.xlu1 %v5295_v7, %s4276_s11  ;;  %4253 = vpow2.f32 %v3546_v12  ;;  %v2061_v7 = vshll.u32 %v5074_v1, 16 }
 0x347   : > { %3703 = vmatpush3.bf16.msra.mxu0 %v4130_v40 }
 0x348   : > { %4073 = vmatpush3.bf16.msra.mxu1 %v4130_v40  ;;  %v2176_v40 = vrot.slane %v2174_v43, 1  ;;  %v2040_v43 = vor.u32 %v2039_v62, %v2035_v58  ;;  %v2191_v62 = vshrl.u32 %v5053_v0, 16  ;;  %v5517_v58 = vpop.permute.xlu1 %4111 }
 0x349   : > { %2414 = vrot.lane.b32.xlu0 %v5367_v32, %s4277_s12  ;;  %3950 = vmatprep.subr.bf16.mxu1 %v5491_v57 }
 0x34a   : > { %2333 = vrot.lane.b32.xlu1 %v5317_v37, %s4276_s11  ;;  %v4248_v55 = vpop.eup %4247  ;;  %v5494_v19 = vsel %vm2021_vm6, %v2172_v59, %v2176_v40  ;;  %v2056_v59 = vrot.slane %v2054_v3, 1  ;;  %v2063_v40 = vrot.slane %v2061_v7, 1 }
 0x34b   : > { %v4250_v31 = vpop.eup %4249  ;;  %v1704_v35 = vadd.f32 1.0, %v4248_v55  ;;  %6298 = vst [vmem:[#allocation21_spill] sm:$0xff] %v5494_v19  ;;  %v2052_v55 = vor.u32 %v2051_v39, %v2047_v21  ;;  %v2184_v39 = vor.u32 %v2183_v47, %v2179_v54  ;;  %v2059_v47 = vshrl.u32 %v5074_v1, 16 }
 0x34c   : > { %v1705_v42 = vadd.f32 1.0, %v4250_v31  ;;  %v2186_v31 = vshll.u32 %v5231_v6, 16  ;;  %v2205_v6 = vshll.u32 %v5100_v26, 16  ;;  %v2210_v54 = vshll.u32 %v5312_v16, 16 }
 0x34d   : > { %2438 = vrot.lane.b32.xlu0 %v5392_v50, %s4277_s12  ;;  %v2044_v50 = vrot.slane %v2042_v8, 1  ;;  %4255 = vrcp.f32 %v1704_v35  ;;  %v5513_v8 = vsel %vm2021_vm6, %v2052_v55, %v2056_v59  ;;  %v2066_v35 = vshll.u32 %v5292_v44, 16 }
 0x34e   : > { %2416 = vrot.lane.b32.xlu1 %v5407_v17, %s4277_s12  ;;  %4257 = vrcp.f32 %v1705_v42  ;;  %v2188_v12 = vrot.slane %v2186_v31, 1  ;;  %v2207_v21 = vrot.slane %v2205_v6, 1  ;;  %v2064_v3 = vor.u32 %v2063_v40, %v2059_v47 }
 0x34f   : > { %v5506_v45 = vsel %vm2021_vm6, %v2040_v43, %v2044_v50  ;;  %v2200_v50 = vrot.slane %v2198_v46, 1  ;;  %v2073_v42 = vshll.u32 %v5145_v52, 16  ;;  %v2203_v55 = vshrl.u32 %v5100_v26, 16  ;;  %v5536_v46 = vpop.permute.xlu1 %2502 }
 0x350   : > { %v5520_v9 = vsel %vm2021_vm6, %v2184_v39, %v2188_v12  ;;  %v2068_v31 = vrot.slane %v2066_v35, 1  ;;  %v2212_v16 = vrot.slane %v2210_v54, 1  ;;  %v2078_v47 = vshll.u32 %v5336_v27, 16 }
 0x351   : > { %2357 = vrot.lane.b32.xlu0 %v5343_v29, %s4276_s11  ;;  %v2195_v29 = vrot.slane %v2193_v25, 1  ;;  %v2208_v59 = vor.u32 %v2207_v21, %v2203_v55  ;;  %v2075_v6 = vrot.slane %v2073_v42, 1  ;;  %v2393_v27 = vshrl.u32 %v5159_v41, 16 }
 0x352   : > { %2418 = vrot.lane.b32.xlu1 %v5431_v36, %s4277_s12  ;;  %v5539_v39 = vsel %vm2021_vm6, %v2064_v3, %v2068_v31  ;;  %v2400_v54 = vshll.u32 %v5358_v28, 16 }
 0x353   : > { %v2196_v25 = vor.u32 %v2195_v29, %v2191_v62  ;;  %v4252_v29 = vpop.eup %4251  ;;  %v5549_v3 = vsel %vm2021_vm6, %v2208_v59, %v2212_v16 }
 0x354   : > { %v4254_v43 = vpop.eup %4253  ;;  %v1706_v12 = vadd.f32 1.0, %v4252_v29  ;;  %v5553_v29 = vpop.permute.xlu0 %2214  ;;  %v2402_v16 = vrot.slane %v2400_v54, 1 }
 0x355   : > { %2335 = vrot.lane.b32.xlu0 %v5367_v32, %s4276_s11  ;;  %v5527_v7 = vsel %vm2021_vm6, %v2196_v25, %v2200_v50  ;;  %v2395_v25 = vshll.u32 %v5159_v41, 16  ;;  %v1707_v40 = vadd.f32 1.0, %v4254_v43  ;;  %v2071_v50 = vshrl.u32 %v5145_v52, 16 }
 0x356   : > { %2420 = vrot.lane.b32.xlu1 %v5455_v22, %s4277_s12  ;;  %v2085_v43 = vshll.u32 %v5169_v30, 16  ;;  %4259 = vrcp.f32 %v1706_v12  ;;  %v5571_v41 = vsel %vm4823_vm4, %v5210_v53, 0  ;;  %v2090_v12 = vshll.u32 %v5381_v61, 16 }
 0x357   : > { %v4256_v44 = vpop.eup %4255  ;;  %v2076_v42 = vor.u32 %v2075_v6, %v2071_v50  ;;  %v2397_v55 = vrot.slane %v2395_v25, 1  ;;  %4261 = vrcp.f32 %v1707_v40  ;;  %v2083_v25 = vshrl.u32 %v5169_v30, 16 }
 0x358   : > { %v4258_v62 = vpop.eup %4257  ;;  %v1800_v35 = vmul.f32 %v4256_v44, %v5361_v60  ;;  %v2097_v44 = vshll.u32 %v5186_v10, 16  ;;  %v2087_v6 = vrot.slane %v2085_v43, 1  ;;  %v2306_v40 = vrot.slane %v5238_v2, 1 }
 0x359   : > { %2337 = vrot.lane.b32.xlu0 %v5407_v17, %s4276_s11  ;;  %v1801_v21 = vmul.f32 %v4258_v62, %v5371_v38  ;;  %v2080_v38 = vrot.slane %v2078_v47, 1  ;;  %v2398_v59 = vor.u32 %v2397_v55, %v2393_v27  ;;  %v2307_v53 = vrot.slane %v5571_v41, 1 }
 0x35a   : > { %2422 = vrot.lane.b32.xlu1 %v5474_v11, %s4277_s12  ;;  %v2099_v47 = vrot.slane %v2097_v44, 1  ;;  %v2095_v55 = vshrl.u32 %v5186_v10, 16  ;;  %v2102_v61 = vshll.u32 %v5404_v15, 16  ;;  %v2109_v43 = vshll.u32 %v5204_v49, 16 }
 0x35b   : > { %v1823_v31 = vpack.c.bf16 %v1801_v21, %v1800_v35  ;;  %v5566_v62 = vsel %vm2021_vm6, %v2076_v42, %v2080_v38  ;;  %v5586_v21 = vsel %vm2021_vm6, %v2398_v59, %v2402_v16  ;;  %v2088_v42 = vor.u32 %v2087_v6, %v2083_v25 }
 0x35c   : > { %v2092_v38 = vrot.slane %v2090_v12, 1  ;;  %v5594_v54 = vsel %vm2278_vm5, %v2306_v40, %v2307_v53  ;;  %v2100_v44 = vor.u32 %v2099_v47, %v2095_v55  ;;  %v2104_v25 = vrot.slane %v2102_v61, 1 }
 0x35d   : > { %2339 = vrot.lane.b32.xlu0 %v5431_v36, %s4276_s11  ;;  %v1902_v35 = vshrl.u32 %v1823_v31, 16  ;;  %6299 = vst [vmem:[#allocation22_spill] sm:$0xff] %v5594_v54  ;;  %v2111_v12 = vrot.slane %v2109_v43, 1  ;;  %v4113_v52 = vunpack.i.l.bf16 %v5517_v58 }
 0x35e   : > { %2238 = vrot.lane.b32.xlu1 %v5494_v19, %s4277_s12  ;;  %v5603_v15 = vsel %vm2021_vm6, %v2088_v42, %v2092_v38  ;;  %v5608_v40 = vsel %vm2021_vm6, %v2100_v44, %v2104_v25  ;;  %v2107_v42 = vshrl.u32 %v5204_v49, 16  ;;  %v2133_v49 = vshll.u32 %v5238_v2, 16 }
 0x35f   : > { %v1904_v59 = vrot.slane %v1902_v35, 7  ;;  %6300 = vst [vmem:[#allocation23_spill] sm:$0xff] %v5608_v40 }
 0x360   : > { %v4260_v27 = vpop.eup %4259  ;;  %v2112_v43 = vor.u32 %v2111_v12, %v2107_v42  ;;  %v2119_v42 = vshrl.u32 %v5222_v4, 16 }
 0x361   : > { %2341 = vrot.lane.b32.xlu0 %v5455_v22, %s4276_s11  ;;  %v4262_v16 = vpop.eup %4261  ;;  %v1905_v22 = vshll.u32 %v1823_v31, 16  ;;  %v1802_v53 = vmul.f32 %v4260_v27, %v5461_v34  ;;  %v2114_v31 = vshll.u32 %v5428_v14, 16  ;;  %v2014_v14 = vsel %vm4823_vm4, %v1904_v59, 0 }
 0x362   : > { %2216 = vrot.lane.b32.xlu1 %v5506_v45, %s4277_s12  ;;  %v1803_v55 = vmul.f32 %v4262_v16, %v5466_v23  ;;  %v2121_v23 = vshll.u32 %v5222_v4, 16  ;;  %v2150_v30 = vshll.u32 %v2014_v14, 16 }
 0x363   : > { %v1907_v47 = vor.u32 %v1905_v22, %v1904_v59  ;;  %v2116_v38 = vrot.slane %v2114_v31, 1  ;;  %v2126_v31 = vshll.u32 %v5451_v51, 16 }
 0x364   : > { %v1824_v27 = vpack.c.bf16 %v1803_v55, %v1802_v53  ;;  %v2123_v12 = vrot.slane %v2121_v23, 1  ;;  %v2310_v55 = vrot.slane %v2014_v14, 1  ;;  %v2152_v32 = vrot.slane %v2150_v30, 1 }
 0x365   : > { %2472 = vrot.lane.b32.xlu0 %v5513_v8, %s4278_s13  ;;  %v5624_v22 = vsel %vm4823_vm4, 0, %v1907_v47  ;;  %v5636_v44 = vsel %vm2021_vm6, %v2112_v43, %v2116_v38 }
 0x366   : > { %2240 = vrot.lane.b32.xlu1 %v5520_v9, %s4277_s12  ;;  %6301 = vst [vmem:[#allocation24_spill] sm:$0xff] %v5624_v22  ;;  %6302 = vst [vmem:[#allocation25_spill] sm:$0xff] %v5636_v44  ;;  %v2309_v16 = vrot.slane %v5624_v22, 1  ;;  %v1909_v47 = vshrl.u32 %v1824_v27, 16  ;;  %v2124_v43 = vor.u32 %v2123_v12, %v2119_v42  ;;  %v1912_v36 = vshll.u32 %v1824_v27, 16 }
 0x367   : > { %v2135_v12 = vrot.slane %v2133_v49, 1  ;;  %v2131_v42 = vshrl.u32 %v5238_v2, 16  ;;  %v2145_v49 = vshll.u32 %v5624_v22, 16  ;;  %v2143_v17 = vshrl.u32 %v5624_v22, 16 }
 0x368   : > { %v5650_v59 = vsel %vm2278_vm5, %v2309_v16, %v2310_v55  ;;  %v1911_v23 = vrot.slane %v1909_v47, 7 }
 0x369   : > { %2496 = vrot.lane.b32.xlu0 %v5527_v7, %s4278_s13  ;;  %6303 = vst [vmem:[#allocation26_spill] sm:$0xff] %v5650_v59 }
 0x36a   : > { %2218 = vrot.lane.b32.xlu1 %v5513_v8, %s4277_s12  ;;  %v1914_v16 = vor.u32 %v1912_v36, %v1911_v23  ;;  %v2136_v36 = vor.u32 %v2135_v12, %v2131_v42  ;;  %v2147_v42 = vrot.slane %v2145_v49, 1 }
 0x36d   : > { %2474 = vrot.lane.b32.xlu0 %v5539_v39, %s4278_s13 }
 0x36e   : > { %2242 = vrot.lane.b32.xlu1 %v5527_v7, %s4277_s12 }
 0x36f   : > { %v5575_v28 = vpop.permute.xlu0 %2464 }
 0x371   : > { %2498 = vrot.lane.b32.xlu0 %v5549_v3, %s4278_s13  ;;  %v5559_v60 = vpop.permute.xlu1 %2440 }
 0x372   : > { %2220 = vrot.lane.b32.xlu1 %v5539_v39, %s4277_s12 }
 0x373   : > { %v5600_v6 = vpop.permute.xlu0 %2442 }
 0x375   : > { %2476 = vrot.lane.b32.xlu0 %v5566_v62, %s4278_s13 }
 0x376   : > { %v5580_v50 = vpop.permute.xlu1 %2360  ;;  %2244 = vrot.lane.b32.xlu1 %v5549_v3, %s4277_s12 }
 0x378   : > { %v5620_v61 = vpop.permute.xlu0 %2466 }
 0x379   : > { %2500 = vrot.lane.b32.xlu0 %v5586_v21, %s4278_s13 }
 0x37a   : > { %v5596_v56 = vpop.permute.xlu1 %2384  ;;  %2424 = vrot.lane.b32.xlu1 %v5594_v54, %s4277_s12 }
 0x37d   : > { %2478 = vrot.lane.b32.xlu0 %v5603_v15, %s4278_s13 }
 0x37e   : > { %v5610_v35 = vpop.permute.xlu1 %2362  ;;  %2480 = vrot.lane.b32.xlu1 %v5608_v40, %s4278_s13 }
 0x381   : > { %2374 = vrot.lane.b32.xlu0 %v5222_v4, %s4278_s13  ;;  %v2128_v4 = vrot.slane %v2126_v31, 1  ;;  %v2138_v31 = vshll.u32 %v5571_v41, 16  ;;  %v2015_v41 = vsel %vm4823_vm4, %v1911_v23, 0  ;;  %v2148_v23 = vor.u32 %v2147_v42, %v2143_v17 }
 0x382   : > { %v5626_v34 = vpop.permute.xlu1 %2386  ;;  %2456 = vrot.lane.b32.xlu1 %v5624_v22, %s4276_s11 }
 0x383   : > { %v5662_v51 = vsel %vm2021_vm6, %v2124_v43, %v2128_v4  ;;  %v5676_v4 = vsel %vm4823_vm4, 0, %v1914_v16  ;;  %v2140_v43 = vrot.slane %v2138_v31, 1  ;;  %v2313_v31 = vrot.slane %v2015_v41, 1 }
 0x384   : > { %6304 = vst [vmem:[#allocation27_spill] sm:$0xff] %v5662_v51  ;;  %6305 = vst [vmem:[#allocation28_spill] sm:$0xff] %v5676_v4  ;;  %v2312_v12 = vrot.slane %v5676_v4, 1  ;;  %v5713_v14 = vsel %vm2021_vm6, %v2148_v23, %v2152_v32  ;;  %v2155_v42 = vshrl.u32 %v5676_v4, 16 }
 0x385   : > { %2222 = vrot.lane.b32.xlu0 %v5566_v62, %s4277_s12  ;;  %6311 = vst [vmem:[#allocation34_spill] sm:$0xff] %v5713_v14 }
 0x386   : > { %v5639_v25 = vpop.permute.xlu1 %2364  ;;  %2482 = vrot.lane.b32.xlu1 %v5636_v44, %s4278_s13  ;;  %v5701_v24 = vsel %vm2278_vm5, %v2312_v12, %v2313_v31  ;;  %v2162_v31 = vshll.u32 %v2015_v41, 16 }
 0x387   : > { %v5641_v53 = vpop.permute.xlu0 %2444  ;;  %6308 = vst [vmem:[#allocation31_spill] sm:$0xff] %v5701_v24 }
 0x388   : > { %v2164_v23 = vrot.slane %v2162_v31, 1 }
 0x389   : > { %2343 = vrot.lane.b32.xlu0 %v5474_v11, %s4276_s11 }
 0x38a   : > { %v5652_v38 = vpop.permute.xlu1 %2388  ;;  %2426 = vrot.lane.b32.xlu1 %v5650_v59, %s4277_s12 }
 0x38b   : > { %v5655_v10 = vpop.permute.xlu0 %2468 }
 0x38d   : > { %2224 = vrot.lane.b32.xlu0 %v5603_v15, %s4277_s12 }
 0x38e   : > { %2484 = vrot.lane.b32.xlu1 %v5662_v51, %s4278_s13  ;;  %v5668_v47 = vpop.permute.xlu1 %2366 }
 0x38f   : > { %v5664_v55 = vpop.permute.xlu0 %2446 }
 0x391   : > { %2376 = vrot.lane.b32.xlu0 %v5238_v2, %s4278_s13  ;;  %v5688_v2 = vsel %vm2021_vm6, %v2136_v36, %v2140_v43  ;;  %v2157_v36 = vshll.u32 %v5676_v4, 16 }
 0x392   : > { %2458 = vrot.lane.b32.xlu1 %v5676_v4, %s4276_s11  ;;  %6306 = vst [vmem:[#allocation29_spill] sm:$0xff] %v5688_v2 }
 0x393   : > { %v5679_v27 = vpop.permute.xlu0 %2390 }
 0x395   : > { %2226 = vrot.lane.b32.xlu0 %v5608_v40, %s4277_s12  ;;  %v5690_v16 = vpop.permute.xlu1 %2448 }
 0x396   : > { %2486 = vrot.lane.b32.xlu1 %v5688_v2, %s4278_s13 }
 0x397   : > { %v5693_v11 = vpop.permute.xlu0 %2368 }
 0x398   : > { %6307 = vst [vmem:[#allocation30_spill] sm:$0xff] %v5693_v11 }
 0x399   : > { %2345 = vrot.lane.b32.xlu0 %v5594_v54, %s4276_s11  ;;  %v2159_v54 = vrot.slane %v2157_v36, 1 }
 0x39a   : > { %2428 = vrot.lane.b32.xlu1 %v5701_v24, %s4277_s12 }
 0x39b   : > { %v5704_v43 = vpop.permute.xlu0 %2370  ;;  %v2160_v30 = vor.u32 %v2159_v54, %v2155_v42 }
 0x39c   : > { %6309 = vst [vmem:[#allocation32_spill] sm:$0xff] %v5704_v43  ;;  %v5708_v49 = vpop.permute.xlu1 %2450 }
 0x39d   : > { %6310 = vst [vmem:[#allocation33_spill] sm:$0xff] %v5708_v49  ;;  %2228 = vrot.lane.b32.xlu0 %v5636_v44, %s4277_s12  ;;  %v5731_v36 = vsel %vm2021_vm6, %v2160_v30, %v2164_v23 }
 0x39e   : > { %2488 = vrot.lane.b32.xlu1 %v5713_v14, %s4278_s13  ;;  %6315 = vst [vmem:[#allocation38_spill] sm:$0xff] %v5731_v36 }
 0x39f   : > { %v5715_v12 = vpop.permute.xlu0 %2372 }
 0x3a0   : > { %6312 = vst [vmem:[#allocation35_spill] sm:$0xff] %v5715_v12  ;;  %v5719_v17 = vpop.permute.xlu1 %2452 }
 0x3a1   : > { %6313 = vst [vmem:[#allocation36_spill] sm:$0xff] %v5719_v17  ;;  %2378 = vrot.lane.b32.xlu0 %v5624_v22, %s4278_s13 }
 0x3a2   : > { %2460 = vrot.lane.b32.xlu1 %v5249_v48, %s4276_s11 }
 0x3a3   : > { %v2409_v43 = vpop.permute.xlu0 %2408 }
 0x3a4   : > { %v5726_v32 = vpop.permute.xlu1 %2454  ;;  %v2620_v13 = vsel %vm291_vm1, %v5506_v45, %v2409_v43 }
 0x3a5   : > { %6314 = vst [vmem:[#allocation37_spill] sm:$0xff] %v5726_v32  ;;  %2230 = vrot.lane.b32.xlu0 %v5662_v51, %s4277_s12 }
 0x3a6   : > { %2490 = vrot.lane.b32.xlu1 %v5731_v36, %s4278_s13 }
 0x3a7   : > { %v2433_v12 = vpop.permute.xlu0 %2432 }
 0x3a8   : > { %v2352_v54 = vpop.permute.xlu1 %2351  ;;  %v2656_v40 = vsel %vm291_vm1, %v5520_v9, %v2433_v12 }
 0x3a9   : > { %2347 = vrot.lane.b32.xlu0 %v5650_v59, %s4276_s11 }
 0x3aa   : > { %2430 = vrot.lane.b32.xlu1 %v5265_v18, %s4277_s12 }
 0x3ab   : > { %v2411_v41 = vpop.permute.xlu0 %2410 }
 0x3ac   : > { %v2330_v42 = vpop.permute.xlu1 %2329 }
 0x3ad   : > { %2232 = vrot.lane.b32.xlu0 %v5688_v2, %s4277_s12 }
 0x3ae   : > { %2492 = vrot.lane.b32.xlu1 %v5494_v19, %s4278_s13 }
 0x3af   : > { %v2435_v31 = vpop.permute.xlu0 %2434 }
 0x3b0   : > { %v5745_v30 = vpop.permute.xlu1 %2353 }
 0x3b1   : > { %2380 = vrot.lane.b32.xlu0 %v5676_v4, %s4278_s13 }
 0x3b2   : > { %2462 = vrot.lane.b32.xlu1 %v5109_v5, %s4276_s11 }
 0x3b3   : > { %v5747_v23 = vpop.permute.xlu0 %2412 }
 0x3b4   : > { %v5753_v22 = vpop.permute.xlu1 %2331 }
 0x3b5   : > { %2234 = vrot.lane.b32.xlu0 %v5713_v14, %s4277_s12 }
 0x3b6   : > { %2494 = vrot.lane.b32.xlu1 %v5520_v9, %s4278_s13  ;;  %v4132_v9 = vld [vmem:[%s6241_s4 + $0x88] sm:$0xff]  }
 0x3b7   : > { %v5755_v18 = vpop.permute.xlu0 %2436 }
 0x3b8   : > { %v5761_v4 = vpop.permute.xlu1 %2355 }
 0x3b9   : > { %2349 = vrot.lane.b32.xlu0 %v5701_v24, %s4276_s11 }
 0x3bb   : > { %v5763_v19 = vpop.permute.xlu0 %2414 }
 0x3bc   : > { %v5767_v59 = vpop.permute.xlu1 %2333 }
 0x3bd   : > { %2236 = vrot.lane.b32.xlu0 %v5731_v36, %s4277_s12 }
 0x3bf   : > { %v5769_v14 = vpop.permute.xlu0 %2438 }
 0x3c0   : > { %v5773_v2 = vpop.permute.xlu1 %2416 }
 0x3c1   : > { %2382 = vrot.lane.b32.xlu0 %v5249_v48, %s4278_s13 }
 0x3c3   : > { %v5775_v32 = vpop.permute.xlu0 %2357 }
 0x3c4   : > { %v5777_v51 = vpop.permute.xlu1 %2418 }
 0x3c7   : > { %v5779_v24 = vpop.permute.xlu0 %2335 }
 0x3c8   : > { %6316 = vst [vmem:[#allocation39_spill] sm:$0xff] %v5779_v24  ;;  %v5781_v17 = vpop.permute.xlu1 %2420  ;;  %v2505_v24 = vsel %vm291_vm1, %v4829_v33, %v5553_v29 }
 0x3c9   : > { %6317 = vst [vmem:[#allocation40_spill] sm:$0xff] %v5781_v17 }
 0x3cb   : > { %v5783_v37 = vpop.permute.xlu0 %2337 }
 0x3cc   : > { %6318 = vst [vmem:[#allocation41_spill] sm:$0xff] %v5783_v37  ;;  %v5785_v36 = vpop.permute.xlu1 %2422 }
 0x3cd   : > { %6319 = vst [vmem:[#allocation42_spill] sm:$0xff] %v5785_v36 }
 0x3cf   : > { %v5787_v44 = vpop.permute.xlu0 %2339 }
 0x3d0   : > { %6320 = vst [vmem:[#allocation43_spill] sm:$0xff] %v5787_v44  ;;  %v2239_v11 = vpop.permute.xlu1 %2238  ;;  %v2667_v44 = vsel %vm2536_vm7, %v2620_v13, %v5559_v60  ;;  %v2623_v13 = vsel %vm291_vm1, %v5513_v8, %v2411_v41 }
 0x3d1   : > { %v2529_v36 = vsel %vm291_vm1, %v5249_v48, %v2239_v11 }
 0x3d2   : > { %v2562_v43 = vsel %vm2536_vm7, %v2529_v36, %v2352_v54 }
 0x3d3   : > { %v5789_v49 = vpop.permute.xlu0 %2341  ;;  %v2607_v60 = vsel %vm2569_vm8, %v2562_v43, %v5596_v56  ;;  %v6322_v43 = vld [vmem:[#allocation23_spill] sm:$0xff] }
 0x3d4   : > { %6321 = vst [vmem:[#allocation44_spill] sm:$0xff] %v5789_v49  ;;  %v2217_v17 = vpop.permute.xlu1 %2216  ;;  %v2538_v49 = vsel %vm2536_vm7, %v2505_v24, %v4113_v52  ;;  %v2691_v52 = vsel %vm2536_vm7, %v2656_v40, %v5575_v28  ;;  %v2669_v40 = vsel %vm2536_vm7, %v2623_v13, %v5600_v6 }
 0x3d5   : > { %v2571_v33 = vsel %vm2569_vm8, %v2538_v49, %v5580_v50  ;;  %v2507_v48 = vsel %vm291_vm1, %v5086_v20, %v2217_v17 }
 0x3d6   : > { %v2540_v20 = vsel %vm2536_vm7, %v2507_v48, %v2330_v42 }
 0x3d7   : > { %v2473_v37 = vpop.permute.xlu0 %2472  ;;  %v2574_v56 = vsel %vm2569_vm8, %v2540_v20, %v5610_v35 }
 0x3d8   : > { %v2699_v45 = vsel %vm2569_vm8, %v2667_v44, %v2473_v37  ;;  %v2241_v29 = vpop.permute.xlu1 %2240  ;;  %v2659_v44 = vsel %vm291_vm1, %v5527_v7, %v2435_v31  ;;  %v2626_v7 = vsel %vm291_vm1, %v5539_v39, %v5747_v23  ;;  %v2662_v39 = vsel %vm291_vm1, %v5549_v3, %v5755_v18 }
 0x3d9   : > { %2976 = vmatprep.mubr.bf16.mxu0 %v2699_v45  ;;  %v2531_v28 = vsel %vm291_vm1, %v5109_v5, %v2241_v29  ;;  %v2693_v6 = vsel %vm2536_vm7, %v2659_v44, %v5620_v61  ;;  %v2671_v41 = vsel %vm2536_vm7, %v2626_v7, %v5641_v53  ;;  %v4114_v31 = vunpack.i.h.bf16 %v5517_v58 }
 0x3da   : > { %2977 = vmatmul.mubr.bf16.vlgmr.msra.gmra.mrb[4].mxu0 %v2571_v33  ;;  %v2564_v5 = vsel %vm2536_vm7, %v2531_v28, %v5745_v30  ;;  %v2629_v58 = vsel %vm291_vm1, %v5566_v62, %v5763_v19 }
 0x3db   : > { %v2497_v11 = vpop.permute.xlu0 %2496  ;;  %v2610_v35 = vsel %vm2569_vm8, %v2564_v5, %v5626_v34  ;;  %v2665_v34 = vsel %vm291_vm1, %v5586_v21, %v5769_v14  ;;  %v2695_v21 = vsel %vm2536_vm7, %v2662_v39, %v5655_v10  ;;  %v6332_v5 = vld [vmem:[#allocation4_spill] sm:$0xff]  ;;  %v6336_v39 = vld [vmem:[#allocation42_spill] sm:$0xff] }
 0x3dc   : > { %v2735_v37 = vsel %vm2569_vm8, %v2691_v52, %v2497_v11  ;;  %v2219_v50 = vpop.permute.xlu1 %2218  ;;  %v2697_v14 = vsel %vm2536_vm7, %v2665_v34, %v4114_v31  ;;  %v6323_v11 = vld [vmem:[#allocation11_spill] sm:$0xff]  ;;  %v6338_v31 = vld [vmem:[#allocation17_spill] sm:$0xff] }
 0x3dd   : > { %3072 = vmatprep.mubr.bf16.mxu1 %v2735_v37  ;;  %v2744_v10 = vsel %vm2569_vm8, %v2697_v14, %v5536_v46  ;;  %v6337_v34 = vld [vmem:[#allocation27_spill] sm:$0xff] }
 0x3de   : > { %3073 = vmatmul.mubr.bf16.vlgmr.msra.gmra.mrb[4].mxu1 %v2607_v60  ;;  %v6327_v60 = vld [vmem:[#allocation30_spill] sm:$0xff] }
 0x3df   : > { %3951 = vmatpush3.bf16.msra.mxu1 %v5491_v57  ;;  %v2475_v8 = vpop.permute.xlu0 %2474  ;;  %v2509_v57 = vsel %vm291_vm1, %v5064_v63, %v2219_v50 }
 0x3e0   : > { %v2702_v24 = vsel %vm2569_vm8, %v2669_v40, %v2475_v8  ;;  %3952 = vmatprep.subr.bf16.mxu1 %v4132_v9  ;;  %v2243_v49 = vpop.permute.xlu1 %2242  ;;  %v2542_v63 = vsel %vm2536_vm7, %v2509_v57, %v5753_v22  ;;  %v6328_v8 = vld [vmem:[#allocation40_spill] sm:$0xff]  ;;  %v6329_v40 = vld [vmem:[#allocation25_spill] sm:$0xff] }
 0x3e1   : > { %2984 = vmatprep.mubr.bf16.mxu0 %v2702_v24  ;;  %v2533_v54 = vsel %vm291_vm1, %v5053_v0, %v2243_v49  ;;  %v2577_v0 = vsel %vm2569_vm8, %v2542_v63, %v5639_v25  ;;  %v2638_v44 = vsel %vm291_vm1, %v6329_v40, %v6328_v8  ;;  %v6330_v24 = vld [vmem:[#allocation13_spill] sm:$0xff]  ;;  %v6331_v49 = vld [vmem:[#allocation15_spill] sm:$0xff] }
 0x3e2   : > { %2985 = vmatmul.mubr.bf16.gmra.mrb[8].mxu0 %v2574_v56  ;;  %v2566_v53 = vsel %vm2536_vm7, %v2533_v54, %v5761_v4 }
 0x3e3   : > { %v2499_v12 = vpop.permute.xlu0 %2498  ;;  %3953 = vmatpush3.bf16.msra.mxu1 %v4132_v9  ;;  %v2613_v30 = vsel %vm2569_vm8, %v2566_v53, %v5652_v38  ;;  %v2673_v38 = vsel %vm2536_vm7, %v2629_v58, %v5664_v55  ;;  %v6326_v9 = vld [vmem:[#allocation33_spill] sm:$0xff] }
 0x3e4   : > { %v2738_v17 = vsel %vm2569_vm8, %v2693_v6, %v2499_v12  ;;  %v2221_v36 = vpop.permute.xlu1 %2220  ;;  %v6333_v6 = vld [vmem:[#allocation41_spill] sm:$0xff] }
 0x3e5   : > { %3080 = vmatprep.mubr.bf16.mxu1 %v2738_v17  ;;  %v2511_v18 = vsel %vm291_vm1, %v5074_v1, %v2221_v36  ;;  %v2632_v1 = vsel %vm291_vm1, %v5603_v15, %v5773_v2  ;;  %v6334_v17 = vld [vmem:[#allocation36_spill] sm:$0xff]  ;;  %v6340_v53 = vld [vmem:[#allocation5_spill] sm:$0xff] }
 0x3e6   : > { %3081 = vmatmul.mubr.bf16.gmra.mrb[8].mxu1 %v2610_v35  ;;  %v2544_v23 = vsel %vm2536_vm7, %v2511_v18, %v5767_v59  ;;  %v2675_v46 = vsel %vm2536_vm7, %v2632_v1, %v5690_v16  ;;  %v6324_v16 = vld [vmem:[#allocation3_spill] sm:$0xff]  ;;  %v2679_v35 = vsel %vm2536_vm7, %v2638_v44, %v6334_v17  ;;  %v6335_v36 = vld [vmem:[#allocation32_spill] sm:$0xff]  ;;  %v6342_v58 = vld [vmem:[#allocation37_spill] sm:$0xff] }
 0x3e7   : > { %v2477_v61 = vpop.permute.xlu0 %2476  ;;  %v2580_v2 = vsel %vm2569_vm8, %v2544_v23, %v5668_v47  ;;  %v2635_v47 = vsel %vm291_vm1, %v6322_v43, %v5777_v51  ;;  %v6348_v43 = vld [vmem:[#allocation44_spill] sm:$0xff] }
 0x3e8   : > { %v2705_v42 = vsel %vm2569_vm8, %v2671_v41, %v2477_v61  ;;  %v2245_v22 = vpop.permute.xlu1 %2244 }
 0x3e9   : > { %2992 = vmatprep.mubr.bf16.mxu0 %v2705_v42  ;;  %v2535_v19 = vsel %vm291_vm1, %v5100_v26, %v2245_v22  ;;  %v2641_v42 = vsel %vm291_vm1, %v6337_v34, %v6336_v39  ;;  %v6339_v22 = vld [vmem:[#allocation18_spill] sm:$0xff]  ;;  %v6359_v39 = vld [vmem:[#allocation21_spill] sm:$0xff] }
 0x3ea   : > { %2993 = vmatmul.mubr.bf16.gmra.mrb[12].mxu0 %v2577_v0  ;;  %v2568_v26 = vsel %vm2536_vm7, %v2535_v19, %v5775_v32  ;;  %v6325_v32 = vld [vmem:[#allocation39_spill] sm:$0xff] }
 0x3eb   : > { %v2501_v3 = vpop.permute.xlu0 %2500  ;;  %v2616_v55 = vsel %vm2569_vm8, %v2568_v26, %v5679_v27  ;;  %v2677_v27 = vsel %vm2536_vm7, %v2635_v47, %v6326_v9  ;;  %v6352_v9 = vld [vmem:[#allocation7_spill] sm:$0xff] }
 0x3ec   : > { %v2741_v25 = vsel %vm2569_vm8, %v2695_v21, %v2501_v3  ;;  %v5872_v4 = vpop.permute.xlu1 %2424  ;;  %v6341_v21 = vld [vmem:[#allocation43_spill] sm:$0xff] }
 0x3ed   : > { %3088 = vmatprep.mubr.bf16.mxu1 %v2741_v25  ;;  %v2681_v25 = vsel %vm2536_vm7, %v2641_v42, %v6342_v58  ;;  %v6360_v42 = vld [vmem:[#allocation24_spill] sm:$0xff] }
 0x3ee   : > { %3089 = vmatmul.mubr.bf16.gmra.mrb[12].mxu1 %v2613_v30  ;;  %v6343_v30 = vld [vmem:[#allocation35_spill] sm:$0xff] }
 0x3ef   : > { %v2479_v62 = vpop.permute.xlu0 %2478  ;;  %3096 = vmatprep.mubr.bf16.mxu1 %v2744_v10 }
 0x3f0   : > { %v2708_v45 = vsel %vm2569_vm8, %v2673_v38, %v2479_v62  ;;  %v2481_v15 = vpop.permute.xlu1 %2480  ;;  %v6344_v62 = vld [vmem:[#allocation19_spill] sm:$0xff] }
 0x3f1   : > { %3000 = vmatprep.mubr.bf16.mxu0 %v2708_v45  ;;  %v2711_v59 = vsel %vm2569_vm8, %v2675_v46, %v2481_v15  ;;  %v6345_v45 = vld [vmem:[#allocation20_spill] sm:$0xff]  ;;  %v6347_v46 = vld [vmem:[#allocation6_spill] sm:$0xff] }
 0x3f2   : > { %3001 = vmatmul.mubr.bf16.gmra.mrb[16].mxu0 %v2580_v2  ;;  %v6346_v2 = vld [vmem:[#allocation29_spill] sm:$0xff] }
 0x3f3   : > { %v2375_v33 = vpop.permute.xlu0 %2374  ;;  %3008 = vmatprep.mubr.bf16.mxu0 %v2711_v59  ;;  %v2644_v15 = vsel %vm291_vm1, %v6346_v2, %v5872_v4 }
 0x3f4   : > { %v2457_v29 = vpop.permute.xlu1 %2456 }
 0x3f5   : > { %v2683_v26 = vsel %vm2536_vm7, %v2644_v15, %v2457_v29  ;;  %v6351_v29 = vld [vmem:[#allocation34_spill] sm:$0xff] }
 0x3f6   : > { %3097 = vmatmul.mubr.bf16.gmra.mrb[16].mxu1 %v2616_v55 }
 0x3f7   : > { %v2223_v48 = vpop.permute.xlu0 %2222  ;;  %3954 = vmatprep.mubr.msk.bf16.mxu1 %vm291_vm1, %v6323_v11 }
 0x3f8   : > { %v2513_v52 = vsel %vm291_vm1, %v6324_v16, %v2223_v48  ;;  %v2483_v13 = vpop.permute.xlu1 %2482 }
 0x3f9   : > { %v2546_v37 = vsel %vm2536_vm7, %v2513_v52, %v6325_v32  ;;  %v2714_v51 = vsel %vm2569_vm8, %v2677_v27, %v2483_v13  ;;  %v6349_v13 = vld [vmem:[#allocation22_spill] sm:$0xff] }
 0x3fa   : > { %v2583_v50 = vsel %vm2569_vm8, %v2546_v37, %v6327_v60  ;;  %v6350_v32 = vld [vmem:[#allocation26_spill] sm:$0xff] }
 0x3fb   : > { %v2344_v20 = vpop.permute.xlu0 %2343  ;;  %3009 = vmatmul.mubr.bf16.gmra.mrb[20].mxu0 %v2583_v50 }
 0x3fc   : > { %3016 = vmatprep.mubr.bf16.mxu0 %v2714_v51  ;;  %v2427_v28 = vpop.permute.xlu1 %2426 }
 0x3fd   : > { %v2647_v37 = vsel %vm291_vm1, %v6351_v29, %v2427_v28 }
 0x3fe   : > { %3955 = vmatmul.mubr.msk.bf16.vlgmr.msra.gmra.mrb[20].mxu1 %vm291_vm1, %v6330_v24  ;;  %v6353_v24 = vld [vmem:[#allocation31_spill] sm:$0xff] }
 0x3ff   : > { %v2225_v56 = vpop.permute.xlu0 %2224  ;;  %3958 = vmatprep.mubr.msk.bf16.mxu1 %vm291_vm1, %v6331_v49  ;;  %v6355_v49 = vld [vmem:[#allocation38_spill] sm:$0xff] }
 0x400   : > { %v2515_v57 = vsel %vm291_vm1, %v6332_v5, %v2225_v56  ;;  %v2485_v12 = vpop.permute.xlu1 %2484  ;;  %v6354_v56 = vld [vmem:[#allocation10_spill] sm:$0xff] }
 0x401   : > { %v2548_v7 = vsel %vm2536_vm7, %v2515_v57, %v6333_v6  ;;  %v2717_v54 = vsel %vm2569_vm8, %v2679_v35, %v2485_v12  ;;  %v6356_v57 = vld [vmem:[#allocation8_spill] sm:$0xff] }
 0x402   : > { %v2586_v63 = vsel %vm2569_vm8, %v2548_v7, %v6335_v36 }
 0x403   : > { %v2377_v61 = vpop.permute.xlu0 %2376  ;;  %3017 = vmatmul.mubr.bf16.gmra.mrb[24].mxu0 %v2586_v63 }
 0x404   : > { %3024 = vmatprep.mubr.bf16.mxu0 %v2717_v54  ;;  %v2459_v41 = vpop.permute.xlu1 %2458  ;;  %v6357_v54 = vld [vmem:[#allocation9_spill] sm:$0xff] }
 0x406   : > { %3959 = vmatmul.mubr.msk.bf16.gmra.mrb[24].mxu1 %vm291_vm1, %v6338_v31 }
 0x407   : > { %v2227_v0 = vpop.permute.xlu0 %2226  ;;  %3962 = vmatprep.mubr.msk.bf16.mxu1 %vm291_vm1, %v6339_v22 }
 0x408   : > { %v2517_v18 = vsel %vm291_vm1, %v6340_v53, %v2227_v0  ;;  %v2487_v3 = vpop.permute.xlu1 %2486 }
 0x409   : > { %v2550_v14 = vsel %vm2536_vm7, %v2517_v18, %v6341_v21  ;;  %v2720_v10 = vsel %vm2569_vm8, %v2681_v25, %v2487_v3  ;;  %v6362_v25 = vld [vmem:[#allocation16_spill] sm:$0xff] }
 0x40a   : > { %v2589_v1 = vsel %vm2569_vm8, %v2550_v14, %v6343_v30  ;;  %v6361_v14 = vld [vmem:[#allocation14_spill] sm:$0xff]  ;;  %v6363_v30 = vld [vmem:[#allocation28_spill] sm:$0xff] }
 0x40b   : > { %v2346_v23 = vpop.permute.xlu0 %2345  ;;  %3025 = vmatmul.mubr.bf16.gmra.mrb[28].mxu0 %v2589_v1 }
 0x40c   : > { %3032 = vmatprep.mubr.bf16.mxu0 %v2720_v10  ;;  %v2429_v19 = vpop.permute.xlu1 %2428 }
 0x40d   : > { %v2650_v5 = vsel %vm291_vm1, %v6355_v49, %v2429_v19 }
 0x40e   : > { %3963 = vmatmul.mubr.msk.bf16.gmra.mrb[28].mxu1 %vm291_vm1, %v6344_v62  ;;  %v6364_v62 = vld [vmem:[#allocation2_spill] sm:$0xff] }
 0x40f   : > { %v2229_v38 = vpop.permute.xlu0 %2228  ;;  %3966 = vmatprep.mubr.msk.bf16.mxu1 %vm291_vm1, %v6345_v45 }
 0x410   : > { %v2519_v59 = vsel %vm291_vm1, %v6347_v46, %v2229_v38  ;;  %v2489_v55 = vpop.permute.xlu1 %2488 }
 0x411   : > { %v2552_v47 = vsel %vm2536_vm7, %v2519_v59, %v6348_v43  ;;  %v2723_v11 = vsel %vm2569_vm8, %v2683_v26, %v2489_v55 }
 0x412   : > { %v2592_v48 = vsel %vm2569_vm8, %v2552_v47, %v2375_v33  ;;  %v2685_v33 = vsel %vm2536_vm7, %v2647_v37, %v2459_v41  ;;  %v6358_v41 = vld [vmem:[#allocation12_spill] sm:$0xff] }
 0x413   : > { %v2379_v16 = vpop.permute.xlu0 %2378  ;;  %3033 = vmatmul.mubr.bf16.gmra.mrb[32].mxu0 %v2592_v48 }
 0x414   : > { %3040 = vmatprep.mubr.bf16.mxu0 %v2723_v11  ;;  %v2461_v52 = vpop.permute.xlu1 %2460 }
 0x415   : > { %v2687_v12 = vsel %vm2536_vm7, %v2650_v5, %v2461_v52 }
 0x416   : > { %3967 = vmatmul.mubr.msk.bf16.gmra.mrb[32].mxu1 %vm291_vm1, %v6349_v13 }
 0x417   : > { %v2231_v4 = vpop.permute.xlu0 %2230  ;;  %3970 = vmatprep.mubr.msk.bf16.mxu1 %vm291_vm1, %v6350_v32 }
 0x418   : > { %v2521_v27 = vsel %vm291_vm1, %v6352_v9, %v2231_v4  ;;  %v2491_v60 = vpop.permute.xlu1 %2490 }
 0x419   : > { %v2554_v50 = vsel %vm2536_vm7, %v2521_v27, %v2344_v20  ;;  %v2726_v8 = vsel %vm2569_vm8, %v2685_v33, %v2491_v60 }
 0x41a   : > { %v2595_v51 = vsel %vm2569_vm8, %v2554_v50, %v2377_v61 }
 0x41b   : > { %v2348_v40 = vpop.permute.xlu0 %2347  ;;  %3041 = vmatmul.mubr.bf16.gmra.mrb[36].mxu0 %v2595_v51 }
 0x41c   : > { %3048 = vmatprep.mubr.bf16.mxu0 %v2726_v8  ;;  %v2431_v44 = vpop.permute.xlu1 %2430 }
 0x41d   : > { %v2653_v34 = vsel %vm291_vm1, %v6359_v39, %v2431_v44 }
 0x41e   : > { %3971 = vmatmul.mubr.msk.bf16.gmra.mrb[36].mxu1 %vm291_vm1, %v6353_v24 }
 0x41f   : > { %v2233_v28 = vpop.permute.xlu0 %2232  ;;  %3974 = vmatprep.mubr.msk.bf16.mxu1 %vm291_vm1, %v6354_v56 }
 0x420   : > { %v2523_v20 = vsel %vm291_vm1, %v6356_v57, %v2233_v28  ;;  %v2493_v6 = vpop.permute.xlu1 %2492 }
 0x421   : > { %v2556_v7 = vsel %vm2536_vm7, %v2523_v20, %v2346_v23  ;;  %v2729_v35 = vsel %vm2569_vm8, %v2687_v12, %v2493_v6 }
 0x422   : > { %v2598_v17 = vsel %vm2569_vm8, %v2556_v7, %v2379_v16 }
 0x423   : > { %v2381_v36 = vpop.permute.xlu0 %2380  ;;  %3049 = vmatmul.mubr.bf16.gmra.mrb[40].mxu0 %v2598_v17 }
 0x424   : > { %3056 = vmatprep.mubr.bf16.mxu0 %v2729_v35  ;;  %v2463_v63 = vpop.permute.xlu1 %2462 }
 0x425   : > { %v2689_v0 = vsel %vm2536_vm7, %v2653_v34, %v2463_v63 }
 0x426   : > { %3975 = vmatmul.mubr.msk.bf16.gmra.mrb[40].mxu1 %vm291_vm1, %v6357_v54 }
 0x427   : > { %v2235_v61 = vpop.permute.xlu0 %2234  ;;  %3978 = vmatprep.mubr.msk.bf16.mxu1 %vm291_vm1, %v6358_v41 }
 0x428   : > { %v2525_v31 = vsel %vm291_vm1, %v6360_v42, %v2235_v61  ;;  %v2495_v22 = vpop.permute.xlu1 %2494 }
 0x429   : > { %v2558_v53 = vsel %vm2536_vm7, %v2525_v31, %v2348_v40  ;;  %v2732_v3 = vsel %vm2569_vm8, %v2689_v0, %v2495_v22  ;;  %v6021_v0 = vld [vmem:[%s6242_s5] ss:$0 sm:$0xff] }
 0x42a   : > { %v2601_v18 = vsel %vm2569_vm8, %v2558_v53, %v2381_v36 }
 0x42b   : > { %v2350_v21 = vpop.permute.xlu0 %2349  ;;  %3057 = vmatmul.mubr.bf16.gmra.mrb[44].mxu0 %v2601_v18 }
 0x42c   : > { %3064 = vmatprep.mubr.bf16.mxu0 %v2732_v3 }
 0x42e   : > { %3979 = vmatmul.mubr.msk.bf16.gmra.mrb[44].mxu1 %vm291_vm1, %v6361_v14 }
 0x42f   : > { %v2237_v58 = vpop.permute.xlu0 %2236  ;;  %3982 = vmatprep.mubr.msk.bf16.mxu1 %vm291_vm1, %v6362_v25 }
 0x430   : > { %v2527_v1 = vsel %vm291_vm1, %v6363_v30, %v2237_v58 }
 0x431   : > { %v2560_v23 = vsel %vm2536_vm7, %v2527_v1, %v2350_v21 }
 0x433   : > { %v2383_v10 = vpop.permute.xlu0 %2382 }
 0x434   : > { %v2604_v19 = vsel %vm2569_vm8, %v2560_v23, %v2383_v10 }
 0x435   : > { %3065 = vmatmul.mubr.bf16.gmra.mrb[48].mxu0 %v2604_v19 }
 0x436   : > { %3983 = vmatmul.mubr.msk.bf16.gmra.mrb[48].mxu1 %vm291_vm1, %v6364_v62 }
 0x4ad   : > { %v3704_v38 = vpop.f32.mrb[4].mxu0 }
 0x4ae   : > { %v3705_v45 = vpop.f32.mrb[5].mxu0 }
 0x4af   : > { %v3706_v2 = vadd.f32 %v3705_v45, %v3704_v38  ;;  %v3707_v15 = vpop.f32.mrb[6].mxu0 }
 0x4b0   : > { %v3708_v46 = vpop.f32.mrb[7].mxu0 }
 0x4b1   : > { %v3709_v59 = vadd.f32 %v3708_v46, %v3707_v15  ;;  %v3776_v26 = vpop.f32.mrb[4].mxu1  ;;  %v2979_v58 = vadd.f32 %v3706_v2, %v6021_v0 }
 0x4b2   : > { %v3777_v55 = vpop.f32.mrb[5].mxu1 }
 0x4b3   : > { %v6001_v43 = vadd.f32 %v3777_v55, %v3776_v26  ;;  %v3779_v47 = vpop.f32.mrb[6].mxu1  ;;  %v2982_v62 = vadd.f32 %v3709_v59, %v6021_v0 }
 0x4b4   : > { %v3780_v48 = vpop.f32.mrb[7].mxu1 }
 0x4b5   : > { %v6003_v11 = vadd.f32 %v3780_v48, %v3779_v47  ;;  %v3710_v16 = vpop.f32.mrb[8].mxu0 }
 0x4b6   : > { %v3711_v52 = vpop.f32.mrb[9].mxu0 }
 0x4b7   : > { %v3712_v13 = vadd.f32 %v3711_v52, %v3710_v16  ;;  %v3713_v4 = vpop.f32.mrb[10].mxu0 }
 0x4b8   : > { %v3714_v32 = vpop.f32.mrb[11].mxu0 }
 0x4b9   : > { %v3715_v29 = vadd.f32 %v3714_v32, %v3713_v4  ;;  %v3782_v37 = vpop.f32.mrb[8].mxu1  ;;  %v2987_v3 = vadd.f32 %v3712_v13, %v6021_v0 }
 0x4ba   : > { %v3783_v9 = vpop.f32.mrb[9].mxu1 }
 0x4bb   : > { %v6005_v27 = vadd.f32 %v3783_v9, %v3782_v37  ;;  %v3785_v33 = vpop.f32.mrb[10].mxu1  ;;  %v2990_v10 = vadd.f32 %v3715_v29, %v6021_v0 }
 0x4bc   : > { %v3786_v60 = vpop.f32.mrb[11].mxu1 }
 0x4bd   : > { %v6007_v50 = vadd.f32 %v3786_v60, %v3785_v33  ;;  %v3716_v51 = vpop.f32.mrb[12].mxu0 }
 0x4be   : > { %v3717_v8 = vpop.f32.mrb[13].mxu0 }
 0x4bf   : > { %v3718_v40 = vadd.f32 %v3717_v8, %v3716_v51  ;;  %v3719_v44 = vpop.f32.mrb[14].mxu0 }
 0x4c0   : > { %v3720_v24 = vpop.f32.mrb[15].mxu0 }
 0x4c1   : > { %v3721_v28 = vadd.f32 %v3720_v24, %v3719_v44  ;;  %v3788_v56 = vpop.f32.mrb[12].mxu1  ;;  %v2995_v16 = vadd.f32 %v3718_v40, %v6021_v0 }
 0x4c2   : > { %v3789_v49 = vpop.f32.mrb[13].mxu1 }
 0x4c3   : > { %v6009_v5 = vadd.f32 %v3789_v49, %v3788_v56  ;;  %v3791_v57 = vpop.f32.mrb[14].mxu1  ;;  %v2998_v9 = vadd.f32 %v3721_v28, %v6021_v0 }
 0x4c4   : > { %v3792_v20 = vpop.f32.mrb[15].mxu1 }
 0x4c5   : > { %v6011_v12 = vadd.f32 %v3792_v20, %v3791_v57  ;;  %v3722_v6 = vpop.f32.mrb[16].mxu0 }
 0x4c6   : > { %v3723_v7 = vpop.f32.mrb[17].mxu0 }
 0x4c7   : > { %v3724_v17 = vadd.f32 %v3723_v7, %v3722_v6  ;;  %v3725_v35 = vpop.f32.mrb[18].mxu0 }
 0x4c8   : > { %v3726_v36 = vpop.f32.mrb[19].mxu0 }
 0x4c9   : > { %v3727_v63 = vadd.f32 %v3726_v36, %v3725_v35  ;;  %v3794_v54 = vpop.f32.mrb[16].mxu1  ;;  %v3003_v55 = vadd.f32 %v3724_v17, %v6021_v0 }
 0x4ca   : > { %v3795_v61 = vpop.f32.mrb[17].mxu1 }
 0x4cb   : > { %v6013_v41 = vadd.f32 %v3795_v61, %v3794_v54  ;;  %v3797_v39 = vpop.f32.mrb[18].mxu1  ;;  %v3006_v32 = vadd.f32 %v3727_v63, %v6021_v0 }
 0x4cc   : > { %v3798_v34 = vpop.f32.mrb[19].mxu1 }
 0x4cd   : > { %v6015_v42 = vadd.f32 %v3798_v34, %v3797_v39 }
 0x4ce   : > { %v3728_v31 = vpop.f32.mrb[20].mxu0 }
 0x4cf   : > { %v3729_v22 = vpop.f32.mrb[21].mxu0 }
 0x4d0   : > { %v3730_v53 = vadd.f32 %v3729_v22, %v3728_v31  ;;  %v3731_v18 = vpop.f32.mrb[22].mxu0 }
 0x4d1   : > { %v3732_v21 = vpop.f32.mrb[23].mxu0  ;;  %v3956_v14 = vpop.f32.mrb[20].mxu1 }
 0x4d2   : > { %v3733_v25 = vadd.f32 %v3732_v21, %v3731_v18  ;;  %v3148_v30 = vadd.f32 %v3956_v14, %v2987_v3  ;;  %v3139_v1 = vpop.f32.mrb[21].mxu1  ;;  %v3011_v57 = vadd.f32 %v3730_v53, %v6021_v0 }
 0x4d3   : > { %v3140_v23 = vadd.f32 %v3139_v1, %v2979_v58  ;;  %v3957_v19 = vpop.f32.mrb[22].mxu1 }
 0x4d4   : > { %3268 = vst.msk [vmem:[%s6027_s23 + $0x20] sm:$0xff] %vm2536_vm7, %v3148_v30  ;;  %v3151_v38 = vadd.f32 %v3957_v19, %v2990_v10  ;;  %v3142_v45 = vpop.f32.mrb[23].mxu1  ;;  %3334 = vrot.lane.b32.xlu1 %v3148_v30, %s4276_s11  ;;  %v3014_v63 = vadd.f32 %v3733_v25, %v6021_v0 }
 0x4d5   : > { %3266 = vst.msk [vmem:[%s6027_s23] sm:$0xff] %vm2536_vm7, %v3140_v23  ;;  %v3143_v15 = vadd.f32 %v3142_v45, %v2982_v62 }
 0x4d6   : > { %3269 = vst.msk [vmem:[%s6027_s23 + $0x28] sm:$0xff] %vm2536_vm7, %v3151_v38  ;;  %v3734_v2 = vpop.f32.mrb[24].mxu0  ;;  %3336 = vrot.lane.b32.xlu0 %v3151_v38, %s4276_s11 }
 0x4d7   : > { %3267 = vst.msk [vmem:[%s6027_s23 + $0x8] sm:$0xff] %vm2536_vm7, %v3143_v15  ;;  %v3735_v46 = vpop.f32.mrb[25].mxu0 }
 0x4d8   : > { %v3736_v26 = vadd.f32 %v3735_v46, %v3734_v2  ;;  %v3737_v59 = vpop.f32.mrb[26].mxu0  ;;  %3330 = vrot.lane.b32.xlu1 %v3140_v23, %s4276_s11 }
 0x4d9   : > { %v3738_v47 = vpop.f32.mrb[27].mxu0  ;;  %v3960_v48 = vpop.f32.mrb[24].mxu1 }
 0x4da   : > { %v3739_v52 = vadd.f32 %v3738_v47, %v3737_v59  ;;  %v3164_v13 = vadd.f32 %v3960_v48, %v3003_v55  ;;  %v3155_v4 = vpop.f32.mrb[25].mxu1  ;;  %3332 = vrot.lane.b32.xlu0 %v3143_v15, %s4276_s11  ;;  %v3019_v28 = vadd.f32 %v3736_v26, %v6021_v0 }
 0x4db   : > { %v3156_v29 = vadd.f32 %v3155_v4, %v2995_v16  ;;  %v3961_v37 = vpop.f32.mrb[26].mxu1 }
 0x4dc   : > { %3272 = vst.msk [vmem:[%s6027_s23 + $0x60] sm:$0xff] %vm2536_vm7, %v3164_v13  ;;  %v3167_v33 = vadd.f32 %v3961_v37, %v3006_v32  ;;  %v3158_v60 = vpop.f32.mrb[27].mxu1  ;;  %3342 = vrot.lane.b32.xlu1 %v3164_v13, %s4276_s11  ;;  %v3022_v17 = vadd.f32 %v3739_v52, %v6021_v0 }
 0x4dd   : > { %3270 = vst.msk [vmem:[%s6027_s23 + $0x40] sm:$0xff] %vm2536_vm7, %v3156_v29  ;;  %v3159_v51 = vadd.f32 %v3158_v60, %v2998_v9 }
 0x4de   : > { %3273 = vst.msk [vmem:[%s6027_s23 + $0x68] sm:$0xff] %vm2536_vm7, %v3167_v33  ;;  %v3740_v8 = vpop.f32.mrb[28].mxu0  ;;  %3344 = vrot.lane.b32.xlu0 %v3167_v33, %s4276_s11 }
 0x4df   : > { %3271 = vst.msk [vmem:[%s6027_s23 + $0x48] sm:$0xff] %vm2536_vm7, %v3159_v51  ;;  %v3741_v40 = vpop.f32.mrb[29].mxu0 }
 0x4e0   : > { %v3742_v44 = vadd.f32 %v3741_v40, %v3740_v8  ;;  %v3743_v24 = vpop.f32.mrb[30].mxu0  ;;  %3338 = vrot.lane.b32.xlu1 %v3156_v29, %s4276_s11 }
 0x4e1   : > { %v3744_v56 = vpop.f32.mrb[31].mxu0  ;;  %v3964_v49 = vpop.f32.mrb[28].mxu1 }
 0x4e2   : > { %v3745_v20 = vadd.f32 %v3744_v56, %v3743_v24  ;;  %v3180_v6 = vadd.f32 %v3964_v49, %v3019_v28  ;;  %v3171_v7 = vpop.f32.mrb[29].mxu1  ;;  %3340 = vrot.lane.b32.xlu0 %v3159_v51, %s4276_s11  ;;  %v3027_v21 = vadd.f32 %v3742_v44, %v6021_v0 }
 0x4e3   : > { %v3172_v35 = vadd.f32 %v3171_v7, %v3011_v57  ;;  %v3965_v36 = vpop.f32.mrb[30].mxu1 }
 0x4e4   : > { %3276 = vst.msk [vmem:[%s6027_s23 + $0xa0] sm:$0xff] %vm2536_vm7, %v3180_v6  ;;  %v3183_v54 = vadd.f32 %v3965_v36, %v3022_v17  ;;  %v3174_v61 = vpop.f32.mrb[31].mxu1  ;;  %3350 = vrot.lane.b32.xlu1 %v3180_v6, %s4276_s11  ;;  %v3030_v10 = vadd.f32 %v3745_v20, %v6021_v0  ;;  %v3083_v36 = vadd.f32 %v6005_v27, %v6021_v0 }
 0x4e5   : > { %3274 = vst.msk [vmem:[%s6027_s23 + $0x80] sm:$0xff] %vm2536_vm7, %v3172_v35  ;;  %v3175_v39 = vadd.f32 %v3174_v61, %v3014_v63  ;;  %v3075_v61 = vadd.f32 %v6001_v43, %v6021_v0 }
 0x4e6   : > { %3277 = vst.msk [vmem:[%s6027_s23 + $0xa8] sm:$0xff] %vm2536_vm7, %v3183_v54  ;;  %v3746_v34 = vpop.f32.mrb[32].mxu0  ;;  %3352 = vrot.lane.b32.xlu0 %v3183_v54, %s4276_s11 }
 0x4e7   : > { %3275 = vst.msk [vmem:[%s6027_s23 + $0x88] sm:$0xff] %vm2536_vm7, %v3175_v39  ;;  %v3747_v31 = vpop.f32.mrb[33].mxu0 }
 0x4e8   : > { %v3748_v22 = vadd.f32 %v3747_v31, %v3746_v34  ;;  %v3749_v53 = vpop.f32.mrb[34].mxu0  ;;  %3346 = vrot.lane.b32.xlu1 %v3172_v35, %s4276_s11 }
 0x4e9   : > { %v3750_v18 = vpop.f32.mrb[35].mxu0  ;;  %v3968_v3 = vpop.f32.mrb[32].mxu1 }
 0x4ea   : > { %v3751_v14 = vadd.f32 %v3750_v18, %v3749_v53  ;;  %v3035_v58 = vadd.f32 %v3748_v22, %v6021_v0  ;;  %v3187_v25 = vpop.f32.mrb[33].mxu1  ;;  %3348 = vrot.lane.b32.xlu0 %v3175_v39, %s4276_s11  ;;  %v3086_v53 = vadd.f32 %v6007_v50, %v6021_v0 }
 0x4eb   : > { %v3188_v30 = vadd.f32 %v3187_v25, %v3027_v21  ;;  %v3969_v1 = vpop.f32.mrb[34].mxu1 }
 0x4ec   : > { %v3196_v23 = vadd.f32 %v3968_v3, %v3035_v58  ;;  %v3038_v19 = vadd.f32 %v3751_v14, %v6021_v0  ;;  %v3190_v62 = vpop.f32.mrb[35].mxu1  ;;  %v3078_v3 = vadd.f32 %v6003_v11, %v6021_v0 }
 0x4ed   : > { %3278 = vst.msk [vmem:[%s6027_s23 + $0xc0] sm:$0xff] %vm2536_vm7, %v3188_v30  ;;  %v3191_v38 = vadd.f32 %v3190_v62, %v3030_v10  ;;  %3354 = vrot.lane.b32.xlu1 %v3188_v30, %s4276_s11  ;;  %v3099_v30 = vadd.f32 %v6013_v41, %v6021_v0 }
 0x4ee   : > { %3280 = vst.msk [vmem:[%s6027_s23 + $0xe0] sm:$0xff] %vm2536_vm7, %v3196_v23  ;;  %v3199_v45 = vadd.f32 %v3969_v1, %v3038_v19  ;;  %v3752_v15 = vpop.f32.mrb[36].mxu0 }
 0x4ef   : > { %3279 = vst.msk [vmem:[%s6027_s23 + $0xc8] sm:$0xff] %vm2536_vm7, %v3191_v38  ;;  %v3753_v2 = vpop.f32.mrb[37].mxu0  ;;  %3356 = vrot.lane.b32.xlu0 %v3191_v38, %s4276_s11 }
 0x4f0   : > { %3281 = vst.msk [vmem:[%s6027_s23 + $0xe8] sm:$0xff] %vm2536_vm7, %v3199_v45  ;;  %v3754_v46 = vadd.f32 %v3753_v2, %v3752_v15  ;;  %v3755_v26 = vpop.f32.mrb[38].mxu0  ;;  %v3102_v15 = vadd.f32 %v6015_v42, %v6021_v0 }
 0x4f1   : > { %v3756_v59 = vpop.f32.mrb[39].mxu0  ;;  %v3972_v55 = vpop.f32.mrb[36].mxu1  ;;  %3358 = vrot.lane.b32.xlu1 %v3196_v23, %s4276_s11  ;;  %v3091_v23 = vadd.f32 %v6009_v5, %v6021_v0 }
 0x4f2   : > { %v3757_v47 = vadd.f32 %v3756_v59, %v3755_v26  ;;  %v3043_v48 = vadd.f32 %v3754_v46, %v6021_v0  ;;  %v3203_v16 = vpop.f32.mrb[37].mxu1  ;;  %v3094_v26 = vadd.f32 %v6011_v12, %v6021_v0 }
 0x4f3   : > { %v3973_v52 = vpop.f32.mrb[38].mxu1  ;;  %3360 = vrot.lane.b32.xlu0 %v3199_v45, %s4276_s11 }
 0x4f4   : > { %v3204_v13 = vadd.f32 %v3203_v16, %v3043_v48  ;;  %v3046_v4 = vadd.f32 %v3757_v47, %v6021_v0  ;;  %v3206_v32 = vpop.f32.mrb[39].mxu1 }
 0x4f6   : > { %3282 = vst.msk [vmem:[%s6027_s23 + $0x100] sm:$0xff] %vm2536_vm7, %v3204_v13  ;;  %v3207_v29 = vadd.f32 %v3206_v32, %v3046_v4  ;;  %v3758_v37 = vpop.f32.mrb[40].mxu0  ;;  %3362 = vrot.lane.b32.xlu1 %v3204_v13, %s4276_s11 }
 0x4f7   : > { %v3759_v9 = vpop.f32.mrb[41].mxu0 }
 0x4f8   : > { %3283 = vst.msk [vmem:[%s6027_s23 + $0x108] sm:$0xff] %vm2536_vm7, %v3207_v29  ;;  %v3760_v33 = vadd.f32 %v3759_v9, %v3758_v37  ;;  %v3761_v60 = vpop.f32.mrb[42].mxu0  ;;  %3364 = vrot.lane.b32.xlu0 %v3207_v29, %s4276_s11 }
 0x4f9   : > { %v3762_v51 = vpop.f32.mrb[43].mxu0  ;;  %v6100_v8 = vpop.f32.mrb[40].mxu1 }
 0x4fa   : > { %v3051_v40 = vadd.f32 %v3760_v33, %v6021_v0  ;;  %v3763_v44 = vadd.f32 %v3762_v51, %v3761_v60  ;;  %v3219_v24 = vpop.f32.mrb[41].mxu1 }
 0x4fb   : > { %v6103_v28 = vpop.f32.mrb[42].mxu1 }
 0x4fc   : > { %v3212_v56 = vadd.f32 %v3972_v55, %v3051_v40  ;;  %v3054_v49 = vadd.f32 %v3763_v44, %v6021_v0  ;;  %v3222_v57 = vpop.f32.mrb[43].mxu1 }
 0x4fe   : > { %3284 = vst.msk [vmem:[%s6027_s23 + $0x120] sm:$0xff] %vm2536_vm7, %v3212_v56  ;;  %v3215_v20 = vadd.f32 %v3973_v52, %v3054_v49  ;;  %v3764_v6 = vpop.f32.mrb[44].mxu0  ;;  %3366 = vrot.lane.b32.xlu1 %v3212_v56, %s4276_s11 }
 0x4ff   : > { %v3765_v7 = vpop.f32.mrb[45].mxu0 }
 0x500   : > { %3285 = vst.msk [vmem:[%s6027_s23 + $0x128] sm:$0xff] %vm2536_vm7, %v3215_v20  ;;  %v3766_v17 = vadd.f32 %v3765_v7, %v3764_v6  ;;  %v3767_v35 = vpop.f32.mrb[46].mxu0  ;;  %3368 = vrot.lane.b32.xlu0 %v3215_v20, %s4276_s11 }
 0x501   : > { %v3768_v63 = vpop.f32.mrb[47].mxu0  ;;  %v3980_v54 = vpop.f32.mrb[44].mxu1 }
 0x502   : > { %v3059_v39 = vadd.f32 %v3766_v17, %v6021_v0  ;;  %v3769_v34 = vadd.f32 %v3768_v63, %v3767_v35  ;;  %v3244_v31 = vadd.f32 %v3980_v54, %v3083_v36  ;;  %v3235_v22 = vpop.f32.mrb[45].mxu1 }
 0x503   : > { %v3236_v18 = vadd.f32 %v3235_v22, %v3075_v61  ;;  %v3981_v27 = vpop.f32.mrb[46].mxu1 }
 0x504   : > { %v3220_v21 = vadd.f32 %v3219_v24, %v3059_v39  ;;  %v3062_v43 = vadd.f32 %v3769_v34, %v6021_v0  ;;  %3292 = vst.msk [vmem:[%s6027_s23 + $0x1a0] sm:$0xff] %vm2536_vm7, %v3244_v31  ;;  %v3247_v14 = vadd.f32 %v3981_v27, %v3086_v53  ;;  %v3238_v58 = vpop.f32.mrb[47].mxu1  ;;  %3382 = vrot.lane.b32.xlu1 %v3244_v31, %s4276_s11 }
 0x505   : > { %3290 = vst.msk [vmem:[%s6027_s23 + $0x180] sm:$0xff] %vm2536_vm7, %v3236_v18  ;;  %v3239_v25 = vadd.f32 %v3238_v58, %v3078_v3 }
 0x506   : > { %3286 = vst.msk [vmem:[%s6027_s23 + $0x140] sm:$0xff] %vm2536_vm7, %v3220_v21  ;;  %v3223_v50 = vadd.f32 %v3222_v57, %v3062_v43  ;;  %3293 = vst.msk [vmem:[%s6027_s23 + $0x1a8] sm:$0xff] %vm2536_vm7, %v3247_v14  ;;  %3384 = vrot.lane.b32.xlu0 %v3247_v14, %s4276_s11 }
 0x507   : > { %3291 = vst.msk [vmem:[%s6027_s23 + $0x188] sm:$0xff] %vm2536_vm7, %v3239_v25 }
 0x508   : > { %3287 = vst.msk [vmem:[%s6027_s23 + $0x148] sm:$0xff] %vm2536_vm7, %v3223_v50  ;;  %v3770_v11 = vpop.f32.mrb[48].mxu0  ;;  %3378 = vrot.lane.b32.xlu1 %v3236_v18, %s4276_s11 }
 0x509   : > { %v3771_v1 = vpop.f32.mrb[49].mxu0  ;;  %v3984_v10 = vpop.f32.mrb[48].mxu1 }
 0x50a   : > { %v3772_v19 = vadd.f32 %v3771_v1, %v3770_v11  ;;  %v3260_v62 = vadd.f32 %v3984_v10, %v3099_v30  ;;  %v3773_v38 = vpop.f32.mrb[50].mxu0  ;;  %v3251_v45 = vpop.f32.mrb[49].mxu1  ;;  %3380 = vrot.lane.b32.xlu0 %v3239_v25, %s4276_s11 }
 0x50b   : > { %v3252_v2 = vadd.f32 %v3251_v45, %v3091_v23  ;;  %v3774_v46 = vpop.f32.mrb[51].mxu0  ;;  %v3985_v41 = vpop.f32.mrb[50].mxu1 }
 0x50c   : > { %v3067_v5 = vadd.f32 %v3772_v19, %v6021_v0  ;;  %3296 = vst.msk [vmem:[%s6027_s23 + $0x1e0] sm:$0xff] %vm2536_vm7, %v3260_v62  ;;  %v3775_v59 = vadd.f32 %v3774_v46, %v3773_v38  ;;  %v3263_v55 = vadd.f32 %v3985_v41, %v3102_v15  ;;  %v3254_v47 = vpop.f32.mrb[51].mxu1  ;;  %3370 = vrot.lane.b32.xlu1 %v3220_v21, %s4276_s11 }
 0x50d   : > { %3294 = vst.msk [vmem:[%s6027_s23 + $0x1c0] sm:$0xff] %vm2536_vm7, %v3252_v2  ;;  %v3255_v42 = vadd.f32 %v3254_v47, %v3094_v26 }
 0x50e   : > { %v3228_v48 = vadd.f32 %v6100_v8, %v3067_v5  ;;  %v3070_v16 = vadd.f32 %v3775_v59, %v6021_v0  ;;  %3297 = vst.msk [vmem:[%s6027_s23 + $0x1e8] sm:$0xff] %vm2536_vm7, %v3263_v55  ;;  %3372 = vrot.lane.b32.xlu0 %v3223_v50, %s4276_s11 }
 0x50f   : > { %3295 = vst.msk [vmem:[%s6027_s23 + $0x1c8] sm:$0xff] %vm2536_vm7, %v3255_v42 }
 0x510   : > { %3288 = vst.msk [vmem:[%s6027_s23 + $0x160] sm:$0xff] %vm2536_vm7, %v3228_v48  ;;  %v3231_v12 = vadd.f32 %v6103_v28, %v3070_v16  ;;  %3386 = vrot.lane.b32.xlu1 %v3252_v2, %s4276_s11 }
 0x512   : > { %3289 = vst.msk [vmem:[%s6027_s23 + $0x168] sm:$0xff] %vm2536_vm7, %v3231_v12  ;;  %3388 = vrot.lane.b32.xlu0 %v3255_v42, %s4276_s11 }
 0x514   : > { %3374 = vrot.lane.b32.xlu1 %v3228_v48, %s4276_s11 }
 0x516   : > { %3376 = vrot.lane.b32.xlu0 %v3231_v12, %s4276_s11 }
 0x518   : > { %3390 = vrot.lane.b32.xlu1 %v3260_v62, %s4276_s11 }
 0x51a   : > { %3392 = vrot.lane.b32.xlu0 %v3263_v55, %s4276_s11 }
 0x546   : > { %v3335_v0 = vpop.permute.xlu1 %3334 }
 0x547   : > { %3594 = vst.msk [vmem:[%s6027_s23 + $0x30] sm:$0xff] %vm2536_vm7, %v3335_v0 }
 0x548   : > { %v3337_v52 = vpop.permute.xlu0 %3336 }
 0x549   : > { %3595 = vst.msk [vmem:[%s6027_s23 + $0x38] sm:$0xff] %vm2536_vm7, %v3337_v52 }
 0x54a   : > { %v3331_v13 = vpop.permute.xlu1 %3330 }
 0x54b   : > { %3592 = vst.msk [vmem:[%s6027_s23 + $0x10] sm:$0xff] %vm2536_vm7, %v3331_v13 }
 0x54c   : > { %v3333_v4 = vpop.permute.xlu0 %3332 }
 0x54d   : > { %3593 = vst.msk [vmem:[%s6027_s23 + $0x18] sm:$0xff] %vm2536_vm7, %v3333_v4 }
 0x54e   : > { %v3343_v32 = vpop.permute.xlu1 %3342 }
 0x54f   : > { %3598 = vst.msk [vmem:[%s6027_s23 + $0x70] sm:$0xff] %vm2536_vm7, %v3343_v32 }
 0x550   : > { %v3345_v29 = vpop.permute.xlu0 %3344 }
 0x551   : > { %3599 = vst.msk [vmem:[%s6027_s23 + $0x78] sm:$0xff] %vm2536_vm7, %v3345_v29 }
 0x552   : > { %v3339_v37 = vpop.permute.xlu1 %3338 }
 0x553   : > { %3596 = vst.msk [vmem:[%s6027_s23 + $0x50] sm:$0xff] %vm2536_vm7, %v3339_v37 }
 0x554   : > { %v3341_v9 = vpop.permute.xlu0 %3340 }
 0x555   : > { %3597 = vst.msk [vmem:[%s6027_s23 + $0x58] sm:$0xff] %vm2536_vm7, %v3341_v9 }
 0x556   : > { %v3351_v33 = vpop.permute.xlu1 %3350 }
 0x557   : > { %3602 = vst.msk [vmem:[%s6027_s23 + $0xb0] sm:$0xff] %vm2536_vm7, %v3351_v33 }
 0x558   : > { %v3353_v60 = vpop.permute.xlu0 %3352 }
 0x559   : > { %3603 = vst.msk [vmem:[%s6027_s23 + $0xb8] sm:$0xff] %vm2536_vm7, %v3353_v60 }
 0x55a   : > { %v3347_v51 = vpop.permute.xlu1 %3346 }
 0x55b   : > { %3600 = vst.msk [vmem:[%s6027_s23 + $0x90] sm:$0xff] %vm2536_vm7, %v3347_v51 }
 0x55c   : > { %v3349_v8 = vpop.permute.xlu0 %3348 }
 0x55d   : > { %3601 = vst.msk [vmem:[%s6027_s23 + $0x98] sm:$0xff] %vm2536_vm7, %v3349_v8 }
 0x55f   : > { %v3355_v40 = vpop.permute.xlu1 %3354 }
 0x560   : > { %3604 = vst.msk [vmem:[%s6027_s23 + $0xd0] sm:$0xff] %vm2536_vm7, %v3355_v40 }
 0x561   : > { %v3357_v44 = vpop.permute.xlu0 %3356 }
 0x562   : > { %3605 = vst.msk [vmem:[%s6027_s23 + $0xd8] sm:$0xff] %vm2536_vm7, %v3357_v44 }
 0x563   : > { %v3359_v24 = vpop.permute.xlu1 %3358 }
 0x564   : > { %3606 = vst.msk [vmem:[%s6027_s23 + $0xf0] sm:$0xff] %vm2536_vm7, %v3359_v24 }
 0x565   : > { %v3361_v28 = vpop.permute.xlu0 %3360 }
 0x566   : > { %3607 = vst.msk [vmem:[%s6027_s23 + $0xf8] sm:$0xff] %vm2536_vm7, %v3361_v28 }
 0x568   : > { %v3363_v56 = vpop.permute.xlu1 %3362 }
 0x569   : > { %3608 = vst.msk [vmem:[%s6027_s23 + $0x110] sm:$0xff] %vm2536_vm7, %v3363_v56 }
 0x56a   : > { %v3365_v49 = vpop.permute.xlu0 %3364 }
 0x56b   : > { %3609 = vst.msk [vmem:[%s6027_s23 + $0x118] sm:$0xff] %vm2536_vm7, %v3365_v49 }
 0x570   : > { %v3367_v57 = vpop.permute.xlu1 %3366 }
 0x571   : > { %3610 = vst.msk [vmem:[%s6027_s23 + $0x130] sm:$0xff] %vm2536_vm7, %v3367_v57 }
 0x572   : > { %v3369_v20 = vpop.permute.xlu0 %3368 }
 0x573   : > { %3611 = vst.msk [vmem:[%s6027_s23 + $0x138] sm:$0xff] %vm2536_vm7, %v3369_v20 }
 0x576   : > { %v3383_v6 = vpop.permute.xlu1 %3382 }
 0x577   : > { %3618 = vst.msk [vmem:[%s6027_s23 + $0x1b0] sm:$0xff] %vm2536_vm7, %v3383_v6 }
 0x578   : > { %v3385_v7 = vpop.permute.xlu0 %3384 }
 0x579   : > { %3619 = vst.msk [vmem:[%s6027_s23 + $0x1b8] sm:$0xff] %vm2536_vm7, %v3385_v7 }
 0x57a   : > { %v3379_v17 = vpop.permute.xlu1 %3378 }
 0x57b   : > { %3616 = vst.msk [vmem:[%s6027_s23 + $0x190] sm:$0xff] %vm2536_vm7, %v3379_v17 }
 0x57c   : > { %v3381_v35 = vpop.permute.xlu0 %3380 }
 0x57d   : > { %3617 = vst.msk [vmem:[%s6027_s23 + $0x198] sm:$0xff] %vm2536_vm7, %v3381_v35 }
 0x57e   : > { %v3371_v36 = vpop.permute.xlu1 %3370 }
 0x57f   : > { %3612 = vst.msk [vmem:[%s6027_s23 + $0x150] sm:$0xff] %vm2536_vm7, %v3371_v36 }
 0x580   : > { %v3373_v63 = vpop.permute.xlu0 %3372 }
 0x581   : > { %3613 = vst.msk [vmem:[%s6027_s23 + $0x158] sm:$0xff] %vm2536_vm7, %v3373_v63 }
 0x582   : > { %v3387_v54 = vpop.permute.xlu1 %3386 }
 0x583   : > { %3620 = vst.msk [vmem:[%s6027_s23 + $0x1d0] sm:$0xff] %vm2536_vm7, %v3387_v54 }
 0x584   : > { %v3389_v61 = vpop.permute.xlu0 %3388 }
 0x585   : > { %3621 = vst.msk [vmem:[%s6027_s23 + $0x1d8] sm:$0xff] %vm2536_vm7, %v3389_v61 }
 0x586   : > { %v3375_v39 = vpop.permute.xlu1 %3374 }
 0x587   : > { %3614 = vst.msk [vmem:[%s6027_s23 + $0x170] sm:$0xff] %vm2536_vm7, %v3375_v39 }
 0x588   : > { %v3377_v34 = vpop.permute.xlu0 %3376 }
 0x589   : > { %3615 = vst.msk [vmem:[%s6027_s23 + $0x178] sm:$0xff] %vm2536_vm7, %v3377_v34 }
 0x58a   : > { %v3391_v31 = vpop.permute.xlu1 %3390 }
 0x58b   : > { %3622 = vst.msk [vmem:[%s6027_s23 + $0x1f0] sm:$0xff] %vm2536_vm7, %v3391_v31 }
 0x58c   : > { %v3393_v22 = vpop.permute.xlu0 %3392 }
 0x58d   : > { %3623 = vst.msk [vmem:[%s6027_s23 + $0x1f8] sm:$0xff] %vm2536_vm7, %v3393_v22 }
 0x58e PF: > { %s16_s21 = sadd.s32 1, %s4270_s21  }
 0x58f   : > { %p13_p4 = scmp.ge.s32.totalorder %s16_s21, 4  }
 0x591   :  { %15 = sbr.rel (!%p13_p4) target bundleno = 1 (0x1), region = 75 }

// kernel: decoder_forward.5
= control target key start
LH: loop header
LB: loop body
LE: loop exit
PB: predicated region body
PF: predicated region fallthrough
CT: control target
= control target key end

     0   :  { %s5131_s21 = smov 0   ;;  %s7820_s0 = inlined_call_operand.vmem [shape: f32[2,32,32,32], index: 0, kind: input, shape index: {}]   ;;  %s7821_s1 = inlined_call_operand.vmem [shape: f32[1,32], index: 1, kind: input, shape index: {}]   ;;  %s7822_s2 = inlined_call_operand.vmem [shape: f32[1,32], index: 2, kind: input, shape index: {}]   ;;  %s7823_s3 = inlined_call_operand.vmem [shape: f32[32,32], index: 3, kind: input, shape index: {}]   ;;  %s7824_s4 = inlined_call_operand.vmem [shape: bf16[4,32], index: 4, kind: input, shape index: {}]   ;;  %s7825_s5 = inlined_call_operand.vmem [shape: f32[4,1], index: 5, kind: input, shape index: {}]   ;;  %s7826_s6 = inlined_call_operand.vmem [shape: f32[2,4,1024], index: 6, kind: output, shape index: {}]  }
   0x1 LB: > { %s3951_s22 = sadd.s32 4294967295, %s5090_s21   ;;  %p3955_p0 = scmp.ge.s32.totalorder %s5090_s21, 1  ;;  %s5090_s21 = sphi %s5131_s21, %s16_s21  }
   0x2   : > { %p212_p1 = scmp.lt.s32.totalorder %s5090_s21, 3 }
   0x4   : > { %p213_p2 = pnand %p3955_p0, %p212_p1 }
   0x6   : > { %216 = sbr.rel (%p213_p2) target bundleno = 1637 (0x665), region = 44 }
   0xd   : > { %v5142_v0 = vld [vmem:[%s7823_s3] sm:$0xff]  ;;  %v5147_v1 = vld [vmem:[%s7823_s3 + $0x8] sm:$0xff]  ;;  %v5152_v2 = vld [vmem:[%s7823_s3 + $0x10] sm:$0xff]  ;;  %v7827_v3 = vmov 0.0|0.0   ;;  %vm5093_vm0 = vmmov 0   ;;  %v7829_v8 = vmov 0.0  }
   0xe   : > { %4362 = vmatprep.subr.bf16.mxu0 %v7827_v3  ;;  %v7834_v4 = vand.u32 4294901760, %v5142_v0  ;;  %v7833_v5 = vand.u32 4294901760, %v5147_v1  ;;  %v5160_v6 = vld [vmem:[%s7823_s3 + $0x18] sm:$0xff]  ;;  %v7832_v7 = vand.u32 4294901760, %v5152_v2  ;;  %4238 = vmatprep.mubr.msk.f32.mxu0 %vm5093_vm0, %v7829_v8  ;;  %p242_p3 = scmp.lt.s32.totalorder %s3951_s22, 1  ;;  %vm387_vm1 = vcmask 261120  }
   0xf   : > { %v7831_v9 = vand.u32 4294901760, %v5160_v6  ;;  %4398 = vmatprep.subr.bf16.mxu1 %v7827_v3  ;;  %4304 = vmatprep.mubr.msk.f32.mxu1 %vm5093_vm0, %v7829_v8 }
  0x10   : > { %v5173_v10 = vpack.c.bf16 %v7833_v5, %v7834_v4  ;;  %s8216_s22 = smov (!%p242_p3, %s3951_s22), 1 }
  0x11   : > { %v5182_v11 = vpack.c.bf16 %v7831_v9, %v7832_v7  ;;  %s4096_s7 = sshll.u32 %s8216_s22, 10  ;;  %s4097_s9 = sshll.u32 %s8216_s22, 5 }
  0x12   : > { %4364 = vmatpush3.bf16.msra.mxu0 %v5173_v10  ;;  %4400 = vmatpush3.bf16.msra.mxu1 %v5173_v10  ;;  %s5190_s10 = scalar_lea.vmem %s7820_s0, %s4096_s7  ;;  %s251_s12 = scalar_lea.vmem %s7826_s6, %s4097_s9 }
  0x13   : > { %4365 = vmatprep.subr.bf16.mxu0 %v7827_v3  ;;  %4401 = vmatprep.subr.bf16.mxu1 %v7827_v3  ;;  %v5194_v12 = vld [vmem:[%s5190_s10] sm:$0xff]  ;;  %v5197_v13 = vld [vmem:[%s5190_s10 + $0x8] sm:$0xff]  ;;  %v5200_v14 = vld [vmem:[%s5190_s10 + $0x10] sm:$0xff] }
  0x14   : > { %v5203_v15 = vld [vmem:[%s5190_s10 + $0x18] sm:$0xff]  ;;  %v388_v16 = vsel %vm387_vm1, %v5194_v12, 0.0  ;;  %v389_v17 = vsel %vm387_vm1, %v5197_v13, 0.0  ;;  %v391_v18 = vsel %vm387_vm1, %v5200_v14, 0.0  ;;  %v5213_v19 = vld [vmem:[%s5190_s10 + $0x20] sm:$0xff]  ;;  %v5221_v22 = vld [vmem:[%s5190_s10 + $0x28] sm:$0xff] }
  0x15   : > { %v390_v20 = vadd.f32 %v389_v17, %v388_v16  ;;  %v393_v21 = vsel %vm387_vm1, %v5203_v15, 0.0  ;;  %v395_v24 = vsel %vm387_vm1, %v5213_v19, 0.0  ;;  %v5226_v25 = vld [vmem:[%s5190_s10 + $0x30] sm:$0xff]  ;;  %v397_v27 = vsel %vm387_vm1, %v5221_v22, 0.0  ;;  %v5231_v28 = vld [vmem:[%s5190_s10 + $0x38] sm:$0xff]  ;;  %v5236_v31 = vld [vmem:[%s5190_s10 + $0x40] sm:$0xff] }
  0x16   : > { %4367 = vmatpush3.bf16.msra.mxu0 %v5182_v11  ;;  %4403 = vmatpush3.bf16.msra.mxu1 %v5182_v11  ;;  %v399_v30 = vsel %vm387_vm1, %v5226_v25, 0.0  ;;  %v401_v33 = vsel %vm387_vm1, %v5231_v28, 0.0  ;;  %v5241_v34 = vld [vmem:[%s5190_s10 + $0x48] sm:$0xff]  ;;  %v403_v36 = vsel %vm387_vm1, %v5236_v31, 0.0  ;;  %v5246_v37 = vld [vmem:[%s5190_s10 + $0x50] sm:$0xff]  ;;  %v5251_v40 = vld [vmem:[%s5190_s10 + $0x58] sm:$0xff] }
  0x17   : > { %4368 = vmatprep.subr.bf16.mxu0 %v7827_v3  ;;  %4404 = vmatprep.subr.bf16.mxu1 %v7827_v3  ;;  %v392_v23 = vadd.f32 %v391_v18, %v390_v20  ;;  %v405_v39 = vsel %vm387_vm1, %v5241_v34, 0.0  ;;  %v407_v42 = vsel %vm387_vm1, %v5246_v37, 0.0  ;;  %v5256_v43 = vld [vmem:[%s5190_s10 + $0x60] sm:$0xff]  ;;  %v409_v45 = vsel %vm387_vm1, %v5251_v40, 0.0  ;;  %v5261_v46 = vld [vmem:[%s5190_s10 + $0x68] sm:$0xff]  ;;  %v5266_v49 = vld [vmem:[%s5190_s10 + $0x70] sm:$0xff] }
  0x18   : > { %v411_v48 = vsel %vm387_vm1, %v5256_v43, 0.0  ;;  %v413_v51 = vsel %vm387_vm1, %v5261_v46, 0.0  ;;  %v5271_v52 = vld [vmem:[%s5190_s10 + $0x78] sm:$0xff]  ;;  %v415_v54 = vsel %vm387_vm1, %v5266_v49, 0.0  ;;  %v5276_v55 = vld [vmem:[%s5190_s10 + $0x80] sm:$0xff]  ;;  %v5281_v58 = vld [vmem:[%s5190_s10 + $0x88] sm:$0xff] }
  0x19   : > { %v394_v26 = vadd.f32 %v393_v21, %v392_v23  ;;  %v417_v57 = vsel %vm387_vm1, %v5271_v52, 0.0  ;;  %v419_v60 = vsel %vm387_vm1, %v5276_v55, 0.0  ;;  %v5286_v61 = vld [vmem:[%s5190_s10 + $0x90] sm:$0xff]  ;;  %v421_v63 = vsel %vm387_vm1, %v5281_v58, 0.0  ;;  %v5291_v16 = vld [vmem:[%s5190_s10 + $0x98] sm:$0xff]  ;;  %v5296_v20 = vld [vmem:[%s5190_s10 + $0xa0] sm:$0xff] }
  0x1a   : > { %v423_v18 = vsel %vm387_vm1, %v5286_v61, 0.0  ;;  %v425_v23 = vsel %vm387_vm1, %v5291_v16, 0.0  ;;  %v5411_v3 = vld [vmem:[%s5190_s10 + $0x158] sm:$0xff]  ;;  %v5416_v8 = vld [vmem:[%s5190_s10 + $0x160] sm:$0xff]  ;;  %v5421_v9 = vld [vmem:[%s5190_s10 + $0x168] sm:$0xff] }
  0x1b   : > { %v396_v29 = vadd.f32 %v395_v24, %v394_v26  ;;  %v5301_v24 = vld [vmem:[%s5190_s10 + $0xa8] sm:$0xff]  ;;  %7967 = vst [vmem:[#allocation9_spill] sm:$0xff] %v5411_v3  ;;  %7968 = vst [vmem:[#allocation10_spill] sm:$0xff] %v5416_v8  ;;  %v5426_v7 = vld [vmem:[%s5190_s10 + $0x170] sm:$0xff] }
  0x1c   : > { %7969 = vst [vmem:[#allocation11_spill] sm:$0xff] %v5421_v9  ;;  %7970 = vst [vmem:[#allocation12_spill] sm:$0xff] %v5426_v7  ;;  %v5431_v5 = vld [vmem:[%s5190_s10 + $0x178] sm:$0xff]  ;;  %v5436_v4 = vld [vmem:[%s5190_s10 + $0x180] sm:$0xff] }
  0x1d   : > { %v398_v32 = vadd.f32 %v397_v27, %v396_v29  ;;  %v427_v27 = vsel %vm387_vm1, %v5296_v20, 0.0  ;;  %v5306_v29 = vld [vmem:[%s5190_s10 + $0xb0] sm:$0xff]  ;;  %7971 = vst [vmem:[#allocation13_spill] sm:$0xff] %v5431_v5  ;;  %7972 = vst [vmem:[#allocation14_spill] sm:$0xff] %v5436_v4 }
  0x1f   : > { %v400_v35 = vadd.f32 %v399_v30, %v398_v32  ;;  %v429_v32 = vsel %vm387_vm1, %v5301_v24, 0.0 }
  0x21   : > { %v402_v38 = vadd.f32 %v401_v33, %v400_v35  ;;  %v5311_v33 = vld [vmem:[%s5190_s10 + $0xb8] sm:$0xff] }
  0x23   : > { %v404_v41 = vadd.f32 %v403_v36, %v402_v38  ;;  %v431_v36 = vsel %vm387_vm1, %v5306_v29, 0.0  ;;  %v5316_v38 = vld [vmem:[%s5190_s10 + $0xc0] sm:$0xff] }
  0x25   : > { %v406_v44 = vadd.f32 %v405_v39, %v404_v41  ;;  %v433_v41 = vsel %vm387_vm1, %v5311_v33, 0.0 }
  0x27   : > { %v408_v47 = vadd.f32 %v407_v42, %v406_v44  ;;  %v5321_v42 = vld [vmem:[%s5190_s10 + $0xc8] sm:$0xff] }
  0x29   : > { %v410_v50 = vadd.f32 %v409_v45, %v408_v47  ;;  %v435_v45 = vsel %vm387_vm1, %v5316_v38, 0.0  ;;  %v5326_v47 = vld [vmem:[%s5190_s10 + $0xd0] sm:$0xff] }
  0x2b   : > { %v412_v53 = vadd.f32 %v411_v48, %v410_v50  ;;  %v437_v50 = vsel %vm387_vm1, %v5321_v42, 0.0 }
  0x2d   : > { %v414_v56 = vadd.f32 %v413_v51, %v412_v53  ;;  %v5331_v51 = vld [vmem:[%s5190_s10 + $0xd8] sm:$0xff] }
  0x2f   : > { %v416_v59 = vadd.f32 %v415_v54, %v414_v56  ;;  %v439_v54 = vsel %vm387_vm1, %v5326_v47, 0.0  ;;  %v5336_v56 = vld [vmem:[%s5190_s10 + $0xe0] sm:$0xff] }
  0x31   : > { %v418_v62 = vadd.f32 %v417_v57, %v416_v59  ;;  %v441_v59 = vsel %vm387_vm1, %v5331_v51, 0.0 }
  0x33   : > { %v420_v17 = vadd.f32 %v419_v60, %v418_v62  ;;  %v5341_v60 = vld [vmem:[%s5190_s10 + $0xe8] sm:$0xff] }
  0x35   : > { %v422_v21 = vadd.f32 %v421_v63, %v420_v17  ;;  %v443_v63 = vsel %vm387_vm1, %v5336_v56, 0.0  ;;  %v5346_v17 = vld [vmem:[%s5190_s10 + $0xf0] sm:$0xff] }
  0x37   : > { %v424_v26 = vadd.f32 %v423_v18, %v422_v21  ;;  %v445_v21 = vsel %vm387_vm1, %v5341_v60, 0.0 }
  0x39   : > { %v426_v30 = vadd.f32 %v425_v23, %v424_v26  ;;  %v5351_v23 = vld [vmem:[%s5190_s10 + $0xf8] sm:$0xff] }
  0x3b   : > { %v428_v35 = vadd.f32 %v427_v27, %v426_v30  ;;  %v447_v27 = vsel %vm387_vm1, %v5346_v17, 0.0  ;;  %v5356_v30 = vld [vmem:[%s5190_s10 + $0x100] sm:$0xff] }
  0x3d   : > { %v430_v39 = vadd.f32 %v429_v32, %v428_v35  ;;  %v449_v35 = vsel %vm387_vm1, %v5351_v23, 0.0 }
  0x3f   : > { %v432_v44 = vadd.f32 %v431_v36, %v430_v39  ;;  %v5361_v36 = vld [vmem:[%s5190_s10 + $0x108] sm:$0xff] }
  0x41   : > { %v434_v48 = vadd.f32 %v433_v41, %v432_v44  ;;  %v451_v41 = vsel %vm387_vm1, %v5356_v30, 0.0  ;;  %v5366_v44 = vld [vmem:[%s5190_s10 + $0x110] sm:$0xff] }
  0x43   : > { %v436_v53 = vadd.f32 %v435_v45, %v434_v48  ;;  %v453_v48 = vsel %vm387_vm1, %v5361_v36, 0.0 }
  0x45   : > { %v438_v57 = vadd.f32 %v437_v50, %v436_v53  ;;  %v5371_v50 = vld [vmem:[%s5190_s10 + $0x118] sm:$0xff] }
  0x47   : > { %v440_v62 = vadd.f32 %v439_v54, %v438_v57  ;;  %v455_v54 = vsel %vm387_vm1, %v5366_v44, 0.0  ;;  %v5376_v57 = vld [vmem:[%s5190_s10 + $0x120] sm:$0xff] }
  0x48   : > { %7960 = vst [vmem:[#allocation2_spill] sm:$0xff] %v5376_v57 }
  0x49   : > { %v442_v18 = vadd.f32 %v441_v59, %v440_v62  ;;  %v457_v62 = vsel %vm387_vm1, %v5371_v50, 0.0 }
  0x4b   : > { %v444_v26 = vadd.f32 %v443_v63, %v442_v18  ;;  %v5381_v63 = vld [vmem:[%s5190_s10 + $0x128] sm:$0xff] }
  0x4c   : > { %7961 = vst [vmem:[#allocation3_spill] sm:$0xff] %v5381_v63 }
  0x4d   : > { %v446_v32 = vadd.f32 %v445_v21, %v444_v26  ;;  %v459_v21 = vsel %vm387_vm1, %v5376_v57, 0.0  ;;  %v5386_v26 = vld [vmem:[%s5190_s10 + $0x130] sm:$0xff] }
  0x4e   : > { %7962 = vst [vmem:[#allocation4_spill] sm:$0xff] %v5386_v26 }
  0x4f   : > { %v448_v39 = vadd.f32 %v447_v27, %v446_v32  ;;  %v461_v32 = vsel %vm387_vm1, %v5381_v63, 0.0 }
  0x51   : > { %v450_v45 = vadd.f32 %v449_v35, %v448_v39  ;;  %v5391_v35 = vld [vmem:[%s5190_s10 + $0x138] sm:$0xff] }
  0x52   : > { %7963 = vst [vmem:[#allocation5_spill] sm:$0xff] %v5391_v35 }
  0x53   : > { %v452_v53 = vadd.f32 %v451_v41, %v450_v45  ;;  %v463_v41 = vsel %vm387_vm1, %v5386_v26, 0.0  ;;  %v5396_v45 = vld [vmem:[%s5190_s10 + $0x140] sm:$0xff]  ;;  %v380_v26 = vld [vmem:[%s5190_s10 + $0x3f8] sm:$0xff] }
  0x54   : > { %7964 = vst [vmem:[#allocation6_spill] sm:$0xff] %v5396_v45 }
  0x55   : > { %v454_v59 = vadd.f32 %v453_v48, %v452_v53  ;;  %v465_v53 = vsel %vm387_vm1, %v5391_v35, 0.0 }
  0x57   : > { %v456_v18 = vadd.f32 %v455_v54, %v454_v59  ;;  %v5401_v54 = vld [vmem:[%s5190_s10 + $0x148] sm:$0xff] }
  0x58   : > { %7965 = vst [vmem:[#allocation7_spill] sm:$0xff] %v5401_v54 }
  0x59   : > { %v458_v27 = vadd.f32 %v457_v62, %v456_v18  ;;  %v467_v62 = vsel %vm387_vm1, %v5396_v45, 0.0  ;;  %v5406_v18 = vld [vmem:[%s5190_s10 + $0x150] sm:$0xff] }
  0x5a   : > { %7966 = vst [vmem:[#allocation8_spill] sm:$0xff] %v5406_v18 }
  0x5b   : > { %v460_v39 = vadd.f32 %v459_v21, %v458_v27  ;;  %v469_v27 = vsel %vm387_vm1, %v5401_v54, 0.0  ;;  %v322_v54 = vld [vmem:[%s5190_s10 + $0x228] sm:$0xff] }
  0x5d   : > { %v462_v48 = vadd.f32 %v461_v32, %v460_v39  ;;  %v471_v39 = vsel %vm387_vm1, %v5406_v18, 0.0 }
  0x5f   : > { %v464_v59 = vadd.f32 %v463_v41, %v462_v48  ;;  %v473_v48 = vsel %vm387_vm1, %v5411_v3, 0.0 }
  0x61   : > { %v466_v21 = vadd.f32 %v465_v53, %v464_v59  ;;  %v475_v59 = vsel %vm387_vm1, %v5416_v8, 0.0  ;;  %v5441_v8 = vld [vmem:[%s5190_s10 + $0x188] sm:$0xff] }
  0x62   : > { %7973 = vst [vmem:[#allocation15_spill] sm:$0xff] %v5441_v8 }
  0x63   : > { %v468_v32 = vadd.f32 %v467_v62, %v466_v21  ;;  %v477_v21 = vsel %vm387_vm1, %v5421_v9, 0.0  ;;  %v5446_v9 = vld [vmem:[%s5190_s10 + $0x190] sm:$0xff] }
  0x64   : > { %7974 = vst [vmem:[#allocation16_spill] sm:$0xff] %v5446_v9 }
  0x65   : > { %v470_v41 = vadd.f32 %v469_v27, %v468_v32  ;;  %v479_v32 = vsel %vm387_vm1, %v5426_v7, 0.0  ;;  %v5451_v7 = vld [vmem:[%s5190_s10 + $0x198] sm:$0xff] }
  0x66   : > { %7975 = vst [vmem:[#allocation17_spill] sm:$0xff] %v5451_v7 }
  0x67   : > { %v472_v53 = vadd.f32 %v471_v39, %v470_v41  ;;  %v481_v41 = vsel %vm387_vm1, %v5431_v5, 0.0  ;;  %v5456_v5 = vld [vmem:[%s5190_s10 + $0x1a0] sm:$0xff] }
  0x68   : > { %7976 = vst [vmem:[#allocation18_spill] sm:$0xff] %v5456_v5 }
  0x69   : > { %v474_v62 = vadd.f32 %v473_v48, %v472_v53  ;;  %v483_v53 = vsel %vm387_vm1, %v5436_v4, 0.0  ;;  %v5461_v4 = vld [vmem:[%s5190_s10 + $0x1a8] sm:$0xff] }
  0x6a   : > { %7977 = vst [vmem:[#allocation19_spill] sm:$0xff] %v5461_v4 }
  0x6b   : > { %v476_v27 = vadd.f32 %v475_v59, %v474_v62  ;;  %v485_v62 = vsel %vm387_vm1, %v5441_v8, 0.0  ;;  %v5466_v8 = vld [vmem:[%s5190_s10 + $0x1b0] sm:$0xff] }
  0x6c   : > { %7978 = vst [vmem:[#allocation20_spill] sm:$0xff] %v5466_v8 }
  0x6d   : > { %v478_v39 = vadd.f32 %v477_v21, %v476_v27  ;;  %v487_v27 = vsel %vm387_vm1, %v5446_v9, 0.0  ;;  %v5471_v9 = vld [vmem:[%s5190_s10 + $0x1b8] sm:$0xff] }
  0x6e   : > { %7979 = vst [vmem:[#allocation21_spill] sm:$0xff] %v5471_v9 }
  0x6f   : > { %v480_v48 = vadd.f32 %v479_v32, %v478_v39  ;;  %v489_v39 = vsel %vm387_vm1, %v5451_v7, 0.0  ;;  %v5476_v7 = vld [vmem:[%s5190_s10 + $0x1c0] sm:$0xff] }
  0x70   : > { %7980 = vst [vmem:[#allocation22_spill] sm:$0xff] %v5476_v7 }
  0x71   : > { %v482_v59 = vadd.f32 %v481_v41, %v480_v48  ;;  %v491_v48 = vsel %vm387_vm1, %v5456_v5, 0.0  ;;  %v5481_v5 = vld [vmem:[%s5190_s10 + $0x1c8] sm:$0xff] }
  0x72   : > { %7981 = vst [vmem:[#allocation23_spill] sm:$0xff] %v5481_v5 }
  0x73   : > { %v484_v21 = vadd.f32 %v483_v53, %v482_v59  ;;  %v493_v59 = vsel %vm387_vm1, %v5461_v4, 0.0  ;;  %v5486_v4 = vld [vmem:[%s5190_s10 + $0x1d0] sm:$0xff] }
  0x74   : > { %7982 = vst [vmem:[#allocation24_spill] sm:$0xff] %v5486_v4 }
  0x75   : > { %v486_v32 = vadd.f32 %v485_v62, %v484_v21  ;;  %v495_v21 = vsel %vm387_vm1, %v5466_v8, 0.0  ;;  %v5491_v8 = vld [vmem:[%s5190_s10 + $0x1d8] sm:$0xff] }
  0x76   : > { %7983 = vst [vmem:[#allocation25_spill] sm:$0xff] %v5491_v8 }
  0x77   : > { %v488_v41 = vadd.f32 %v487_v27, %v486_v32  ;;  %v497_v32 = vsel %vm387_vm1, %v5471_v9, 0.0  ;;  %v5496_v9 = vld [vmem:[%s5190_s10 + $0x1e0] sm:$0xff] }
  0x78   : > { %7984 = vst [vmem:[#allocation26_spill] sm:$0xff] %v5496_v9 }
  0x79   : > { %v490_v53 = vadd.f32 %v489_v39, %v488_v41  ;;  %v499_v41 = vsel %vm387_vm1, %v5476_v7, 0.0  ;;  %v5501_v7 = vld [vmem:[%s5190_s10 + $0x1e8] sm:$0xff] }
  0x7a   : > { %7985 = vst [vmem:[#allocation27_spill] sm:$0xff] %v5501_v7 }
  0x7b   : > { %v492_v62 = vadd.f32 %v491_v48, %v490_v53  ;;  %v501_v53 = vsel %vm387_vm1, %v5481_v5, 0.0  ;;  %v5506_v5 = vld [vmem:[%s5190_s10 + $0x1f0] sm:$0xff] }
  0x7c   : > { %7986 = vst [vmem:[#allocation28_spill] sm:$0xff] %v5506_v5 }
  0x7d   : > { %v494_v27 = vadd.f32 %v493_v59, %v492_v62  ;;  %v503_v62 = vsel %vm387_vm1, %v5486_v4, 0.0  ;;  %v5511_v4 = vld [vmem:[%s5190_s10 + $0x1f8] sm:$0xff] }
  0x7e   : > { %7987 = vst [vmem:[#allocation29_spill] sm:$0xff] %v5511_v4 }
  0x7f   : > { %v496_v39 = vadd.f32 %v495_v21, %v494_v27  ;;  %v505_v27 = vsel %vm387_vm1, %v5491_v8, 0.0  ;;  %v317_v8 = vld [vmem:[%s5190_s10 + $0x200] sm:$0xff] }
  0x81   : > { %v498_v48 = vadd.f32 %v497_v32, %v496_v39  ;;  %v507_v39 = vsel %vm387_vm1, %v5496_v9, 0.0  ;;  %v318_v9 = vld [vmem:[%s5190_s10 + $0x208] sm:$0xff] }
  0x82   : > { %v517_v18 = vsel %vm387_vm1, %v318_v9, 0.0  ;;  %v525_v9 = vsel %vm387_vm1, %v322_v54, 0.0 }
  0x83   : > { %v500_v59 = vadd.f32 %v499_v41, %v498_v48  ;;  %v509_v48 = vsel %vm387_vm1, %v5501_v7, 0.0 }
  0x85   : > { %v502_v21 = vadd.f32 %v501_v53, %v500_v59  ;;  %v511_v59 = vsel %vm387_vm1, %v5506_v5, 0.0 }
  0x87   : > { %v504_v32 = vadd.f32 %v503_v62, %v502_v21  ;;  %v513_v21 = vsel %vm387_vm1, %v5511_v4, 0.0 }
  0x89   : > { %v506_v41 = vadd.f32 %v505_v27, %v504_v32  ;;  %v515_v27 = vsel %vm387_vm1, %v317_v8, 0.0  ;;  %v319_v32 = vld [vmem:[%s5190_s10 + $0x210] sm:$0xff] }
  0x8a   : > { %v519_v5 = vsel %vm387_vm1, %v319_v32, 0.0  ;;  %v325_v32 = vld [vmem:[%s5190_s10 + $0x240] sm:$0xff] }
  0x8b   : > { %v508_v53 = vadd.f32 %v507_v39, %v506_v41  ;;  %v320_v39 = vld [vmem:[%s5190_s10 + $0x218] sm:$0xff] }
  0x8c   : > { %v521_v4 = vsel %vm387_vm1, %v320_v39, 0.0 }
  0x8d   : > { %v510_v62 = vadd.f32 %v509_v48, %v508_v53  ;;  %v321_v48 = vld [vmem:[%s5190_s10 + $0x220] sm:$0xff] }
  0x8e   : > { %v523_v8 = vsel %vm387_vm1, %v321_v48, 0.0  ;;  %v531_v48 = vsel %vm387_vm1, %v325_v32, 0.0 }
  0x8f   : > { %v512_v3 = vadd.f32 %v511_v59, %v510_v62  ;;  %v323_v62 = vld [vmem:[%s5190_s10 + $0x230] sm:$0xff] }
  0x91   : > { %v514_v7 = vadd.f32 %v513_v21, %v512_v3  ;;  %v324_v21 = vld [vmem:[%s5190_s10 + $0x238] sm:$0xff] }
  0x92   : > { %v529_v39 = vsel %vm387_vm1, %v324_v21, 0.0 }
  0x93   : > { %v516_v41 = vadd.f32 %v515_v27, %v514_v7  ;;  %v527_v27 = vsel %vm387_vm1, %v323_v62, 0.0 }
  0x95   : > { %v518_v53 = vadd.f32 %v517_v18, %v516_v41  ;;  %v326_v41 = vld [vmem:[%s5190_s10 + $0x248] sm:$0xff] }
  0x96   : > { %v533_v54 = vsel %vm387_vm1, %v326_v41, 0.0 }
  0x97   : > { %v520_v59 = vadd.f32 %v519_v5, %v518_v53  ;;  %v327_v53 = vld [vmem:[%s5190_s10 + $0x250] sm:$0xff] }
  0x98   : > { %v535_v62 = vsel %vm387_vm1, %v327_v53, 0.0 }
  0x99   : > { %v522_v3 = vadd.f32 %v521_v4, %v520_v59  ;;  %v328_v59 = vld [vmem:[%s5190_s10 + $0x258] sm:$0xff] }
  0x9a   : > { %v537_v21 = vsel %vm387_vm1, %v328_v59, 0.0 }
  0x9b   : > { %v524_v7 = vadd.f32 %v523_v8, %v522_v3  ;;  %v329_v3 = vld [vmem:[%s5190_s10 + $0x260] sm:$0xff] }
  0x9c   : > { %v539_v32 = vsel %vm387_vm1, %v329_v3, 0.0 }
  0x9d   : > { %v526_v18 = vadd.f32 %v525_v9, %v524_v7  ;;  %v330_v7 = vld [vmem:[%s5190_s10 + $0x268] sm:$0xff] }
  0x9e   : > { %v541_v41 = vsel %vm387_vm1, %v330_v7, 0.0 }
  0x9f   : > { %v528_v5 = vadd.f32 %v527_v27, %v526_v18  ;;  %v331_v18 = vld [vmem:[%s5190_s10 + $0x270] sm:$0xff] }
  0xa0   : > { %v543_v53 = vsel %vm387_vm1, %v331_v18, 0.0 }
  0xa1   : > { %v530_v4 = vadd.f32 %v529_v39, %v528_v5  ;;  %v332_v5 = vld [vmem:[%s5190_s10 + $0x278] sm:$0xff] }
  0xa2   : > { %v545_v59 = vsel %vm387_vm1, %v332_v5, 0.0 }
  0xa3   : > { %v532_v8 = vadd.f32 %v531_v48, %v530_v4  ;;  %v333_v4 = vld [vmem:[%s5190_s10 + $0x280] sm:$0xff] }
  0xa4   : > { %v547_v3 = vsel %vm387_vm1, %v333_v4, 0.0 }
  0xa5   : > { %v534_v9 = vadd.f32 %v533_v54, %v532_v8  ;;  %v334_v8 = vld [vmem:[%s5190_s10 + $0x288] sm:$0xff] }
  0xa6   : > { %v549_v7 = vsel %vm387_vm1, %v334_v8, 0.0 }
  0xa7   : > { %v536_v27 = vadd.f32 %v535_v62, %v534_v9  ;;  %v335_v9 = vld [vmem:[%s5190_s10 + $0x290] sm:$0xff] }
  0xa8   : > { %v551_v18 = vsel %vm387_vm1, %v335_v9, 0.0 }
  0xa9   : > { %v538_v39 = vadd.f32 %v537_v21, %v536_v27  ;;  %v336_v27 = vld [vmem:[%s5190_s10 + $0x298] sm:$0xff] }
  0xaa   : > { %v553_v5 = vsel %vm387_vm1, %v336_v27, 0.0 }
  0xab   : > { %v540_v48 = vadd.f32 %v539_v32, %v538_v39  ;;  %v337_v39 = vld [vmem:[%s5190_s10 + $0x2a0] sm:$0xff] }
  0xac   : > { %v555_v4 = vsel %vm387_vm1, %v337_v39, 0.0 }
  0xad   : > { %v542_v54 = vadd.f32 %v541_v41, %v540_v48  ;;  %v338_v48 = vld [vmem:[%s5190_s10 + $0x2a8] sm:$0xff] }
  0xae   : > { %v557_v8 = vsel %vm387_vm1, %v338_v48, 0.0 }
  0xaf   : > { %v544_v62 = vadd.f32 %v543_v53, %v542_v54  ;;  %v339_v54 = vld [vmem:[%s5190_s10 + $0x2b0] sm:$0xff] }
  0xb0   : > { %v559_v9 = vsel %vm387_vm1, %v339_v54, 0.0 }
  0xb1   : > { %v546_v21 = vadd.f32 %v545_v59, %v544_v62  ;;  %v340_v62 = vld [vmem:[%s5190_s10 + $0x2b8] sm:$0xff] }
  0xb2   : > { %v561_v27 = vsel %vm387_vm1, %v340_v62, 0.0 }
  0xb3   : > { %v548_v32 = vadd.f32 %v547_v3, %v546_v21  ;;  %v341_v21 = vld [vmem:[%s5190_s10 + $0x2c0] sm:$0xff] }
  0xb4   : > { %v563_v39 = vsel %vm387_vm1, %v341_v21, 0.0 }
  0xb5   : > { %v550_v41 = vadd.f32 %v549_v7, %v548_v32  ;;  %v342_v32 = vld [vmem:[%s5190_s10 + $0x2c8] sm:$0xff] }
  0xb6   : > { %v565_v48 = vsel %vm387_vm1, %v342_v32, 0.0 }
  0xb7   : > { %v552_v53 = vadd.f32 %v551_v18, %v550_v41  ;;  %v343_v41 = vld [vmem:[%s5190_s10 + $0x2d0] sm:$0xff] }
  0xb8   : > { %v567_v54 = vsel %vm387_vm1, %v343_v41, 0.0 }
  0xb9   : > { %v554_v59 = vadd.f32 %v553_v5, %v552_v53  ;;  %v344_v53 = vld [vmem:[%s5190_s10 + $0x2d8] sm:$0xff] }
  0xba   : > { %v569_v62 = vsel %vm387_vm1, %v344_v53, 0.0 }
  0xbb   : > { %v556_v3 = vadd.f32 %v555_v4, %v554_v59  ;;  %v345_v59 = vld [vmem:[%s5190_s10 + $0x2e0] sm:$0xff] }
  0xbc   : > { %v571_v21 = vsel %vm387_vm1, %v345_v59, 0.0 }
  0xbd   : > { %v558_v7 = vadd.f32 %v557_v8, %v556_v3  ;;  %v346_v3 = vld [vmem:[%s5190_s10 + $0x2e8] sm:$0xff] }
  0xbe   : > { %v573_v32 = vsel %vm387_vm1, %v346_v3, 0.0 }
  0xbf   : > { %v560_v18 = vadd.f32 %v559_v9, %v558_v7  ;;  %v347_v7 = vld [vmem:[%s5190_s10 + $0x2f0] sm:$0xff] }
  0xc0   : > { %v575_v41 = vsel %vm387_vm1, %v347_v7, 0.0 }
  0xc1   : > { %v562_v5 = vadd.f32 %v561_v27, %v560_v18  ;;  %v348_v18 = vld [vmem:[%s5190_s10 + $0x2f8] sm:$0xff] }
  0xc2   : > { %v577_v53 = vsel %vm387_vm1, %v348_v18, 0.0 }
  0xc3   : > { %v564_v4 = vadd.f32 %v563_v39, %v562_v5  ;;  %v349_v5 = vld [vmem:[%s5190_s10 + $0x300] sm:$0xff] }
  0xc4   : > { %v579_v59 = vsel %vm387_vm1, %v349_v5, 0.0 }
  0xc5   : > { %v566_v8 = vadd.f32 %v565_v48, %v564_v4  ;;  %v350_v4 = vld [vmem:[%s5190_s10 + $0x308] sm:$0xff] }
  0xc6   : > { %v581_v3 = vsel %vm387_vm1, %v350_v4, 0.0 }
  0xc7   : > { %v568_v9 = vadd.f32 %v567_v54, %v566_v8  ;;  %v351_v8 = vld [vmem:[%s5190_s10 + $0x310] sm:$0xff] }
  0xc8   : > { %v583_v7 = vsel %vm387_vm1, %v351_v8, 0.0 }
  0xc9   : > { %v570_v27 = vadd.f32 %v569_v62, %v568_v9  ;;  %v352_v9 = vld [vmem:[%s5190_s10 + $0x318] sm:$0xff] }
  0xca   : > { %v585_v18 = vsel %vm387_vm1, %v352_v9, 0.0 }
  0xcb   : > { %v572_v39 = vadd.f32 %v571_v21, %v570_v27  ;;  %v353_v27 = vld [vmem:[%s5190_s10 + $0x320] sm:$0xff] }
  0xcc   : > { %v587_v5 = vsel %vm387_vm1, %v353_v27, 0.0 }
  0xcd   : > { %v574_v48 = vadd.f32 %v573_v32, %v572_v39  ;;  %v354_v39 = vld [vmem:[%s5190_s10 + $0x328] sm:$0xff] }
  0xce   : > { %v589_v4 = vsel %vm387_vm1, %v354_v39, 0.0 }
  0xcf   : > { %v576_v54 = vadd.f32 %v575_v41, %v574_v48  ;;  %v355_v48 = vld [vmem:[%s5190_s10 + $0x330] sm:$0xff] }
  0xd0   : > { %v591_v8 = vsel %vm387_vm1, %v355_v48, 0.0 }
  0xd1   : > { %v578_v62 = vadd.f32 %v577_v53, %v576_v54  ;;  %v356_v54 = vld [vmem:[%s5190_s10 + $0x338] sm:$0xff] }
  0xd2   : > { %v593_v9 = vsel %vm387_vm1, %v356_v54, 0.0 }
  0xd3   : > { %v580_v21 = vadd.f32 %v579_v59, %v578_v62  ;;  %v357_v62 = vld [vmem:[%s5190_s10 + $0x340] sm:$0xff] }
  0xd4   : > { %v595_v27 = vsel %vm387_vm1, %v357_v62, 0.0 }
  0xd5   : > { %v582_v32 = vadd.f32 %v581_v3, %v580_v21  ;;  %v358_v21 = vld [vmem:[%s5190_s10 + $0x348] sm:$0xff] }
  0xd6   : > { %v597_v39 = vsel %vm387_vm1, %v358_v21, 0.0 }
  0xd7   : > { %v584_v41 = vadd.f32 %v583_v7, %v582_v32  ;;  %v359_v32 = vld [vmem:[%s5190_s10 + $0x350] sm:$0xff] }
  0xd8   : > { %v599_v48 = vsel %vm387_vm1, %v359_v32, 0.0 }
  0xd9   : > { %v586_v53 = vadd.f32 %v585_v18, %v584_v41  ;;  %v360_v41 = vld [vmem:[%s5190_s10 + $0x358] sm:$0xff] }
  0xda   : > { %v601_v54 = vsel %vm387_vm1, %v360_v41, 0.0 }
  0xdb   : > { %v588_v59 = vadd.f32 %v587_v5, %v586_v53  ;;  %v361_v53 = vld [vmem:[%s5190_s10 + $0x360] sm:$0xff] }
  0xdc   : > { %v603_v62 = vsel %vm387_vm1, %v361_v53, 0.0 }
  0xdd   : > { %v590_v3 = vadd.f32 %v589_v4, %v588_v59  ;;  %v362_v59 = vld [vmem:[%s5190_s10 + $0x368] sm:$0xff] }
  0xde   : > { %v605_v21 = vsel %vm387_vm1, %v362_v59, 0.0 }
  0xdf   : > { %v592_v7 = vadd.f32 %v591_v8, %v590_v3  ;;  %v363_v3 = vld [vmem:[%s5190_s10 + $0x370] sm:$0xff] }
  0xe0   : > { %v607_v32 = vsel %vm387_vm1, %v363_v3, 0.0 }
  0xe1   : > { %v594_v18 = vadd.f32 %v593_v9, %v592_v7  ;;  %v364_v7 = vld [vmem:[%s5190_s10 + $0x378] sm:$0xff] }
  0xe2   : > { %v609_v41 = vsel %vm387_vm1, %v364_v7, 0.0 }
  0xe3   : > { %v596_v5 = vadd.f32 %v595_v27, %v594_v18  ;;  %v365_v18 = vld [vmem:[%s5190_s10 + $0x380] sm:$0xff] }
  0xe4   : > { %v611_v53 = vsel %vm387_vm1, %v365_v18, 0.0 }
  0xe5   : > { %v598_v4 = vadd.f32 %v597_v39, %v596_v5  ;;  %v366_v5 = vld [vmem:[%s5190_s10 + $0x388] sm:$0xff] }
  0xe6   : > { %v613_v59 = vsel %vm387_vm1, %v366_v5, 0.0 }
  0xe7   : > { %v600_v8 = vadd.f32 %v599_v48, %v598_v4  ;;  %v367_v4 = vld [vmem:[%s5190_s10 + $0x390] sm:$0xff] }
  0xe8   : > { %v615_v3 = vsel %vm387_vm1, %v367_v4, 0.0 }
  0xe9   : > { %v602_v9 = vadd.f32 %v601_v54, %v600_v8  ;;  %v368_v8 = vld [vmem:[%s5190_s10 + $0x398] sm:$0xff] }
  0xea   : > { %v617_v7 = vsel %vm387_vm1, %v368_v8, 0.0 }
  0xeb   : > { %v604_v27 = vadd.f32 %v603_v62, %v602_v9  ;;  %v369_v9 = vld [vmem:[%s5190_s10 + $0x3a0] sm:$0xff] }
  0xec   : > { %v619_v18 = vsel %vm387_vm1, %v369_v9, 0.0 }
  0xed   : > { %v606_v39 = vadd.f32 %v605_v21, %v604_v27  ;;  %v370_v27 = vld [vmem:[%s5190_s10 + $0x3a8] sm:$0xff] }
  0xee   : > { %v621_v5 = vsel %vm387_vm1, %v370_v27, 0.0 }
  0xef   : > { %v608_v48 = vadd.f32 %v607_v32, %v606_v39  ;;  %v371_v39 = vld [vmem:[%s5190_s10 + $0x3b0] sm:$0xff] }
  0xf0   : > { %v623_v4 = vsel %vm387_vm1, %v371_v39, 0.0  ;;  %v377_v39 = vld [vmem:[%s5190_s10 + $0x3e0] sm:$0xff] }
  0xf1   : > { %v610_v54 = vadd.f32 %v609_v41, %v608_v48  ;;  %v372_v48 = vld [vmem:[%s5190_s10 + $0x3b8] sm:$0xff]  ;;  %v635_v35 = vsel %vm387_vm1, %v377_v39, 0.0 }
  0xf2   : > { %v625_v8 = vsel %vm387_vm1, %v372_v48, 0.0 }
  0xf3   : > { %v612_v62 = vadd.f32 %v611_v53, %v610_v54  ;;  %v373_v54 = vld [vmem:[%s5190_s10 + $0x3c0] sm:$0xff] }
  0xf4   : > { %v627_v9 = vsel %vm387_vm1, %v373_v54, 0.0 }
  0xf5   : > { %v614_v21 = vadd.f32 %v613_v59, %v612_v62  ;;  %v374_v62 = vld [vmem:[%s5190_s10 + $0x3c8] sm:$0xff] }
  0xf6   : > { %v629_v27 = vsel %vm387_vm1, %v374_v62, 0.0 }
  0xf7   : > { %v616_v32 = vadd.f32 %v615_v3, %v614_v21  ;;  %v375_v21 = vld [vmem:[%s5190_s10 + $0x3d0] sm:$0xff] }
  0xf9   : > { %v618_v41 = vadd.f32 %v617_v7, %v616_v32  ;;  %v376_v32 = vld [vmem:[%s5190_s10 + $0x3d8] sm:$0xff] }
  0xfb   : > { %v620_v53 = vadd.f32 %v619_v18, %v618_v41  ;;  %v631_v18 = vsel %vm387_vm1, %v375_v21, 0.0 }
  0xfd   : > { %v622_v59 = vadd.f32 %v621_v5, %v620_v53  ;;  %v633_v5 = vsel %vm387_vm1, %v376_v32, 0.0  ;;  %v378_v53 = vld [vmem:[%s5190_s10 + $0x3e8] sm:$0xff] }
  0xfe   : > { %v637_v54 = vsel %vm387_vm1, %v378_v53, 0.0 }
  0xff   : > { %v624_v3 = vadd.f32 %v623_v4, %v622_v59  ;;  %v379_v4 = vld [vmem:[%s5190_s10 + $0x3f0] sm:$0xff] }
 0x100   : > { %v639_v62 = vsel %vm387_vm1, %v379_v4, 0.0 }
 0x101   : > { %v626_v7 = vadd.f32 %v625_v8, %v624_v3 }
 0x103   : > { %v628_v45 = vadd.f32 %v627_v9, %v626_v7  ;;  %v641_v9 = vsel %vm387_vm1, %v380_v26, 0.0  ;;  %v7990_v26 = vand.u32 4294901760, %v5152_v2 }
 0x105   : > { %v630_v41 = vadd.f32 %v629_v27, %v628_v45 }
 0x107   : > { %v632_v48 = vadd.f32 %v631_v18, %v630_v41  ;;  %v7988_v18 = vand.u32 4294901760, %v5142_v0 }
 0x109   : > { %v634_v59 = vadd.f32 %v633_v5, %v632_v48  ;;  %v735_v39 = vsub.f32 %v5142_v0, %v7988_v18  ;;  %v7989_v5 = vand.u32 4294901760, %v5147_v1 }
 0x10b   : > { %v636_v8 = vadd.f32 %v635_v35, %v634_v59  ;;  %v742_v53 = vsub.f32 %v5147_v1, %v7989_v5  ;;  %v736_v48 = vand.u32 4294901760, %v735_v39 }
 0x10d   : > { %v638_v3 = vadd.f32 %v637_v54, %v636_v8  ;;  %v743_v59 = vand.u32 4294901760, %v742_v53  ;;  %v749_v54 = vsub.f32 %v5152_v2, %v7990_v26  ;;  %v7991_v8 = vand.u32 4294901760, %v5160_v6 }
 0x10f   : > { %v640_v21 = vadd.f32 %v639_v62, %v638_v3  ;;  %v756_v62 = vsub.f32 %v5160_v6, %v7991_v8  ;;  %v7992_v8 = vmov 0.0  }
 0x111   : > { %v642_v7 = vadd.f32 %v641_v9, %v640_v21  ;;  %v737_v9 = vsub.f32 %v735_v39, %v736_v48  ;;  %v744_v21 = vsub.f32 %v742_v53, %v743_v59 }
 0x113   : > { %v643_v45 = vrot.slane %v642_v7, 4  ;;  %v745_v18 = vand.u32 4294901760, %v744_v21 }
 0x115   : > { %v644_v27 = vadd.f32 %v643_v45, %v642_v7  ;;  %v750_v7 = vand.u32 4294901760, %v749_v54  ;;  %v757_v45 = vand.u32 4294901760, %v756_v62 }
 0x117   : > { %v645_v32 = vrot.slane %v644_v27, 2  ;;  %v758_v5 = vsub.f32 %v756_v62, %v757_v45 }
 0x119   : > { %v646_v41 = vadd.f32 %v645_v32, %v644_v27  ;;  %v738_v32 = vand.u32 4294901760, %v737_v9  ;;  %v759_v57 = vand.u32 4294901760, %v758_v5  ;;  %v5667_v9 = vpack.c.bf16 %v742_v53, %v735_v39 }
 0x11a   : > { %v5687_v39 = vpack.c.bf16 %v757_v45, %v750_v7 }
 0x11b   : > { %v647_v35 = vrot.slane %v646_v41, 1  ;;  %v5658_v2 = vpack.c.bf16 %v745_v18, %v738_v32 }
 0x11d   : > { %v648_v4 = vadd.f32 %v647_v35, %v646_v41  ;;  %v751_v41 = vsub.f32 %v749_v54, %v750_v7 }
 0x11f   : > { %v650_v3 = vmul.f32 0.0009765625, %v648_v4  ;;  %v752_v26 = vand.u32 4294901760, %v751_v41 }
 0x121   : > { %v652_v0 = vsel %vm387_vm1, %v650_v3, 0  ;;  %v5661_v4 = vpack.c.bf16 %v759_v57, %v752_v26  ;;  %v7993_v3 = vmov 0.0|0.0   ;;  %v5683_v57 = vpack.c.bf16 %v743_v59, %v736_v48 }
 0x122   : > { %v723_v1 = vand.u32 4294901760, %v652_v0  ;;  %v1139_v59 = vlaneseq }
 0x124   : > { %v724_v27 = vsub.f32 %v652_v0, %v723_v1 }
 0x126   : > { %v725_v35 = vand.u32 4294901760, %v724_v27 }
 0x128   : > { %v726_v63 = vsub.f32 %v724_v27, %v725_v35 }
 0x12a   : > { %v727_v6 = vand.u32 4294901760, %v726_v63  ;;  %v5671_v63 = vpack.c.bf16 %v756_v62, %v749_v54  ;;  %v5699_v54 = vshrl.u32 %v1139_v59, 7 }
 0x12c   : > { %4239 = vmatmul.mubr.f32.vlgmr.msra.gmra.mrb[0].mxu0 %v727_v6  ;;  %v7863_v62 = vsub.s32 0, %v5699_v54 }
 0x12d   : > { %4370 = vmatpush3.bf16.msra.mxu0 %v5658_v2  ;;  %4249 = vmatprep.mubr.msk.f32.mxu0 %vm5093_vm0, %v7992_v8 }
 0x12e   : > { %4371 = vmatprep.subr.bf16.mxu0 %v7993_v3 }
 0x131   : > { %4373 = vmatpush3.bf16.msra.mxu0 %v5661_v4 }
 0x132   : > { %4374 = vmatprep.subr.bf16.mxu0 %v7993_v3 }
 0x134   : > { %4250 = vmatmul.mubr.f32.vlgmr.msra.gmra.mrb[0].mxu0 %v723_v1 }
 0x135   : > { %4376 = vmatpush3.bf16.msra.mxu0 %v5667_v9  ;;  %4260 = vmatprep.mubr.msk.f32.mxu0 %vm5093_vm0, %v7992_v8 }
 0x136   : > { %4377 = vmatprep.subr.bf16.mxu0 %v7993_v3 }
 0x139   : > { %4379 = vmatpush3.bf16.msra.mxu0 %v5671_v63 }
 0x13a   : > { %4380 = vmatprep.subr.bf16.mxu0 %v7993_v3 }
 0x13c   : > { %4261 = vmatmul.mubr.f32.vlgmr.msra.gmra.mrb[0].mxu0 %v724_v27 }
 0x13d   : > { %4382 = vmatpush3.bf16.msra.mxu0 %v5173_v10  ;;  %4271 = vmatprep.mubr.msk.f32.mxu0 %vm5093_vm0, %v7992_v8 }
 0x13e   : > { %4383 = vmatprep.subr.bf16.mxu0 %v7993_v3 }
 0x141   : > { %4385 = vmatpush3.bf16.msra.mxu0 %v5182_v11 }
 0x142   : > { %4386 = vmatprep.subr.bf16.mxu0 %v7993_v3 }
 0x144   : > { %4272 = vmatmul.mubr.f32.vlgmr.msra.gmra.mrb[0].mxu0 %v725_v35 }
 0x145   : > { %4388 = vmatpush3.bf16.msra.mxu0 %v5683_v57  ;;  %4282 = vmatprep.mubr.msk.f32.mxu0 %vm5093_vm0, %v7992_v8 }
 0x146   : > { %4389 = vmatprep.subr.bf16.mxu0 %v7993_v3 }
 0x149   : > { %4391 = vmatpush3.bf16.msra.mxu0 %v5687_v39 }
 0x14a   : > { %4392 = vmatprep.subr.bf16.mxu0 %v7993_v3 }
 0x14c   : > { %4283 = vmatmul.mubr.f32.vlgmr.msra.gmra.mrb[0].mxu0 %v723_v1 }
 0x14d   : > { %4394 = vmatpush3.bf16.msra.mxu0 %v5173_v10  ;;  %4293 = vmatprep.mubr.msk.f32.mxu0 %vm5093_vm0, %v7992_v8 }
 0x14e   : > { %4395 = vmatprep.subr.bf16.mxu0 %v7993_v3 }
 0x151   : > { %4397 = vmatpush3.bf16.msra.mxu0 %v5182_v11 }
 0x154   : > { %4294 = vmatmul.mubr.f32.vlgmr.msra.gmra.mrb[0].mxu0 %v723_v1 }
 0x227   : > { %v1135_v53 = vpop.f32.mrb[0].mxu0 }
 0x228   : > { %v4295_v48 = vpop.f32.mrb[1].mxu0  ;;  %v5704_v0 = vrot.slane %v1135_v53, %v7863_v62 }
 0x22a   : > { %v5708_v21 = vsub.f32 %v5194_v12, %v5704_v0  ;;  %v5712_v7 = vsub.f32 %v5197_v13, %v5704_v0  ;;  %v5716_v45 = vsub.f32 %v5200_v14, %v5704_v0  ;;  %v5720_v1 = vsub.f32 %v5203_v15, %v5704_v0 }
 0x22b   : > { %v5728_v12 = vsub.f32 %v5213_v19, %v5704_v0  ;;  %v5734_v14 = vsub.f32 %v5221_v22, %v5704_v0  ;;  %v5742_v35 = vsub.f32 %v5226_v25, %v5704_v0  ;;  %v5749_v22 = vsub.f32 %v5231_v28, %v5704_v0 }
 0x22c   : > { %v1271_v27 = vmul.f32 %v5708_v21, %v5708_v21  ;;  %v1272_v32 = vmul.f32 %v5712_v7, %v5712_v7  ;;  %v1273_v13 = vmul.f32 %v5716_v45, %v5716_v45  ;;  %v1274_v15 = vmul.f32 %v5720_v1, %v5720_v1 }
 0x22d   : > { %v1275_v19 = vmul.f32 %v5728_v12, %v5728_v12  ;;  %v1276_v53 = vmul.f32 %v5734_v14, %v5734_v14  ;;  %v5756_v25 = vsub.f32 %v5236_v31, %v5704_v0  ;;  %v5763_v28 = vsub.f32 %v5241_v34, %v5704_v0 }
 0x22e   : > { %v1399_v18 = vsel %vm387_vm1, %v1271_v27, 0.0  ;;  %v1400_v41 = vsel %vm387_vm1, %v1272_v32, 0.0  ;;  %v1402_v26 = vsel %vm387_vm1, %v1273_v13, 0.0  ;;  %v1404_v48 = vsel %vm387_vm1, %v1274_v15, 0.0 }
 0x22f   : > { %v1401_v5 = vadd.f32 %v1400_v41, %v1399_v18  ;;  %7994 = vst [vmem:[#allocation30_spill] sm:$0xff] %v5756_v25  ;;  %v1277_v27 = vmul.f32 %v5742_v35, %v5742_v35  ;;  %v1406_v32 = vsel %vm387_vm1, %v1275_v19, 0.0  ;;  %7995 = vst [vmem:[#allocation31_spill] sm:$0xff] %v5763_v28  ;;  %v1278_v18 = vmul.f32 %v5749_v22, %v5749_v22 }
 0x230   : > { %v1408_v15 = vsel %vm387_vm1, %v1276_v53, 0.0  ;;  %v5770_v31 = vsub.f32 %v5246_v37, %v5704_v0  ;;  %v5777_v34 = vsub.f32 %v5251_v40, %v5704_v0  ;;  %v5784_v37 = vsub.f32 %v5256_v43, %v5704_v0 }
 0x231   : > { %v1403_v6 = vadd.f32 %v1402_v26, %v1401_v5  ;;  %v1279_v5 = vmul.f32 %v5756_v25, %v5756_v25  ;;  %v1410_v19 = vsel %vm387_vm1, %v1277_v27, 0.0  ;;  %v1412_v53 = vsel %vm387_vm1, %v1278_v18, 0.0 }
 0x232   : > { %7996 = vst [vmem:[#allocation32_spill] sm:$0xff] %v5770_v31  ;;  %7997 = vst [vmem:[#allocation33_spill] sm:$0xff] %v5777_v34  ;;  %v5791_v40 = vsub.f32 %v5261_v46, %v5704_v0  ;;  %v5798_v43 = vsub.f32 %v5266_v49, %v5704_v0  ;;  %v5805_v46 = vsub.f32 %v5271_v52, %v5704_v0 }
 0x233   : > { %v1405_v59 = vadd.f32 %v1404_v48, %v1403_v6  ;;  %v1280_v6 = vmul.f32 %v5763_v28, %v5763_v28  ;;  %7998 = vst [vmem:[#allocation34_spill] sm:$0xff] %v5784_v37  ;;  %v1414_v27 = vsel %vm387_vm1, %v1279_v5, 0.0  ;;  %v5812_v49 = vsub.f32 %v5276_v55, %v5704_v0 }
 0x234   : > { %7999 = vst [vmem:[#allocation35_spill] sm:$0xff] %v5791_v40  ;;  %8000 = vst [vmem:[#allocation36_spill] sm:$0xff] %v5798_v43  ;;  %v5819_v52 = vsub.f32 %v5281_v58, %v5704_v0  ;;  %v5826_v55 = vsub.f32 %v5286_v61, %v5704_v0  ;;  %v5833_v58 = vsub.f32 %v5291_v16, %v5704_v0 }
 0x235   : > { %v1407_v13 = vadd.f32 %v1406_v32, %v1405_v59  ;;  %v1281_v59 = vmul.f32 %v5770_v31, %v5770_v31  ;;  %v1416_v18 = vsel %vm387_vm1, %v1280_v6, 0.0  ;;  %8001 = vst [vmem:[#allocation37_spill] sm:$0xff] %v5805_v46  ;;  %v5840_v61 = vsub.f32 %v5296_v20, %v5704_v0 }
 0x236   : > { %v5847_v16 = vsub.f32 %v5301_v24, %v5704_v0  ;;  %v5854_v20 = vsub.f32 %v5306_v29, %v5704_v0  ;;  %v5861_v24 = vsub.f32 %v5311_v33, %v5704_v0  ;;  %v5868_v29 = vsub.f32 %v5316_v38, %v5704_v0 }
 0x237   : > { %v1409_v41 = vadd.f32 %v1408_v15, %v1407_v13  ;;  %v1282_v13 = vmul.f32 %v5777_v34, %v5777_v34  ;;  %v1418_v5 = vsel %vm387_vm1, %v1281_v59, 0.0  ;;  %v5875_v33 = vsub.f32 %v5321_v42, %v5704_v0 }
 0x238   : > { %8002 = vst [vmem:[#allocation38_spill] sm:$0xff] %v5868_v29  ;;  %v5882_v38 = vsub.f32 %v5326_v47, %v5704_v0  ;;  %v5889_v42 = vsub.f32 %v5331_v51, %v5704_v0  ;;  %v5896_v47 = vsub.f32 %v5336_v56, %v5704_v0  ;;  %v5903_v51 = vsub.f32 %v5341_v60, %v5704_v0 }
 0x239   : > { %v1411_v26 = vadd.f32 %v1410_v19, %v1409_v41  ;;  %v1283_v41 = vmul.f32 %v5784_v37, %v5784_v37  ;;  %v1420_v6 = vsel %vm387_vm1, %v1282_v13, 0.0  ;;  %8003 = vst [vmem:[#allocation39_spill] sm:$0xff] %v5875_v33  ;;  %v5910_v56 = vsub.f32 %v5346_v17, %v5704_v0 }
 0x23a   : > { %8004 = vst [vmem:[#allocation40_spill] sm:$0xff] %v5882_v38  ;;  %8005 = vst [vmem:[#allocation41_spill] sm:$0xff] %v5889_v42  ;;  %v5917_v60 = vsub.f32 %v5351_v23, %v5704_v0  ;;  %v5924_v17 = vsub.f32 %v5356_v30, %v5704_v0  ;;  %v5931_v23 = vsub.f32 %v5361_v36, %v5704_v0 }
 0x23b   : > { %v1413_v48 = vadd.f32 %v1412_v53, %v1411_v26  ;;  %v1284_v26 = vmul.f32 %v5791_v40, %v5791_v40  ;;  %v1422_v59 = vsel %vm387_vm1, %v1283_v41, 0.0  ;;  %8006 = vst [vmem:[#allocation42_spill] sm:$0xff] %v5896_v47  ;;  %8007 = vst [vmem:[#allocation43_spill] sm:$0xff] %v5903_v51  ;;  %v5938_v30 = vsub.f32 %v5366_v44, %v5704_v0 }
 0x23c   : > { %8008 = vst [vmem:[#allocation44_spill] sm:$0xff] %v5910_v56  ;;  %8009 = vst [vmem:[#allocation45_spill] sm:$0xff] %v5917_v60  ;;  %v5945_v36 = vsub.f32 %v5371_v50, %v5704_v0 }
 0x23d   : > { %v1415_v32 = vadd.f32 %v1414_v27, %v1413_v48  ;;  %v1285_v48 = vmul.f32 %v5798_v43, %v5798_v43  ;;  %v1424_v13 = vsel %vm387_vm1, %v1284_v26, 0.0 }
 0x23f   : > { %v1417_v15 = vadd.f32 %v1416_v18, %v1415_v32  ;;  %v1286_v32 = vmul.f32 %v5805_v46, %v5805_v46  ;;  %v1426_v41 = vsel %vm387_vm1, %v1285_v48, 0.0 }
 0x241   : > { %v1419_v19 = vadd.f32 %v1418_v5, %v1417_v15  ;;  %v1287_v15 = vmul.f32 %v5812_v49, %v5812_v49  ;;  %v1428_v26 = vsel %vm387_vm1, %v1286_v32, 0.0 }
 0x243   : > { %v1421_v53 = vadd.f32 %v1420_v6, %v1419_v19  ;;  %v1288_v19 = vmul.f32 %v5819_v52, %v5819_v52  ;;  %v1430_v48 = vsel %vm387_vm1, %v1287_v15, 0.0 }
 0x245   : > { %v1423_v27 = vadd.f32 %v1422_v59, %v1421_v53  ;;  %v1289_v53 = vmul.f32 %v5826_v55, %v5826_v55  ;;  %v1432_v32 = vsel %vm387_vm1, %v1288_v19, 0.0 }
 0x247   : > { %v1425_v18 = vadd.f32 %v1424_v13, %v1423_v27  ;;  %v1290_v27 = vmul.f32 %v5833_v58, %v5833_v58  ;;  %v1434_v15 = vsel %vm387_vm1, %v1289_v53, 0.0 }
 0x249   : > { %v1427_v5 = vadd.f32 %v1426_v41, %v1425_v18  ;;  %v1291_v18 = vmul.f32 %v5840_v61, %v5840_v61  ;;  %v1436_v19 = vsel %vm387_vm1, %v1290_v27, 0.0 }
 0x24b   : > { %v1429_v6 = vadd.f32 %v1428_v26, %v1427_v5  ;;  %v1292_v5 = vmul.f32 %v5847_v16, %v5847_v16  ;;  %v1438_v53 = vsel %vm387_vm1, %v1291_v18, 0.0 }
 0x24d   : > { %v1431_v59 = vadd.f32 %v1430_v48, %v1429_v6  ;;  %v1293_v6 = vmul.f32 %v5854_v20, %v5854_v20  ;;  %v1440_v27 = vsel %vm387_vm1, %v1292_v5, 0.0 }
 0x24f   : > { %v1433_v13 = vadd.f32 %v1432_v32, %v1431_v59  ;;  %v1294_v59 = vmul.f32 %v5861_v24, %v5861_v24  ;;  %v1442_v18 = vsel %vm387_vm1, %v1293_v6, 0.0 }
 0x251   : > { %v1435_v41 = vadd.f32 %v1434_v15, %v1433_v13  ;;  %v1295_v13 = vmul.f32 %v5868_v29, %v5868_v29  ;;  %v1444_v5 = vsel %vm387_vm1, %v1294_v59, 0.0 }
 0x253   : > { %v1437_v26 = vadd.f32 %v1436_v19, %v1435_v41  ;;  %v1296_v41 = vmul.f32 %v5875_v33, %v5875_v33  ;;  %v1446_v6 = vsel %vm387_vm1, %v1295_v13, 0.0 }
 0x255   : > { %v1439_v48 = vadd.f32 %v1438_v53, %v1437_v26  ;;  %v1297_v26 = vmul.f32 %v5882_v38, %v5882_v38  ;;  %v1448_v59 = vsel %vm387_vm1, %v1296_v41, 0.0 }
 0x257   : > { %v1441_v32 = vadd.f32 %v1440_v27, %v1439_v48  ;;  %v1298_v48 = vmul.f32 %v5889_v42, %v5889_v42  ;;  %v1450_v13 = vsel %vm387_vm1, %v1297_v26, 0.0 }
 0x259   : > { %v1443_v15 = vadd.f32 %v1442_v18, %v1441_v32  ;;  %v1299_v32 = vmul.f32 %v5896_v47, %v5896_v47  ;;  %v1452_v41 = vsel %vm387_vm1, %v1298_v48, 0.0 }
 0x25b   : > { %v1445_v19 = vadd.f32 %v1444_v5, %v1443_v15  ;;  %v1300_v15 = vmul.f32 %v5903_v51, %v5903_v51  ;;  %v1454_v26 = vsel %vm387_vm1, %v1299_v32, 0.0 }
 0x25d   : > { %v1447_v53 = vadd.f32 %v1446_v6, %v1445_v19  ;;  %v1301_v19 = vmul.f32 %v5910_v56, %v5910_v56  ;;  %v1456_v48 = vsel %vm387_vm1, %v1300_v15, 0.0 }
 0x25f   : > { %v1449_v27 = vadd.f32 %v1448_v59, %v1447_v53  ;;  %v1302_v53 = vmul.f32 %v5917_v60, %v5917_v60  ;;  %v1458_v32 = vsel %vm387_vm1, %v1301_v19, 0.0 }
 0x261   : > { %v1451_v18 = vadd.f32 %v1450_v13, %v1449_v27  ;;  %v1303_v27 = vmul.f32 %v5924_v17, %v5924_v17  ;;  %v1460_v15 = vsel %vm387_vm1, %v1302_v53, 0.0 }
 0x263   : > { %v1453_v5 = vadd.f32 %v1452_v41, %v1451_v18  ;;  %v1304_v18 = vmul.f32 %v5931_v23, %v5931_v23  ;;  %v1462_v19 = vsel %vm387_vm1, %v1303_v27, 0.0 }
 0x265   : > { %v1455_v6 = vadd.f32 %v1454_v26, %v1453_v5  ;;  %v8010_v5 = vld [vmem:[#allocation2_spill] sm:$0xff]  ;;  %v1305_v26 = vmul.f32 %v5938_v30, %v5938_v30  ;;  %v1464_v53 = vsel %vm387_vm1, %v1304_v18, 0.0 }
 0x266   : > { %v5952_v44 = vsub.f32 %v8010_v5, %v5704_v0 }
 0x267   : > { %v1457_v59 = vadd.f32 %v1456_v48, %v1455_v6  ;;  %v8011_v48 = vld [vmem:[#allocation3_spill] sm:$0xff]  ;;  %v1466_v27 = vsel %vm387_vm1, %v1305_v26, 0.0 }
 0x268   : > { %v5959_v50 = vsub.f32 %v8011_v48, %v5704_v0  ;;  %v1307_v5 = vmul.f32 %v5952_v44, %v5952_v44 }
 0x269   : > { %v1459_v13 = vadd.f32 %v1458_v32, %v1457_v59  ;;  %v1306_v59 = vmul.f32 %v5945_v36, %v5945_v36 }
 0x26a   : > { %v1308_v62 = vmul.f32 %v5959_v50, %v5959_v50  ;;  %v1470_v26 = vsel %vm387_vm1, %v1307_v5, 0.0 }
 0x26b   : > { %v1461_v41 = vadd.f32 %v1460_v15, %v1459_v13  ;;  %v8012_v13 = vld [vmem:[#allocation4_spill] sm:$0xff]  ;;  %v1468_v18 = vsel %vm387_vm1, %v1306_v59, 0.0 }
 0x26c   : > { %v5966_v15 = vsub.f32 %v8012_v13, %v5704_v0  ;;  %v1472_v59 = vsel %vm387_vm1, %v1308_v62, 0.0 }
 0x26d   : > { %v1463_v6 = vadd.f32 %v1462_v19, %v1461_v41  ;;  %v8013_v19 = vld [vmem:[#allocation5_spill] sm:$0xff] }
 0x26e   : > { %v5973_v48 = vsub.f32 %v8013_v19, %v5704_v0  ;;  %v1309_v46 = vmul.f32 %v5966_v15, %v5966_v15 }
 0x26f   : > { %v1465_v32 = vadd.f32 %v1464_v53, %v1463_v6  ;;  %v8014_v53 = vld [vmem:[#allocation6_spill] sm:$0xff] }
 0x270   : > { %v5980_v13 = vsub.f32 %v8014_v53, %v5704_v0  ;;  %v1310_v43 = vmul.f32 %v5973_v48, %v5973_v48  ;;  %v1474_v5 = vsel %vm387_vm1, %v1309_v46, 0.0 }
 0x271   : > { %v1467_v41 = vadd.f32 %v1466_v27, %v1465_v32  ;;  %v8016_v27 = vld [vmem:[#allocation7_spill] sm:$0xff] }
 0x272   : > { %8015 = vst [vmem:[#allocation2_spill] sm:$0xff] %v5980_v13  ;;  %v5987_v19 = vsub.f32 %v8016_v27, %v5704_v0  ;;  %v1311_v60 = vmul.f32 %v5980_v13, %v5980_v13  ;;  %v1476_v62 = vsel %vm387_vm1, %v1310_v43, 0.0 }
 0x273   : > { %v1469_v6 = vadd.f32 %v1468_v18, %v1467_v41  ;;  %v8018_v18 = vld [vmem:[#allocation8_spill] sm:$0xff] }
 0x274   : > { %8017 = vst [vmem:[#allocation3_spill] sm:$0xff] %v5987_v19  ;;  %v5994_v53 = vsub.f32 %v8018_v18, %v5704_v0  ;;  %v1312_v56 = vmul.f32 %v5987_v19, %v5987_v19  ;;  %v1478_v46 = vsel %vm387_vm1, %v1311_v60, 0.0 }
 0x275   : > { %v1471_v32 = vadd.f32 %v1470_v26, %v1469_v6  ;;  %v8020_v26 = vld [vmem:[#allocation9_spill] sm:$0xff] }
 0x276   : > { %8019 = vst [vmem:[#allocation4_spill] sm:$0xff] %v5994_v53  ;;  %v6001_v27 = vsub.f32 %v8020_v26, %v5704_v0  ;;  %v1313_v40 = vmul.f32 %v5994_v53, %v5994_v53  ;;  %v1480_v43 = vsel %vm387_vm1, %v1312_v56, 0.0 }
 0x277   : > { %v1473_v41 = vadd.f32 %v1472_v59, %v1471_v32  ;;  %v8022_v59 = vld [vmem:[#allocation10_spill] sm:$0xff] }
 0x278   : > { %8021 = vst [vmem:[#allocation5_spill] sm:$0xff] %v6001_v27  ;;  %v6008_v18 = vsub.f32 %v8022_v59, %v5704_v0  ;;  %v1314_v37 = vmul.f32 %v6001_v27, %v6001_v27  ;;  %v1482_v60 = vsel %vm387_vm1, %v1313_v40, 0.0 }
 0x279   : > { %v1475_v6 = vadd.f32 %v1474_v5, %v1473_v41  ;;  %v8024_v5 = vld [vmem:[#allocation11_spill] sm:$0xff] }
 0x27a   : > { %8023 = vst [vmem:[#allocation6_spill] sm:$0xff] %v6008_v18  ;;  %v6015_v26 = vsub.f32 %v8024_v5, %v5704_v0  ;;  %v1315_v51 = vmul.f32 %v6008_v18, %v6008_v18  ;;  %v1484_v56 = vsel %vm387_vm1, %v1314_v37, 0.0 }
 0x27b   : > { %v1477_v32 = vadd.f32 %v1476_v62, %v1475_v6  ;;  %v8026_v62 = vld [vmem:[#allocation12_spill] sm:$0xff] }
 0x27c   : > { %8025 = vst [vmem:[#allocation7_spill] sm:$0xff] %v6015_v26  ;;  %v6022_v59 = vsub.f32 %v8026_v62, %v5704_v0  ;;  %v1316_v47 = vmul.f32 %v6015_v26, %v6015_v26  ;;  %v1486_v40 = vsel %vm387_vm1, %v1315_v51, 0.0 }
 0x27d   : > { %v1479_v41 = vadd.f32 %v1478_v46, %v1477_v32  ;;  %v8028_v46 = vld [vmem:[#allocation13_spill] sm:$0xff] }
 0x27e   : > { %8027 = vst [vmem:[#allocation8_spill] sm:$0xff] %v6022_v59  ;;  %v6029_v5 = vsub.f32 %v8028_v46, %v5704_v0  ;;  %v1317_v18 = vmul.f32 %v6022_v59, %v6022_v59  ;;  %v1488_v37 = vsel %vm387_vm1, %v1316_v47, 0.0 }
 0x27f   : > { %v1481_v6 = vadd.f32 %v1480_v43, %v1479_v41  ;;  %v8030_v43 = vld [vmem:[#allocation14_spill] sm:$0xff] }
 0x280   : > { %8029 = vst [vmem:[#allocation9_spill] sm:$0xff] %v6029_v5  ;;  %v6036_v62 = vsub.f32 %v8030_v43, %v5704_v0  ;;  %v1318_v26 = vmul.f32 %v6029_v5, %v6029_v5  ;;  %v1490_v51 = vsel %vm387_vm1, %v1317_v18, 0.0 }
 0x281   : > { %v1483_v32 = vadd.f32 %v1482_v60, %v1481_v6  ;;  %v8031_v60 = vld [vmem:[#allocation15_spill] sm:$0xff] }
 0x282   : > { %v6043_v46 = vsub.f32 %v8031_v60, %v5704_v0  ;;  %v1319_v59 = vmul.f32 %v6036_v62, %v6036_v62  ;;  %v1492_v47 = vsel %vm387_vm1, %v1318_v26, 0.0 }
 0x283   : > { %v1485_v41 = vadd.f32 %v1484_v56, %v1483_v32  ;;  %v8032_v56 = vld [vmem:[#allocation16_spill] sm:$0xff] }
 0x284   : > { %v6050_v43 = vsub.f32 %v8032_v56, %v5704_v0  ;;  %v1320_v5 = vmul.f32 %v6043_v46, %v6043_v46  ;;  %v1494_v18 = vsel %vm387_vm1, %v1319_v59, 0.0 }
 0x285   : > { %v1487_v6 = vadd.f32 %v1486_v40, %v1485_v41  ;;  %v8033_v40 = vld [vmem:[#allocation17_spill] sm:$0xff] }
 0x286   : > { %v6057_v60 = vsub.f32 %v8033_v40, %v5704_v0  ;;  %v1321_v27 = vmul.f32 %v6050_v43, %v6050_v43  ;;  %v1496_v26 = vsel %vm387_vm1, %v1320_v5, 0.0 }
 0x287   : > { %v1489_v32 = vadd.f32 %v1488_v37, %v1487_v6  ;;  %v8034_v37 = vld [vmem:[#allocation18_spill] sm:$0xff] }
 0x288   : > { %v6064_v56 = vsub.f32 %v8034_v37, %v5704_v0  ;;  %v1322_v53 = vmul.f32 %v6057_v60, %v6057_v60  ;;  %v1498_v59 = vsel %vm387_vm1, %v1321_v27, 0.0 }
 0x289   : > { %v1491_v41 = vadd.f32 %v1490_v51, %v1489_v32  ;;  %v8035_v51 = vld [vmem:[#allocation19_spill] sm:$0xff] }
 0x28a   : > { %v6071_v40 = vsub.f32 %v8035_v51, %v5704_v0  ;;  %v1323_v34 = vmul.f32 %v6064_v56, %v6064_v56  ;;  %v1500_v5 = vsel %vm387_vm1, %v1322_v53, 0.0 }
 0x28b   : > { %v1493_v6 = vadd.f32 %v1492_v47, %v1491_v41  ;;  %v8036_v47 = vld [vmem:[#allocation20_spill] sm:$0xff] }
 0x28c   : > { %v6078_v37 = vsub.f32 %v8036_v47, %v5704_v0  ;;  %v1324_v31 = vmul.f32 %v6071_v40, %v6071_v40  ;;  %v1502_v27 = vsel %vm387_vm1, %v1323_v34, 0.0 }
 0x28d   : > { %v1495_v32 = vadd.f32 %v1494_v18, %v1493_v6  ;;  %v8037_v18 = vld [vmem:[#allocation21_spill] sm:$0xff] }
 0x28e   : > { %v6085_v51 = vsub.f32 %v8037_v18, %v5704_v0  ;;  %v1325_v42 = vmul.f32 %v6078_v37, %v6078_v37  ;;  %v1504_v53 = vsel %vm387_vm1, %v1324_v31, 0.0 }
 0x28f   : > { %v1497_v41 = vadd.f32 %v1496_v26, %v1495_v32  ;;  %v8038_v26 = vld [vmem:[#allocation22_spill] sm:$0xff] }
 0x290   : > { %v6092_v47 = vsub.f32 %v8038_v26, %v5704_v0  ;;  %v1326_v38 = vmul.f32 %v6085_v51, %v6085_v51  ;;  %v1506_v34 = vsel %vm387_vm1, %v1325_v42, 0.0 }
 0x291   : > { %v1499_v6 = vadd.f32 %v1498_v59, %v1497_v41  ;;  %v8040_v59 = vld [vmem:[#allocation23_spill] sm:$0xff] }
 0x292   : > { %8039 = vst [vmem:[#allocation10_spill] sm:$0xff] %v6092_v47  ;;  %v6099_v18 = vsub.f32 %v8040_v59, %v5704_v0  ;;  %v1327_v19 = vmul.f32 %v6092_v47, %v6092_v47  ;;  %v1508_v31 = vsel %vm387_vm1, %v1326_v38, 0.0 }
 0x293   : > { %v1501_v32 = vadd.f32 %v1500_v5, %v1499_v6  ;;  %v8042_v5 = vld [vmem:[#allocation24_spill] sm:$0xff] }
 0x294   : > { %8041 = vst [vmem:[#allocation11_spill] sm:$0xff] %v6099_v18  ;;  %v6106_v26 = vsub.f32 %v8042_v5, %v5704_v0  ;;  %v1328_v13 = vmul.f32 %v6099_v18, %v6099_v18  ;;  %v1510_v42 = vsel %vm387_vm1, %v1327_v19, 0.0 }
 0x295   : > { %v1503_v41 = vadd.f32 %v1502_v27, %v1501_v32  ;;  %v8044_v27 = vld [vmem:[#allocation25_spill] sm:$0xff] }
 0x296   : > { %8043 = vst [vmem:[#allocation12_spill] sm:$0xff] %v6106_v26  ;;  %v6113_v59 = vsub.f32 %v8044_v27, %v5704_v0  ;;  %v1329_v28 = vmul.f32 %v6106_v26, %v6106_v26  ;;  %v1512_v38 = vsel %vm387_vm1, %v1328_v13, 0.0 }
 0x297   : > { %v1505_v6 = vadd.f32 %v1504_v53, %v1503_v41  ;;  %v8046_v53 = vld [vmem:[#allocation26_spill] sm:$0xff] }
 0x298   : > { %8045 = vst [vmem:[#allocation13_spill] sm:$0xff] %v6113_v59  ;;  %v6120_v5 = vsub.f32 %v8046_v53, %v5704_v0  ;;  %v1330_v25 = vmul.f32 %v6113_v59, %v6113_v59  ;;  %v1514_v19 = vsel %vm387_vm1, %v1329_v28, 0.0 }
 0x299   : > { %v1507_v32 = vadd.f32 %v1506_v34, %v1505_v6  ;;  %v8048_v34 = vld [vmem:[#allocation27_spill] sm:$0xff] }
 0x29a   : > { %8047 = vst [vmem:[#allocation14_spill] sm:$0xff] %v6120_v5  ;;  %v6127_v27 = vsub.f32 %v8048_v34, %v5704_v0  ;;  %v1331_v26 = vmul.f32 %v6120_v5, %v6120_v5  ;;  %v1516_v13 = vsel %vm387_vm1, %v1330_v25, 0.0 }
 0x29b   : > { %v1509_v41 = vadd.f32 %v1508_v31, %v1507_v32  ;;  %v8050_v31 = vld [vmem:[#allocation28_spill] sm:$0xff] }
 0x29c   : > { %8049 = vst [vmem:[#allocation15_spill] sm:$0xff] %v6127_v27  ;;  %v6134_v53 = vsub.f32 %v8050_v31, %v5704_v0  ;;  %v1332_v59 = vmul.f32 %v6127_v27, %v6127_v27 }
 0x29d   : > { %v1511_v6 = vadd.f32 %v1510_v42, %v1509_v41  ;;  %v8052_v42 = vld [vmem:[#allocation29_spill] sm:$0xff] }
 0x29e   : > { %8051 = vst [vmem:[#allocation16_spill] sm:$0xff] %v6134_v53  ;;  %v6141_v34 = vsub.f32 %v8052_v42, %v5704_v0  ;;  %v1333_v28 = vmul.f32 %v6134_v53, %v6134_v53  ;;  %v5015_v42 = vld [vmem:[%s5190_s10 + $0x208] sm:$0xff] }
 0x29f   : > { %v1513_v32 = vadd.f32 %v1512_v38, %v1511_v6  ;;  %v5014_v38 = vld [vmem:[%s5190_s10 + $0x200] sm:$0xff]  ;;  %v6155_v5 = vsub.f32 %v5015_v42, %v5704_v0  ;;  %v5017_v42 = vld [vmem:[%s5190_s10 + $0x218] sm:$0xff] }
 0x2a0   : > { %8053 = vst [vmem:[#allocation17_spill] sm:$0xff] %v6141_v34  ;;  %v6148_v31 = vsub.f32 %v5014_v38, %v5704_v0  ;;  %v1334_v25 = vmul.f32 %v6141_v34, %v6141_v34  ;;  %v5016_v38 = vld [vmem:[%s5190_s10 + $0x210] sm:$0xff]  ;;  %v6169_v53 = vsub.f32 %v5017_v42, %v5704_v0  ;;  %v5019_v42 = vld [vmem:[%s5190_s10 + $0x228] sm:$0xff] }
 0x2a1   : > { %v1515_v41 = vadd.f32 %v1514_v19, %v1513_v32  ;;  %v1518_v32 = vsel %vm387_vm1, %v1331_v26, 0.0  ;;  %8055 = vst [vmem:[#allocation19_spill] sm:$0xff] %v6155_v5  ;;  %v6162_v27 = vsub.f32 %v5016_v38, %v5704_v0  ;;  %v5018_v38 = vld [vmem:[%s5190_s10 + $0x220] sm:$0xff] }
 0x2a2   : > { %8054 = vst [vmem:[#allocation18_spill] sm:$0xff] %v6148_v31  ;;  %v1335_v26 = vmul.f32 %v6148_v31, %v6148_v31  ;;  %8057 = vst [vmem:[#allocation21_spill] sm:$0xff] %v6169_v53  ;;  %v6176_v34 = vsub.f32 %v5018_v38, %v5704_v0  ;;  %v6183_v31 = vsub.f32 %v5019_v42, %v5704_v0  ;;  %v5020_v38 = vld [vmem:[%s5190_s10 + $0x230] sm:$0xff]  ;;  %v5021_v42 = vld [vmem:[%s5190_s10 + $0x238] sm:$0xff] }
 0x2a3   : > { %v1517_v6 = vadd.f32 %v1516_v13, %v1515_v41  ;;  %v1520_v41 = vsel %vm387_vm1, %v1332_v59, 0.0  ;;  %8056 = vst [vmem:[#allocation20_spill] sm:$0xff] %v6162_v27  ;;  %v1336_v59 = vmul.f32 %v6155_v5, %v6155_v5  ;;  %v6190_v5 = vsub.f32 %v5020_v38, %v5704_v0  ;;  %v5022_v38 = vld [vmem:[%s5190_s10 + $0x240] sm:$0xff] }
 0x2a4   : > { %8058 = vst [vmem:[#allocation22_spill] sm:$0xff] %v6176_v34  ;;  %8059 = vst [vmem:[#allocation23_spill] sm:$0xff] %v6183_v31 }
 0x2a5   : > { %v1519_v19 = vadd.f32 %v1518_v32, %v1517_v6  ;;  %v1522_v6 = vsel %vm387_vm1, %v1333_v28, 0.0  ;;  %v1337_v28 = vmul.f32 %v6162_v27, %v6162_v27  ;;  %8060 = vst [vmem:[#allocation24_spill] sm:$0xff] %v6190_v5  ;;  %v6197_v27 = vsub.f32 %v5021_v42, %v5704_v0  ;;  %v5023_v42 = vld [vmem:[%s5190_s10 + $0x248] sm:$0xff] }
 0x2a7   : > { %v1521_v13 = vadd.f32 %v1520_v41, %v1519_v19  ;;  %v1524_v19 = vsel %vm387_vm1, %v1334_v25, 0.0  ;;  %v1338_v25 = vmul.f32 %v6169_v53, %v6169_v53  ;;  %8061 = vst [vmem:[#allocation25_spill] sm:$0xff] %v6197_v27  ;;  %v6204_v53 = vsub.f32 %v5022_v38, %v5704_v0  ;;  %v5024_v38 = vld [vmem:[%s5190_s10 + $0x250] sm:$0xff] }
 0x2a9   : > { %v1523_v32 = vadd.f32 %v1522_v6, %v1521_v13  ;;  %v1526_v13 = vsel %vm387_vm1, %v1335_v26, 0.0  ;;  %v1339_v26 = vmul.f32 %v6176_v34, %v6176_v34  ;;  %8062 = vst [vmem:[#allocation26_spill] sm:$0xff] %v6204_v53  ;;  %v6211_v34 = vsub.f32 %v5023_v42, %v5704_v0  ;;  %v5025_v42 = vld [vmem:[%s5190_s10 + $0x258] sm:$0xff] }
 0x2ab   : > { %v1525_v41 = vadd.f32 %v1524_v19, %v1523_v32  ;;  %v1528_v32 = vsel %vm387_vm1, %v1336_v59, 0.0  ;;  %v1340_v59 = vmul.f32 %v6183_v31, %v6183_v31  ;;  %8063 = vst [vmem:[#allocation27_spill] sm:$0xff] %v6211_v34  ;;  %v6218_v31 = vsub.f32 %v5024_v38, %v5704_v0  ;;  %v5026_v38 = vld [vmem:[%s5190_s10 + $0x260] sm:$0xff] }
 0x2ad   : > { %v1527_v6 = vadd.f32 %v1526_v13, %v1525_v41  ;;  %v1530_v41 = vsel %vm387_vm1, %v1337_v28, 0.0  ;;  %v1341_v28 = vmul.f32 %v6190_v5, %v6190_v5  ;;  %8064 = vst [vmem:[#allocation28_spill] sm:$0xff] %v6218_v31  ;;  %v6225_v5 = vsub.f32 %v5025_v42, %v5704_v0  ;;  %v5027_v42 = vld [vmem:[%s5190_s10 + $0x268] sm:$0xff] }
 0x2af   : > { %v1529_v19 = vadd.f32 %v1528_v32, %v1527_v6  ;;  %v1532_v6 = vsel %vm387_vm1, %v1338_v25, 0.0  ;;  %v1342_v25 = vmul.f32 %v6197_v27, %v6197_v27  ;;  %8065 = vst [vmem:[#allocation29_spill] sm:$0xff] %v6225_v5  ;;  %v6232_v27 = vsub.f32 %v5026_v38, %v5704_v0  ;;  %v5028_v38 = vld [vmem:[%s5190_s10 + $0x270] sm:$0xff] }
 0x2b1   : > { %v1531_v13 = vadd.f32 %v1530_v41, %v1529_v19  ;;  %v1534_v19 = vsel %vm387_vm1, %v1339_v26, 0.0  ;;  %v1343_v26 = vmul.f32 %v6204_v53, %v6204_v53  ;;  %8066 = vst [vmem:[#allocation46_spill] sm:$0xff] %v6232_v27  ;;  %v6239_v53 = vsub.f32 %v5027_v42, %v5704_v0  ;;  %v5029_v42 = vld [vmem:[%s5190_s10 + $0x278] sm:$0xff] }
 0x2b3   : > { %v1533_v32 = vadd.f32 %v1532_v6, %v1531_v13  ;;  %v1536_v13 = vsel %vm387_vm1, %v1340_v59, 0.0  ;;  %v1344_v59 = vmul.f32 %v6211_v34, %v6211_v34  ;;  %8067 = vst [vmem:[#allocation47_spill] sm:$0xff] %v6239_v53  ;;  %v6246_v34 = vsub.f32 %v5028_v38, %v5704_v0  ;;  %v5030_v38 = vld [vmem:[%s5190_s10 + $0x280] sm:$0xff] }
 0x2b5   : > { %v1535_v41 = vadd.f32 %v1534_v19, %v1533_v32  ;;  %v1538_v32 = vsel %vm387_vm1, %v1341_v28, 0.0  ;;  %v1345_v28 = vmul.f32 %v6218_v31, %v6218_v31  ;;  %8068 = vst [vmem:[#allocation48_spill] sm:$0xff] %v6246_v34  ;;  %v6253_v31 = vsub.f32 %v5029_v42, %v5704_v0  ;;  %v5031_v42 = vld [vmem:[%s5190_s10 + $0x288] sm:$0xff] }
 0x2b7   : > { %v1537_v6 = vadd.f32 %v1536_v13, %v1535_v41  ;;  %v1540_v41 = vsel %vm387_vm1, %v1342_v25, 0.0  ;;  %v1346_v25 = vmul.f32 %v6225_v5, %v6225_v5  ;;  %8069 = vst [vmem:[#allocation49_spill] sm:$0xff] %v6253_v31  ;;  %v6260_v5 = vsub.f32 %v5030_v38, %v5704_v0  ;;  %v5032_v38 = vld [vmem:[%s5190_s10 + $0x290] sm:$0xff] }
 0x2b9   : > { %v1539_v19 = vadd.f32 %v1538_v32, %v1537_v6  ;;  %v1542_v6 = vsel %vm387_vm1, %v1343_v26, 0.0  ;;  %v1347_v26 = vmul.f32 %v6232_v27, %v6232_v27  ;;  %8070 = vst [vmem:[#allocation50_spill] sm:$0xff] %v6260_v5  ;;  %v6267_v27 = vsub.f32 %v5031_v42, %v5704_v0  ;;  %v5033_v42 = vld [vmem:[%s5190_s10 + $0x298] sm:$0xff] }
 0x2bb   : > { %v1541_v13 = vadd.f32 %v1540_v41, %v1539_v19  ;;  %v1544_v19 = vsel %vm387_vm1, %v1344_v59, 0.0  ;;  %v1348_v59 = vmul.f32 %v6239_v53, %v6239_v53  ;;  %8071 = vst [vmem:[#allocation51_spill] sm:$0xff] %v6267_v27  ;;  %v6274_v53 = vsub.f32 %v5032_v38, %v5704_v0  ;;  %v5034_v38 = vld [vmem:[%s5190_s10 + $0x2a0] sm:$0xff] }
 0x2bd   : > { %v1543_v32 = vadd.f32 %v1542_v6, %v1541_v13  ;;  %v1546_v13 = vsel %vm387_vm1, %v1345_v28, 0.0  ;;  %v1349_v28 = vmul.f32 %v6246_v34, %v6246_v34  ;;  %8072 = vst [vmem:[#allocation52_spill] sm:$0xff] %v6274_v53  ;;  %v6281_v34 = vsub.f32 %v5033_v42, %v5704_v0  ;;  %v5035_v42 = vld [vmem:[%s5190_s10 + $0x2a8] sm:$0xff] }
 0x2bf   : > { %v1545_v41 = vadd.f32 %v1544_v19, %v1543_v32  ;;  %v1548_v32 = vsel %vm387_vm1, %v1346_v25, 0.0  ;;  %v1350_v25 = vmul.f32 %v6253_v31, %v6253_v31  ;;  %8073 = vst [vmem:[#allocation53_spill] sm:$0xff] %v6281_v34  ;;  %v6288_v31 = vsub.f32 %v5034_v38, %v5704_v0  ;;  %v5036_v38 = vld [vmem:[%s5190_s10 + $0x2b0] sm:$0xff] }
 0x2c1   : > { %v1547_v6 = vadd.f32 %v1546_v13, %v1545_v41  ;;  %v1550_v41 = vsel %vm387_vm1, %v1347_v26, 0.0  ;;  %v1351_v26 = vmul.f32 %v6260_v5, %v6260_v5  ;;  %8074 = vst [vmem:[#allocation54_spill] sm:$0xff] %v6288_v31  ;;  %v6295_v5 = vsub.f32 %v5035_v42, %v5704_v0  ;;  %v5037_v42 = vld [vmem:[%s5190_s10 + $0x2b8] sm:$0xff] }
 0x2c3   : > { %v1549_v19 = vadd.f32 %v1548_v32, %v1547_v6  ;;  %v1552_v6 = vsel %vm387_vm1, %v1348_v59, 0.0  ;;  %v1352_v59 = vmul.f32 %v6267_v27, %v6267_v27  ;;  %8075 = vst [vmem:[#allocation55_spill] sm:$0xff] %v6295_v5  ;;  %v6302_v27 = vsub.f32 %v5036_v38, %v5704_v0  ;;  %v5038_v38 = vld [vmem:[%s5190_s10 + $0x2c0] sm:$0xff] }
 0x2c5   : > { %v1551_v13 = vadd.f32 %v1550_v41, %v1549_v19  ;;  %v1554_v19 = vsel %vm387_vm1, %v1349_v28, 0.0  ;;  %v1353_v28 = vmul.f32 %v6274_v53, %v6274_v53  ;;  %8076 = vst [vmem:[#allocation56_spill] sm:$0xff] %v6302_v27  ;;  %v6309_v53 = vsub.f32 %v5037_v42, %v5704_v0  ;;  %v5039_v42 = vld [vmem:[%s5190_s10 + $0x2c8] sm:$0xff] }
 0x2c7   : > { %v1553_v32 = vadd.f32 %v1552_v6, %v1551_v13  ;;  %v1556_v13 = vsel %vm387_vm1, %v1350_v25, 0.0  ;;  %v1354_v25 = vmul.f32 %v6281_v34, %v6281_v34  ;;  %8077 = vst [vmem:[#allocation57_spill] sm:$0xff] %v6309_v53  ;;  %v6316_v34 = vsub.f32 %v5038_v38, %v5704_v0  ;;  %v5040_v38 = vld [vmem:[%s5190_s10 + $0x2d0] sm:$0xff] }
 0x2c9   : > { %v1555_v41 = vadd.f32 %v1554_v19, %v1553_v32  ;;  %v1558_v32 = vsel %vm387_vm1, %v1351_v26, 0.0  ;;  %v1355_v26 = vmul.f32 %v6288_v31, %v6288_v31  ;;  %8078 = vst [vmem:[#allocation58_spill] sm:$0xff] %v6316_v34  ;;  %v6323_v31 = vsub.f32 %v5039_v42, %v5704_v0  ;;  %v5041_v42 = vld [vmem:[%s5190_s10 + $0x2d8] sm:$0xff] }
 0x2cb   : > { %v1557_v6 = vadd.f32 %v1556_v13, %v1555_v41  ;;  %v1560_v41 = vsel %vm387_vm1, %v1352_v59, 0.0  ;;  %v1356_v59 = vmul.f32 %v6295_v5, %v6295_v5  ;;  %8079 = vst [vmem:[#allocation59_spill] sm:$0xff] %v6323_v31  ;;  %v6330_v5 = vsub.f32 %v5040_v38, %v5704_v0  ;;  %v5042_v38 = vld [vmem:[%s5190_s10 + $0x2e0] sm:$0xff] }
 0x2cd   : > { %v1559_v19 = vadd.f32 %v1558_v32, %v1557_v6  ;;  %v1562_v6 = vsel %vm387_vm1, %v1353_v28, 0.0  ;;  %v1357_v28 = vmul.f32 %v6302_v27, %v6302_v27  ;;  %8080 = vst [vmem:[#allocation60_spill] sm:$0xff] %v6330_v5  ;;  %v6337_v27 = vsub.f32 %v5041_v42, %v5704_v0  ;;  %v5043_v42 = vld [vmem:[%s5190_s10 + $0x2e8] sm:$0xff] }
 0x2cf   : > { %v1561_v13 = vadd.f32 %v1560_v41, %v1559_v19  ;;  %v1564_v19 = vsel %vm387_vm1, %v1354_v25, 0.0  ;;  %v1358_v25 = vmul.f32 %v6309_v53, %v6309_v53  ;;  %8081 = vst [vmem:[#allocation61_spill] sm:$0xff] %v6337_v27  ;;  %v6344_v53 = vsub.f32 %v5042_v38, %v5704_v0  ;;  %v5044_v38 = vld [vmem:[%s5190_s10 + $0x2f0] sm:$0xff] }
 0x2d1   : > { %v1563_v32 = vadd.f32 %v1562_v6, %v1561_v13  ;;  %v1566_v13 = vsel %vm387_vm1, %v1355_v26, 0.0  ;;  %v1359_v26 = vmul.f32 %v6316_v34, %v6316_v34  ;;  %8082 = vst [vmem:[#allocation62_spill] sm:$0xff] %v6344_v53  ;;  %v6351_v34 = vsub.f32 %v5043_v42, %v5704_v0  ;;  %v5045_v42 = vld [vmem:[%s5190_s10 + $0x2f8] sm:$0xff] }
 0x2d3   : > { %v1565_v41 = vadd.f32 %v1564_v19, %v1563_v32  ;;  %v1568_v32 = vsel %vm387_vm1, %v1356_v59, 0.0  ;;  %v1360_v59 = vmul.f32 %v6323_v31, %v6323_v31  ;;  %8083 = vst [vmem:[#allocation63_spill] sm:$0xff] %v6351_v34  ;;  %v6358_v31 = vsub.f32 %v5044_v38, %v5704_v0  ;;  %v5046_v38 = vld [vmem:[%s5190_s10 + $0x300] sm:$0xff] }
 0x2d5   : > { %v1567_v6 = vadd.f32 %v1566_v13, %v1565_v41  ;;  %v1570_v41 = vsel %vm387_vm1, %v1357_v28, 0.0  ;;  %v1361_v28 = vmul.f32 %v6330_v5, %v6330_v5  ;;  %8084 = vst [vmem:[#allocation64_spill] sm:$0xff] %v6358_v31  ;;  %v6365_v5 = vsub.f32 %v5045_v42, %v5704_v0  ;;  %v5047_v42 = vld [vmem:[%s5190_s10 + $0x308] sm:$0xff] }
 0x2d7   : > { %v1569_v19 = vadd.f32 %v1568_v32, %v1567_v6  ;;  %v1572_v6 = vsel %vm387_vm1, %v1358_v25, 0.0  ;;  %v1362_v25 = vmul.f32 %v6337_v27, %v6337_v27  ;;  %8085 = vst [vmem:[#allocation65_spill] sm:$0xff] %v6365_v5  ;;  %v6372_v27 = vsub.f32 %v5046_v38, %v5704_v0  ;;  %v5048_v38 = vld [vmem:[%s5190_s10 + $0x310] sm:$0xff] }
 0x2d9   : > { %v1571_v13 = vadd.f32 %v1570_v41, %v1569_v19  ;;  %v1574_v19 = vsel %vm387_vm1, %v1359_v26, 0.0  ;;  %v1363_v26 = vmul.f32 %v6344_v53, %v6344_v53  ;;  %8086 = vst [vmem:[#allocation66_spill] sm:$0xff] %v6372_v27  ;;  %v6379_v53 = vsub.f32 %v5047_v42, %v5704_v0  ;;  %v5049_v42 = vld [vmem:[%s5190_s10 + $0x318] sm:$0xff] }
 0x2db   : > { %v1573_v32 = vadd.f32 %v1572_v6, %v1571_v13  ;;  %v1576_v13 = vsel %vm387_vm1, %v1360_v59, 0.0  ;;  %v1364_v59 = vmul.f32 %v6351_v34, %v6351_v34  ;;  %8087 = vst [vmem:[#allocation67_spill] sm:$0xff] %v6379_v53  ;;  %v6386_v34 = vsub.f32 %v5048_v38, %v5704_v0  ;;  %v5050_v38 = vld [vmem:[%s5190_s10 + $0x320] sm:$0xff] }
 0x2dd   : > { %v1575_v41 = vadd.f32 %v1574_v19, %v1573_v32  ;;  %v1578_v32 = vsel %vm387_vm1, %v1361_v28, 0.0  ;;  %v1365_v28 = vmul.f32 %v6358_v31, %v6358_v31  ;;  %8088 = vst [vmem:[#allocation68_spill] sm:$0xff] %v6386_v34  ;;  %v6393_v31 = vsub.f32 %v5049_v42, %v5704_v0  ;;  %v5051_v42 = vld [vmem:[%s5190_s10 + $0x328] sm:$0xff] }
 0x2df   : > { %v1577_v6 = vadd.f32 %v1576_v13, %v1575_v41  ;;  %v1580_v41 = vsel %vm387_vm1, %v1362_v25, 0.0  ;;  %v1366_v25 = vmul.f32 %v6365_v5, %v6365_v5  ;;  %8089 = vst [vmem:[#allocation69_spill] sm:$0xff] %v6393_v31  ;;  %v6400_v5 = vsub.f32 %v5050_v38, %v5704_v0  ;;  %v5052_v38 = vld [vmem:[%s5190_s10 + $0x330] sm:$0xff] }
 0x2e1   : > { %v1579_v19 = vadd.f32 %v1578_v32, %v1577_v6  ;;  %v1582_v6 = vsel %vm387_vm1, %v1363_v26, 0.0  ;;  %v1367_v26 = vmul.f32 %v6372_v27, %v6372_v27  ;;  %8090 = vst [vmem:[#allocation70_spill] sm:$0xff] %v6400_v5  ;;  %v6407_v27 = vsub.f32 %v5051_v42, %v5704_v0  ;;  %v5053_v42 = vld [vmem:[%s5190_s10 + $0x338] sm:$0xff] }
 0x2e3   : > { %v1581_v13 = vadd.f32 %v1580_v41, %v1579_v19  ;;  %v1584_v19 = vsel %vm387_vm1, %v1364_v59, 0.0  ;;  %v1368_v59 = vmul.f32 %v6379_v53, %v6379_v53  ;;  %8091 = vst [vmem:[#allocation71_spill] sm:$0xff] %v6407_v27  ;;  %v6414_v53 = vsub.f32 %v5052_v38, %v5704_v0  ;;  %v5054_v38 = vld [vmem:[%s5190_s10 + $0x340] sm:$0xff] }
 0x2e5   : > { %v1583_v32 = vadd.f32 %v1582_v6, %v1581_v13  ;;  %v1586_v13 = vsel %vm387_vm1, %v1365_v28, 0.0  ;;  %v1369_v28 = vmul.f32 %v6386_v34, %v6386_v34  ;;  %8092 = vst [vmem:[#allocation72_spill] sm:$0xff] %v6414_v53  ;;  %v6421_v34 = vsub.f32 %v5053_v42, %v5704_v0  ;;  %v5055_v42 = vld [vmem:[%s5190_s10 + $0x348] sm:$0xff] }
 0x2e7   : > { %v1585_v41 = vadd.f32 %v1584_v19, %v1583_v32  ;;  %v1588_v32 = vsel %vm387_vm1, %v1366_v25, 0.0  ;;  %v1370_v25 = vmul.f32 %v6393_v31, %v6393_v31  ;;  %8093 = vst [vmem:[#allocation73_spill] sm:$0xff] %v6421_v34  ;;  %v6428_v31 = vsub.f32 %v5054_v38, %v5704_v0  ;;  %v5056_v38 = vld [vmem:[%s5190_s10 + $0x350] sm:$0xff] }
 0x2e9   : > { %v1587_v6 = vadd.f32 %v1586_v13, %v1585_v41  ;;  %v1590_v41 = vsel %vm387_vm1, %v1367_v26, 0.0  ;;  %v1371_v26 = vmul.f32 %v6400_v5, %v6400_v5  ;;  %8094 = vst [vmem:[#allocation74_spill] sm:$0xff] %v6428_v31  ;;  %v6435_v5 = vsub.f32 %v5055_v42, %v5704_v0  ;;  %v5057_v42 = vld [vmem:[%s5190_s10 + $0x358] sm:$0xff] }
 0x2eb   : > { %v1589_v19 = vadd.f32 %v1588_v32, %v1587_v6  ;;  %v1592_v6 = vsel %vm387_vm1, %v1368_v59, 0.0  ;;  %v1372_v59 = vmul.f32 %v6407_v27, %v6407_v27  ;;  %8095 = vst [vmem:[#allocation75_spill] sm:$0xff] %v6435_v5  ;;  %v6442_v27 = vsub.f32 %v5056_v38, %v5704_v0  ;;  %v5058_v38 = vld [vmem:[%s5190_s10 + $0x360] sm:$0xff] }
 0x2ed   : > { %v1591_v13 = vadd.f32 %v1590_v41, %v1589_v19  ;;  %v1594_v19 = vsel %vm387_vm1, %v1369_v28, 0.0  ;;  %v1373_v28 = vmul.f32 %v6414_v53, %v6414_v53  ;;  %8096 = vst [vmem:[#allocation76_spill] sm:$0xff] %v6442_v27  ;;  %v6449_v53 = vsub.f32 %v5057_v42, %v5704_v0  ;;  %v5059_v42 = vld [vmem:[%s5190_s10 + $0x368] sm:$0xff] }
 0x2ef   : > { %v1593_v32 = vadd.f32 %v1592_v6, %v1591_v13  ;;  %v1596_v13 = vsel %vm387_vm1, %v1370_v25, 0.0  ;;  %v1374_v25 = vmul.f32 %v6421_v34, %v6421_v34  ;;  %8097 = vst [vmem:[#allocation77_spill] sm:$0xff] %v6449_v53  ;;  %v6456_v34 = vsub.f32 %v5058_v38, %v5704_v0  ;;  %v5060_v38 = vld [vmem:[%s5190_s10 + $0x370] sm:$0xff] }
 0x2f1   : > { %v1595_v41 = vadd.f32 %v1594_v19, %v1593_v32  ;;  %v1598_v32 = vsel %vm387_vm1, %v1371_v26, 0.0  ;;  %v1375_v26 = vmul.f32 %v6428_v31, %v6428_v31  ;;  %8098 = vst [vmem:[#allocation78_spill] sm:$0xff] %v6456_v34  ;;  %v6463_v31 = vsub.f32 %v5059_v42, %v5704_v0  ;;  %v5061_v42 = vld [vmem:[%s5190_s10 + $0x378] sm:$0xff] }
 0x2f3   : > { %v1597_v6 = vadd.f32 %v1596_v13, %v1595_v41  ;;  %v1600_v41 = vsel %vm387_vm1, %v1372_v59, 0.0  ;;  %v1376_v59 = vmul.f32 %v6435_v5, %v6435_v5  ;;  %8099 = vst [vmem:[#allocation79_spill] sm:$0xff] %v6463_v31  ;;  %v6470_v5 = vsub.f32 %v5060_v38, %v5704_v0  ;;  %v5062_v38 = vld [vmem:[%s5190_s10 + $0x380] sm:$0xff] }
 0x2f5   : > { %v1599_v19 = vadd.f32 %v1598_v32, %v1597_v6  ;;  %v1602_v6 = vsel %vm387_vm1, %v1373_v28, 0.0  ;;  %v1377_v28 = vmul.f32 %v6442_v27, %v6442_v27  ;;  %8100 = vst [vmem:[#allocation80_spill] sm:$0xff] %v6470_v5  ;;  %v6477_v27 = vsub.f32 %v5061_v42, %v5704_v0  ;;  %v5063_v42 = vld [vmem:[%s5190_s10 + $0x388] sm:$0xff] }
 0x2f7   : > { %v1601_v13 = vadd.f32 %v1600_v41, %v1599_v19  ;;  %v1604_v19 = vsel %vm387_vm1, %v1374_v25, 0.0  ;;  %v1378_v25 = vmul.f32 %v6449_v53, %v6449_v53  ;;  %8101 = vst [vmem:[#allocation81_spill] sm:$0xff] %v6477_v27  ;;  %v6484_v53 = vsub.f32 %v5062_v38, %v5704_v0  ;;  %v5064_v38 = vld [vmem:[%s5190_s10 + $0x390] sm:$0xff] }
 0x2f9   : > { %v1603_v32 = vadd.f32 %v1602_v6, %v1601_v13  ;;  %v1606_v13 = vsel %vm387_vm1, %v1375_v26, 0.0  ;;  %v1379_v26 = vmul.f32 %v6456_v34, %v6456_v34  ;;  %8102 = vst [vmem:[#allocation82_spill] sm:$0xff] %v6484_v53  ;;  %v6491_v34 = vsub.f32 %v5063_v42, %v5704_v0  ;;  %v5065_v42 = vld [vmem:[%s5190_s10 + $0x398] sm:$0xff] }
 0x2fb   : > { %v1605_v41 = vadd.f32 %v1604_v19, %v1603_v32  ;;  %v1608_v32 = vsel %vm387_vm1, %v1376_v59, 0.0  ;;  %v1380_v59 = vmul.f32 %v6463_v31, %v6463_v31  ;;  %8103 = vst [vmem:[#allocation83_spill] sm:$0xff] %v6491_v34  ;;  %v6498_v31 = vsub.f32 %v5064_v38, %v5704_v0  ;;  %v5066_v38 = vld [vmem:[%s5190_s10 + $0x3a0] sm:$0xff] }
 0x2fd   : > { %v1607_v6 = vadd.f32 %v1606_v13, %v1605_v41  ;;  %v1610_v41 = vsel %vm387_vm1, %v1377_v28, 0.0  ;;  %v1381_v28 = vmul.f32 %v6470_v5, %v6470_v5  ;;  %8104 = vst [vmem:[#allocation84_spill] sm:$0xff] %v6498_v31  ;;  %v6505_v5 = vsub.f32 %v5065_v42, %v5704_v0  ;;  %v5067_v42 = vld [vmem:[%s5190_s10 + $0x3a8] sm:$0xff] }
 0x2ff   : > { %v1609_v19 = vadd.f32 %v1608_v32, %v1607_v6  ;;  %v1612_v6 = vsel %vm387_vm1, %v1378_v25, 0.0  ;;  %v1382_v25 = vmul.f32 %v6477_v27, %v6477_v27  ;;  %8105 = vst [vmem:[#allocation85_spill] sm:$0xff] %v6505_v5  ;;  %v6512_v27 = vsub.f32 %v5066_v38, %v5704_v0  ;;  %v5068_v38 = vld [vmem:[%s5190_s10 + $0x3b0] sm:$0xff] }
 0x301   : > { %v1611_v13 = vadd.f32 %v1610_v41, %v1609_v19  ;;  %v1614_v19 = vsel %vm387_vm1, %v1379_v26, 0.0  ;;  %v1383_v26 = vmul.f32 %v6484_v53, %v6484_v53  ;;  %8106 = vst [vmem:[#allocation86_spill] sm:$0xff] %v6512_v27  ;;  %v6519_v53 = vsub.f32 %v5067_v42, %v5704_v0  ;;  %v5069_v42 = vld [vmem:[%s5190_s10 + $0x3b8] sm:$0xff] }
 0x303   : > { %v1613_v32 = vadd.f32 %v1612_v6, %v1611_v13  ;;  %v1616_v13 = vsel %vm387_vm1, %v1380_v59, 0.0  ;;  %v1384_v59 = vmul.f32 %v6491_v34, %v6491_v34  ;;  %8107 = vst [vmem:[#allocation87_spill] sm:$0xff] %v6519_v53  ;;  %v6526_v34 = vsub.f32 %v5068_v38, %v5704_v0  ;;  %v5070_v38 = vld [vmem:[%s5190_s10 + $0x3c0] sm:$0xff] }
 0x305   : > { %v1615_v41 = vadd.f32 %v1614_v19, %v1613_v32  ;;  %v1618_v32 = vsel %vm387_vm1, %v1381_v28, 0.0  ;;  %v1385_v28 = vmul.f32 %v6498_v31, %v6498_v31  ;;  %8108 = vst [vmem:[#allocation88_spill] sm:$0xff] %v6526_v34  ;;  %v6533_v31 = vsub.f32 %v5069_v42, %v5704_v0  ;;  %v5071_v42 = vld [vmem:[%s5190_s10 + $0x3c8] sm:$0xff] }
 0x307   : > { %v1617_v6 = vadd.f32 %v1616_v13, %v1615_v41  ;;  %v1620_v41 = vsel %vm387_vm1, %v1382_v25, 0.0  ;;  %v1386_v25 = vmul.f32 %v6505_v5, %v6505_v5  ;;  %8109 = vst [vmem:[#allocation89_spill] sm:$0xff] %v6533_v31  ;;  %v6540_v5 = vsub.f32 %v5070_v38, %v5704_v0  ;;  %v5072_v38 = vld [vmem:[%s5190_s10 + $0x3d0] sm:$0xff] }
 0x309   : > { %v1619_v19 = vadd.f32 %v1618_v32, %v1617_v6  ;;  %v1622_v6 = vsel %vm387_vm1, %v1383_v26, 0.0  ;;  %v1387_v26 = vmul.f32 %v6512_v27, %v6512_v27  ;;  %8110 = vst [vmem:[#allocation90_spill] sm:$0xff] %v6540_v5  ;;  %v6547_v27 = vsub.f32 %v5071_v42, %v5704_v0  ;;  %v5073_v42 = vld [vmem:[%s5190_s10 + $0x3d8] sm:$0xff] }
 0x30b   : > { %v1621_v13 = vadd.f32 %v1620_v41, %v1619_v19  ;;  %v1624_v19 = vsel %vm387_vm1, %v1384_v59, 0.0  ;;  %v1388_v59 = vmul.f32 %v6519_v53, %v6519_v53  ;;  %8111 = vst [vmem:[#allocation91_spill] sm:$0xff] %v6547_v27  ;;  %v6554_v53 = vsub.f32 %v5072_v38, %v5704_v0  ;;  %v5074_v38 = vld [vmem:[%s5190_s10 + $0x3e0] sm:$0xff] }
 0x30d   : > { %v1623_v32 = vadd.f32 %v1622_v6, %v1621_v13  ;;  %v1626_v13 = vsel %vm387_vm1, %v1385_v28, 0.0  ;;  %v1389_v28 = vmul.f32 %v6526_v34, %v6526_v34  ;;  %8112 = vst [vmem:[#allocation92_spill] sm:$0xff] %v6554_v53  ;;  %v6561_v34 = vsub.f32 %v5073_v42, %v5704_v0 }
 0x30f   : > { %v1625_v41 = vadd.f32 %v1624_v19, %v1623_v32  ;;  %v1628_v32 = vsel %vm387_vm1, %v1386_v25, 0.0  ;;  %v1390_v25 = vmul.f32 %v6533_v31, %v6533_v31  ;;  %8113 = vst [vmem:[#allocation93_spill] sm:$0xff] %v6561_v34  ;;  %v6568_v31 = vsub.f32 %v5074_v38, %v5704_v0 }
 0x311   : > { %v1627_v6 = vadd.f32 %v1626_v13, %v1625_v41  ;;  %v1630_v41 = vsel %vm387_vm1, %v1387_v26, 0.0  ;;  %v1391_v26 = vmul.f32 %v6540_v5, %v6540_v5  ;;  %8114 = vst [vmem:[#allocation94_spill] sm:$0xff] %v6568_v31  ;;  %v5075_v5 = vld [vmem:[%s5190_s10 + $0x3e8] sm:$0xff] }
 0x312   : > { %v6575_v42 = vsub.f32 %v5075_v5, %v5704_v0 }
 0x313   : > { %v1629_v19 = vadd.f32 %v1628_v32, %v1627_v6  ;;  %v1632_v6 = vsel %vm387_vm1, %v1388_v59, 0.0  ;;  %v1392_v59 = vmul.f32 %v6547_v27, %v6547_v27  ;;  %v1394_v27 = vmul.f32 %v6561_v34, %v6561_v34 }
 0x314   : > { %8115 = vst [vmem:[#allocation95_spill] sm:$0xff] %v6575_v42  ;;  %v1396_v34 = vmul.f32 %v6575_v42, %v6575_v42 }
 0x315   : > { %v1631_v13 = vadd.f32 %v1630_v41, %v1629_v19  ;;  %v1634_v19 = vsel %vm387_vm1, %v1389_v28, 0.0  ;;  %v1393_v28 = vmul.f32 %v6554_v53, %v6554_v53  ;;  %v1395_v53 = vmul.f32 %v6568_v31, %v6568_v31 }
 0x317   : > { %v1633_v32 = vadd.f32 %v1632_v6, %v1631_v13  ;;  %v1636_v13 = vsel %vm387_vm1, %v1390_v25, 0.0  ;;  %v1640_v25 = vsel %vm387_vm1, %v1392_v59, 0.0  ;;  %v1644_v59 = vsel %vm387_vm1, %v1394_v27, 0.0 }
 0x319   : > { %v1635_v41 = vadd.f32 %v1634_v19, %v1633_v32  ;;  %v1638_v32 = vsel %vm387_vm1, %v1391_v26, 0.0  ;;  %v1642_v26 = vsel %vm387_vm1, %v1393_v28, 0.0 }
 0x31b   : > { %v1637_v6 = vadd.f32 %v1636_v13, %v1635_v41  ;;  %v5076_v13 = vld [vmem:[%s5190_s10 + $0x3f0] sm:$0xff] }
 0x31c   : > { %v6582_v38 = vsub.f32 %v5076_v13, %v5704_v0  ;;  %v1646_v13 = vsel %vm387_vm1, %v1395_v53, 0.0 }
 0x31d   : > { %v1639_v19 = vadd.f32 %v1638_v32, %v1637_v6  ;;  %v5077_v32 = vld [vmem:[%s5190_s10 + $0x3f8] sm:$0xff] }
 0x31e   : > { %8116 = vst [vmem:[#allocation96_spill] sm:$0xff] %v6582_v38  ;;  %v6589_v5 = vsub.f32 %v5077_v32, %v5704_v0 }
 0x31f   : > { %v1641_v41 = vadd.f32 %v1640_v25, %v1639_v19  ;;  %v1397_v25 = vmul.f32 %v6582_v38, %v6582_v38 }
 0x320   : > { %8117 = vst [vmem:[#allocation97_spill] sm:$0xff] %v6589_v5  ;;  %v1398_v28 = vmul.f32 %v6589_v5, %v6589_v5 }
 0x321   : > { %v1643_v6 = vadd.f32 %v1642_v26, %v1641_v41  ;;  %v1648_v41 = vsel %vm387_vm1, %v1396_v34, 0.0  ;;  %v1650_v0 = vsel %vm387_vm1, %v1397_v25, 0.0 }
 0x322   : > { %v1652_v42 = vsel %vm387_vm1, %v1398_v28, 0.0 }
 0x323   : > { %v1645_v19 = vadd.f32 %v1644_v59, %v1643_v6 }
 0x325   : > { %v1647_v18 = vadd.f32 %v1646_v13, %v1645_v19 }
 0x327   : > { %v1649_v26 = vadd.f32 %v1648_v41, %v1647_v18 }
 0x329   : > { %v1651_v32 = vadd.f32 %v1650_v0, %v1649_v26 }
 0x32b   : > { %v1653_v31 = vadd.f32 %v1652_v42, %v1651_v32 }
 0x32d   : > { %v1654_v27 = vrot.slane %v1653_v31, 4 }
 0x32f   : > { %v1655_v6 = vadd.f32 %v1654_v27, %v1653_v31 }
 0x331   : > { %v1656_v59 = vrot.slane %v1655_v6, 2 }
 0x333   : > { %v1657_v47 = vadd.f32 %v1656_v59, %v1655_v6 }
 0x335   : > { %v1658_v38 = vrot.slane %v1657_v47, 1 }
 0x337   : > { %v1659_v33 = vadd.f32 %v1658_v38, %v1657_v47 }
 0x339   : > { %v1660_v53 = vmul.f32 0.0009765625, %v1659_v33 }
 0x33b   : > { %v1662_v19 = vsel %vm387_vm1, %v1660_v53, 0 }
 0x33c   : > { %v1733_v13 = vand.u32 4294901760, %v1662_v19 }
 0x33e   : > { %v1734_v5 = vsub.f32 %v1662_v19, %v1733_v13 }
 0x340   : > { %v1735_v29 = vand.u32 4294901760, %v1734_v5 }
 0x342   : > { %v1736_v34 = vsub.f32 %v1734_v5, %v1735_v29 }
 0x344   : > { %v1737_v18 = vand.u32 4294901760, %v1736_v34 }
 0x346   : > { %4305 = vmatmul.mubr.f32.vlgmr.msra.gmra.mrb[0].mxu1 %v1737_v18 }
 0x347   : > { %4406 = vmatpush3.bf16.msra.mxu1 %v5658_v2  ;;  %4315 = vmatprep.mubr.msk.f32.mxu1 %vm5093_vm0, %v7992_v8 }
 0x348   : > { %4407 = vmatprep.subr.bf16.mxu1 %v7993_v3 }
 0x34b   : > { %4409 = vmatpush3.bf16.msra.mxu1 %v5661_v4 }
 0x34c   : > { %4410 = vmatprep.subr.bf16.mxu1 %v7993_v3 }
 0x34e   : > { %4316 = vmatmul.mubr.f32.vlgmr.msra.gmra.mrb[0].mxu1 %v1733_v13 }
 0x34f   : > { %4412 = vmatpush3.bf16.msra.mxu1 %v5667_v9  ;;  %4326 = vmatprep.mubr.msk.f32.mxu1 %vm5093_vm0, %v7992_v8 }
 0x350   : > { %4413 = vmatprep.subr.bf16.mxu1 %v7993_v3 }
 0x353   : > { %4415 = vmatpush3.bf16.msra.mxu1 %v5671_v63 }
 0x354   : > { %4416 = vmatprep.subr.bf16.mxu1 %v7993_v3 }
 0x356   : > { %4327 = vmatmul.mubr.f32.vlgmr.msra.gmra.mrb[0].mxu1 %v1734_v5 }
 0x357   : > { %4418 = vmatpush3.bf16.msra.mxu1 %v5173_v10  ;;  %4337 = vmatprep.mubr.msk.f32.mxu1 %vm5093_vm0, %v7992_v8 }
 0x358   : > { %4419 = vmatprep.subr.bf16.mxu1 %v7993_v3 }
 0x35b   : > { %4421 = vmatpush3.bf16.msra.mxu1 %v5182_v11 }
 0x35c   : > { %4422 = vmatprep.subr.bf16.mxu1 %v7993_v3 }
 0x35e   : > { %4338 = vmatmul.mubr.f32.vlgmr.msra.gmra.mrb[0].mxu1 %v1735_v29 }
 0x35f   : > { %4424 = vmatpush3.bf16.msra.mxu1 %v5683_v57  ;;  %4348 = vmatprep.mubr.msk.f32.mxu1 %vm5093_vm0, %v7992_v8  ;;  %v8118_v57 = vsub.s32 0, %v5699_v54  ;;  %v6652_v54 = vld [vmem:[%s7822_s2] ss:$0 sm:$0xff] }
 0x360   : > { %4425 = vmatprep.subr.bf16.mxu1 %v7993_v3 }
 0x363   : > { %4427 = vmatpush3.bf16.msra.mxu1 %v5687_v39 }
 0x364   : > { %4428 = vmatprep.subr.bf16.mxu1 %v7993_v3 }
 0x366   : > { %4349 = vmatmul.mubr.f32.vlgmr.msra.gmra.mrb[0].mxu1 %v1733_v13 }
 0x367   : > { %4430 = vmatpush3.bf16.msra.mxu1 %v5173_v10  ;;  %4359 = vmatprep.mubr.msk.f32.mxu1 %vm5093_vm0, %v7992_v8  ;;  %v6639_v10 = vld [vmem:[%s7821_s1] ss:$0 sm:$0xff] }
 0x368   : > { %4431 = vmatprep.subr.bf16.mxu1 %v7993_v3 }
 0x36b   : > { %4433 = vmatpush3.bf16.msra.mxu1 %v5182_v11 }
 0x36e   : > { %4360 = vmatmul.mubr.f32.vlgmr.msra.gmra.mrb[0].mxu1 %v1733_v13 }
 0x441   : > { %v2145_v2 = vpop.f32.mrb[0].mxu1 }
 0x442   : > { %v4434_v4 = vadd.f32 1e-05, %v2145_v2  ;;  %v4361_v9 = vpop.f32.mrb[1].mxu1 }
 0x444   : > { %4500 = vrsqrt.f32 %v4434_v4 }
 0x44e   : > { %v4501_v63 = vpop.eup %4500 }
 0x44f   : > { %v6634_v39 = vrot.slane %v4501_v63, %v8118_v57 }
 0x451   : > { %v2170_v8 = vmul.f32 %v6634_v39, %v5812_v49  ;;  %v2171_v11 = vmul.f32 %v6634_v39, %v5819_v52  ;;  %v2202_v3 = vmul.f32 %v6634_v39, %v6036_v62  ;;  %v2203_v29 = vmul.f32 %v6634_v39, %v6043_v46 }
 0x452   : > { %v2154_v33 = vmul.f32 %v6634_v39, %v5708_v21  ;;  %v2155_v49 = vmul.f32 %v6634_v39, %v5712_v7  ;;  %v2186_v52 = vmul.f32 %v6634_v39, %v5924_v17  ;;  %v2187_v62 = vmul.f32 %v6634_v39, %v5931_v23 }
 0x453   : > { %v2304_v47 = vmul.f32 %v6639_v10, %v2170_v8  ;;  %v2305_v46 = vmul.f32 %v6639_v10, %v2171_v11  ;;  %v2336_v31 = vmul.f32 %v6639_v10, %v2202_v3  ;;  %v2337_v42 = vmul.f32 %v6639_v10, %v2203_v29 }
 0x454   : > { %v2288_v38 = vmul.f32 %v6639_v10, %v2154_v33  ;;  %v2289_v21 = vmul.f32 %v6639_v10, %v2155_v49  ;;  %v2320_v7 = vmul.f32 %v6639_v10, %v2186_v52  ;;  %v2321_v5 = vmul.f32 %v6639_v10, %v2187_v62 }
 0x455   : > { %v6671_v17 = vadd.f32 %v6652_v54, %v2304_v47  ;;  %v6674_v23 = vadd.f32 %v6652_v54, %v2305_v46  ;;  %v6677_v25 = vadd.f32 %v6652_v54, %v2336_v31  ;;  %v6680_v28 = vadd.f32 %v6652_v54, %v2337_v42 }
 0x456   : > { %v6683_v41 = vadd.f32 %v6652_v54, %v2288_v38  ;;  %v6686_v26 = vadd.f32 %v6652_v54, %v2289_v21  ;;  %v6689_v0 = vadd.f32 %v6652_v54, %v2320_v7  ;;  %v6692_v32 = vadd.f32 %v6652_v54, %v2321_v5 }
 0x457   : > { %v3978_v27 = vmul.f32 -1.442695, %v6671_v17  ;;  %v3979_v6 = vmul.f32 -1.442695, %v6674_v23  ;;  %v4010_v59 = vmul.f32 -1.442695, %v6677_v25  ;;  %v2172_v53 = vmul.f32 %v6634_v39, %v5826_v55 }
 0x458   : > { %v4011_v19 = vmul.f32 -1.442695, %v6680_v28  ;;  %v3962_v13 = vmul.f32 -1.442695, %v6683_v41  ;;  %v3963_v34 = vmul.f32 -1.442695, %v6686_v26  ;;  %v2173_v18 = vmul.f32 %v6634_v39, %v5833_v58 }
 0x459   : > { %4502 = vpow2.f32 %v3978_v27  ;;  %v3994_v2 = vmul.f32 -1.442695, %v6689_v0  ;;  %v3995_v4 = vmul.f32 -1.442695, %v6692_v32  ;;  %v2306_v9 = vmul.f32 %v6639_v10, %v2172_v53 }
 0x45a   : > { %4504 = vpow2.f32 %v3979_v6  ;;  %v2307_v63 = vmul.f32 %v6639_v10, %v2173_v18  ;;  %v2204_v55 = vmul.f32 %v6634_v39, %v6050_v43  ;;  %v2205_v57 = vmul.f32 %v6634_v39, %v6057_v60 }
 0x45b   : > { %4506 = vpow2.f32 %v4010_v59  ;;  %v6713_v8 = vadd.f32 %v6652_v54, %v2306_v9  ;;  %v2156_v58 = vmul.f32 %v6634_v39, %v5716_v45  ;;  %v2157_v11 = vmul.f32 %v6634_v39, %v5720_v1 }
 0x45c   : > { %4508 = vpow2.f32 %v4011_v19  ;;  %v6720_v3 = vadd.f32 %v6652_v54, %v2307_v63  ;;  %v2338_v29 = vmul.f32 %v6639_v10, %v2204_v55  ;;  %v2339_v43 = vmul.f32 %v6639_v10, %v2205_v57 }
 0x45d   : > { %4510 = vpow2.f32 %v3962_v13  ;;  %v3980_v60 = vmul.f32 -1.442695, %v6713_v8  ;;  %v2290_v33 = vmul.f32 %v6639_v10, %v2156_v58  ;;  %v2291_v49 = vmul.f32 %v6639_v10, %v2157_v11 }
 0x45e   : > { %4512 = vpow2.f32 %v3963_v34  ;;  %v3981_v45 = vmul.f32 -1.442695, %v6720_v3  ;;  %v6729_v1 = vadd.f32 %v6652_v54, %v2338_v29  ;;  %v6732_v52 = vadd.f32 %v6652_v54, %v2339_v43 }
 0x45f   : > { %4514 = vpow2.f32 %v3994_v2  ;;  %v6735_v62 = vadd.f32 %v6652_v54, %v2290_v33  ;;  %v6738_v47 = vadd.f32 %v6652_v54, %v2291_v49  ;;  %v2188_v46 = vmul.f32 %v6634_v39, %v5938_v30 }
 0x460   : > { %4516 = vpow2.f32 %v3995_v4  ;;  %v4012_v31 = vmul.f32 -1.442695, %v6729_v1  ;;  %v4013_v42 = vmul.f32 -1.442695, %v6732_v52  ;;  %v2189_v38 = vmul.f32 %v6634_v39, %v5945_v36 }
 0x461   : > { %4518 = vpow2.f32 %v3980_v60  ;;  %v3964_v21 = vmul.f32 -1.442695, %v6735_v62  ;;  %v6748_v7 = vmul.f32 -1.442695, %v6738_v47  ;;  %v2322_v5 = vmul.f32 %v6639_v10, %v2188_v46 }
 0x462   : > { %4520 = vpow2.f32 %v3981_v45  ;;  %v2323_v27 = vmul.f32 %v6639_v10, %v2189_v38  ;;  %v2174_v30 = vmul.f32 %v6634_v39, %v5840_v61  ;;  %v2175_v6 = vmul.f32 %v6634_v39, %v5847_v16 }
 0x463   : > { %v4503_v59 = vpop.eup %4502  ;;  %4522 = vpow2.f32 %v4012_v31  ;;  %v6757_v36 = vadd.f32 %v6652_v54, %v2322_v5  ;;  %v2206_v53 = vmul.f32 %v6634_v39, %v6064_v56  ;;  %v2207_v19 = vmul.f32 %v6634_v39, %v6071_v40 }
 0x464   : > { %v4505_v13 = vpop.eup %4504  ;;  %v2950_v34 = vadd.f32 1.0, %v4503_v59  ;;  %4524 = vpow2.f32 %v4013_v42  ;;  %v6764_v18 = vadd.f32 %v6652_v54, %v2323_v27  ;;  %v2308_v61 = vmul.f32 %v6639_v10, %v2174_v30 }
 0x465   : > { %v4507_v16 = vpop.eup %4506  ;;  %v2951_v2 = vadd.f32 1.0, %v4505_v13  ;;  %4526 = vpow2.f32 %v3964_v21  ;;  %v6768_v4 = vmul.f32 -1.442695, %v6757_v36  ;;  %v2309_v9 = vmul.f32 %v6639_v10, %v2175_v6 }
 0x466   : > { %v4509_v56 = vpop.eup %4508  ;;  %4528 = vrcp.f32 %v2950_v34  ;;  %v2982_v63 = vadd.f32 1.0, %v4507_v16  ;;  %v6772_v40 = vmul.f32 -1.442695, %v6764_v18  ;;  %v6775_v55 = vadd.f32 %v6652_v54, %v2308_v61 }
 0x467   : > { %v4511_v57 = vpop.eup %4510  ;;  %4530 = vrcp.f32 %v2951_v2  ;;  %v2983_v58 = vadd.f32 1.0, %v4509_v56  ;;  %v6778_v11 = vadd.f32 %v6652_v54, %v2309_v9  ;;  %v2340_v29 = vmul.f32 %v6639_v10, %v2206_v53 }
 0x468   : > { %v4513_v43 = vpop.eup %4512  ;;  %4532 = vrcp.f32 %v2982_v63  ;;  %v2934_v60 = vadd.f32 1.0, %v4511_v57  ;;  %v6782_v33 = vmul.f32 -1.442695, %v6775_v55  ;;  %v2341_v49 = vmul.f32 %v6639_v10, %v2207_v19 }
 0x469   : > { %v4515_v45 = vpop.eup %4514  ;;  %4534 = vrcp.f32 %v2983_v58  ;;  %v2935_v46 = vadd.f32 1.0, %v4513_v43  ;;  %v6786_v31 = vmul.f32 -1.442695, %v6778_v11  ;;  %v6789_v42 = vadd.f32 %v6652_v54, %v2340_v29 }
 0x46a   : > { %v4517_v38 = vpop.eup %4516  ;;  %4536 = vrcp.f32 %v2934_v60  ;;  %v2966_v21 = vadd.f32 1.0, %v4515_v45  ;;  %v6792_v5 = vadd.f32 %v6652_v54, %v2341_v49  ;;  %v2158_v27 = vmul.f32 %v6634_v39, %v5728_v12 }
 0x46b   : > { %v4519_v30 = vpop.eup %4518  ;;  %4538 = vrcp.f32 %v2935_v46  ;;  %v2967_v6 = vadd.f32 1.0, %v4517_v38  ;;  %v6797_v59 = vmul.f32 -1.442695, %v6789_v42  ;;  %v2159_v53 = vmul.f32 %v6634_v39, %v5734_v14 }
 0x46c   : > { %v4521_v19 = vpop.eup %4520  ;;  %4540 = vrcp.f32 %v2966_v21  ;;  %v2952_v13 = vadd.f32 1.0, %v4519_v30  ;;  %v6802_v34 = vmul.f32 -1.442695, %v6792_v5  ;;  %v2292_v61 = vmul.f32 %v6639_v10, %v2158_v27 }
 0x46d   : > { %v4523_v16 = vpop.eup %4522  ;;  %4542 = vrcp.f32 %v2967_v6  ;;  %v2953_v12 = vadd.f32 1.0, %v4521_v19  ;;  %v2293_v2 = vmul.f32 %v6639_v10, %v2159_v53  ;;  %v2190_v9 = vmul.f32 %v6634_v39, %v5952_v44 }
 0x46e   : > { %v4525_v56 = vpop.eup %4524  ;;  %4544 = vrcp.f32 %v2952_v13  ;;  %v2984_v63 = vadd.f32 1.0, %v4523_v16  ;;  %v6809_v14 = vadd.f32 %v6652_v54, %v2292_v61  ;;  %v2191_v57 = vmul.f32 %v6634_v39, %v5959_v50 }
 0x46f   : > { %v4527_v58 = vpop.eup %4526  ;;  %4546 = vrcp.f32 %v2953_v12  ;;  %v2985_v29 = vadd.f32 1.0, %v4525_v56  ;;  %v6814_v43 = vadd.f32 %v6652_v54, %v2293_v2  ;;  %v2324_v60 = vmul.f32 %v6639_v10, %v2190_v9 }
 0x470   : > { %v4529_v49 = vpop.eup %4528  ;;  %4548 = vrcp.f32 %v2984_v63  ;;  %v2936_v44 = vadd.f32 1.0, %v4527_v58  ;;  %v3966_v45 = vmul.f32 -1.442695, %v6809_v14  ;;  %v2325_v46 = vmul.f32 %v6639_v10, %v2191_v57 }
 0x471   : > { %v4531_v38 = vpop.eup %4530  ;;  %v3334_v21 = vmul.f32 %v4529_v49, %v6671_v17  ;;  %4550 = vrcp.f32 %v2985_v29  ;;  %v3967_v50 = vmul.f32 -1.442695, %v6814_v43  ;;  %v6822_v27 = vadd.f32 %v6652_v54, %v2324_v60 }
 0x472   : > { %v4533_v30 = vpop.eup %4532  ;;  %v3335_v6 = vmul.f32 %v4531_v38, %v6674_v23  ;;  %4552 = vpow2.f32 %v6748_v7  ;;  %v6827_v53 = vadd.f32 %v6652_v54, %v2325_v46  ;;  %v2176_v19 = vmul.f32 %v6634_v39, %v5854_v20 }
 0x473   : > { %v4535_v13 = vpop.eup %4534  ;;  %v3366_v17 = vmul.f32 %v4533_v30, %v6677_v25  ;;  %4554 = vrcp.f32 %v2936_v44  ;;  %v3998_v61 = vmul.f32 -1.442695, %v6822_v27  ;;  %v2177_v16 = vmul.f32 %v6634_v39, %v5861_v24  ;;  %v3510_v44 = vld [vmem:[%s7824_s4] sm:$0x3] }
 0x474   : > { %v4537_v12 = vpop.eup %4536  ;;  %v3454_v2 = vpack.c.bf16 %v3335_v6, %v3334_v21  ;;  %v3367_v23 = vmul.f32 %v4535_v13, %v6680_v28  ;;  %4556 = vpow2.f32 %v6768_v4  ;;  %v3999_v7 = vmul.f32 -1.442695, %v6827_v53  ;;  %4174 = vmatprep.mubr.msk.bf16.mxu0 %vm387_vm1, %v3510_v44  ;;  %4192 = vmatprep.mubr.msk.bf16.mxu1 %vm387_vm1, %v3510_v44 }
 0x475   : > { %v4539_v9 = vpop.eup %4538  ;;  %v3318_v20 = vmul.f32 %v4537_v12, %v6683_v41  ;;  %4558 = vpow2.f32 %v6772_v40  ;;  %v2310_v25 = vmul.f32 %v6639_v10, %v2176_v19  ;;  %v2311_v56 = vmul.f32 %v6639_v10, %v2177_v16 }
 0x476   : > { %v4541_v63 = vpop.eup %4540  ;;  %4455 = vmatprep.subr.msk.bf16.mxu0 %vm387_vm1, %v3454_v2  ;;  %v3470_v24 = vpack.c.bf16 %v3367_v23, %v3366_v17  ;;  %v3319_v57 = vmul.f32 %v4539_v9, %v6686_v26  ;;  %4560 = vpow2.f32 %v6782_v33  ;;  %v2208_v28 = vmul.f32 %v6634_v39, %v6078_v37 }
 0x477   : > { %v4543_v4 = vpop.eup %4542  ;;  %v3350_v41 = vmul.f32 %v4541_v63, %v6689_v0  ;;  %4562 = vpow2.f32 %v6786_v31  ;;  %v6850_v40 = vadd.f32 %v6652_v54, %v2310_v25  ;;  %v6853_v58 = vadd.f32 %v6652_v54, %v2311_v56 }
 0x478   : > { %v4545_v29 = vpop.eup %4544  ;;  %4463 = vmatprep.subr.msk.bf16.mxu1 %vm387_vm1, %v3470_v24  ;;  %v3446_v26 = vpack.c.bf16 %v3319_v57, %v3318_v20  ;;  %v3351_v33 = vmul.f32 %v4543_v4, %v6692_v32  ;;  %4564 = vpow2.f32 %v6797_v59  ;;  %v2209_v37 = vmul.f32 %v6634_v39, %v6085_v51 }
 0x479   : > { %v4547_v0 = vpop.eup %4546  ;;  %v3336_v31 = vmul.f32 %v4545_v29, %v6713_v8  ;;  %4566 = vpow2.f32 %v6802_v34  ;;  %v3984_v60 = vmul.f32 -1.442695, %v6850_v40  ;;  %v3985_v49 = vmul.f32 -1.442695, %v6853_v58 }
 0x47a   : > { %v4549_v46 = vpop.eup %4548  ;;  %v3521_v32 = vsel %vm387_vm1, %v3446_v26, 0  ;;  %v3462_v59 = vpack.c.bf16 %v3351_v33, %v3350_v41  ;;  %v3337_v38 = vmul.f32 %v4547_v0, %v6720_v3  ;;  %4568 = vpow2.f32 %v3966_v45 }
 0x47b   : > { %v4551_v51 = vpop.eup %4550  ;;  %4159 = vmatpush3.bf16.xpose.msra.mxu0 %v3521_v32  ;;  %v3368_v8 = vmul.f32 %v4549_v46, %v6729_v1  ;;  %4570 = vpow2.f32 %v3967_v50  ;;  %v2342_v34 = vmul.f32 %v6639_v10, %v2208_v28  ;;  %v2343_v21 = vmul.f32 %v6639_v10, %v2209_v37 }
 0x47c   : > { %v4553_v30 = vpop.eup %4552  ;;  %v3569_v6 = vsel %vm387_vm1, %v3462_v59, 0  ;;  %v3455_v19 = vpack.c.bf16 %v3337_v38, %v3336_v31  ;;  %v3369_v3 = vmul.f32 %v4551_v51, %v6732_v52  ;;  %4572 = vpow2.f32 %v3998_v61  ;;  %v8119_v38 = vld [vmem:[#allocation38_spill] sm:$0xff] }
 0x47d   : > { %v4555_v45 = vpop.eup %4554  ;;  %4177 = vmatpush3.bf16.xpose.msra.mxu1 %v3569_v6  ;;  %v2937_v13 = vadd.f32 1.0, %v4553_v30  ;;  %4574 = vpow2.f32 %v3999_v7  ;;  %v6877_v17 = vadd.f32 %v6652_v54, %v2342_v34  ;;  %v6880_v1 = vadd.f32 %v6652_v54, %v2343_v21 }
 0x47e   : > { %v4557_v50 = vpop.eup %4556  ;;  %4456 = vmatprep.subr.msk.bf16.mxu0 %vm387_vm1, %v3455_v19  ;;  %v3471_v16 = vpack.c.bf16 %v3369_v3, %v3368_v8  ;;  %v6884_v12 = vmul.f32 %v4555_v45, %v6735_v62  ;;  %4576 = vpow2.f32 %v3984_v60  ;;  %v2160_v52 = vmul.f32 %v6634_v39, %v5742_v35  ;;  %v8120_v3 = vld [vmem:[#allocation39_spill] sm:$0xff] }
 0x47f   : > { %v4559_v61 = vpop.eup %4558  ;;  %4578 = vrcp.f32 %v2937_v13  ;;  %v2968_v2 = vadd.f32 1.0, %v4557_v50  ;;  %v6889_v23 = vmul.f32 -1.442695, %v6877_v17  ;;  %v6892_v7 = vmul.f32 -1.442695, %v6880_v1 }
 0x480   : > { %v4561_v9 = vpop.eup %4560  ;;  %4464 = vmatprep.subr.msk.bf16.mxu1 %vm387_vm1, %v3471_v16  ;;  %v2969_v20 = vadd.f32 1.0, %v4559_v61  ;;  %4580 = vpow2.f32 %v3985_v49  ;;  %v2161_v62 = vmul.f32 %v6634_v39, %v5749_v22  ;;  %v2294_v25 = vmul.f32 %v6639_v10, %v2160_v52  ;;  %v8121_v52 = vld [vmem:[#allocation10_spill] sm:$0xff] }
 0x481   : > { %v4563_v35 = vpop.eup %4562  ;;  %4582 = vrcp.f32 %v2968_v2  ;;  %v2954_v56 = vadd.f32 1.0, %v4561_v9  ;;  %v2192_v63 = vmul.f32 %v6634_v39, %v5966_v15  ;;  %v2193_v24 = vmul.f32 %v6634_v39, %v5973_v48  ;;  %v8122_v2 = vld [vmem:[#allocation11_spill] sm:$0xff] }
 0x482   : > { %v4565_v57 = vpop.eup %4564  ;;  %4584 = vrcp.f32 %v2969_v20  ;;  %v2955_v28 = vadd.f32 1.0, %v4563_v35  ;;  %v2295_v4 = vmul.f32 %v6639_v10, %v2161_v62  ;;  %v6904_v41 = vadd.f32 %v6652_v54, %v2294_v25 }
 0x483   : > { %v4567_v22 = vpop.eup %4566  ;;  %4586 = vrcp.f32 %v2954_v56  ;;  %v2986_v29 = vadd.f32 1.0, %v4565_v57  ;;  %v2326_v26 = vmul.f32 %v6639_v10, %v2192_v63  ;;  %v2327_v33 = vmul.f32 %v6639_v10, %v2193_v24 }
 0x484   : > { %v4569_v37 = vpop.eup %4568  ;;  %4588 = vrcp.f32 %v2955_v28  ;;  %v2987_v15 = vadd.f32 1.0, %v4567_v22  ;;  %v6909_v48 = vadd.f32 %v6652_v54, %v2295_v4  ;;  %v3968_v0 = vmul.f32 -1.442695, %v6904_v41 }
 0x485   : > { %v4571_v31 = vpop.eup %4570  ;;  %4590 = vrcp.f32 %v2986_v29  ;;  %v2938_v60 = vadd.f32 1.0, %v4569_v37  ;;  %v6913_v49 = vadd.f32 %v6652_v54, %v2326_v26  ;;  %v6916_v44 = vadd.f32 %v6652_v54, %v2327_v33 }
 0x486   : > { %v4573_v46 = vpop.eup %4572  ;;  %4592 = vrcp.f32 %v2987_v15  ;;  %v2939_v32 = vadd.f32 1.0, %v4571_v31  ;;  %v3969_v59 = vmul.f32 -1.442695, %v6909_v48  ;;  %v2178_v51 = vmul.f32 %v6634_v39, %v8119_v38 }
 0x487   : > { %v4575_v8 = vpop.eup %4574  ;;  %4594 = vrcp.f32 %v2938_v60  ;;  %v2970_v34 = vadd.f32 1.0, %v4573_v46  ;;  %v4000_v21 = vmul.f32 -1.442695, %v6913_v49  ;;  %v4001_v30 = vmul.f32 -1.442695, %v6916_v44 }
 0x488   : > { %v4577_v6 = vpop.eup %4576  ;;  %4596 = vrcp.f32 %v2939_v32  ;;  %v2971_v19 = vadd.f32 1.0, %v4575_v8  ;;  %v2179_v45 = vmul.f32 %v6634_v39, %v8120_v3  ;;  %v2312_v13 = vmul.f32 %v6639_v10, %v2178_v51 }
 0x489   : > { %v4579_v50 = vpop.eup %4578  ;;  %4598 = vrcp.f32 %v2970_v34  ;;  %v2956_v16 = vadd.f32 1.0, %v4577_v6  ;;  %v2210_v61 = vmul.f32 %v6634_v39, %v8121_v52  ;;  %v2211_v9 = vmul.f32 %v6634_v39, %v8122_v2 }
 0x48a   : > { %v4581_v20 = vpop.eup %4580  ;;  %v3321_v62 = vmul.f32 %v4579_v50, %v6738_v47  ;;  %4600 = vrcp.f32 %v2971_v19  ;;  %v2313_v25 = vmul.f32 %v6639_v10, %v2179_v45  ;;  %v6933_v35 = vadd.f32 %v6652_v54, %v2312_v13 }
 0x48b   : > { %v4583_v56 = vpop.eup %4582  ;;  %v2957_v63 = vadd.f32 1.0, %v4581_v20  ;;  %4602 = vrcp.f32 %v2956_v16  ;;  %v2344_v24 = vmul.f32 %v6639_v10, %v2210_v61  ;;  %v2345_v57 = vmul.f32 %v6639_v10, %v2211_v9 }
 0x48c   : > { %v4585_v28 = vpop.eup %4584  ;;  %v3447_v4 = vpack.c.bf16 %v3321_v62, %v6884_v12  ;;  %v3352_v22 = vmul.f32 %v4583_v56, %v6757_v36  ;;  %4604 = vpow2.f32 %v6889_v23  ;;  %v6941_v47 = vadd.f32 %v6652_v54, %v2313_v25  ;;  %v8126_v25 = vld [vmem:[#allocation3_spill] sm:$0xff] }
 0x48d   : > { %v4587_v29 = vpop.eup %4586  ;;  %v3353_v26 = vmul.f32 %v4585_v28, %v6764_v18  ;;  %4606 = vrcp.f32 %v2957_v63  ;;  %v3986_v33 = vmul.f32 -1.442695, %v6933_v35  ;;  %v6946_v37 = vadd.f32 %v6652_v54, %v2344_v24 }
 0x48e   : > { %v4589_v15 = vpop.eup %4588  ;;  %v3524_v31 = vsel %vm387_vm1, %v3447_v4, 0  ;;  %v3338_v12 = vmul.f32 %v4587_v29, %v6775_v55  ;;  %4608 = vpow2.f32 %v6892_v7  ;;  %v3987_v36 = vmul.f32 -1.442695, %v6941_v47  ;;  %v8123_v55 = vld [vmem:[#allocation30_spill] sm:$0xff] }
 0x48f   : > { %v4591_v23 = vpop.eup %4590  ;;  %4161 = vmatpush3.bf16.xpose.msra.mxu0 %v3524_v31  ;;  %v3463_v60 = vpack.c.bf16 %v3353_v26, %v3352_v22  ;;  %v3339_v18 = vmul.f32 %v4589_v15, %v6778_v11  ;;  %4610 = vpow2.f32 %v3968_v0  ;;  %v6954_v46 = vadd.f32 %v6652_v54, %v2345_v57 }
 0x490   : > { %v4593_v32 = vpop.eup %4592  ;;  %v3370_v38 = vmul.f32 %v4591_v23, %v6789_v42  ;;  %4612 = vpow2.f32 %v3969_v59  ;;  %v4018_v51 = vmul.f32 -1.442695, %v6946_v37  ;;  %v2162_v7 = vmul.f32 %v6634_v39, %v8123_v55  ;;  %v8124_v59 = vld [vmem:[#allocation31_spill] sm:$0xff]  ;;  %v8128_v55 = vld [vmem:[#allocation41_spill] sm:$0xff] }
 0x491   : > { %v4595_v8 = vpop.eup %4594  ;;  %v3572_v34 = vsel %vm387_vm1, %v3463_v60, 0  ;;  %v3456_v6 = vpack.c.bf16 %v3339_v18, %v3338_v12  ;;  %v3371_v19 = vmul.f32 %v4593_v32, %v6792_v5  ;;  %4614 = vpow2.f32 %v4000_v21  ;;  %v8127_v12 = vld [vmem:[#allocation40_spill] sm:$0xff] }
 0x492   : > { %v4597_v11 = vpop.eup %4596  ;;  %4179 = vmatpush3.bf16.xpose.msra.mxu1 %v3572_v34  ;;  %v3322_v0 = vmul.f32 %v4595_v8, %v6809_v14  ;;  %4616 = vpow2.f32 %v4001_v30  ;;  %v4019_v42 = vmul.f32 -1.442695, %v6954_v46  ;;  %v2163_v3 = vmul.f32 %v6634_v39, %v8124_v59  ;;  %v8125_v30 = vld [vmem:[#allocation2_spill] sm:$0xff] }
 0x493   : > { %v4599_v45 = vpop.eup %4598  ;;  %4457 = vmatprep.subr.msk.bf16.mxu0 %vm387_vm1, %v3456_v6  ;;  %v3472_v13 = vpack.c.bf16 %v3371_v19, %v3370_v38  ;;  %v3323_v50 = vmul.f32 %v4597_v11, %v6814_v43  ;;  %4618 = vpow2.f32 %v3986_v33  ;;  %v2296_v5 = vmul.f32 %v6639_v10, %v2162_v7 }
 0x494   : > { %v4601_v21 = vpop.eup %4600  ;;  %v3354_v16 = vmul.f32 %v4599_v45, %v6822_v27  ;;  %4620 = vpow2.f32 %v3987_v36  ;;  %v2297_v14 = vmul.f32 %v6639_v10, %v2163_v3  ;;  %v2194_v52 = vmul.f32 %v6634_v39, %v8125_v30  ;;  %v8130_v30 = vld [vmem:[#allocation13_spill] sm:$0xff] }
 0x495   : > { %v4603_v61 = vpop.eup %4602  ;;  %4465 = vmatprep.subr.msk.bf16.mxu1 %vm387_vm1, %v3472_v13  ;;  %v3448_v2 = vpack.c.bf16 %v3323_v50, %v3322_v0  ;;  %v3355_v9 = vmul.f32 %v4601_v21, %v6827_v53  ;;  %4622 = vpow2.f32 %v4018_v51  ;;  %v6976_v43 = vadd.f32 %v6652_v54, %v2296_v5  ;;  %v8129_v50 = vld [vmem:[#allocation12_spill] sm:$0xff] }
 0x496   : > { %v4605_v20 = vpop.eup %4604  ;;  %v3340_v62 = vmul.f32 %v4603_v61, %v6850_v40  ;;  %4624 = vpow2.f32 %v4019_v42  ;;  %v6980_v27 = vadd.f32 %v6652_v54, %v2297_v14  ;;  %v2195_v56 = vmul.f32 %v6634_v39, %v8126_v25 }
 0x497   : > { %v4607_v63 = vpop.eup %4606  ;;  %v3527_v24 = vsel %vm387_vm1, %v3448_v2, 0  ;;  %v3464_v57 = vpack.c.bf16 %v3355_v9, %v3354_v16  ;;  %v2988_v28 = vadd.f32 1.0, %v4605_v20  ;;  %v3970_v53 = vmul.f32 -1.442695, %v6976_v43 }
 0x498   : > { %v4609_v4 = vpop.eup %4608  ;;  %4163 = vmatpush3.bf16.xpose.msra.mxu0 %v3527_v24  ;;  %v3341_v22 = vmul.f32 %v4607_v63, %v6853_v58  ;;  %v3971_v40 = vmul.f32 -1.442695, %v6980_v27  ;;  %v2328_v29 = vmul.f32 %v6639_v10, %v2194_v52  ;;  %v2329_v26 = vmul.f32 %v6639_v10, %v2195_v56  ;;  %v8131_v24 = vld [vmem:[#allocation32_spill] sm:$0xff] }
 0x499   : > { %v4611_v33 = vpop.eup %4610  ;;  %v3575_v15 = vsel %vm387_vm1, %v3464_v57, 0  ;;  %v2989_v31 = vadd.f32 1.0, %v4609_v4  ;;  %4626 = vrcp.f32 %v2988_v28  ;;  %v2180_v36 = vmul.f32 %v6634_v39, %v8127_v12  ;;  %v8132_v28 = vld [vmem:[#allocation33_spill] sm:$0xff] }
 0x49a   : > { %v4613_v23 = vpop.eup %4612  ;;  %4181 = vmatpush3.bf16.xpose.msra.mxu1 %v3575_v15  ;;  %v3457_v60 = vpack.c.bf16 %v3341_v22, %v3340_v62  ;;  %v2940_v18 = vadd.f32 1.0, %v4611_v33  ;;  %4628 = vpow2.f32 %v3970_v53  ;;  %v6994_v58 = vadd.f32 %v6652_v54, %v2328_v29  ;;  %v8133_v29 = vld [vmem:[#allocation4_spill] sm:$0xff]  ;;  %v8134_v33 = vld [vmem:[#allocation5_spill] sm:$0xff] }
 0x49b   : > { %v4615_v32 = vpop.eup %4614  ;;  %4630 = vrcp.f32 %v2989_v31  ;;  %v2941_v38 = vadd.f32 1.0, %v4613_v23  ;;  %v6997_v51 = vadd.f32 %v6652_v54, %v2329_v26  ;;  %v2181_v7 = vmul.f32 %v6634_v39, %v8128_v55 }
 0x49c   : > { %v4617_v8 = vpop.eup %4616  ;;  %4458 = vmatprep.subr.msk.bf16.mxu0 %vm387_vm1, %v3457_v60  ;;  %4632 = vrcp.f32 %v2940_v18  ;;  %v2972_v34 = vadd.f32 1.0, %v4615_v32  ;;  %v4002_v6 = vmul.f32 -1.442695, %v6994_v58  ;;  %v2314_v19 = vmul.f32 %v6639_v10, %v2180_v36 }
 0x49d   : > { %v4619_v11 = vpop.eup %4618  ;;  %4634 = vrcp.f32 %v2941_v38  ;;  %v2973_v0 = vadd.f32 1.0, %v4617_v8  ;;  %v4003_v42 = vmul.f32 -1.442695, %v6997_v51  ;;  %v2315_v59 = vmul.f32 %v6639_v10, %v2181_v7 }
 0x49e   : > { %v4621_v3 = vpop.eup %4620  ;;  %4636 = vrcp.f32 %v2972_v34  ;;  %v2958_v45 = vadd.f32 1.0, %v4619_v11  ;;  %v7007_v13 = vadd.f32 %v6652_v54, %v2314_v19  ;;  %v2212_v5 = vmul.f32 %v6634_v39, %v8129_v50 }
 0x49f   : > { %v4623_v21 = vpop.eup %4622  ;;  %4638 = vrcp.f32 %v2973_v0  ;;  %v2959_v16 = vadd.f32 1.0, %v4621_v3  ;;  %v7012_v14 = vadd.f32 %v6652_v54, %v2315_v59  ;;  %v2213_v52 = vmul.f32 %v6634_v39, %v8130_v30 }
 0x4a0   : > { %v4625_v61 = vpop.eup %4624  ;;  %4640 = vrcp.f32 %v2958_v45  ;;  %v2990_v2 = vadd.f32 1.0, %v4623_v21  ;;  %v3988_v9 = vmul.f32 -1.442695, %v7007_v13  ;;  %v2346_v20 = vmul.f32 %v6639_v10, %v2212_v5 }
 0x4a1   : > { %4642 = vrcp.f32 %v2959_v16  ;;  %v2991_v62 = vadd.f32 1.0, %v4625_v61  ;;  %v3989_v25 = vmul.f32 -1.442695, %v7012_v14  ;;  %v2347_v56 = vmul.f32 %v6639_v10, %v2213_v52  ;;  %v8135_v52 = vld [vmem:[#allocation42_spill] sm:$0xff] }
 0x4a2   : > { %4644 = vrcp.f32 %v2990_v2  ;;  %v7021_v63 = vadd.f32 %v6652_v54, %v2346_v20  ;;  %v2164_v57 = vmul.f32 %v6634_v39, %v8131_v24  ;;  %v2165_v53 = vmul.f32 %v6634_v39, %v8132_v28 }
 0x4a3   : > { %v4627_v4 = vpop.eup %4626  ;;  %4646 = vrcp.f32 %v2991_v62  ;;  %v7028_v22 = vadd.f32 %v6652_v54, %v2347_v56  ;;  %v2196_v26 = vmul.f32 %v6634_v39, %v8133_v29  ;;  %v2197_v15 = vmul.f32 %v6634_v39, %v8134_v33  ;;  %v8136_v56 = vld [vmem:[#allocation43_spill] sm:$0xff] }
 0x4a4   : > { %v4629_v31 = vpop.eup %4628  ;;  %v3372_v12 = vmul.f32 %v4627_v4, %v6877_v17  ;;  %4648 = vpow2.f32 %v3971_v40  ;;  %v4020_v36 = vmul.f32 -1.442695, %v7021_v63  ;;  %v2298_v23 = vmul.f32 %v6639_v10, %v2164_v57 }
 0x4a5   : > { %v4631_v60 = vpop.eup %4630  ;;  %v2942_v18 = vadd.f32 1.0, %v4629_v31  ;;  %4650 = vpow2.f32 %v4002_v6  ;;  %v4021_v32 = vmul.f32 -1.442695, %v7028_v22  ;;  %v2299_v38 = vmul.f32 %v6639_v10, %v2165_v53 }
 0x4a6   : > { %v4633_v55 = vpop.eup %4632  ;;  %v3373_v7 = vmul.f32 %v4631_v60, %v6880_v1  ;;  %4652 = vpow2.f32 %v4003_v42  ;;  %v7041_v8 = vadd.f32 %v6652_v54, %v2298_v23  ;;  %v2330_v17 = vmul.f32 %v6639_v10, %v2196_v26  ;;  %v8138_v23 = vld [vmem:[#allocation15_spill] sm:$0xff] }
 0x4a7   : > { %v4635_v40 = vpop.eup %4634  ;;  %v3324_v34 = vmul.f32 %v4633_v55, %v6904_v41  ;;  %4654 = vrcp.f32 %v2942_v18  ;;  %v7046_v19 = vadd.f32 %v6652_v54, %v2299_v38  ;;  %v2331_v6 = vmul.f32 %v6639_v10, %v2197_v15 }
 0x4a8   : > { %v4637_v11 = vpop.eup %4636  ;;  %v3473_v0 = vpack.c.bf16 %v3373_v7, %v3372_v12  ;;  %v3325_v59 = vmul.f32 %v4635_v40, %v6909_v48  ;;  %4656 = vpow2.f32 %v3988_v9  ;;  %v3972_v1 = vmul.f32 -1.442695, %v7041_v8  ;;  %v8137_v12 = vld [vmem:[#allocation14_spill] sm:$0xff] }
 0x4a9   : > { %v4639_v42 = vpop.eup %4638  ;;  %v3356_v3 = vmul.f32 %v4637_v11, %v6913_v49  ;;  %4658 = vpow2.f32 %v3989_v25  ;;  %v3973_v45 = vmul.f32 -1.442695, %v7046_v19  ;;  %v7054_v41 = vadd.f32 %v6652_v54, %v2330_v17 }
 0x4aa   : > { %v4641_v50 = vpop.eup %4640  ;;  %4466 = vmatprep.subr.msk.bf16.mxu1 %vm387_vm1, %v3473_v0  ;;  %v3449_v5 = vpack.c.bf16 %v3325_v59, %v3324_v34  ;;  %v3357_v21 = vmul.f32 %v4639_v42, %v6916_v44  ;;  %4660 = vpow2.f32 %v4020_v36  ;;  %v7059_v48 = vadd.f32 %v6652_v54, %v2331_v6 }
 0x4ab   : > { %v4643_v16 = vpop.eup %4642  ;;  %v3342_v30 = vmul.f32 %v4641_v50, %v6933_v35  ;;  %4662 = vpow2.f32 %v4021_v32  ;;  %v4004_v49 = vmul.f32 -1.442695, %v7054_v41  ;;  %v2182_v61 = vmul.f32 %v6634_v39, %v8135_v52 }
 0x4ac   : > { %v4645_v2 = vpop.eup %4644  ;;  %v3530_v9 = vsel %vm387_vm1, %v3449_v5, 0  ;;  %v3465_v20 = vpack.c.bf16 %v3357_v21, %v3356_v3  ;;  %v3343_v62 = vmul.f32 %v4643_v16, %v6941_v47  ;;  %4664 = vpow2.f32 %v3972_v1  ;;  %v8139_v3 = vld [vmem:[#allocation34_spill] sm:$0xff]  ;;  %v8140_v5 = vld [vmem:[#allocation35_spill] sm:$0xff] }
 0x4ad   : > { %v4647_v44 = vpop.eup %4646  ;;  %4165 = vmatpush3.bf16.xpose.msra.mxu0 %v3530_v9  ;;  %v3374_v25 = vmul.f32 %v4645_v2, %v6946_v37  ;;  %4666 = vpow2.f32 %v3973_v45  ;;  %v4005_v35 = vmul.f32 -1.442695, %v7059_v48  ;;  %v2183_v24 = vmul.f32 %v6634_v39, %v8136_v56  ;;  %v8141_v16 = vld [vmem:[#allocation6_spill] sm:$0xff]  ;;  %v8142_v56 = vld [vmem:[#allocation7_spill] sm:$0xff] }
 0x4ae   : > { %v4649_v57 = vpop.eup %4648  ;;  %v3578_v28 = vsel %vm387_vm1, %v3465_v20, 0  ;;  %v3458_v53 = vpack.c.bf16 %v3343_v62, %v3342_v30  ;;  %v3375_v4 = vmul.f32 %v4647_v44, %v6954_v46  ;;  %4668 = vpow2.f32 %v4004_v49  ;;  %v7111_v20 = vld [vmem:[%s7821_s1] ss:$0 sm:$0xff] }
 0x4af   : > { %v4651_v29 = vpop.eup %4650  ;;  %4183 = vmatpush3.bf16.xpose.msra.mxu1 %v3578_v28  ;;  %v2943_v47 = vadd.f32 1.0, %v4649_v57  ;;  %4670 = vpow2.f32 %v4005_v35  ;;  %v2316_v26 = vmul.f32 %v6639_v10, %v2182_v61  ;;  %v2317_v37 = vmul.f32 %v6639_v10, %v2183_v24 }
 0x4b0   : > { %v4653_v33 = vpop.eup %4652  ;;  %4459 = vmatprep.subr.msk.bf16.mxu0 %vm387_vm1, %v3458_v53  ;;  %v3474_v15 = vpack.c.bf16 %v3375_v4, %v3374_v25  ;;  %v2974_v31 = vadd.f32 1.0, %v4651_v29  ;;  %v2214_v36 = vmul.f32 %v6634_v39, %v8137_v12  ;;  %v2215_v46 = vmul.f32 %v6634_v39, %v8138_v23  ;;  %v7121_v4 = vld [vmem:[%s7822_s2] ss:$0 sm:$0xff] }
 0x4b1   : > { %v4655_v60 = vpop.eup %4654  ;;  %4672 = vrcp.f32 %v2943_v47  ;;  %v2975_v18 = vadd.f32 1.0, %v4653_v33  ;;  %v7081_v32 = vadd.f32 %v6652_v54, %v2316_v26  ;;  %v7084_v38 = vadd.f32 %v6652_v54, %v2317_v37 }
 0x4b2   : > { %v4657_v55 = vpop.eup %4656  ;;  %4467 = vmatprep.subr.msk.bf16.mxu1 %vm387_vm1, %v3474_v15  ;;  %v7088_v7 = vmul.f32 %v4655_v60, %v6976_v43  ;;  %4674 = vrcp.f32 %v2974_v31  ;;  %v2348_v17 = vmul.f32 %v6639_v10, %v2214_v36  ;;  %v2349_v40 = vmul.f32 %v6639_v10, %v2215_v46  ;;  %v8143_v36 = vld [vmem:[#allocation44_spill] sm:$0xff] }
 0x4b3   : > { %v4659_v34 = vpop.eup %4658  ;;  %4676 = vrcp.f32 %v2975_v18  ;;  %v2960_v6 = vadd.f32 1.0, %v4657_v55  ;;  %v3990_v11 = vmul.f32 -1.442695, %v7081_v32  ;;  %v3991_v0 = vmul.f32 -1.442695, %v7084_v38 }
 0x4b4   : > { %v4661_v59 = vpop.eup %4660  ;;  %v2961_v1 = vadd.f32 1.0, %v4659_v34  ;;  %v7095_v42 = vadd.f32 %v6652_v54, %v2348_v17  ;;  %v7098_v43 = vadd.f32 %v6652_v54, %v2349_v40  ;;  %v2166_v45 = vmul.f32 %v6634_v39, %v8139_v3  ;;  %v8144_v34 = vld [vmem:[#allocation45_spill] sm:$0xff] }
 0x4b5   : > { %v4663_v50 = vpop.eup %4662  ;;  %4678 = vrcp.f32 %v2960_v6  ;;  %v2992_v10 = vadd.f32 1.0, %v4661_v59  ;;  %v2167_v21 = vmul.f32 %v6634_v39, %v8140_v5  ;;  %v2198_v30 = vmul.f32 %v6634_v39, %v8141_v16 }
 0x4b6   : > { %v4665_v49 = vpop.eup %4664  ;;  %4680 = vrcp.f32 %v2961_v1  ;;  %v2993_v52 = vadd.f32 1.0, %v4663_v50  ;;  %v4022_v61 = vmul.f32 -1.442695, %v7095_v42  ;;  %v4023_v54 = vmul.f32 -1.442695, %v7098_v43 }
 0x4b7   : > { %v4667_v2 = vpop.eup %4666  ;;  %4682 = vrcp.f32 %v2992_v10  ;;  %v2944_v9 = vadd.f32 1.0, %v4665_v49  ;;  %v2300_v62 = vmul.f32 %v7111_v20, %v2166_v45  ;;  %v2301_v44 = vmul.f32 %v7111_v20, %v2167_v21 }
 0x4b8   : > { %v4669_v25 = vpop.eup %4668  ;;  %4684 = vrcp.f32 %v2993_v52  ;;  %v2945_v35 = vadd.f32 1.0, %v4667_v2  ;;  %v2199_v24 = vmul.f32 %v6634_v39, %v8142_v56  ;;  %v2332_v57 = vmul.f32 %v7111_v20, %v2198_v30 }
 0x4b9   : > { %v4671_v28 = vpop.eup %4670  ;;  %4686 = vrcp.f32 %v2944_v9  ;;  %v2976_v53 = vadd.f32 1.0, %v4669_v25  ;;  %v7124_v29 = vadd.f32 %v7121_v4, %v2300_v62  ;;  %v7127_v47 = vadd.f32 %v7121_v4, %v2301_v44  ;;  %v8146_v9 = vld [vmem:[#allocation17_spill] sm:$0xff] }
 0x4ba   : > { %4688 = vrcp.f32 %v2945_v35  ;;  %v2977_v26 = vadd.f32 1.0, %v4671_v28  ;;  %v2333_v37 = vmul.f32 %v7111_v20, %v2199_v24  ;;  %v7131_v33 = vadd.f32 %v7121_v4, %v2332_v57 }
 0x4bb   : > { %v4673_v15 = vpop.eup %4672  ;;  %4690 = vrcp.f32 %v2976_v53  ;;  %v3974_v31 = vmul.f32 -1.442695, %v7124_v29  ;;  %v3975_v12 = vmul.f32 -1.442695, %v7127_v47  ;;  %v2184_v23 = vmul.f32 %v6634_v39, %v8143_v36  ;;  %v8147_v53 = vld [vmem:[#allocation36_spill] sm:$0xff]  ;;  %v8148_v36 = vld [vmem:[#allocation37_spill] sm:$0xff] }
 0x4bc   : > { %v4675_v46 = vpop.eup %4674  ;;  %v3327_v60 = vmul.f32 %v4673_v15, %v6980_v27  ;;  %4692 = vrcp.f32 %v2977_v26  ;;  %v7139_v18 = vadd.f32 %v7121_v4, %v2333_v37  ;;  %v4006_v55 = vmul.f32 -1.442695, %v7131_v33 }
 0x4bd   : > { %v4677_v17 = vpop.eup %4676  ;;  %v3358_v40 = vmul.f32 %v4675_v46, %v6994_v58  ;;  %4694 = vpow2.f32 %v3990_v11  ;;  %v2185_v6 = vmul.f32 %v6634_v39, %v8144_v34  ;;  %v2318_v59 = vmul.f32 %v7111_v20, %v2184_v23  ;;  %v8145_v58 = vld [vmem:[#allocation16_spill] sm:$0xff] }
 0x4be   : > { %v3450_v1 = vpack.c.bf16 %v3327_v60, %v7088_v7  ;;  %v3359_v3 = vmul.f32 %v4677_v17, %v6997_v51  ;;  %4696 = vpow2.f32 %v3991_v0  ;;  %v4007_v27 = vmul.f32 -1.442695, %v7139_v18 }
 0x4bf   : > { %v4679_v45 = vpop.eup %4678  ;;  %4698 = vpow2.f32 %v4022_v61  ;;  %v2319_v50 = vmul.f32 %v7111_v20, %v2185_v6  ;;  %v7151_v10 = vadd.f32 %v7121_v4, %v2318_v59  ;;  %v2216_v11 = vmul.f32 %v6634_v39, %v8145_v58  ;;  %v8150_v58 = vld [vmem:[#allocation9_spill] sm:$0xff] }
 0x4c0   : > { %v4681_v5 = vpop.eup %4680  ;;  %v3533_v21 = vsel %vm387_vm1, %v3450_v1, 0  ;;  %v3466_v16 = vpack.c.bf16 %v3359_v3, %v3358_v40  ;;  %v3344_v7 = vmul.f32 %v4679_v45, %v7007_v13  ;;  %4700 = vpow2.f32 %v4023_v54  ;;  %v8149_v40 = vld [vmem:[#allocation8_spill] sm:$0xff] }
 0x4c1   : > { %v4683_v51 = vpop.eup %4682  ;;  %4167 = vmatpush3.bf16.xpose.msra.mxu0 %v3533_v21  ;;  %v3345_v0 = vmul.f32 %v4681_v5, %v7012_v14  ;;  %4702 = vpow2.f32 %v3974_v31  ;;  %v7159_v30 = vadd.f32 %v7121_v4, %v2319_v50  ;;  %v3992_v49 = vmul.f32 -1.442695, %v7151_v10 }
 0x4c2   : > { %v4685_v52 = vpop.eup %4684  ;;  %v3581_v61 = vsel %vm387_vm1, %v3466_v16, 0  ;;  %v3376_v2 = vmul.f32 %v4683_v51, %v7021_v63  ;;  %4704 = vpow2.f32 %v3975_v12  ;;  %v2217_v13 = vmul.f32 %v6634_v39, %v8146_v9 }
 0x4c3   : > { %v4687_v54 = vpop.eup %4686  ;;  %4185 = vmatpush3.bf16.xpose.msra.mxu1 %v3581_v61  ;;  %v3459_v62 = vpack.c.bf16 %v3345_v0, %v3344_v7  ;;  %v3377_v14 = vmul.f32 %v4685_v52, %v7028_v22  ;;  %4706 = vpow2.f32 %v4006_v55  ;;  %v3993_v44 = vmul.f32 -1.442695, %v7159_v30 }
 0x4c4   : > { %v4689_v25 = vpop.eup %4688  ;;  %v3328_v35 = vmul.f32 %v4687_v54, %v7041_v8  ;;  %4708 = vpow2.f32 %v4007_v27  ;;  %v2350_v56 = vmul.f32 %v7111_v20, %v2216_v11  ;;  %v2351_v63 = vmul.f32 %v7111_v20, %v2217_v13 }
 0x4c5   : > { %v4691_v24 = vpop.eup %4690  ;;  %4460 = vmatprep.subr.msk.bf16.mxu0 %vm387_vm1, %v3459_v62  ;;  %v3475_v57 = vpack.c.bf16 %v3377_v14, %v3376_v2  ;;  %v3329_v28 = vmul.f32 %v4689_v25, %v7046_v19  ;;  %4710 = vpow2.f32 %v3992_v49  ;;  %v2168_v22 = vmul.f32 %v6634_v39, %v8147_v53 }
 0x4c6   : > { %v4693_v26 = vpop.eup %4692  ;;  %v3360_v37 = vmul.f32 %v4691_v24, %v7054_v41  ;;  %4712 = vpow2.f32 %v3993_v44  ;;  %v7177_v8 = vadd.f32 %v7121_v4, %v2350_v56  ;;  %v7180_v15 = vadd.f32 %v7121_v4, %v2351_v63  ;;  %v8151_v44 = vld [vmem:[#allocation50_spill] sm:$0xff]  ;;  %v8152_v24 = vld [vmem:[#allocation51_spill] sm:$0xff] }
 0x4c7   : > { %v4695_v31 = vpop.eup %4694  ;;  %4468 = vmatprep.subr.msk.bf16.mxu1 %vm387_vm1, %v3475_v57  ;;  %v3451_v12 = vpack.c.bf16 %v3329_v28, %v3328_v35  ;;  %v3361_v19 = vmul.f32 %v4693_v26, %v7059_v48  ;;  %v2169_v23 = vmul.f32 %v6634_v39, %v8148_v36  ;;  %v2302_v46 = vmul.f32 %v7111_v20, %v2168_v22  ;;  %v8153_v36 = vld [vmem:[#allocation82_spill] sm:$0xff] }
 0x4c8   : > { %v4697_v60 = vpop.eup %4696  ;;  %v2962_v41 = vadd.f32 1.0, %v4695_v31  ;;  %v4024_v55 = vmul.f32 -1.442695, %v7177_v8  ;;  %v7189_v17 = vmul.f32 -1.442695, %v7180_v15  ;;  %v2200_v34 = vmul.f32 %v6634_v39, %v8149_v40  ;;  %v8155_v40 = vld [vmem:[#allocation18_spill] sm:$0xff] }
 0x4c9   : > { %v4699_v6 = vpop.eup %4698  ;;  %v3536_v59 = vsel %vm387_vm1, %v3451_v12, 0  ;;  %v3467_v1 = vpack.c.bf16 %v3361_v19, %v3360_v37  ;;  %v2963_v48 = vadd.f32 1.0, %v4697_v60  ;;  %v2303_v3 = vmul.f32 %v7111_v20, %v2169_v23 }
 0x4ca   : > { %v4701_v27 = vpop.eup %4700  ;;  %4169 = vmatpush3.bf16.xpose.msra.mxu0 %v3536_v59  ;;  %4714 = vrcp.f32 %v2962_v41  ;;  %v2994_v45 = vadd.f32 1.0, %v4699_v6  ;;  %v7196_v50 = vadd.f32 %v7121_v4, %v2302_v46  ;;  %v2201_v11 = vmul.f32 %v6634_v39, %v8150_v58  ;;  %v8154_v46 = vld [vmem:[#allocation83_spill] sm:$0xff] }
 0x4cb   : > { %v4703_v5 = vpop.eup %4702  ;;  %v3584_v21 = vsel %vm387_vm1, %v3467_v1, 0  ;;  %4716 = vrcp.f32 %v2963_v48  ;;  %v2995_v16 = vadd.f32 1.0, %v4701_v27  ;;  %v7202_v7 = vadd.f32 %v7121_v4, %v2303_v3  ;;  %v8156_v6 = vld [vmem:[#allocation19_spill] sm:$0xff] }
 0x4cc   : > { %v4705_v51 = vpop.eup %4704  ;;  %4187 = vmatpush3.bf16.xpose.msra.mxu1 %v3584_v21  ;;  %4718 = vrcp.f32 %v2994_v45  ;;  %v2946_v0 = vadd.f32 1.0, %v4703_v5  ;;  %v3976_v49 = vmul.f32 -1.442695, %v7196_v50  ;;  %v2334_v52 = vmul.f32 %v7111_v20, %v2200_v34 }
 0x4cd   : > { %v4707_v61 = vpop.eup %4706  ;;  %4720 = vrcp.f32 %v2995_v16  ;;  %v2947_v2 = vadd.f32 1.0, %v4705_v51  ;;  %v3977_v9 = vmul.f32 -1.442695, %v7202_v7  ;;  %v2335_v13 = vmul.f32 %v7111_v20, %v2201_v11 }
 0x4ce   : > { %v4709_v54 = vpop.eup %4708  ;;  %4722 = vrcp.f32 %v2946_v0  ;;  %v2978_v62 = vadd.f32 1.0, %v4707_v61  ;;  %v7209_v14 = vadd.f32 %v7121_v4, %v2334_v52  ;;  %v2234_v25 = vmul.f32 %v6634_v39, %v8151_v44 }
 0x4cf   : > { %v4711_v35 = vpop.eup %4710  ;;  %4724 = vrcp.f32 %v2947_v2  ;;  %v2979_v56 = vadd.f32 1.0, %v4709_v54  ;;  %v7214_v63 = vadd.f32 %v7121_v4, %v2335_v13  ;;  %v2235_v57 = vmul.f32 %v6634_v39, %v8152_v24  ;;  %v8157_v24 = vld [vmem:[#allocation66_spill] sm:$0xff] }
 0x4d0   : > { %v4713_v28 = vpop.eup %4712  ;;  %4726 = vrcp.f32 %v2978_v62  ;;  %v2964_v53 = vadd.f32 1.0, %v4711_v35  ;;  %v4008_v22 = vmul.f32 -1.442695, %v7209_v14  ;;  %v2368_v26 = vmul.f32 %v7111_v20, %v2234_v25 }
 0x4d1   : > { %4728 = vrcp.f32 %v2979_v56  ;;  %v2965_v37 = vadd.f32 1.0, %v4713_v28  ;;  %v4009_v31 = vmul.f32 -1.442695, %v7214_v63  ;;  %v2369_v12 = vmul.f32 %v7111_v20, %v2235_v57 }
 0x4d2   : > { %4730 = vrcp.f32 %v2964_v53  ;;  %v7223_v19 = vadd.f32 %v7121_v4, %v2368_v26  ;;  %v2266_v23 = vmul.f32 %v6634_v39, %v8153_v36  ;;  %v2267_v60 = vmul.f32 %v6634_v39, %v8154_v46 }
 0x4d3   : > { %4732 = vrcp.f32 %v2965_v37  ;;  %v7230_v41 = vadd.f32 %v7121_v4, %v2369_v12  ;;  %v2218_v34 = vmul.f32 %v6634_v39, %v8155_v40  ;;  %v2219_v59 = vmul.f32 %v6634_v39, %v8156_v6  ;;  %v8159_v12 = vld [vmem:[#allocation52_spill] sm:$0xff] }
 0x4d4   : > { %v4715_v1 = vpop.eup %4714  ;;  %4734 = vpow2.f32 %v4024_v55  ;;  %v4042_v48 = vmul.f32 -1.442695, %v7223_v19  ;;  %v2400_v3 = vmul.f32 %v7111_v20, %v2266_v23  ;;  %v2401_v27 = vmul.f32 %v7111_v20, %v2267_v60 }
 0x4d5   : > { %v4717_v45 = vpop.eup %4716  ;;  %v3346_v58 = vmul.f32 %v4715_v1, %v7081_v32  ;;  %4736 = vpow2.f32 %v7189_v17  ;;  %v4043_v11 = vmul.f32 -1.442695, %v7230_v41  ;;  %v2352_v5 = vmul.f32 %v7111_v20, %v2218_v34 }
 0x4d6   : > { %v4719_v21 = vpop.eup %4718  ;;  %v3347_v16 = vmul.f32 %v4717_v45, %v7084_v38  ;;  %4738 = vpow2.f32 %v3976_v49  ;;  %v7245_v55 = vadd.f32 %v7121_v4, %v2400_v3  ;;  %v7248_v51 = vadd.f32 %v7121_v4, %v2401_v27  ;;  %v8160_v27 = vld [vmem:[#allocation53_spill] sm:$0xff] }
 0x4d7   : > { %v4721_v0 = vpop.eup %4720  ;;  %v3378_v52 = vmul.f32 %v4719_v21, %v7095_v42  ;;  %4740 = vpow2.f32 %v3977_v9  ;;  %v2353_v32 = vmul.f32 %v7111_v20, %v2219_v59  ;;  %v7253_v17 = vadd.f32 %v7121_v4, %v2352_v5 }
 0x4d8   : > { %v4723_v61 = vpop.eup %4722  ;;  %v3460_v2 = vpack.c.bf16 %v3347_v16, %v3346_v58  ;;  %v3379_v38 = vmul.f32 %v4721_v0, %v7098_v43  ;;  %4742 = vpow2.f32 %v4008_v22  ;;  %v4074_v49 = vmul.f32 -1.442695, %v7245_v55 }
 0x4d9   : > { %v4725_v13 = vpop.eup %4724  ;;  %v3330_v54 = vmul.f32 %v4723_v61, %v7124_v29  ;;  %4744 = vpow2.f32 %v4009_v31  ;;  %v4075_v62 = vmul.f32 -1.442695, %v7248_v51  ;;  %v7260_v42 = vadd.f32 %v7121_v4, %v2353_v32 }
 0x4da   : > { %v4727_v9 = vpop.eup %4726  ;;  %4461 = vmatprep.subr.msk.bf16.mxu0 %vm387_vm1, %v3460_v2  ;;  %v3476_v44 = vpack.c.bf16 %v3379_v38, %v3378_v52  ;;  %v3331_v25 = vmul.f32 %v4725_v13, %v7127_v47  ;;  %4746 = vpow2.f32 %v4042_v48  ;;  %v4026_v43 = vmul.f32 -1.442695, %v7253_v17  ;;  %v8158_v47 = vld [vmem:[#allocation67_spill] sm:$0xff]  ;;  %v8161_v38 = vld [vmem:[#allocation84_spill] sm:$0xff] }
 0x4db   : > { %v4729_v35 = vpop.eup %4728  ;;  %v3362_v56 = vmul.f32 %v4727_v9, %v7131_v33  ;;  %4748 = vpow2.f32 %v4043_v11  ;;  %v4027_v29 = vmul.f32 -1.442695, %v7260_v42  ;;  %v2250_v57 = vmul.f32 %v6634_v39, %v8157_v24 }
 0x4dc   : > { %v4731_v28 = vpop.eup %4730  ;;  %4469 = vmatprep.subr.msk.bf16.mxu1 %vm387_vm1, %v3476_v44  ;;  %v3452_v53 = vpack.c.bf16 %v3331_v25, %v3330_v54  ;;  %v3363_v22 = vmul.f32 %v4729_v35, %v7139_v18  ;;  %4750 = vpow2.f32 %v4074_v49  ;;  %v2251_v26 = vmul.f32 %v6634_v39, %v8158_v47 }
 0x4dd   : > { %v4733_v37 = vpop.eup %4732  ;;  %v3348_v31 = vmul.f32 %v4731_v28, %v7151_v10  ;;  %4752 = vpow2.f32 %v4075_v62  ;;  %v2384_v33 = vmul.f32 %v7111_v20, %v2250_v57  ;;  %v2236_v36 = vmul.f32 %v6634_v39, %v8159_v12 }
 0x4de   : > { %v4735_v23 = vpop.eup %4734  ;;  %v3539_v46 = vsel %vm387_vm1, %v3452_v53, 0  ;;  %v3468_v60 = vpack.c.bf16 %v3363_v22, %v3362_v56  ;;  %v3349_v40 = vmul.f32 %v4733_v37, %v7159_v30  ;;  %4754 = vpow2.f32 %v4026_v43  ;;  %v8162_v43 = vld [vmem:[#allocation85_spill] sm:$0xff] }
 0x4df   : > { %v4737_v18 = vpop.eup %4736  ;;  %4171 = vmatpush3.bf16.xpose.msra.mxu0 %v3539_v46  ;;  %v2996_v34 = vadd.f32 1.0, %v4735_v23  ;;  %4756 = vpow2.f32 %v4027_v29  ;;  %v2385_v6 = vmul.f32 %v7111_v20, %v2251_v26  ;;  %v7281_v10 = vadd.f32 %v7121_v4, %v2384_v33  ;;  %v8163_v33 = vld [vmem:[#allocation20_spill] sm:$0xff] }
 0x4e0   : > { %v4739_v59 = vpop.eup %4738  ;;  %v3587_v1 = vsel %vm387_vm1, %v3468_v60, 0  ;;  %v3461_v48 = vpack.c.bf16 %v3349_v40, %v3348_v31  ;;  %v2997_v3 = vadd.f32 1.0, %v4737_v18  ;;  %v2237_v45 = vmul.f32 %v6634_v39, %v8160_v27 }
 0x4e1   : > { %v4741_v58 = vpop.eup %4740  ;;  %4189 = vmatpush3.bf16.xpose.msra.mxu1 %v3587_v1  ;;  %4758 = vrcp.f32 %v2996_v34  ;;  %v2948_v30 = vadd.f32 1.0, %v4739_v59  ;;  %v7287_v11 = vadd.f32 %v7121_v4, %v2385_v6  ;;  %v4058_v5 = vmul.f32 -1.442695, %v7281_v10 }
 0x4e2   : > { %v4743_v21 = vpop.eup %4742  ;;  %4462 = vmatprep.subr.msk.bf16.mxu0 %vm387_vm1, %v3461_v48  ;;  %4760 = vrcp.f32 %v2997_v3  ;;  %v2949_v16 = vadd.f32 1.0, %v4741_v58  ;;  %v2370_v0 = vmul.f32 %v7111_v20, %v2236_v36  ;;  %v2371_v52 = vmul.f32 %v7111_v20, %v2237_v45  ;;  %v8164_v36 = vld [vmem:[#allocation21_spill] sm:$0xff]  ;;  %v8165_v3 = vld [vmem:[#allocation68_spill] sm:$0xff] }
 0x4e3   : > { %v4745_v32 = vpop.eup %4744  ;;  %4762 = vrcp.f32 %v2948_v30  ;;  %v2980_v61 = vadd.f32 1.0, %v4743_v21  ;;  %v4059_v2 = vmul.f32 -1.442695, %v7287_v11  ;;  %v2268_v49 = vmul.f32 %v6634_v39, %v8161_v38  ;;  %v8166_v45 = vld [vmem:[#allocation69_spill] sm:$0xff] }
 0x4e4   : > { %v4747_v13 = vpop.eup %4746  ;;  %4764 = vrcp.f32 %v2949_v16  ;;  %v2981_v54 = vadd.f32 1.0, %v4745_v32  ;;  %v7297_v62 = vadd.f32 %v7121_v4, %v2370_v0  ;;  %v7300_v9 = vadd.f32 %v7121_v4, %v2371_v52 }
 0x4e5   : > { %v4749_v44 = vpop.eup %4748  ;;  %4766 = vrcp.f32 %v2980_v61  ;;  %v3014_v25 = vadd.f32 1.0, %v4747_v13  ;;  %v2269_v35 = vmul.f32 %v6634_v39, %v8162_v43  ;;  %v2402_v56 = vmul.f32 %v7111_v20, %v2268_v49 }
 0x4e6   : > { %v4751_v29 = vpop.eup %4750  ;;  %4768 = vrcp.f32 %v2981_v54  ;;  %v3015_v24 = vadd.f32 1.0, %v4749_v44  ;;  %v4044_v57 = vmul.f32 -1.442695, %v7297_v62  ;;  %v4045_v28 = vmul.f32 -1.442695, %v7300_v9 }
 0x4e7   : > { %v4753_v53 = vpop.eup %4752  ;;  %4770 = vrcp.f32 %v3014_v25  ;;  %v3046_v22 = vadd.f32 1.0, %v4751_v29  ;;  %v2403_v47 = vmul.f32 %v7111_v20, %v2269_v35  ;;  %v7309_v26 = vadd.f32 %v7121_v4, %v2402_v56 }
 0x4e8   : > { %v4755_v37 = vpop.eup %4754  ;;  %4772 = vrcp.f32 %v3015_v24  ;;  %v3047_v31 = vadd.f32 1.0, %v4753_v53  ;;  %v2220_v12 = vmul.f32 %v6634_v39, %v8163_v33  ;;  %v2221_v23 = vmul.f32 %v6634_v39, %v8164_v36 }
 0x4e9   : > { %v4757_v46 = vpop.eup %4756  ;;  %4774 = vrcp.f32 %v3046_v22  ;;  %v2998_v60 = vadd.f32 1.0, %v4755_v37  ;;  %v7316_v40 = vadd.f32 %v7121_v4, %v2403_v47  ;;  %v4076_v18 = vmul.f32 -1.442695, %v7309_v26 }
 0x4ea   : > { %4776 = vrcp.f32 %v3047_v31  ;;  %v2999_v34 = vadd.f32 1.0, %v4757_v46  ;;  %v2354_v6 = vmul.f32 %v7111_v20, %v2220_v12  ;;  %v2355_v59 = vmul.f32 %v7111_v20, %v2221_v23 }
 0x4eb   : > { %v4759_v1 = vpop.eup %4758  ;;  %4778 = vrcp.f32 %v2998_v60  ;;  %v4077_v48 = vmul.f32 -1.442695, %v7316_v40  ;;  %v2252_v27 = vmul.f32 %v6634_v39, %v8165_v3  ;;  %v2253_v58 = vmul.f32 %v6634_v39, %v8166_v45  ;;  %v8170_v45 = vld [vmem:[#allocation87_spill] sm:$0xff] }
 0x4ec   : > { %v4761_v30 = vpop.eup %4760  ;;  %v3380_v21 = vmul.f32 %v4759_v1, %v7177_v8  ;;  %4780 = vrcp.f32 %v2999_v34  ;;  %v7328_v16 = vadd.f32 %v7121_v4, %v2354_v6  ;;  %v7331_v0 = vadd.f32 %v7121_v4, %v2355_v59 }
 0x4ed   : > { %v4763_v52 = vpop.eup %4762  ;;  %v3381_v32 = vmul.f32 %v4761_v30, %v7180_v15  ;;  %4782 = vpow2.f32 %v4058_v5  ;;  %v2386_v61 = vmul.f32 %v7111_v20, %v2252_v27  ;;  %v2387_v38 = vmul.f32 %v7111_v20, %v2253_v58  ;;  %v8169_v27 = vld [vmem:[#allocation86_spill] sm:$0xff] }
 0x4ee   : > { %v4765_v49 = vpop.eup %4764  ;;  %v3332_v13 = vmul.f32 %v4763_v52, %v7196_v50  ;;  %4784 = vpow2.f32 %v4059_v2  ;;  %v4028_v8 = vmul.f32 -1.442695, %v7328_v16  ;;  %v4029_v54 = vmul.f32 -1.442695, %v7331_v0  ;;  %v8167_v50 = vld [vmem:[#allocation54_spill] sm:$0xff] }
 0x4ef   : > { %v4767_v44 = vpop.eup %4766  ;;  %v3477_v25 = vpack.c.bf16 %v3381_v32, %v3380_v21  ;;  %v3333_v43 = vmul.f32 %v4765_v49, %v7202_v7  ;;  %4786 = vpow2.f32 %v4044_v57  ;;  %v7341_v15 = vadd.f32 %v7121_v4, %v2386_v61  ;;  %v8171_v32 = vld [vmem:[#allocation22_spill] sm:$0xff] }
 0x4f0   : > { %v4769_v5 = vpop.eup %4768  ;;  %v3364_v35 = vmul.f32 %v4767_v44, %v7209_v14  ;;  %4788 = vpow2.f32 %v4045_v28  ;;  %v7345_v56 = vadd.f32 %v7121_v4, %v2387_v38  ;;  %v2238_v2 = vmul.f32 %v6634_v39, %v8167_v50  ;;  %v8168_v28 = vld [vmem:[#allocation55_spill] sm:$0xff]  ;;  %v5080_v50 = vld [vmem:[%s7824_s4] sm:$0x3] }
 0x4f1   : > { %v4771_v29 = vpop.eup %4770  ;;  %4470 = vmatprep.subr.msk.bf16.mxu1 %vm387_vm1, %v3477_v25  ;;  %v3453_v24 = vpack.c.bf16 %v3333_v43, %v3332_v13  ;;  %v3365_v7 = vmul.f32 %v4769_v5, %v7214_v63  ;;  %4790 = vpow2.f32 %v4076_v18  ;;  %v4060_v57 = vmul.f32 -1.442695, %v7341_v15  ;;  %v8172_v25 = vld [vmem:[#allocation23_spill] sm:$0xff] }
 0x4f2   : > { %v4773_v53 = vpop.eup %4772  ;;  %v3398_v22 = vmul.f32 %v4771_v29, %v7223_v19  ;;  %4792 = vpow2.f32 %v4077_v48  ;;  %v4061_v14 = vmul.f32 -1.442695, %v7345_v56  ;;  %v2239_v47 = vmul.f32 %v6634_v39, %v8168_v28 }
 0x4f3   : > { %v4775_v37 = vpop.eup %4774  ;;  %v3542_v31 = vsel %vm387_vm1, %v3453_v24, 0  ;;  %v3469_v33 = vpack.c.bf16 %v3365_v7, %v3364_v35  ;;  %v3399_v12 = vmul.f32 %v4773_v53, %v7230_v41  ;;  %4794 = vpow2.f32 %v4028_v8 }
 0x4f4   : > { %v4777_v63 = vpop.eup %4776  ;;  %4173 = vmatpush3.bf16.xpose.msra.mxu0 %v3542_v31  ;;  %v3430_v36 = vmul.f32 %v4775_v37, %v7245_v55  ;;  %4796 = vpow2.f32 %v4029_v54  ;;  %v2372_v19 = vmul.f32 %v7111_v20, %v2238_v2  ;;  %v2373_v23 = vmul.f32 %v7111_v20, %v2239_v47 }
 0x4f5   : > { %v4779_v46 = vpop.eup %4778  ;;  %v3590_v60 = vsel %vm387_vm1, %v3469_v33, 0  ;;  %v3486_v18 = vpack.c.bf16 %v3399_v12, %v3398_v22  ;;  %v3431_v34 = vmul.f32 %v4777_v63, %v7248_v51  ;;  %4798 = vpow2.f32 %v4060_v57 }
 0x4f6   : > { %v4781_v6 = vpop.eup %4780  ;;  %4191 = vmatpush3.bf16.xpose.msra.mxu1 %v3590_v60  ;;  %v3382_v41 = vmul.f32 %v4779_v46, %v7253_v17  ;;  %4800 = vpow2.f32 %v4061_v14  ;;  %v7365_v59 = vadd.f32 %v7121_v4, %v2372_v19  ;;  %v7368_v55 = vadd.f32 %v7121_v4, %v2373_v23  ;;  %v8173_v46 = vld [vmem:[#allocation70_spill] sm:$0xff] }
 0x4f7   : > { %v4783_v1 = vpop.eup %4782  ;;  %4471 = vmatprep.subr.msk.bf16.mxu0 %vm387_vm1, %v3486_v18  ;;  %v3502_v48 = vpack.c.bf16 %v3431_v34, %v3430_v36  ;;  %v3383_v3 = vmul.f32 %v4781_v6, %v7260_v42  ;;  %v2270_v51 = vmul.f32 %v6634_v39, %v8169_v27  ;;  %v2271_v58 = vmul.f32 %v6634_v39, %v8170_v45  ;;  %v8175_v27 = vld [vmem:[#allocation56_spill] sm:$0xff] }
 0x4f8   : > { %v4785_v17 = vpop.eup %4784  ;;  %v3030_v30 = vadd.f32 1.0, %v4783_v1  ;;  %v4046_v21 = vmul.f32 -1.442695, %v7365_v59  ;;  %v7378_v52 = vmul.f32 -1.442695, %v7368_v55  ;;  %v2222_v61 = vmul.f32 %v6634_v39, %v8171_v32 }
 0x4f9   : > { %v4787_v38 = vpop.eup %4786  ;;  %4479 = vmatprep.subr.msk.bf16.mxu1 %vm387_vm1, %v3502_v48  ;;  %v3478_v42 = vpack.c.bf16 %v3383_v3, %v3382_v41  ;;  %v3031_v49 = vadd.f32 1.0, %v4785_v17  ;;  %v2404_v13 = vmul.f32 %v7111_v20, %v2270_v51  ;;  %v2405_v8 = vmul.f32 %v7111_v20, %v2271_v58  ;;  %v8174_v41 = vld [vmem:[#allocation71_spill] sm:$0xff]  ;;  %v8176_v58 = vld [vmem:[#allocation57_spill] sm:$0xff] }
 0x4fa   : > { %v4789_v54 = vpop.eup %4788  ;;  %4802 = vrcp.f32 %v3030_v30  ;;  %v3016_v44 = vadd.f32 1.0, %v4787_v38  ;;  %v2223_v43 = vmul.f32 %v6634_v39, %v8172_v25  ;;  %v2356_v5 = vmul.f32 %v7111_v20, %v2222_v61  ;;  %v8177_v30 = vld [vmem:[#allocation88_spill] sm:$0xff] }
 0x4fb   : > { %v4791_v35 = vpop.eup %4790  ;;  %4175 = vmatmul.mubr.msk.bf16.vlgmr.msra.gmra.mrb[4].mxu0 %vm387_vm1, %v5080_v50  ;;  %v3617_v2 = vsel %vm387_vm1, %v3478_v42, 0  ;;  %4804 = vrcp.f32 %v3031_v49  ;;  %v3017_v29 = vadd.f32 1.0, %v4789_v54  ;;  %v7394_v24 = vadd.f32 %v7121_v4, %v2404_v13  ;;  %v8178_v42 = vld [vmem:[#allocation89_spill] sm:$0xff] }
 0x4fc   : > { %v4793_v7 = vpop.eup %4792  ;;  %4195 = vmatpush3.bf16.xpose.msra.mxu0 %v3617_v2  ;;  %4806 = vrcp.f32 %v3016_v44  ;;  %v3048_v57 = vadd.f32 1.0, %v4791_v35  ;;  %v7397_v53 = vadd.f32 %v7121_v4, %v2405_v8  ;;  %v2357_v22 = vmul.f32 %v7111_v20, %v2223_v43  ;;  %4210 = vmatprep.mubr.msk.bf16.mxu0 %vm387_vm1, %v5080_v50 }
 0x4fd   : > { %v4795_v14 = vpop.eup %4794  ;;  %4193 = vmatmul.mubr.msk.bf16.vlgmr.msra.gmra.mrb[4].mxu1 %vm387_vm1, %v5080_v50  ;;  %4808 = vrcp.f32 %v3017_v29  ;;  %v3049_v28 = vadd.f32 1.0, %v4793_v7  ;;  %v4078_v47 = vmul.f32 -1.442695, %v7394_v24  ;;  %v7404_v37 = vadd.f32 %v7121_v4, %v2356_v5 }
 0x4fe   : > { %v4797_v31 = vpop.eup %4796  ;;  %4810 = vrcp.f32 %v3048_v57  ;;  %v3000_v33 = vadd.f32 1.0, %v4795_v14  ;;  %v4079_v12 = vmul.f32 -1.442695, %v7397_v53  ;;  %v7408_v63 = vadd.f32 %v7121_v4, %v2357_v22  ;;  %4228 = vmatprep.mubr.msk.bf16.mxu1 %vm387_vm1, %v5080_v50 }
 0x4ff   : > { %v4799_v36 = vpop.eup %4798  ;;  %4812 = vrcp.f32 %v3049_v28  ;;  %v3001_v19 = vadd.f32 1.0, %v4797_v31  ;;  %v4030_v23 = vmul.f32 -1.442695, %v7404_v37  ;;  %v2254_v60 = vmul.f32 %v6634_v39, %v8173_v46 }
 0x500   : > { %v4801_v18 = vpop.eup %4800  ;;  %4814 = vrcp.f32 %v3000_v33  ;;  %v3032_v34 = vadd.f32 1.0, %v4799_v36  ;;  %v4031_v6 = vmul.f32 -1.442695, %v7408_v63  ;;  %v2255_v1 = vmul.f32 %v6634_v39, %v8174_v41  ;;  %v8179_v41 = vld [vmem:[#allocation24_spill] sm:$0xff] }
 0x501   : > { %4816 = vrcp.f32 %v3001_v19  ;;  %v3033_v48 = vadd.f32 1.0, %v4801_v18  ;;  %v2388_v3 = vmul.f32 %v7111_v20, %v2254_v60  ;;  %v2240_v51 = vmul.f32 %v6634_v39, %v8175_v27  ;;  %v8181_v27 = vld [vmem:[#allocation72_spill] sm:$0xff] }
 0x502   : > { %4818 = vrcp.f32 %v3032_v34  ;;  %v2389_v45 = vmul.f32 %v7111_v20, %v2255_v1  ;;  %v2241_v17 = vmul.f32 %v6634_v39, %v8176_v58  ;;  %v2272_v32 = vmul.f32 %v6634_v39, %v8177_v30 }
 0x503   : > { %4820 = vrcp.f32 %v3033_v48  ;;  %v7426_v61 = vadd.f32 %v7121_v4, %v2388_v3  ;;  %v2374_v38 = vmul.f32 %v7111_v20, %v2240_v51  ;;  %v2273_v49 = vmul.f32 %v6634_v39, %v8178_v42 }
 0x504   : > { %v4803_v13 = vpop.eup %4802  ;;  %4822 = vpow2.f32 %v4046_v21  ;;  %v7432_v8 = vadd.f32 %v7121_v4, %v2389_v45  ;;  %v2375_v54 = vmul.f32 %v7111_v20, %v2241_v17  ;;  %v2406_v44 = vmul.f32 %v7111_v20, %v2272_v32 }
 0x505   : > { %v4805_v25 = vpop.eup %4804  ;;  %v3414_v43 = vmul.f32 %v4803_v13, %v7281_v10  ;;  %4824 = vpow2.f32 %v7378_v52  ;;  %v4062_v5 = vmul.f32 -1.442695, %v7426_v61  ;;  %v7440_v35 = vadd.f32 %v7121_v4, %v2374_v38  ;;  %v8182_v38 = vld [vmem:[#allocation73_spill] sm:$0xff] }
 0x506   : > { %v4807_v50 = vpop.eup %4806  ;;  %v3415_v21 = vmul.f32 %v4805_v25, %v7287_v11  ;;  %4826 = vpow2.f32 %v4078_v47  ;;  %v4063_v2 = vmul.f32 -1.442695, %v7432_v8  ;;  %v7445_v29 = vadd.f32 %v7121_v4, %v2375_v54 }
 0x507   : > { %v4809_v7 = vpop.eup %4808  ;;  %v3400_v57 = vmul.f32 %v4807_v50, %v7297_v62  ;;  %4828 = vpow2.f32 %v4079_v12  ;;  %v4048_v10 = vmul.f32 -1.442695, %v7440_v35  ;;  %v2407_v52 = vmul.f32 %v7111_v20, %v2273_v49 }
 0x508   : > { %v4811_v22 = vpop.eup %4810  ;;  %v3494_v14 = vpack.c.bf16 %v3415_v21, %v3414_v43  ;;  %v3401_v28 = vmul.f32 %v4809_v7, %v7300_v9  ;;  %4830 = vpow2.f32 %v4030_v23  ;;  %v4049_v11 = vmul.f32 -1.442695, %v7445_v29 }
 0x509   : > { %v4813_v47 = vpop.eup %4812  ;;  %v3432_v31 = vmul.f32 %v4811_v22, %v7309_v26  ;;  %4832 = vpow2.f32 %v4031_v6  ;;  %v7454_v33 = vadd.f32 %v7121_v4, %v2406_v44  ;;  %v7457_v62 = vadd.f32 %v7121_v4, %v2407_v52 }
 0x50a   : > { %v4815_v12 = vpop.eup %4814  ;;  %v3665_v36 = vsel %vm387_vm1, %v3494_v14, 0  ;;  %v3487_v19 = vpack.c.bf16 %v3401_v28, %v3400_v57  ;;  %v3433_v46 = vmul.f32 %v4813_v47, %v7316_v40  ;;  %4834 = vpow2.f32 %v4062_v5 }
 0x50b   : > { %v4817_v9 = vpop.eup %4816  ;;  %4213 = vmatpush3.bf16.xpose.msra.mxu1 %v3665_v36  ;;  %v3384_v23 = vmul.f32 %v4815_v12, %v7328_v16  ;;  %4836 = vpow2.f32 %v4063_v2  ;;  %v4080_v26 = vmul.f32 -1.442695, %v7454_v33  ;;  %v4081_v60 = vmul.f32 -1.442695, %v7457_v62  ;;  %v8180_v16 = vld [vmem:[#allocation25_spill] sm:$0xff] }
 0x50c   : > { %v4819_v18 = vpop.eup %4818  ;;  %4472 = vmatprep.subr.msk.bf16.mxu0 %vm387_vm1, %v3487_v19  ;;  %v3503_v34 = vpack.c.bf16 %v3433_v46, %v3432_v31  ;;  %v3385_v6 = vmul.f32 %v4817_v9, %v7331_v0  ;;  %4838 = vpow2.f32 %v4048_v10  ;;  %v2224_v40 = vmul.f32 %v6634_v39, %v8179_v41  ;;  %v8183_v31 = vld [vmem:[#allocation58_spill] sm:$0xff]  ;;  %v8184_v9 = vld [vmem:[#allocation59_spill] sm:$0xff] }
 0x50d   : > { %v4821_v1 = vpop.eup %4820  ;;  %v3416_v48 = vmul.f32 %v4819_v18, %v7341_v15  ;;  %4840 = vpow2.f32 %v4049_v11  ;;  %v2225_v3 = vmul.f32 %v6634_v39, %v8180_v16  ;;  %v2256_v51 = vmul.f32 %v6634_v39, %v8181_v27  ;;  %v8185_v27 = vld [vmem:[#allocation90_spill] sm:$0xff] }
 0x50e   : > { %v4823_v45 = vpop.eup %4822  ;;  %4480 = vmatprep.subr.msk.bf16.mxu1 %vm387_vm1, %v3503_v34  ;;  %v3479_v58 = vpack.c.bf16 %v3385_v6, %v3384_v23  ;;  %v3417_v0 = vmul.f32 %v4821_v1, %v7345_v56  ;;  %4842 = vpow2.f32 %v4080_v26  ;;  %v2358_v17 = vmul.f32 %v7111_v20, %v2224_v40 }
 0x50f   : > { %v4825_v30 = vpop.eup %4824  ;;  %v3018_v32 = vadd.f32 1.0, %v4823_v45  ;;  %4844 = vpow2.f32 %v4081_v60  ;;  %v2359_v15 = vmul.f32 %v7111_v20, %v2225_v3  ;;  %v2257_v42 = vmul.f32 %v6634_v39, %v8182_v38 }
 0x510   : > { %v4827_v49 = vpop.eup %4826  ;;  %v3620_v13 = vsel %vm387_vm1, %v3479_v58, 0  ;;  %v3495_v54 = vpack.c.bf16 %v3417_v0, %v3416_v48  ;;  %v3019_v44 = vadd.f32 1.0, %v4825_v30  ;;  %v7481_v25 = vadd.f32 %v7121_v4, %v2358_v17  ;;  %v8186_v17 = vld [vmem:[#allocation91_spill] sm:$0xff] }
 0x511   : > { %v4829_v56 = vpop.eup %4828  ;;  %4197 = vmatpush3.bf16.xpose.msra.mxu0 %v3620_v13  ;;  %4846 = vrcp.f32 %v3018_v32  ;;  %v3050_v43 = vadd.f32 1.0, %v4827_v49  ;;  %v7484_v5 = vadd.f32 %v7121_v4, %v2359_v15  ;;  %v2390_v50 = vmul.f32 %v7111_v20, %v2256_v51  ;;  %v7519_v15 = vld [vmem:[%s7821_s1] ss:$0 sm:$0xff] }
 0x512   : > { %v4831_v21 = vpop.eup %4830  ;;  %v3668_v2 = vsel %vm387_vm1, %v3495_v54, 0  ;;  %4848 = vrcp.f32 %v3019_v44  ;;  %v3051_v7 = vadd.f32 1.0, %v4829_v56  ;;  %v4032_v57 = vmul.f32 -1.442695, %v7481_v25  ;;  %v8187_v54 = vld [vmem:[#allocation26_spill] sm:$0xff] }
 0x513   : > { %v4833_v10 = vpop.eup %4832  ;;  %4215 = vmatpush3.bf16.xpose.msra.mxu1 %v3668_v2  ;;  %4850 = vrcp.f32 %v3050_v43  ;;  %v3002_v52 = vadd.f32 1.0, %v4831_v21  ;;  %v4033_v22 = vmul.f32 -1.442695, %v7484_v5  ;;  %v2391_v14 = vmul.f32 %v7111_v20, %v2257_v42  ;;  %v8188_v21 = vld [vmem:[#allocation27_spill] sm:$0xff] }
 0x514   : > { %v4835_v28 = vpop.eup %4834  ;;  %4852 = vrcp.f32 %v3051_v7  ;;  %v3003_v11 = vadd.f32 1.0, %v4833_v10  ;;  %v7492_v47 = vadd.f32 %v7121_v4, %v2390_v50  ;;  %v2242_v12 = vmul.f32 %v6634_v39, %v8183_v31 }
 0x515   : > { %v4837_v36 = vpop.eup %4836  ;;  %4854 = vrcp.f32 %v3002_v52  ;;  %v3034_v19 = vadd.f32 1.0, %v4835_v28  ;;  %v7497_v46 = vadd.f32 %v7121_v4, %v2391_v14  ;;  %v2243_v23 = vmul.f32 %v6634_v39, %v8184_v9  ;;  %v7536_v52 = vld [vmem:[%s7822_s2] ss:$0 sm:$0xff] }
 0x516   : > { %v4839_v26 = vpop.eup %4838  ;;  %4856 = vrcp.f32 %v3003_v11  ;;  %v3035_v60 = vadd.f32 1.0, %v4837_v36  ;;  %v4064_v18 = vmul.f32 -1.442695, %v7492_v47  ;;  %v2376_v34 = vmul.f32 %v7111_v20, %v2242_v12 }
 0x517   : > { %v4841_v6 = vpop.eup %4840  ;;  %4858 = vrcp.f32 %v3034_v19  ;;  %v3020_v41 = vadd.f32 1.0, %v4839_v26  ;;  %v4065_v40 = vmul.f32 -1.442695, %v7497_v46  ;;  %v2377_v1 = vmul.f32 %v7111_v20, %v2243_v23 }
 0x518   : > { %v4843_v48 = vpop.eup %4842  ;;  %4860 = vrcp.f32 %v3035_v60  ;;  %v3021_v16 = vadd.f32 1.0, %v4841_v6  ;;  %v7506_v3 = vadd.f32 %v7121_v4, %v2376_v34  ;;  %v2274_v51 = vmul.f32 %v6634_v39, %v8185_v27 }
 0x519   : > { %v4845_v45 = vpop.eup %4844  ;;  %4862 = vrcp.f32 %v3020_v41  ;;  %v3052_v58 = vadd.f32 1.0, %v4843_v48  ;;  %v7511_v0 = vadd.f32 %v7121_v4, %v2377_v1  ;;  %v2275_v30 = vmul.f32 %v6634_v39, %v8186_v17 }
 0x51a   : > { %4864 = vrcp.f32 %v3021_v16  ;;  %v3053_v20 = vadd.f32 1.0, %v4845_v45  ;;  %v4050_v32 = vmul.f32 -1.442695, %v7506_v3  ;;  %v2408_v38 = vmul.f32 %v7519_v15, %v2274_v51  ;;  %v8191_v45 = vld [vmem:[#allocation60_spill] sm:$0xff] }
 0x51b   : > { %v4847_v42 = vpop.eup %4846  ;;  %4866 = vrcp.f32 %v3052_v58  ;;  %v4051_v49 = vmul.f32 -1.442695, %v7511_v0  ;;  %v2409_v13 = vmul.f32 %v7519_v15, %v2275_v30  ;;  %v2226_v44 = vmul.f32 %v6634_v39, %v8187_v54 }
 0x51c   : > { %v4849_v56 = vpop.eup %4848  ;;  %v3402_v43 = vmul.f32 %v4847_v42, %v7365_v59  ;;  %4868 = vrcp.f32 %v3053_v20  ;;  %v7528_v50 = vadd.f32 %v7121_v4, %v2408_v38  ;;  %v2227_v2 = vmul.f32 %v6634_v39, %v8188_v21 }
 0x51d   : > { %v4851_v7 = vpop.eup %4850  ;;  %v3403_v10 = vmul.f32 %v4849_v56, %v7368_v55  ;;  %4870 = vpow2.f32 %v4032_v57  ;;  %v7539_v14 = vadd.f32 %v7536_v52, %v2409_v13  ;;  %v2360_v59 = vmul.f32 %v7519_v15, %v2226_v44  ;;  %v8192_v56 = vld [vmem:[#allocation61_spill] sm:$0xff] }
 0x51e   : > { %v4853_v28 = vpop.eup %4852  ;;  %v3434_v4 = vmul.f32 %v4851_v7, %v7394_v24  ;;  %4872 = vpow2.f32 %v4033_v22  ;;  %v4082_v11 = vmul.f32 -1.442695, %v7528_v50  ;;  %v2361_v31 = vmul.f32 %v7519_v15, %v2227_v2 }
 0x51f   : > { %v4855_v55 = vpop.eup %4854  ;;  %v3488_v57 = vpack.c.bf16 %v3403_v10, %v3402_v43  ;;  %v3435_v12 = vmul.f32 %v4853_v28, %v7397_v53  ;;  %4874 = vpow2.f32 %v4064_v18  ;;  %v4083_v36 = vmul.f32 -1.442695, %v7539_v14  ;;  %v8189_v53 = vld [vmem:[#allocation74_spill] sm:$0xff] }
 0x520   : > { %v4857_v19 = vpop.eup %4856  ;;  %v3386_v9 = vmul.f32 %v4855_v55, %v7404_v37  ;;  %4876 = vpow2.f32 %v4065_v40  ;;  %v7549_v23 = vadd.f32 %v7536_v52, %v2360_v59  ;;  %v7552_v24 = vadd.f32 %v7536_v52, %v2361_v31 }
 0x521   : > { %v4859_v22 = vpop.eup %4858  ;;  %4473 = vmatprep.subr.msk.bf16.mxu0 %vm387_vm1, %v3488_v57  ;;  %v3504_v26 = vpack.c.bf16 %v3435_v12, %v3434_v4  ;;  %v3387_v60 = vmul.f32 %v4857_v19, %v7408_v63  ;;  %4878 = vpow2.f32 %v4050_v32  ;;  %v2258_v18 = vmul.f32 %v6634_v39, %v8189_v53  ;;  %v8190_v63 = vld [vmem:[#allocation75_spill] sm:$0xff]  ;;  %v8193_v4 = vld [vmem:[#allocation92_spill] sm:$0xff] }
 0x522   : > { %v4861_v34 = vpop.eup %4860  ;;  %v3418_v37 = vmul.f32 %v4859_v22, %v7426_v61  ;;  %4880 = vpow2.f32 %v4051_v49  ;;  %v4034_v6 = vmul.f32 -1.442695, %v7549_v23  ;;  %v4035_v41 = vmul.f32 -1.442695, %v7552_v24  ;;  %v8194_v22 = vld [vmem:[#allocation93_spill] sm:$0xff] }
 0x523   : > { %v4863_v40 = vpop.eup %4862  ;;  %4481 = vmatprep.subr.msk.bf16.mxu1 %vm387_vm1, %v3504_v26  ;;  %v3480_v1 = vpack.c.bf16 %v3387_v60, %v3386_v9  ;;  %v3419_v48 = vmul.f32 %v4861_v34, %v7432_v8  ;;  %4882 = vpow2.f32 %v4082_v11  ;;  %v2259_v16 = vmul.f32 %v6634_v39, %v8190_v63 }
 0x524   : > { %v4865_v27 = vpop.eup %4864  ;;  %v3404_v51 = vmul.f32 %v4863_v40, %v7440_v35  ;;  %4884 = vpow2.f32 %v4083_v36  ;;  %v2392_v61 = vmul.f32 %v7519_v15, %v2258_v18  ;;  %v2244_v58 = vmul.f32 %v6634_v39, %v8191_v45 }
 0x525   : > { %v4867_v17 = vpop.eup %4866  ;;  %v3623_v30 = vsel %vm387_vm1, %v3480_v1, 0  ;;  %v3496_v20 = vpack.c.bf16 %v3419_v48, %v3418_v37  ;;  %v3405_v32 = vmul.f32 %v4865_v27, %v7445_v29  ;;  %4886 = vpow2.f32 %v4034_v6 }
 0x526   : > { %v4869_v8 = vpop.eup %4868  ;;  %4199 = vmatpush3.bf16.xpose.msra.mxu0 %v3623_v30  ;;  %v3436_v38 = vmul.f32 %v4867_v17, %v7454_v33  ;;  %4888 = vpow2.f32 %v4035_v41  ;;  %v2393_v35 = vmul.f32 %v7519_v15, %v2259_v16  ;;  %v7574_v42 = vadd.f32 %v7536_v52, %v2392_v61  ;;  %v8195_v16 = vld [vmem:[#allocation28_spill] sm:$0xff] }
 0x527   : > { %v4871_v49 = vpop.eup %4870  ;;  %v3671_v13 = vsel %vm387_vm1, %v3496_v20, 0  ;;  %v3489_v54 = vpack.c.bf16 %v3405_v32, %v3404_v51  ;;  %v3437_v44 = vmul.f32 %v4869_v8, %v7457_v62  ;;  %v2245_v29 = vmul.f32 %v6634_v39, %v8192_v56  ;;  %v8198_v56 = vld [vmem:[#allocation77_spill] sm:$0xff] }
 0x528   : > { %v4873_v43 = vpop.eup %4872  ;;  %4217 = vmatpush3.bf16.xpose.msra.mxu1 %v3671_v13  ;;  %v3004_v21 = vadd.f32 1.0, %v4871_v49  ;;  %v7581_v33 = vadd.f32 %v7536_v52, %v2393_v35  ;;  %v4066_v2 = vmul.f32 -1.442695, %v7574_v42  ;;  %v2378_v7 = vmul.f32 %v7519_v15, %v2244_v58  ;;  %v8196_v58 = vld [vmem:[#allocation29_spill] sm:$0xff] }
 0x529   : > { %v4875_v10 = vpop.eup %4874  ;;  %4474 = vmatprep.subr.msk.bf16.mxu0 %vm387_vm1, %v3489_v54  ;;  %v3505_v59 = vpack.c.bf16 %v3437_v44, %v3436_v38  ;;  %v3005_v28 = vadd.f32 1.0, %v4873_v43  ;;  %v2379_v62 = vmul.f32 %v7519_v15, %v2245_v29  ;;  %v2276_v11 = vmul.f32 %v6634_v39, %v8193_v4  ;;  %v8197_v54 = vld [vmem:[#allocation76_spill] sm:$0xff] }
 0x52a   : > { %v4877_v31 = vpop.eup %4876  ;;  %4890 = vrcp.f32 %v3004_v21  ;;  %v3036_v55 = vadd.f32 1.0, %v4875_v10  ;;  %v4067_v57 = vmul.f32 -1.442695, %v7581_v33  ;;  %v7591_v12 = vadd.f32 %v7536_v52, %v2378_v7  ;;  %v8199_v21 = vld [vmem:[#allocation62_spill] sm:$0xff]  ;;  %v8200_v10 = vld [vmem:[#allocation63_spill] sm:$0xff] }
 0x52b   : > { %v4879_v36 = vpop.eup %4878  ;;  %4482 = vmatprep.subr.msk.bf16.mxu1 %vm387_vm1, %v3505_v59  ;;  %4892 = vrcp.f32 %v3005_v28  ;;  %v3037_v19 = vadd.f32 1.0, %v4877_v31  ;;  %v7595_v9 = vadd.f32 %v7536_v52, %v2379_v62  ;;  %v2277_v26 = vmul.f32 %v6634_v39, %v8194_v22 }
 0x52c   : > { %v4881_v60 = vpop.eup %4880  ;;  %4894 = vrcp.f32 %v3036_v55  ;;  %v3022_v53 = vadd.f32 1.0, %v4879_v36  ;;  %v4052_v18 = vmul.f32 -1.442695, %v7591_v12  ;;  %v2410_v34 = vmul.f32 %v7519_v15, %v2276_v11 }
 0x52d   : > { %v4883_v37 = vpop.eup %4882  ;;  %4896 = vrcp.f32 %v3037_v19  ;;  %v3023_v6 = vadd.f32 1.0, %v4881_v60  ;;  %v4053_v41 = vmul.f32 -1.442695, %v7595_v9  ;;  %v2411_v40 = vmul.f32 %v7519_v15, %v2277_v26 }
 0x52e   : > { %v4885_v1 = vpop.eup %4884  ;;  %4898 = vrcp.f32 %v3022_v53  ;;  %v3054_v48 = vadd.f32 1.0, %v4883_v37  ;;  %v7604_v63 = vadd.f32 %v7536_v52, %v2410_v34  ;;  %v2228_v27 = vmul.f32 %v6634_v39, %v8195_v16 }
 0x52f   : > { %v4887_v51 = vpop.eup %4886  ;;  %4900 = vrcp.f32 %v3023_v6  ;;  %v3055_v61 = vadd.f32 1.0, %v4885_v1  ;;  %v7609_v45 = vadd.f32 %v7536_v52, %v2411_v40  ;;  %v2229_v17 = vmul.f32 %v6634_v39, %v8196_v58 }
 0x530   : > { %v4889_v30 = vpop.eup %4888  ;;  %4902 = vrcp.f32 %v3054_v48  ;;  %v3006_v20 = vadd.f32 1.0, %v4887_v51  ;;  %v4084_v32 = vmul.f32 -1.442695, %v7604_v63  ;;  %v2362_v8 = vmul.f32 %v7519_v15, %v2228_v27 }
 0x531   : > { %4904 = vrcp.f32 %v3055_v61  ;;  %v3007_v38 = vadd.f32 1.0, %v4889_v30  ;;  %v4085_v35 = vmul.f32 -1.442695, %v7609_v45  ;;  %v2363_v49 = vmul.f32 %v7519_v15, %v2229_v17 }
 0x532   : > { %4906 = vrcp.f32 %v3006_v20  ;;  %v7618_v13 = vadd.f32 %v7536_v52, %v2362_v8  ;;  %v2260_v44 = vmul.f32 %v6634_v39, %v8197_v54  ;;  %v2261_v29 = vmul.f32 %v6634_v39, %v8198_v56 }
 0x533   : > { %4908 = vrcp.f32 %v3007_v38  ;;  %v7625_v43 = vadd.f32 %v7536_v52, %v2363_v49  ;;  %v2246_v7 = vmul.f32 %v6634_v39, %v8199_v21  ;;  %v2247_v59 = vmul.f32 %v6634_v39, %v8200_v10  ;;  %v8201_v38 = vld [vmem:[#allocation94_spill] sm:$0xff] }
 0x534   : > { %v4891_v28 = vpop.eup %4890  ;;  %4910 = vpow2.f32 %v4066_v2  ;;  %v4036_v62 = vmul.f32 -1.442695, %v7618_v13  ;;  %v2394_v4 = vmul.f32 %v7519_v15, %v2260_v44  ;;  %v2395_v11 = vmul.f32 %v7519_v15, %v2261_v29 }
 0x535   : > { %v4893_v31 = vpop.eup %4892  ;;  %v3388_v55 = vmul.f32 %v4891_v28, %v7481_v25  ;;  %4912 = vpow2.f32 %v4067_v57  ;;  %v4037_v36 = vmul.f32 -1.442695, %v7625_v43  ;;  %v2380_v19 = vmul.f32 %v7519_v15, %v2246_v7 }
 0x536   : > { %v4895_v22 = vpop.eup %4894  ;;  %v3389_v26 = vmul.f32 %v4893_v31, %v7484_v5  ;;  %4914 = vpow2.f32 %v4052_v18  ;;  %v7639_v2 = vadd.f32 %v7536_v52, %v2394_v4  ;;  %v7642_v60 = vadd.f32 %v7536_v52, %v2395_v11  ;;  %v8204_v4 = vld [vmem:[#allocation47_spill] sm:$0xff] }
 0x537   : > { %v4897_v53 = vpop.eup %4896  ;;  %v3420_v34 = vmul.f32 %v4895_v22, %v7492_v47  ;;  %4916 = vpow2.f32 %v4053_v41  ;;  %v2381_v25 = vmul.f32 %v7519_v15, %v2247_v59  ;;  %v7647_v57 = vadd.f32 %v7536_v52, %v2380_v19 }
 0x538   : > { %v4899_v37 = vpop.eup %4898  ;;  %v3481_v6 = vpack.c.bf16 %v3389_v26, %v3388_v55  ;;  %v3421_v5 = vmul.f32 %v4897_v53, %v7497_v46  ;;  %4918 = vpow2.f32 %v4084_v32  ;;  %v4068_v18 = vmul.f32 -1.442695, %v7639_v2 }
 0x539   : > { %v4901_v40 = vpop.eup %4900  ;;  %v3406_v1 = vmul.f32 %v4899_v37, %v7506_v3  ;;  %4920 = vpow2.f32 %v4085_v35  ;;  %v4069_v48 = vmul.f32 -1.442695, %v7642_v60  ;;  %v7654_v47 = vadd.f32 %v7536_v52, %v2381_v25  ;;  %v8202_v35 = vld [vmem:[#allocation95_spill] sm:$0xff] }
 0x53a   : > { %v4903_v41 = vpop.eup %4902  ;;  %v3626_v16 = vsel %vm387_vm1, %v3481_v6, 0  ;;  %v3497_v27 = vpack.c.bf16 %v3421_v5, %v3420_v34  ;;  %v3407_v51 = vmul.f32 %v4901_v40, %v7511_v0  ;;  %4922 = vpow2.f32 %v4036_v62 }
 0x53b   : > { %v4905_v46 = vpop.eup %4904  ;;  %4201 = vmatpush3.bf16.xpose.msra.mxu0 %v3626_v16  ;;  %v3438_v61 = vmul.f32 %v4903_v41, %v7528_v50  ;;  %4924 = vpow2.f32 %v4037_v36  ;;  %v4054_v3 = vmul.f32 -1.442695, %v7647_v57  ;;  %v4055_v58 = vmul.f32 -1.442695, %v7654_v47  ;;  %v8205_v16 = vld [vmem:[#allocation78_spill] sm:$0xff] }
 0x53c   : > { %v4907_v17 = vpop.eup %4906  ;;  %v3674_v30 = vsel %vm387_vm1, %v3497_v27, 0  ;;  %v3490_v20 = vpack.c.bf16 %v3407_v51, %v3406_v1  ;;  %v3439_v32 = vmul.f32 %v4905_v46, %v7539_v14  ;;  %4926 = vpow2.f32 %v4068_v18  ;;  %v8203_v14 = vld [vmem:[#allocation46_spill] sm:$0xff]  ;;  %v8206_v51 = vld [vmem:[#allocation79_spill] sm:$0xff] }
 0x53d   : > { %v4909_v8 = vpop.eup %4908  ;;  %4219 = vmatpush3.bf16.xpose.msra.mxu1 %v3674_v30  ;;  %v3390_v0 = vmul.f32 %v4907_v17, %v7549_v23  ;;  %4928 = vpow2.f32 %v4069_v48  ;;  %v2278_v50 = vmul.f32 %v6634_v39, %v8201_v38  ;;  %v2279_v49 = vmul.f32 %v6634_v39, %v8202_v35 }
 0x53e   : > { %v4911_v54 = vpop.eup %4910  ;;  %4475 = vmatprep.subr.msk.bf16.mxu0 %vm387_vm1, %v3490_v20  ;;  %v3506_v44 = vpack.c.bf16 %v3439_v32, %v3438_v61  ;;  %v3391_v56 = vmul.f32 %v4909_v8, %v7552_v24  ;;  %4930 = vpow2.f32 %v4054_v3  ;;  %v2230_v29 = vmul.f32 %v6634_v39, %v8203_v14 }
 0x53f   : > { %v4913_v21 = vpop.eup %4912  ;;  %v3038_v7 = vadd.f32 1.0, %v4911_v54  ;;  %4932 = vpow2.f32 %v4055_v58  ;;  %v2412_v23 = vmul.f32 %v7519_v15, %v2278_v50  ;;  %v2413_v10 = vmul.f32 %v7519_v15, %v2279_v49  ;;  %v8207_v50 = vld [vmem:[#allocation64_spill] sm:$0xff]  ;;  %v8208_v49 = vld [vmem:[#allocation65_spill] sm:$0xff] }
 0x540   : > { %v4915_v59 = vpop.eup %4914  ;;  %4483 = vmatprep.subr.msk.bf16.mxu1 %vm387_vm1, %v3506_v44  ;;  %v3482_v28 = vpack.c.bf16 %v3391_v56, %v3390_v0  ;;  %v3039_v62 = vadd.f32 1.0, %v4913_v21  ;;  %v2231_v11 = vmul.f32 %v6634_v39, %v8204_v4  ;;  %v2364_v24 = vmul.f32 %v7519_v15, %v2230_v29 }
 0x541   : > { %v4917_v31 = vpop.eup %4916  ;;  %4934 = vrcp.f32 %v3038_v7  ;;  %v3024_v55 = vadd.f32 1.0, %v4915_v59  ;;  %v7679_v36 = vadd.f32 %v7536_v52, %v2412_v23  ;;  %v7682_v19 = vadd.f32 %v7536_v52, %v2413_v10 }
 0x542   : > { %v4919_v22 = vpop.eup %4918  ;;  %v3629_v26 = vsel %vm387_vm1, %v3482_v28, 0  ;;  %4936 = vrcp.f32 %v3039_v62  ;;  %v3025_v53 = vadd.f32 1.0, %v4917_v31  ;;  %v2365_v34 = vmul.f32 %v7519_v15, %v2231_v11  ;;  %v8209_v62 = vld [vmem:[#allocation96_spill] sm:$0xff] }
 0x543   : > { %v4921_v25 = vpop.eup %4920  ;;  %4203 = vmatpush3.bf16.xpose.msra.mxu0 %v3629_v26  ;;  %4938 = vrcp.f32 %v3024_v55  ;;  %v3056_v37 = vadd.f32 1.0, %v4919_v22  ;;  %v4086_v6 = vmul.f32 -1.442695, %v7679_v36  ;;  %v4087_v40 = vmul.f32 -1.442695, %v7682_v19 }
 0x544   : > { %v4923_v5 = vpop.eup %4922  ;;  %4940 = vrcp.f32 %v3025_v53  ;;  %v3057_v18 = vadd.f32 1.0, %v4921_v25  ;;  %v7689_v1 = vadd.f32 %v7536_v52, %v2364_v24  ;;  %v2262_v27 = vmul.f32 %v6634_v39, %v8205_v16  ;;  %v8210_v53 = vld [vmem:[#allocation97_spill] sm:$0xff] }
 0x545   : > { %v4925_v48 = vpop.eup %4924  ;;  %4942 = vrcp.f32 %v3056_v37  ;;  %v3008_v41 = vadd.f32 1.0, %v4923_v5  ;;  %v2263_v46 = vmul.f32 %v6634_v39, %v8206_v51  ;;  %v7696_v58 = vadd.f32 %v7536_v52, %v2365_v34 }
 0x546   : > { %v4927_v61 = vpop.eup %4926  ;;  %4944 = vrcp.f32 %v3057_v18  ;;  %v3009_v3 = vadd.f32 1.0, %v4925_v48  ;;  %v4038_v17 = vmul.f32 -1.442695, %v7689_v1  ;;  %v2396_v32 = vmul.f32 %v7519_v15, %v2262_v27 }
 0x547   : > { %v4929_v30 = vpop.eup %4928  ;;  %4946 = vrcp.f32 %v3008_v41  ;;  %v3040_v20 = vadd.f32 1.0, %v4927_v61  ;;  %v2397_v8 = vmul.f32 %v7519_v15, %v2263_v46  ;;  %v2248_v35 = vmul.f32 %v6634_v39, %v8207_v50 }
 0x548   : > { %v4931_v0 = vpop.eup %4930  ;;  %4948 = vrcp.f32 %v3009_v3  ;;  %v3041_v38 = vadd.f32 1.0, %v4929_v30  ;;  %v2249_v54 = vmul.f32 %v6634_v39, %v8208_v49  ;;  %v7706_v14 = vadd.f32 %v7536_v52, %v2396_v32 }
 0x549   : > { %v4933_v44 = vpop.eup %4932  ;;  %4950 = vrcp.f32 %v3040_v20  ;;  %v3026_v56 = vadd.f32 1.0, %v4931_v0  ;;  %v7709_v29 = vadd.f32 %v7536_v52, %v2397_v8  ;;  %v2382_v7 = vmul.f32 %v7519_v15, %v2248_v35 }
 0x54a   : > { %4952 = vrcp.f32 %v3041_v38  ;;  %v3027_v21 = vadd.f32 1.0, %v4933_v44  ;;  %v2383_v23 = vmul.f32 %v7519_v15, %v2249_v54  ;;  %v4039_v59 = vmul.f32 -1.442695, %v7696_v58  ;;  %v8212_v44 = vld [vmem:[#allocation49_spill] sm:$0xff] }
 0x54b   : > { %v4935_v10 = vpop.eup %4934  ;;  %4954 = vrcp.f32 %v3026_v56  ;;  %v4070_v28 = vmul.f32 -1.442695, %v7706_v14  ;;  %v2280_v4 = vmul.f32 %v6634_v39, %v8209_v62  ;;  %v7719_v31 = vadd.f32 %v7536_v52, %v2382_v7 }
 0x54c   : > { %v4937_v11 = vpop.eup %4936  ;;  %v3422_v24 = vmul.f32 %v4935_v10, %v7574_v42  ;;  %4956 = vrcp.f32 %v3027_v21  ;;  %v7722_v55 = vadd.f32 %v7536_v52, %v2383_v23  ;;  %v2281_v34 = vmul.f32 %v6634_v39, %v8210_v53 }
 0x54d   : > { %v4939_v22 = vpop.eup %4938  ;;  %v3423_v26 = vmul.f32 %v4937_v11, %v7581_v33  ;;  %4958 = vpow2.f32 %v4086_v6  ;;  %v2414_v25 = vmul.f32 %v7519_v15, %v2280_v4  ;;  %v4071_v42 = vmul.f32 -1.442695, %v7709_v29  ;;  %v8214_v11 = vld [vmem:[#allocation81_spill] sm:$0xff] }
 0x54e   : > { %v4941_v37 = vpop.eup %4940  ;;  %v3408_v5 = vmul.f32 %v4939_v22, %v7591_v12  ;;  %4960 = vpow2.f32 %v4087_v40  ;;  %v4056_v18 = vmul.f32 -1.442695, %v7719_v31  ;;  %v2415_v33 = vmul.f32 %v7519_v15, %v2281_v34 }
 0x54f   : > { %v4943_v48 = vpop.eup %4942  ;;  %v3498_v41 = vpack.c.bf16 %v3423_v26, %v3422_v24  ;;  %v3409_v16 = vmul.f32 %v4941_v37, %v7595_v9  ;;  %4962 = vpow2.f32 %v4038_v17  ;;  %v4057_v51 = vmul.f32 -1.442695, %v7722_v55 }
 0x550   : > { %v4945_v6 = vpop.eup %4944  ;;  %v3440_v27 = vmul.f32 %v4943_v48, %v7604_v63  ;;  %4964 = vpow2.f32 %v4039_v59  ;;  %v7736_v12 = vadd.f32 %v7536_v52, %v2414_v25  ;;  %v7742_v63 = vadd.f32 %v7536_v52, %v2415_v33 }
 0x551   : > { %v4947_v40 = vpop.eup %4946  ;;  %v3677_v46 = vsel %vm387_vm1, %v3498_v41, 0  ;;  %v3491_v61 = vpack.c.bf16 %v3409_v16, %v3408_v5  ;;  %v3441_v3 = vmul.f32 %v4945_v6, %v7609_v45  ;;  %4966 = vpow2.f32 %v4070_v28  ;;  %v3511_v5 = vld [vmem:[%s7825_s5] sm:$0xf] }
 0x552   : > { %v4949_v9 = vpop.eup %4948  ;;  %4221 = vmatpush3.bf16.xpose.msra.mxu1 %v3677_v46  ;;  %v3392_v17 = vmul.f32 %v4947_v40, %v7618_v13  ;;  %4968 = vpow2.f32 %v4071_v42  ;;  %v4088_v30 = vmul.f32 -1.442695, %v7736_v12  ;;  %v4089_v38 = vmul.f32 -1.442695, %v7742_v63  ;;  %v8211_v13 = vld [vmem:[#allocation48_spill] sm:$0xff] }
 0x553   : > { %v4951_v20 = vpop.eup %4950  ;;  %4476 = vmatprep.subr.msk.bf16.mxu0 %vm387_vm1, %v3491_v61  ;;  %v3507_v32 = vpack.c.bf16 %v3441_v3, %v3440_v27  ;;  %v3393_v8 = vmul.f32 %v4949_v9, %v7625_v43  ;;  %4970 = vpow2.f32 %v4056_v18  ;;  %v2232_v50 = vmul.f32 %v6634_v39, %v8211_v13 }
 0x554   : > { %v4953_v0 = vpop.eup %4952  ;;  %v3424_v45 = vmul.f32 %v4951_v20, %v7639_v2  ;;  %4972 = vpow2.f32 %v4057_v51  ;;  %v2233_v43 = vmul.f32 %v6634_v39, %v8212_v44  ;;  %v8213_v2 = vld [vmem:[#allocation80_spill] sm:$0xff]  ;;  %v2265_v24 = vmul.f32 %v6634_v39, %v8214_v11 }
 0x555   : > { %v4955_v35 = vpop.eup %4954  ;;  %4484 = vmatprep.subr.msk.bf16.mxu1 %vm387_vm1, %v3507_v32  ;;  %v3483_v49 = vpack.c.bf16 %v3393_v8, %v3392_v17  ;;  %v3425_v54 = vmul.f32 %v4953_v0, %v7642_v60  ;;  %4974 = vpow2.f32 %v4088_v30  ;;  %v2264_v7 = vmul.f32 %v6634_v39, %v8213_v2 }
 0x556   : > { %v4957_v56 = vpop.eup %4956  ;;  %v3410_v21 = vmul.f32 %v4955_v35, %v7647_v57  ;;  %4976 = vpow2.f32 %v4089_v38  ;;  %v2366_v4 = vmul.f32 %v7519_v15, %v2232_v50  ;;  %v2367_v34 = vmul.f32 %v7519_v15, %v2233_v43 }
 0x557   : > { %v4959_v23 = vpop.eup %4958  ;;  %v3632_v10 = vsel %vm387_vm1, %v3483_v49, 0  ;;  %v3499_v59 = vpack.c.bf16 %v3425_v54, %v3424_v45  ;;  %v3411_v28 = vmul.f32 %v4957_v56, %v7654_v47  ;;  %v2398_v47 = vmul.f32 %v7519_v15, %v2264_v7 }
 0x558   : > { %v4961_v62 = vpop.eup %4960  ;;  %4205 = vmatpush3.bf16.xpose.msra.mxu0 %v3632_v10  ;;  %v3058_v60 = vadd.f32 1.0, %v4959_v23  ;;  %v2399_v18 = vmul.f32 %v7519_v15, %v2265_v24  ;;  %v7772_v16 = vadd.f32 %v7536_v52, %v2366_v4  ;;  %v5095_v33 = vmov 0  }
 0x559   : > { %v4963_v22 = vpop.eup %4962  ;;  %v3680_v57 = vsel %vm387_vm1, %v3499_v59, 0  ;;  %v3492_v26 = vpack.c.bf16 %v3411_v28, %v3410_v21  ;;  %v3059_v53 = vadd.f32 1.0, %v4961_v62  ;;  %4499 = vset.pattern.permute.xlu0 %v5095_v33  ;;  %v7775_v51 = vadd.f32 %v7536_v52, %v2367_v34 }
 0x55a   : > { %v4965_v25 = vpop.eup %4964  ;;  %4223 = vmatpush3.bf16.xpose.msra.mxu1 %v3680_v57  ;;  %4978 = vrcp.f32 %v3058_v60  ;;  %v3010_v37 = vadd.f32 1.0, %v4963_v22  ;;  %3514 = vperm.xlu0 %4499, %v3511_v5   ;;  %v7778_v15 = vadd.f32 %v7536_v52, %v2398_v47  ;;  %v7781_v9 = vadd.f32 %v7536_v52, %v2399_v18 }
 0x55b   : > { %v4967_v42 = vpop.eup %4966  ;;  %4477 = vmatprep.subr.msk.bf16.mxu0 %vm387_vm1, %v3492_v26  ;;  %4980 = vrcp.f32 %v3059_v53  ;;  %v3011_v39 = vadd.f32 1.0, %v4965_v25  ;;  %v4040_v20 = vmul.f32 -1.442695, %v7772_v16  ;;  %v4041_v8 = vmul.f32 -1.442695, %v7775_v51 }
 0x55c   : > { %v4969_v48 = vpop.eup %4968  ;;  %4982 = vrcp.f32 %v3010_v37  ;;  %v3042_v41 = vadd.f32 1.0, %v4967_v42  ;;  %v4072_v0 = vmul.f32 -1.442695, %v7778_v15  ;;  %v4073_v45 = vmul.f32 -1.442695, %v7781_v9 }
 0x55d   : > { %v4971_v6 = vpop.eup %4970  ;;  %4984 = vrcp.f32 %v3011_v39  ;;  %v3043_v27 = vadd.f32 1.0, %v4969_v48 }
 0x55e   : > { %v4973_v40 = vpop.eup %4972  ;;  %4986 = vrcp.f32 %v3042_v41  ;;  %v3028_v46 = vadd.f32 1.0, %v4971_v6 }
 0x55f   : > { %v4975_v61 = vpop.eup %4974  ;;  %4988 = vrcp.f32 %v3043_v27  ;;  %v3029_v3 = vadd.f32 1.0, %v4973_v40 }
 0x560   : > { %v4977_v17 = vpop.eup %4976  ;;  %4990 = vrcp.f32 %v3028_v46  ;;  %v3060_v30 = vadd.f32 1.0, %v4975_v61 }
 0x561   : > { %4992 = vrcp.f32 %v3029_v3  ;;  %v3061_v32 = vadd.f32 1.0, %v4977_v17 }
 0x562   : > { %4994 = vrcp.f32 %v3060_v30 }
 0x563   : > { %4996 = vrcp.f32 %v3061_v32 }
 0x564   : > { %v4979_v38 = vpop.eup %4978  ;;  %4998 = vpow2.f32 %v4040_v20 }
 0x565   : > { %v4981_v13 = vpop.eup %4980  ;;  %v3442_v52 = vmul.f32 %v4979_v38, %v7679_v36  ;;  %5000 = vpow2.f32 %v4041_v8 }
 0x566   : > { %v4983_v50 = vpop.eup %4982  ;;  %v3443_v35 = vmul.f32 %v4981_v13, %v7682_v19  ;;  %5002 = vpow2.f32 %v4072_v0 }
 0x567   : > { %v4985_v49 = vpop.eup %4984  ;;  %v3394_v54 = vmul.f32 %v4983_v50, %v7689_v1  ;;  %5004 = vpow2.f32 %v4073_v45 }
 0x568   : > { %v4987_v44 = vpop.eup %4986  ;;  %v3508_v43 = vpack.c.bf16 %v3443_v35, %v3442_v52  ;;  %v3395_v56 = vmul.f32 %v4985_v49, %v7696_v58 }
 0x569   : > { %v4989_v21 = vpop.eup %4988  ;;  %v3426_v2 = vmul.f32 %v4987_v44, %v7706_v14 }
 0x56a   : > { %v4991_v7 = vpop.eup %4990  ;;  %4485 = vmatprep.subr.msk.bf16.mxu1 %vm387_vm1, %v3508_v43  ;;  %v3484_v36 = vpack.c.bf16 %v3395_v56, %v3394_v54  ;;  %v3427_v23 = vmul.f32 %v4989_v21, %v7709_v29 }
 0x56b   : > { %v4993_v10 = vpop.eup %4992  ;;  %v3412_v19 = vmul.f32 %v4991_v7, %v7719_v31 }
 0x56c   : > { %v4995_v59 = vpop.eup %4994  ;;  %v3635_v1 = vsel %vm387_vm1, %v3484_v36, 0  ;;  %v3500_v28 = vpack.c.bf16 %v3427_v23, %v3426_v2  ;;  %v3413_v62 = vmul.f32 %v4993_v10, %v7722_v55 }
 0x56d   : > { %v4997_v60 = vpop.eup %4996  ;;  %4207 = vmatpush3.bf16.xpose.msra.mxu0 %v3635_v1  ;;  %v3444_v58 = vmul.f32 %v4995_v59, %v7736_v12 }
 0x56e   : > { %v4999_v14 = vpop.eup %4998  ;;  %v3683_v4 = vsel %vm387_vm1, %v3500_v28, 0  ;;  %v3493_v11 = vpack.c.bf16 %v3413_v62, %v3412_v19  ;;  %v3445_v24 = vmul.f32 %v4997_v60, %v7742_v63 }
 0x56f   : > { %v5001_v29 = vpop.eup %5000  ;;  %4225 = vmatpush3.bf16.xpose.msra.mxu1 %v3683_v4  ;;  %v3012_v22 = vadd.f32 1.0, %v4999_v14 }
 0x570   : > { %v5003_v31 = vpop.eup %5002  ;;  %4478 = vmatprep.subr.msk.bf16.mxu0 %vm387_vm1, %v3493_v11  ;;  %v3509_v57 = vpack.c.bf16 %v3445_v24, %v3444_v58  ;;  %v3013_v26 = vadd.f32 1.0, %v5001_v29 }
 0x571   : > { %v5005_v53 = vpop.eup %5004  ;;  %5006 = vrcp.f32 %v3012_v22  ;;  %v3044_v55 = vadd.f32 1.0, %v5003_v31 }
 0x572   : > { %4486 = vmatprep.subr.msk.bf16.mxu1 %vm387_vm1, %v3509_v57  ;;  %5008 = vrcp.f32 %v3013_v26  ;;  %v3045_v12 = vadd.f32 1.0, %v5005_v53 }
 0x573   : > { %5010 = vrcp.f32 %v3044_v55 }
 0x574   : > { %5012 = vrcp.f32 %v3045_v12 }
 0x57b   : > { %v5007_v34 = vpop.eup %5006 }
 0x57c   : > { %v5009_v25 = vpop.eup %5008  ;;  %v3396_v63 = vmul.f32 %v5007_v34, %v7772_v16  ;;  %v5083_v16 = vld [vmem:[%s7824_s4] sm:$0x3] }
 0x57d   : > { %v5011_v37 = vpop.eup %5010  ;;  %v3397_v47 = vmul.f32 %v5009_v25, %v7775_v51 }
 0x57e   : > { %v5013_v5 = vpop.eup %5012  ;;  %v3428_v42 = vmul.f32 %v5011_v37, %v7778_v15 }
 0x57f   : > { %v3485_v39 = vpack.c.bf16 %v3397_v47, %v3396_v63  ;;  %v3429_v18 = vmul.f32 %v5013_v5, %v7781_v9 }
 0x581   : > { %v3638_v48 = vsel %vm387_vm1, %v3485_v39, 0  ;;  %v3501_v41 = vpack.c.bf16 %v3429_v18, %v3428_v42 }
 0x582   : > { %4209 = vmatpush3.bf16.xpose.msra.mxu0 %v3638_v48 }
 0x583   : > { %v3686_v33 = vsel %vm387_vm1, %v3501_v41, 0 }
 0x584   : > { %4227 = vmatpush3.bf16.xpose.msra.mxu1 %v3686_v33 }
 0x589   : > { %4211 = vmatmul.mubr.msk.bf16.vlgmr.msra.gmra.mrb[8].mxu0 %vm387_vm1, %v5083_v16 }
 0x58b   : > { %4229 = vmatmul.mubr.msk.bf16.vlgmr.msra.gmra.mrb[8].mxu1 %vm387_vm1, %v5083_v16 }
 0x5ce   : > { %v3746_v6 = vpop.f32.mrb[4].mxu0 }
 0x5cf   : > { %v3748_v27 = vpop.f32.mrb[5].mxu0 }
 0x5d0   : > { %v3787_v51 = vpop.f32.mrb[4].mxu1  ;;  %v3750_v40 = vpop.f32.mrb[6].mxu0 }
 0x5d1   : > { %v3789_v46 = vpop.f32.mrb[5].mxu1  ;;  %v3751_v15 = vpop.f32.mrb[7].mxu0 }
 0x5d2   : > { %v3791_v61 = vpop.f32.mrb[6].mxu1 }
 0x5d3   : > { %v3792_v3 = vpop.f32.mrb[7].mxu1 }
 0x5d9   : > { %v3515_v9 = vpop.permute.xlu0 %3514 }
 0x5da   : > { %v3747_v17 = vadd.f32 %v3746_v6, %v3515_v9  ;;  %v3749_v30 = vadd.f32 %v3748_v27, %v3515_v9  ;;  %v3788_v20 = vadd.f32 %v3787_v51, %v3515_v9  ;;  %v3790_v32 = vadd.f32 %v3789_v46, %v3515_v9 }
 0x5dc   : > { %v3884_v8 = vcombine.low %v3747_v17, %v3749_v30  ;;  %v3885_v0 = vcombine.low %v3788_v20, %v3790_v32 }
 0x5de   : > { %3892 = vst [vmem:[%s251_s12] sm:$0xff] %v3884_v8  ;;  %3893 = vst [vmem:[%s251_s12 + $0x8] sm:$0xff] %v3885_v0 }
 0x65c   : > { %v3828_v45 = vpop.f32.mrb[8].mxu0 }
 0x65d   : > { %v3829_v38 = vadd.f32 %v3828_v45, %v3515_v9  ;;  %v3830_v13 = vpop.f32.mrb[9].mxu0 }
 0x65e   : > { %v3869_v52 = vpop.f32.mrb[8].mxu1  ;;  %v3831_v50 = vadd.f32 %v3830_v13, %v3515_v9  ;;  %v3832_v35 = vpop.f32.mrb[10].mxu0 }
 0x65f   : > { %v3870_v49 = vadd.f32 %v3869_v52, %v3515_v9  ;;  %v3871_v54 = vpop.f32.mrb[9].mxu1  ;;  %v3833_v44 = vpop.f32.mrb[11].mxu0 }
 0x660   : > { %v3886_v43 = vcombine.low %v3829_v38, %v3831_v50  ;;  %v3872_v56 = vadd.f32 %v3871_v54, %v3515_v9  ;;  %v3873_v21 = vpop.f32.mrb[10].mxu1 }
 0x661   : > { %v3874_v2 = vpop.f32.mrb[11].mxu1 }
 0x662   : > { %3894 = vst [vmem:[%s251_s12 + $0x10] sm:$0xff] %v3886_v43  ;;  %v3887_v7 = vcombine.low %v3870_v49, %v3872_v56 }
 0x664   : > { %3895 = vst [vmem:[%s251_s12 + $0x18] sm:$0xff] %v3887_v7 }
 0x665 PF: > { %s16_s21 = sadd.s32 1, %s5090_s21  }
 0x666   : > { %p13_p4 = scmp.ge.s32.totalorder %s16_s21, 4  }
 0x668   :  { %15 = sbr.rel (!%p13_p4) target bundleno = 1 (0x1), region = 74 }

</bundles_post_ra>
